<compile_context>
chip_gen: v6e
topology: v6e:2x2x1
jax: 0.10.0
libtpu: 0.0.40
codegen_flags: <defaults>
</compile_context>

<pallas_src>
import functools

import jax
import jax.numpy as jnp
from jax import lax
from jax.experimental import pallas as pl
from jax.experimental.pallas import tpu as pltpu

D_IN, H1, H2, H3 = 784, 1024, 512, 256
NEG_SLOPE = 0.2
LANE = 128


def _round_up(n, m):
    return ((n + m - 1) // m) * m


# ----------------------------------------------------------------------------
# Pallas kernel: 3 fused matmuls + LeakyReLU + weighted feature sum
# ----------------------------------------------------------------------------
def disc_kernel(x_ref, w1_ref, b1_ref, w2_ref, b2_ref, w3_ref, b3_ref,
                fcw_ref, o_ref):
    def leaky_relu(h):
        return jnp.where(h > 0, h, NEG_SLOPE * h)

    # Layer 1: bf16 MXU matmul, f32 accumulate; bias + activation in f32.
    h = jnp.dot(x_ref[...], w1_ref[...], preferred_element_type=jnp.float32)
    h = leaky_relu(h + b1_ref[...])                           # (TB, 1024) f32
    # Layer 2
    h = jnp.dot(h.astype(jnp.bfloat16), w2_ref[...],
                preferred_element_type=jnp.float32)
    h = leaky_relu(h + b2_ref[...])                           # (TB, 512) f32
    # Layer 3
    h = jnp.dot(h.astype(jnp.bfloat16), w3_ref[...],
                preferred_element_type=jnp.float32)
    h = leaky_relu(h + b3_ref[...])                           # (TB, 256) f32
    # out[0, b] = sum_j fc_w[0, j] * h[b, j]  -> lane-dense (1, TB) on the MXU.
    o_ref[...] = lax.dot_general(
        fcw_ref[...], h, (((1,), (1,)), ((), ())),
        preferred_element_type=jnp.float32)                   # (1, TB)


def base_discriminator_forward(x, params, *, tile_b=128):
    """x: (B, 784) float32 -> (B,) float32."""
    B, d_in = x.shape
    w1, b1, w2, b2, w3, b3, fc_w = params
    assert d_in == w1.shape[0]

    # Pad the feature (K) dim of the first matmul up to a lane multiple.
    d_pad = _round_up(d_in, LANE)
    if d_pad != d_in:
        x = jnp.pad(x, ((0, 0), (0, d_pad - d_in)))
        w1 = jnp.pad(w1, ((0, d_pad - d_in), (0, 0)))
    # Pad batch to a tile multiple instead of requiring divisibility.
    b_pad = _round_up(B, tile_b)
    if b_pad != B:
        x = jnp.pad(x, ((0, b_pad - B), (0, 0)))

    # bf16 MXU operands (accumulation stays f32 inside the kernel).
    x_bf = x.astype(jnp.bfloat16)
    w1_bf = w1.astype(jnp.bfloat16)
    w2_bf = w2.astype(jnp.bfloat16)
    w3_bf = w3.astype(jnp.bfloat16)

    grid = (b_pad // tile_b,)
    # Weights / biases / fc_w have a constant block index -> resident in VMEM
    # (no re-DMA across grid steps); only the x tile streams.
    resident = lambda shape: pl.BlockSpec(shape, lambda i: (0, 0))

    out = pl.pallas_call(
        disc_kernel,
        out_shape=jax.ShapeDtypeStruct((1, b_pad), jnp.float32),
        grid_spec=pl.GridSpec(
            grid=grid,
            in_specs=[
                pl.BlockSpec((tile_b, d_pad), lambda i: (i, 0)),  # x tile
                resident((d_pad, H1)), resident((1, H1)),         # layer 1
                resident((H1, H2)),    resident((1, H2)),         # layer 2
                resident((H2, H3)),    resident((1, H3)),         # layer 3
                resident((1, H3)),                                # fc_w
            ],
            out_specs=pl.BlockSpec((1, tile_b), lambda i: (0, i)),
        ),
        compiler_params=pltpu.CompilerParams(
            dimension_semantics=("parallel",)),
    )(x_bf, w1_bf, b1, w2_bf, b2, w3_bf, b3, fc_w)
    return out[0, :B]


# ----------------------------------------------------------------------------
# Parameter setup (plain JAX glue): deterministic init + spectral norm
# ----------------------------------------------------------------------------
def spectral_normalize(w_out_in, key, n_iter=10):
    """Mimic torch spectral_norm: divide W (out, in) by its top singular value
    estimated with power iteration."""
    out_dim, _ = w_out_in.shape
    u = jax.random.normal(key, (out_dim,), jnp.float32)
    u = u / (jnp.linalg.norm(u) + 1e-12)
    for _ in range(n_iter):
        v = w_out_in.T @ u
        v = v / (jnp.linalg.norm(v) + 1e-12)
        u = w_out_in @ v
        u = u / (jnp.linalg.norm(u) + 1e-12)
    sigma = u @ (w_out_in @ v)
    return w_out_in / sigma


def init_params(key):
    keys = jax.random.split(key, 8)
    dims = [(H1, D_IN), (H2, H1), (H3, H2)]  # torch Linear weight shape (out, in)
    params = []
    for i, (o, c) in enumerate(dims):
        w = jax.random.normal(keys[2 * i], (o, c), jnp.float32) * 0.05
        w = spectral_normalize(w, keys[2 * i + 1])
        b = jax.random.normal(keys[6], (1, o), jnp.float32) * 0.01
        params.append(w.T)          # store as (in, out) for x @ W
        params.append(b)
    fc_w = jax.random.normal(keys[7], (1, H3), jnp.float32)
    params.append(fc_w)
    return tuple(params)


def reference_forward(x, params):
    """Pure-JAX reference with the same bf16-operand / f32-accum matmul recipe
    the kernel uses (so the comparison tolerance stays tight)."""
    w1, b1, w2, b2, w3, b3, fc_w = params
    lrelu = lambda h: jnp.where(h > 0, h, NEG_SLOPE * h)
    bf = lambda a: a.astype(jnp.bfloat16)
    h = lrelu(jnp.dot(bf(x), bf(w1), preferred_element_type=jnp.float32) + b1)
    h = lrelu(jnp.dot(bf(h), bf(w2), preferred_element_type=jnp.float32) + b2)
    h = lrelu(jnp.dot(bf(h), bf(w3), preferred_element_type=jnp.float32) + b3)
    return jnp.sum(h * fc_w, axis=1)


if __name__ == "__main__":
    key = jax.random.PRNGKey(0)
    kx, kp = jax.random.split(key)

    B = 8
    x = jax.random.normal(kx, (B, D_IN), jnp.float32)
    params = init_params(kp)

    fwd = jax.jit(functools.partial(base_discriminator_forward, tile_b=128))
    out = fwd(x, params)
    jax.block_until_ready(out)

    ref = reference_forward(x, params)
    assert out.shape == (B,)
    assert out.dtype == jnp.float32
    assert jnp.allclose(out, ref, atol=2e-2, rtol=2e-2), (out, ref)

    print("KERNEL_OK")
</pallas_src>

<mosaic_0001>
module attributes {stable_mosaic.version = 11 : i64} {
  func.func @disc_kernel(%arg0: i32, %arg1: memref<128x896xbf16, #tpu.memory_space<vmem>>, %arg2: memref<896x1024xbf16, #tpu.memory_space<vmem>>, %arg3: memref<1x1024xf32, #tpu.memory_space<vmem>>, %arg4: memref<1024x512xbf16, #tpu.memory_space<vmem>>, %arg5: memref<1x512xf32, #tpu.memory_space<vmem>>, %arg6: memref<512x256xbf16, #tpu.memory_space<vmem>>, %arg7: memref<1x256xf32, #tpu.memory_space<vmem>>, %arg8: memref<1x256xf32, #tpu.memory_space<vmem>>, %arg9: memref<1x128xf32, #tpu.memory_space<vmem>>) attributes {dimension_semantics = [#tpu.dimension_semantics<parallel>], iteration_bounds = array<i64: 1>, scalar_prefetch = 0 : i64, scratch_operands = 0 : i64, tpu.core_type = #tpu.core_type<tc>, window_params = [{transform_indices = @transform_0, window_bounds = array<i64: 128, 896>}, {pipeline_mode = #tpu.pipeline_mode<synchronous>, transform_indices = @transform_1, window_bounds = array<i64: 896, 1024>}, {pipeline_mode = #tpu.pipeline_mode<synchronous>, transform_indices = @transform_2, window_bounds = array<i64: 1, 1024>}, {pipeline_mode = #tpu.pipeline_mode<synchronous>, transform_indices = @transform_3, window_bounds = array<i64: 1024, 512>}, {pipeline_mode = #tpu.pipeline_mode<synchronous>, transform_indices = @transform_4, window_bounds = array<i64: 1, 512>}, {pipeline_mode = #tpu.pipeline_mode<synchronous>, transform_indices = @transform_5, window_bounds = array<i64: 512, 256>}, {pipeline_mode = #tpu.pipeline_mode<synchronous>, transform_indices = @transform_6, window_bounds = array<i64: 1, 256>}, {pipeline_mode = #tpu.pipeline_mode<synchronous>, transform_indices = @transform_7, window_bounds = array<i64: 1, 256>}, {transform_indices = @transform_8, window_bounds = array<i64: 1, 128>}]} {
    %c0 = arith.constant 0 : index
    %c0_0 = arith.constant 0 : index
    %0 = vector.load %arg1[%c0, %c0_0] : memref<128x896xbf16, #tpu.memory_space<vmem>>, vector<128x896xbf16>
    %c0_1 = arith.constant 0 : index
    %c0_2 = arith.constant 0 : index
    %1 = vector.load %arg2[%c0_1, %c0_2] : memref<896x1024xbf16, #tpu.memory_space<vmem>>, vector<896x1024xbf16>
    %cst = arith.constant dense<0.000000e+00> : vector<128x1024xf32>
    %2 = tpu.matmul %0, %1, %cst {dimension_numbers = #tpu.dot_dimension_numbers<[1], [0], [0], [1], [0, 0, 1, 1], [], []>} : vector<128x896xbf16>, vector<896x1024xbf16>, vector<128x1024xf32> -> vector<128x1024xf32>
    %c0_3 = arith.constant 0 : index
    %c0_4 = arith.constant 0 : index
    %3 = vector.load %arg3[%c0_3, %c0_4] : memref<1x1024xf32, #tpu.memory_space<vmem>>, vector<1x1024xf32>
    %4 = vector.broadcast %3 : vector<1x1024xf32> to vector<128x1024xf32>
    %5 = arith.addf %2, %4 : vector<128x1024xf32>
    %cst_5 = arith.constant 0.000000e+00 : f32
    %6 = vector.broadcast %cst_5 : f32 to vector<128x1024xf32>
    %7 = arith.cmpf ogt, %5, %6 : vector<128x1024xf32>
    %cst_6 = arith.constant 2.000000e-01 : f32
    %8 = vector.broadcast %cst_6 : f32 to vector<128x1024xf32>
    %9 = arith.mulf %8, %5 : vector<128x1024xf32>
    %10 = arith.select %7, %5, %9 : vector<128x1024xi1>, vector<128x1024xf32>
    %11 = arith.truncf %10 : vector<128x1024xf32> to vector<128x1024xbf16>
    %c0_7 = arith.constant 0 : index
    %c0_8 = arith.constant 0 : index
    %12 = vector.load %arg4[%c0_7, %c0_8] : memref<1024x512xbf16, #tpu.memory_space<vmem>>, vector<1024x512xbf16>
    %cst_9 = arith.constant dense<0.000000e+00> : vector<128x512xf32>
    %13 = tpu.matmul %11, %12, %cst_9 {dimension_numbers = #tpu.dot_dimension_numbers<[1], [0], [0], [1], [0, 0, 1, 1], [], []>} : vector<128x1024xbf16>, vector<1024x512xbf16>, vector<128x512xf32> -> vector<128x512xf32>
    %c0_10 = arith.constant 0 : index
    %c0_11 = arith.constant 0 : index
    %14 = vector.load %arg5[%c0_10, %c0_11] : memref<1x512xf32, #tpu.memory_space<vmem>>, vector<1x512xf32>
    %15 = vector.broadcast %14 : vector<1x512xf32> to vector<128x512xf32>
    %16 = arith.addf %13, %15 : vector<128x512xf32>
    %cst_12 = arith.constant 0.000000e+00 : f32
    %17 = vector.broadcast %cst_12 : f32 to vector<128x512xf32>
    %18 = arith.cmpf ogt, %16, %17 : vector<128x512xf32>
    %cst_13 = arith.constant 2.000000e-01 : f32
    %19 = vector.broadcast %cst_13 : f32 to vector<128x512xf32>
    %20 = arith.mulf %19, %16 : vector<128x512xf32>
    %21 = arith.select %18, %16, %20 : vector<128x512xi1>, vector<128x512xf32>
    %22 = arith.truncf %21 : vector<128x512xf32> to vector<128x512xbf16>
    %c0_14 = arith.constant 0 : index
    %c0_15 = arith.constant 0 : index
    %23 = vector.load %arg6[%c0_14, %c0_15] : memref<512x256xbf16, #tpu.memory_space<vmem>>, vector<512x256xbf16>
    %cst_16 = arith.constant dense<0.000000e+00> : vector<128x256xf32>
    %24 = tpu.matmul %22, %23, %cst_16 {dimension_numbers = #tpu.dot_dimension_numbers<[1], [0], [0], [1], [0, 0, 1, 1], [], []>} : vector<128x512xbf16>, vector<512x256xbf16>, vector<128x256xf32> -> vector<128x256xf32>
    %c0_17 = arith.constant 0 : index
    %c0_18 = arith.constant 0 : index
    %25 = vector.load %arg7[%c0_17, %c0_18] : memref<1x256xf32, #tpu.memory_space<vmem>>, vector<1x256xf32>
    %26 = vector.broadcast %25 : vector<1x256xf32> to vector<128x256xf32>
    %27 = arith.addf %24, %26 : vector<128x256xf32>
    %cst_19 = arith.constant 0.000000e+00 : f32
    %28 = vector.broadcast %cst_19 : f32 to vector<128x256xf32>
    %29 = arith.cmpf ogt, %27, %28 : vector<128x256xf32>
    %cst_20 = arith.constant 2.000000e-01 : f32
    %30 = vector.broadcast %cst_20 : f32 to vector<128x256xf32>
    %31 = arith.mulf %30, %27 : vector<128x256xf32>
    %32 = arith.select %29, %27, %31 : vector<128x256xi1>, vector<128x256xf32>
    %c0_21 = arith.constant 0 : index
    %c0_22 = arith.constant 0 : index
    %33 = vector.load %arg8[%c0_21, %c0_22] : memref<1x256xf32, #tpu.memory_space<vmem>>, vector<1x256xf32>
    %cst_23 = arith.constant dense<0.000000e+00> : vector<1x128xf32>
    %34 = tpu.matmul %33, %32, %cst_23 {dimension_numbers = #tpu.dot_dimension_numbers<[1], [1], [0], [0], [0, 0, 1, 0], [], []>} : vector<1x256xf32>, vector<128x256xf32>, vector<1x128xf32> -> vector<1x128xf32>
    %c0_24 = arith.constant 0 : index
    %c0_25 = arith.constant 0 : index
    %35 = vector.load %arg9[%c0_24, %c0_25] : memref<1x128xf32, #tpu.memory_space<vmem>>, vector<1x128xf32>
    tpu.vector_store %arg9[%c0_24, %c0_25], %34 {strides = array<i32>} : memref<1x128xf32, #tpu.memory_space<vmem>>, vector<1x128xf32>,
    return
  }
  func.func @transform_0(%arg0: i32) -> (i32, i32) {
    %c0_i32 = arith.constant 0 : i32
    %c0_i32_0 = arith.constant 0 : i32
    return %arg0, %c0_i32 : i32, i32
  }
  func.func @transform_1(%arg0: i32) -> (i32, i32) {
    %c0_i32 = arith.constant 0 : i32
    %c0_i32_0 = arith.constant 0 : i32
    %c0_i32_1 = arith.constant 0 : i32
    return %c0_i32, %c0_i32_0 : i32, i32
  }
  func.func @transform_2(%arg0: i32) -> (i32, i32) {
    %c0_i32 = arith.constant 0 : i32
    %c0_i32_0 = arith.constant 0 : i32
    %c0_i32_1 = arith.constant 0 : i32
    return %c0_i32, %c0_i32_0 : i32, i32
  }
  func.func @transform_3(%arg0: i32) -> (i32, i32) {
    %c0_i32 = arith.constant 0 : i32
    %c0_i32_0 = arith.constant 0 : i32
    %c0_i32_1 = arith.constant 0 : i32
    return %c0_i32, %c0_i32_0 : i32, i32
  }
  func.func @transform_4(%arg0: i32) -> (i32, i32) {
    %c0_i32 = arith.constant 0 : i32
    %c0_i32_0 = arith.constant 0 : i32
    %c0_i32_1 = arith.constant 0 : i32
    return %c0_i32, %c0_i32_0 : i32, i32
  }
  func.func @transform_5(%arg0: i32) -> (i32, i32) {
    %c0_i32 = arith.constant 0 : i32
    %c0_i32_0 = arith.constant 0 : i32
    %c0_i32_1 = arith.constant 0 : i32
    return %c0_i32, %c0_i32_0 : i32, i32
  }
  func.func @transform_6(%arg0: i32) -> (i32, i32) {
    %c0_i32 = arith.constant 0 : i32
    %c0_i32_0 = arith.constant 0 : i32
    %c0_i32_1 = arith.constant 0 : i32
    return %c0_i32, %c0_i32_0 : i32, i32
  }
  func.func @transform_7(%arg0: i32) -> (i32, i32) {
    %c0_i32 = arith.constant 0 : i32
    %c0_i32_0 = arith.constant 0 : i32
    %c0_i32_1 = arith.constant 0 : i32
    return %c0_i32, %c0_i32_0 : i32, i32
  }
  func.func @transform_8(%arg0: i32) -> (i32, i32) {
    %c0_i32 = arith.constant 0 : i32
    %c0_i32_0 = arith.constant 0 : i32
    return %c0_i32, %arg0 : i32, i32
  }
}

</mosaic_0001>

<bundles_post_ra>
// kernel: base_discriminator_forward.1
= control target key start
LH: loop header
LB: loop body
LE: loop exit
PB: predicated region body
PF: predicated region fallthrough
CT: control target
= control target key end

     0   :  { %s15614_s1 = inlined_call_operand.vmem [shape: bf16[896,1024], index: 1, kind: input, shape index: {}]   ;;  %s15615_s0 = inlined_call_operand.vmem [shape: bf16[128,896], index: 0, kind: input, shape index: {}]   ;;  %s15616_s2 = inlined_call_operand.vmem [shape: f32[1,1024], index: 2, kind: input, shape index: {}]   ;;  %s15617_s3 = inlined_call_operand.vmem [shape: bf16[1024,512], index: 3, kind: input, shape index: {}]   ;;  %s15618_s5 = inlined_call_operand.vmem [shape: bf16[512,256], index: 5, kind: input, shape index: {}]   ;;  %s15619_s4 = inlined_call_operand.vmem [shape: f32[1,512], index: 4, kind: input, shape index: {}]   ;;  %s15620_s6 = inlined_call_operand.vmem [shape: f32[1,256], index: 6, kind: input, shape index: {}]   ;;  %s15621_s7 = inlined_call_operand.vmem [shape: f32[1,256], index: 7, kind: input, shape index: {}]   ;;  %s15622_s8 = inlined_call_operand.vmem [shape: f32[1,128], index: 8, kind: output, shape index: {}]  }
   0x1   :  { %v150_v0 = vld [vmem:[%s15614_s1 + $0x1c0] sm:$0xff]  ;;  %v9686_v59 = vld [vmem:[%s15615_s0 + $0xc] ss:$28 sps:$4 sm:$0xff]  }
   0x2   :  { %v154_v1 = vld [vmem:[%s15614_s1 + $0x1e0] sm:$0xff]  ;;  %3257 = vmatprep.mubr.bf16.mxu1 %v9686_v59 }
   0x3   :  { %v278_v2 = vld [vmem:[%s15614_s1 + $0x5c0] sm:$0xff]  ;;  %v8972_v3 = vcombine.high %v150_v0, %v154_v1  ;;  %v8971_v5 = vcombine.low %v150_v0, %v154_v1 }
   0x4   :  { %v282_v4 = vld [vmem:[%s15614_s1 + $0x5e0] sm:$0xff] }
   0x5   :  { %v142_v6 = vld [vmem:[%s15614_s1 + $0x180] sm:$0xff]  ;;  %v9100_v8 = vcombine.high %v278_v2, %v282_v4  ;;  %v9099_v9 = vcombine.low %v278_v2, %v282_v4  ;;  %3112 = vmatprep.subr.bf16.mxu0 %v8972_v3 }
   0x6   :  { %v146_v7 = vld [vmem:[%s15614_s1 + $0x1a0] sm:$0xff]  ;;  %3113 = vmatpush1.bf16.msra.mxu0 %v8971_v5 }
   0x7   :  { %v8964_v10 = vcombine.high %v142_v6, %v146_v7  ;;  %v270_v11 = vld [vmem:[%s15614_s1 + $0x580] sm:$0xff]  ;;  %3225 = vmatprep.subr.bf16.mxu1 %v9100_v8  ;;  %v8963_v18 = vcombine.low %v142_v6, %v146_v7 }
   0x8   :  { %v274_v12 = vld [vmem:[%s15614_s1 + $0x5a0] sm:$0xff]  ;;  %3226 = vmatpush1.bf16.msra.mxu1 %v9099_v9 }
   0x9   :  { %v134_v13 = vld [vmem:[%s15614_s1 + $0x140] sm:$0xff]  ;;  %v9092_v14 = vcombine.high %v270_v11, %v274_v12  ;;  %3114 = vmatprep.subr.bf16.mxu0 %v8964_v10  ;;  %v9091_v19 = vcombine.low %v270_v11, %v274_v12 }
   0xa   :  { %v138_v15 = vld [vmem:[%s15614_s1 + $0x160] sm:$0xff]  ;;  %3115 = vmatpush1.bf16.msra.mxu0 %v8963_v18 }
   0xb   :  { %v262_v16 = vld [vmem:[%s15614_s1 + $0x540] sm:$0xff]  ;;  %v8956_v20 = vcombine.high %v134_v13, %v138_v15  ;;  %3227 = vmatprep.subr.bf16.mxu1 %v9092_v14  ;;  %v8955_v26 = vcombine.low %v134_v13, %v138_v15 }
   0xc   :  { %v266_v17 = vld [vmem:[%s15614_s1 + $0x560] sm:$0xff]  ;;  %3228 = vmatpush1.bf16.msra.mxu1 %v9091_v19 }
   0xd   :  { %v9084_v21 = vcombine.high %v262_v16, %v266_v17  ;;  %v126_v22 = vld [vmem:[%s15614_s1 + $0x100] sm:$0xff]  ;;  %3116 = vmatprep.subr.bf16.mxu0 %v8956_v20  ;;  %v9083_v27 = vcombine.low %v262_v16, %v266_v17 }
   0xe   :  { %v130_v23 = vld [vmem:[%s15614_s1 + $0x120] sm:$0xff]  ;;  %3117 = vmatpush1.bf16.msra.mxu0 %v8955_v26 }
   0xf   :  { %v254_v24 = vld [vmem:[%s15614_s1 + $0x500] sm:$0xff]  ;;  %v8948_v28 = vcombine.high %v126_v22, %v130_v23  ;;  %3229 = vmatprep.subr.bf16.mxu1 %v9084_v21  ;;  %v8947_v34 = vcombine.low %v126_v22, %v130_v23 }
  0x10   :  { %v258_v25 = vld [vmem:[%s15614_s1 + $0x520] sm:$0xff]  ;;  %3230 = vmatpush1.bf16.msra.mxu1 %v9083_v27 }
  0x11   :  { %v9076_v29 = vcombine.high %v254_v24, %v258_v25  ;;  %v118_v30 = vld [vmem:[%s15614_s1 + $0xc0] sm:$0xff]  ;;  %3118 = vmatprep.subr.bf16.mxu0 %v8948_v28  ;;  %v9075_v35 = vcombine.low %v254_v24, %v258_v25 }
  0x12   :  { %v122_v31 = vld [vmem:[%s15614_s1 + $0xe0] sm:$0xff]  ;;  %3119 = vmatpush1.bf16.msra.mxu0 %v8947_v34 }
  0x13   :  { %v246_v32 = vld [vmem:[%s15614_s1 + $0x4c0] sm:$0xff]  ;;  %v8940_v36 = vcombine.high %v118_v30, %v122_v31  ;;  %3231 = vmatprep.subr.bf16.mxu1 %v9076_v29  ;;  %v8939_v42 = vcombine.low %v118_v30, %v122_v31 }
  0x14   :  { %v250_v33 = vld [vmem:[%s15614_s1 + $0x4e0] sm:$0xff]  ;;  %3232 = vmatpush1.bf16.msra.mxu1 %v9075_v35 }
  0x15   :  { %v9068_v37 = vcombine.high %v246_v32, %v250_v33  ;;  %v110_v38 = vld [vmem:[%s15614_s1 + $0x80] sm:$0xff]  ;;  %3120 = vmatprep.subr.bf16.mxu0 %v8940_v36  ;;  %v9067_v43 = vcombine.low %v246_v32, %v250_v33 }
  0x16   :  { %v114_v39 = vld [vmem:[%s15614_s1 + $0xa0] sm:$0xff]  ;;  %3121 = vmatpush1.bf16.msra.mxu0 %v8939_v42 }
  0x17   :  { %v238_v40 = vld [vmem:[%s15614_s1 + $0x480] sm:$0xff]  ;;  %v8932_v44 = vcombine.high %v110_v38, %v114_v39  ;;  %3233 = vmatprep.subr.bf16.mxu1 %v9068_v37  ;;  %v8931_v50 = vcombine.low %v110_v38, %v114_v39 }
  0x18   :  { %v242_v41 = vld [vmem:[%s15614_s1 + $0x4a0] sm:$0xff]  ;;  %3234 = vmatpush1.bf16.msra.mxu1 %v9067_v43 }
  0x19   :  { %v9060_v45 = vcombine.high %v238_v40, %v242_v41  ;;  %v102_v46 = vld [vmem:[%s15614_s1 + $0x40] sm:$0xff]  ;;  %3122 = vmatprep.subr.bf16.mxu0 %v8932_v44  ;;  %v9059_v52 = vcombine.low %v238_v40, %v242_v41 }
  0x1a   :  { %v106_v47 = vld [vmem:[%s15614_s1 + $0x60] sm:$0xff]  ;;  %3123 = vmatpush1.bf16.msra.mxu0 %v8931_v50 }
  0x1b   :  { %v230_v48 = vld [vmem:[%s15614_s1 + $0x440] sm:$0xff]  ;;  %v8924_v53 = vcombine.high %v102_v46, %v106_v47  ;;  %3235 = vmatprep.subr.bf16.mxu1 %v9060_v45  ;;  %v8923_v60 = vcombine.low %v102_v46, %v106_v47 }
  0x1c   :  { %v234_v49 = vld [vmem:[%s15614_s1 + $0x460] sm:$0xff]  ;;  %3236 = vmatpush1.bf16.msra.mxu1 %v9059_v52 }
  0x1d   :  { %v94_v51 = vld [vmem:[%s15614_s1] sm:$0xff]  ;;  %v9052_v55 = vcombine.high %v230_v48, %v234_v49  ;;  %3124 = vmatprep.subr.bf16.mxu0 %v8924_v53  ;;  %v9051_v61 = vcombine.low %v230_v48, %v234_v49 }
  0x1e   :  { %v98_v54 = vld [vmem:[%s15614_s1 + $0x20] sm:$0xff]  ;;  %3125 = vmatpush1.bf16.msra.mxu0 %v8923_v60 }
  0x1f   :  { %v9684_v56 = vld [vmem:[%s15615_s0 + $0x4] ss:$28 sps:$4 sm:$0xff]   ;;  %v8916_v62 = vcombine.high %v94_v51, %v98_v54  ;;  %3237 = vmatprep.subr.bf16.mxu1 %v9052_v55  ;;  %v8915_v4 = vcombine.low %v94_v51, %v98_v54 }
  0x20   :  { %v222_v57 = vld [vmem:[%s15614_s1 + $0x400] sm:$0xff]  ;;  %3144 = vmatprep.mubr.bf16.mxu0 %v9684_v56  ;;  %3238 = vmatpush1.bf16.msra.mxu1 %v9051_v61 }
  0x21   :  { %v226_v58 = vld [vmem:[%s15614_s1 + $0x420] sm:$0xff]  ;;  %3126 = vmatprep.subr.bf16.mxu0 %v8916_v62 }
  0x22   :  { %v214_v63 = vld [vmem:[%s15614_s1 + $0x3c0] sm:$0xff]  ;;  %v9044_v1 = vcombine.high %v222_v57, %v226_v58  ;;  %v9043_v5 = vcombine.low %v222_v57, %v226_v58  ;;  %3127 = vmatpush1.bf16.msra.mxu0 %v8915_v4 }
  0x23   :  { %v218_v0 = vld [vmem:[%s15614_s1 + $0x3e0] sm:$0xff] }
  0x24   :  { %v342_v2 = vld [vmem:[%s15614_s1 + $0x7c0] sm:$0xff]  ;;  %v9036_v6 = vcombine.high %v214_v63, %v218_v0  ;;  %3239 = vmatprep.subr.bf16.mxu1 %v9044_v1  ;;  %v9035_v12 = vcombine.low %v214_v63, %v218_v0 }
  0x25   :  { %v346_v3 = vld [vmem:[%s15614_s1 + $0x7e0] sm:$0xff]  ;;  %3240 = vmatpush1.bf16.msra.mxu1 %v9043_v5 }
  0x26   :  { %v206_v7 = vld [vmem:[%s15614_s1 + $0x380] sm:$0xff]  ;;  %v9164_v8 = vcombine.high %v342_v2, %v346_v3  ;;  %3128 = vmatprep.subr.bf16.mxu0 %v9036_v6  ;;  %v9163_v13 = vcombine.low %v342_v2, %v346_v3 }
  0x27   :  { %v210_v9 = vld [vmem:[%s15614_s1 + $0x3a0] sm:$0xff]  ;;  %3129 = vmatpush2.bf16.msra.mxu0 %v9035_v12 }
  0x28   :  { %v334_v10 = vld [vmem:[%s15614_s1 + $0x780] sm:$0xff]  ;;  %v9028_v14 = vcombine.high %v206_v7, %v210_v9  ;;  %3241 = vmatprep.subr.bf16.mxu1 %v9164_v8  ;;  %v9027_v20 = vcombine.low %v206_v7, %v210_v9 }
  0x29   :  { %v338_v11 = vld [vmem:[%s15614_s1 + $0x7a0] sm:$0xff]  ;;  %3242 = vmatpush2.bf16.msra.mxu1 %v9163_v13 }
  0x2a   :  { %v9156_v15 = vcombine.high %v334_v10, %v338_v11  ;;  %v198_v16 = vld [vmem:[%s15614_s1 + $0x340] sm:$0xff]  ;;  %3130 = vmatprep.subr.bf16.mxu0 %v9028_v14  ;;  %v9155_v21 = vcombine.low %v334_v10, %v338_v11 }
  0x2b   :  { %v202_v17 = vld [vmem:[%s15614_s1 + $0x360] sm:$0xff]  ;;  %3131 = vmatpush2.bf16.msra.mxu0 %v9027_v20 }
  0x2c   :  { %v326_v18 = vld [vmem:[%s15614_s1 + $0x740] sm:$0xff]  ;;  %v9020_v22 = vcombine.high %v198_v16, %v202_v17  ;;  %3243 = vmatprep.subr.bf16.mxu1 %v9156_v15  ;;  %v9019_v28 = vcombine.low %v198_v16, %v202_v17  ;;  %v10649_v17 = vld [vmem:[%s15615_s0 + $0x3c] ss:$28 sps:$4 sm:$0xff]  }
  0x2d   :  { %v330_v19 = vld [vmem:[%s15614_s1 + $0x760] sm:$0xff]  ;;  %3244 = vmatpush2.bf16.msra.mxu1 %v9155_v21 }
  0x2e   :  { %v9148_v23 = vcombine.high %v326_v18, %v330_v19  ;;  %v190_v24 = vld [vmem:[%s15614_s1 + $0x300] sm:$0xff]  ;;  %3132 = vmatprep.subr.bf16.mxu0 %v9020_v22  ;;  %v9147_v29 = vcombine.low %v326_v18, %v330_v19 }
  0x2f   :  { %v194_v25 = vld [vmem:[%s15614_s1 + $0x320] sm:$0xff]  ;;  %3133 = vmatpush2.bf16.msra.mxu0 %v9019_v28 }
  0x30   :  { %v318_v26 = vld [vmem:[%s15614_s1 + $0x700] sm:$0xff]  ;;  %v9012_v30 = vcombine.high %v190_v24, %v194_v25  ;;  %3245 = vmatprep.subr.bf16.mxu1 %v9148_v23  ;;  %v9011_v36 = vcombine.low %v190_v24, %v194_v25 }
  0x31   :  { %v322_v27 = vld [vmem:[%s15614_s1 + $0x720] sm:$0xff]  ;;  %3246 = vmatpush2.bf16.msra.mxu1 %v9147_v29 }
  0x32   :  { %v9140_v31 = vcombine.high %v318_v26, %v322_v27  ;;  %v182_v32 = vld [vmem:[%s15614_s1 + $0x2c0] sm:$0xff]  ;;  %3134 = vmatprep.subr.bf16.mxu0 %v9012_v30  ;;  %v9139_v37 = vcombine.low %v318_v26, %v322_v27  ;;  %v10681_v30 = vld [vmem:[%s15615_s0 + $0x38] ss:$28 sps:$4 sm:$0xff]  }
  0x33   :  { %v186_v33 = vld [vmem:[%s15614_s1 + $0x2e0] sm:$0xff]  ;;  %3135 = vmatpush2.bf16.msra.mxu0 %v9011_v36  ;;  %v10697_v36 = vld [vmem:[%s15615_s0 + $0x74] ss:$28 sps:$4 sm:$0xff]  }
  0x34   :  { %v310_v34 = vld [vmem:[%s15614_s1 + $0x6c0] sm:$0xff]  ;;  %v9004_v38 = vcombine.high %v182_v32, %v186_v33  ;;  %3247 = vmatprep.subr.bf16.mxu1 %v9140_v31  ;;  %v9003_v44 = vcombine.low %v182_v32, %v186_v33 }
  0x35   :  { %v314_v35 = vld [vmem:[%s15614_s1 + $0x6e0] sm:$0xff]  ;;  %3248 = vmatpush2.bf16.msra.mxu1 %v9139_v37  ;;  %v10702_v37 = vld [vmem:[%s15615_s0 + $0x7c] ss:$28 sps:$4 sm:$0xff]  }
  0x36   :  { %v9132_v39 = vcombine.high %v310_v34, %v314_v35  ;;  %v174_v40 = vld [vmem:[%s15614_s1 + $0x280] sm:$0xff]  ;;  %3136 = vmatprep.subr.bf16.mxu0 %v9004_v38  ;;  %v9131_v45 = vcombine.low %v310_v34, %v314_v35 }
  0x37   :  { %v178_v41 = vld [vmem:[%s15614_s1 + $0x2a0] sm:$0xff]  ;;  %3137 = vmatpush2.bf16.msra.mxu0 %v9003_v44 }
  0x38   :  { %v302_v42 = vld [vmem:[%s15614_s1 + $0x680] sm:$0xff]  ;;  %v8996_v46 = vcombine.high %v174_v40, %v178_v41  ;;  %3249 = vmatprep.subr.bf16.mxu1 %v9132_v39  ;;  %v8995_v52 = vcombine.low %v174_v40, %v178_v41 }
  0x39   :  { %v306_v43 = vld [vmem:[%s15614_s1 + $0x6a0] sm:$0xff]  ;;  %3250 = vmatpush2.bf16.msra.mxu1 %v9131_v45  ;;  %v10722_v45 = vld [vmem:[%s15615_s0 + $0x70] ss:$28 sps:$4 sm:$0xff]  }
  0x3a   :  { %v166_v47 = vld [vmem:[%s15614_s1 + $0x240] sm:$0xff]  ;;  %v9124_v48 = vcombine.high %v302_v42, %v306_v43  ;;  %3138 = vmatprep.subr.bf16.mxu0 %v8996_v46  ;;  %v9123_v53 = vcombine.low %v302_v42, %v306_v43 }
  0x3b   :  { %v170_v49 = vld [vmem:[%s15614_s1 + $0x260] sm:$0xff]  ;;  %3139 = vmatpush2.bf16.msra.mxu0 %v8995_v52 }
  0x3c   :  { %v294_v50 = vld [vmem:[%s15614_s1 + $0x640] sm:$0xff]  ;;  %v8988_v54 = vcombine.high %v166_v47, %v170_v49  ;;  %3251 = vmatprep.subr.bf16.mxu1 %v9124_v48  ;;  %v8987_v60 = vcombine.low %v166_v47, %v170_v49 }
  0x3d   :  { %v298_v51 = vld [vmem:[%s15614_s1 + $0x660] sm:$0xff]  ;;  %3252 = vmatpush2.bf16.msra.mxu1 %v9123_v53 }
  0x3e   :  { %v158_v55 = vld [vmem:[%s15614_s1 + $0x200] sm:$0xff]  ;;  %v9116_v57 = vcombine.high %v294_v50, %v298_v51  ;;  %3140 = vmatprep.subr.bf16.mxu0 %v8988_v54  ;;  %v9115_v61 = vcombine.low %v294_v50, %v298_v51  ;;  %v10734_v50 = vld [vmem:[%s15615_s0 + $0x78] ss:$28 sps:$4 sm:$0xff]  }
  0x3f   :  { %v162_v56 = vld [vmem:[%s15614_s1 + $0x220] sm:$0xff]  ;;  %3141 = vmatpush2.bf16.msra.mxu0 %v8987_v60 }
  0x40   :  { %v286_v58 = vld [vmem:[%s15614_s1 + $0x600] sm:$0xff]  ;;  %v8980_v62 = vcombine.high %v158_v55, %v162_v56  ;;  %3253 = vmatprep.subr.bf16.mxu1 %v9116_v57  ;;  %v8979_v4 = vcombine.low %v158_v55, %v162_v56  ;;  %v10745_v56 = vld [vmem:[%s15615_s0 + $0xac] ss:$28 sps:$4 sm:$0xff]   ;;  %v10750_v57 = vld [vmem:[%s15615_s0 + $0xb4] ss:$28 sps:$4 sm:$0xff]  }
  0x41   :  { %v290_v59 = vld [vmem:[%s15614_s1 + $0x620] sm:$0xff]  ;;  %3254 = vmatpush2.bf16.msra.mxu1 %v9115_v61 }
  0x42   :  { %v9108_v63 = vcombine.high %v286_v58, %v290_v59  ;;  %v406_v0 = vld [vmem:[%s15614_s1 + $0x9c0] sm:$0xff]  ;;  %3142 = vmatprep.subr.bf16.mxu0 %v8980_v62  ;;  %v9107_v5 = vcombine.low %v286_v58, %v290_v59 }
  0x43   :  { %v410_v1 = vld [vmem:[%s15614_s1 + $0x9e0] sm:$0xff]  ;;  %3143 = vmatpush2.bf16.msra.mxu0 %v8979_v4 }
  0x44   :  { %v534_v2 = vld [vmem:[%s15614_s1 + $0xdc0] sm:$0xff]  ;;  %v9228_v6 = vcombine.high %v406_v0, %v410_v1  ;;  %3255 = vmatprep.subr.bf16.mxu1 %v9108_v63  ;;  %v9227_v12 = vcombine.low %v406_v0, %v410_v1 }
  0x45   :  { %v538_v3 = vld [vmem:[%s15614_s1 + $0xde0] sm:$0xff]  ;;  %3256 = vmatpush2.bf16.msra.mxu1 %v9107_v5 }
  0x46   :  { %v9356_v7 = vcombine.high %v534_v2, %v538_v3  ;;  %v398_v8 = vld [vmem:[%s15614_s1 + $0x980] sm:$0xff]  ;;  %3338 = vmatprep.subr.bf16.mxu0 %v9228_v6  ;;  %v9355_v15 = vcombine.low %v534_v2, %v538_v3  ;;  %v10782_v6 = vld [vmem:[%s15615_s0 + $0xb0] ss:$28 sps:$4 sm:$0xff]  }
  0x47   :  { %v402_v9 = vld [vmem:[%s15614_s1 + $0x9a0] sm:$0xff] }
  0x48   :  { %v10633_v10 = vld [vmem:[%s15615_s0] ss:$28 sps:$4 sm:$0xff]   ;;  %v10638_v11 = vld [vmem:[%s15615_s0 + $0x8] ss:$28 sps:$4 sm:$0xff]   ;;  %v9220_v16 = vcombine.high %v398_v8, %v402_v9  ;;  %3451 = vmatprep.subr.bf16.mxu1 %v9356_v7  ;;  %v9219_v24 = vcombine.low %v398_v8, %v402_v9 }
  0x49   :  { %v526_v13 = vld [vmem:[%s15614_s1 + $0xd80] sm:$0xff]  ;;  %3145 = vmatmul.mubr.bf16.vlgmr.msra.gmra.mxu0 %v10633_v10  ;;  %3258 = vmatmul.mubr.bf16.vlgmr.msra.gmra.mxu1 %v10638_v11 }
  0x4a   :  { %v530_v14 = vld [vmem:[%s15614_s1 + $0xda0] sm:$0xff]  ;;  %3339 = vmatpush1.bf16.msra.mxu0 %v9227_v12  ;;  %3452 = vmatpush1.bf16.msra.mxu1 %v9355_v15  ;;  %v10798_v15 = vld [vmem:[%s15615_s0 + $0xec] ss:$28 sps:$4 sm:$0xff]  }
  0x4b   :  { %v10654_v18 = vld [vmem:[%s15615_s0 + $0x44] ss:$28 sps:$4 sm:$0xff]   ;;  %v9348_v21 = vcombine.high %v526_v13, %v530_v14  ;;  %3340 = vmatprep.subr.bf16.mxu0 %v9220_v16  ;;  %v9347_v26 = vcombine.low %v526_v13, %v530_v14  ;;  %3154 = vmatprep.mubr.bf16.mxu0 %v10649_v17 }
  0x4c   :  { %v390_v19 = vld [vmem:[%s15614_s1 + $0x940] sm:$0xff]  ;;  %3267 = vmatprep.mubr.bf16.mxu1 %v10654_v18 }
  0x4d   :  { %v394_v20 = vld [vmem:[%s15614_s1 + $0x960] sm:$0xff]  ;;  %3453 = vmatprep.subr.bf16.mxu1 %v9348_v21 }
  0x4e   :  { %v518_v22 = vld [vmem:[%s15614_s1 + $0xd40] sm:$0xff]  ;;  %v9212_v25 = vcombine.high %v390_v19, %v394_v20  ;;  %3341 = vmatpush1.bf16.msra.mxu0 %v9219_v24  ;;  %v9211_v32 = vcombine.low %v390_v19, %v394_v20  ;;  %3454 = vmatpush1.bf16.msra.mxu1 %v9347_v26  ;;  %v10816_v24 = vld [vmem:[%s15614_s1 + $0x5e8] sm:$0xff] }
  0x4f   :  { %v522_v23 = vld [vmem:[%s15614_s1 + $0xd60] sm:$0xff] }
  0x50   :  { %v382_v27 = vld [vmem:[%s15614_s1 + $0x900] sm:$0xff]  ;;  %v9340_v29 = vcombine.high %v518_v22, %v522_v23  ;;  %3342 = vmatprep.subr.bf16.mxu0 %v9212_v25  ;;  %v9339_v40 = vcombine.low %v518_v22, %v522_v23  ;;  %v10811_v23 = vld [vmem:[%s15614_s1 + $0x5c8] sm:$0xff] }
  0x51   :  { %v386_v28 = vld [vmem:[%s15614_s1 + $0x920] sm:$0xff]  ;;  %3155 = vmatmul.mubr.bf16.gmra.mxu0 %v10681_v30 }
  0x52   :  { %v10686_v31 = vld [vmem:[%s15615_s0 + $0x40] ss:$28 sps:$4 sm:$0xff]   ;;  %v9204_v35 = vcombine.high %v382_v27, %v386_v28  ;;  %3455 = vmatprep.subr.bf16.mxu1 %v9340_v29  ;;  %3343 = vmatpush1.bf16.msra.mxu0 %v9211_v32  ;;  %v9203_v42 = vcombine.low %v382_v27, %v386_v28  ;;  %v10777_v5 = vld [vmem:[%s15615_s0 + $0xa8] ss:$28 sps:$4 sm:$0xff]   ;;  %v9102_v32 = vcombine.high %v10811_v23, %v10816_v24 }
  0x53   :  { %v510_v33 = vld [vmem:[%s15614_s1 + $0xd00] sm:$0xff]  ;;  %3268 = vmatmul.mubr.bf16.gmra.mxu1 %v10686_v31  ;;  %3164 = vmatprep.mubr.bf16.mxu0 %v10697_v36 }
  0x54   :  { %v514_v34 = vld [vmem:[%s15614_s1 + $0xd20] sm:$0xff]  ;;  %3344 = vmatprep.subr.bf16.mxu0 %v9204_v35  ;;  %3277 = vmatprep.mubr.bf16.mxu1 %v10702_v37 }
  0x55   :  { %v374_v38 = vld [vmem:[%s15614_s1 + $0x8c0] sm:$0xff]  ;;  %v9332_v41 = vcombine.high %v510_v33, %v514_v34  ;;  %3456 = vmatpush1.bf16.msra.mxu1 %v9339_v40  ;;  %v9331_v49 = vcombine.low %v510_v33, %v514_v34 }
  0x56   :  { %v378_v39 = vld [vmem:[%s15614_s1 + $0x8e0] sm:$0xff]  ;;  %3345 = vmatpush1.bf16.msra.mxu0 %v9203_v42 }
  0x57   :  { %v502_v43 = vld [vmem:[%s15614_s1 + $0xcc0] sm:$0xff]  ;;  %v9196_v46 = vcombine.high %v374_v38, %v378_v39  ;;  %3457 = vmatprep.subr.bf16.mxu1 %v9332_v41  ;;  %v9195_v53 = vcombine.low %v374_v38, %v378_v39  ;;  %v10841_v38 = vld [vmem:[%s15615_s0 + $0x11c] ss:$28 sps:$4 sm:$0xff]  }
  0x58   :  { %v506_v44 = vld [vmem:[%s15614_s1 + $0xce0] sm:$0xff] }
  0x59   :  { %v366_v47 = vld [vmem:[%s15614_s1 + $0x880] sm:$0xff]  ;;  %v9324_v51 = vcombine.high %v502_v43, %v506_v44  ;;  %3346 = vmatprep.subr.bf16.mxu0 %v9196_v46  ;;  %3458 = vmatpush1.bf16.msra.mxu1 %v9331_v49  ;;  %v9323_v60 = vcombine.low %v502_v43, %v506_v44 }
  0x5a   :  { %v370_v48 = vld [vmem:[%s15614_s1 + $0x8a0] sm:$0xff]  ;;  %3165 = vmatmul.mubr.bf16.gmra.mxu0 %v10722_v45 }
  0x5b   :  { %v494_v52 = vld [vmem:[%s15614_s1 + $0xc80] sm:$0xff]  ;;  %v9188_v55 = vcombine.high %v366_v47, %v370_v48  ;;  %3459 = vmatprep.subr.bf16.mxu1 %v9324_v51  ;;  %3278 = vmatmul.mubr.bf16.gmra.mxu1 %v10734_v50  ;;  %v9187_v62 = vcombine.low %v366_v47, %v370_v48  ;;  %v10867_v47 = vld [vmem:[%s15615_s0 + $0x118] ss:$28 sps:$4 sm:$0xff]  }
  0x5c   :  { %v498_v54 = vld [vmem:[%s15614_s1 + $0xca0] sm:$0xff]  ;;  %3347 = vmatpush1.bf16.msra.mxu0 %v9195_v53  ;;  %3174 = vmatprep.mubr.bf16.mxu0 %v10745_v56  ;;  %v10882_v53 = vld [vmem:[%s15615_s0 + $0x15c] ss:$28 sps:$4 sm:$0xff]  }
  0x5d   :  { %v358_v58 = vld [vmem:[%s15614_s1 + $0x840] sm:$0xff]  ;;  %v9316_v61 = vcombine.high %v494_v52, %v498_v54  ;;  %3348 = vmatprep.subr.bf16.mxu0 %v9188_v55  ;;  %3287 = vmatprep.mubr.bf16.mxu1 %v10750_v57  ;;  %v9315_v4 = vcombine.low %v494_v52, %v498_v54  ;;  %v10877_v52 = vld [vmem:[%s15615_s0 + $0x154] ss:$28 sps:$4 sm:$0xff]  }
  0x5e   :  { %v362_v59 = vld [vmem:[%s15614_s1 + $0x860] sm:$0xff]  ;;  %3460 = vmatpush1.bf16.msra.mxu1 %v9323_v60 }
  0x5f   :  { %v486_v63 = vld [vmem:[%s15614_s1 + $0xc40] sm:$0xff]  ;;  %v9180_v1 = vcombine.high %v358_v58, %v362_v59  ;;  %3461 = vmatprep.subr.bf16.mxu1 %v9316_v61  ;;  %v9179_v9 = vcombine.low %v358_v58, %v362_v59 }
  0x60   :  { %v490_v0 = vld [vmem:[%s15614_s1 + $0xc60] sm:$0xff]  ;;  %3349 = vmatpush1.bf16.msra.mxu0 %v9187_v62  ;;  %v10903_v62 = vld [vmem:[%s15615_s0 + $0x150] ss:$28 sps:$4 sm:$0xff]  }
  0x61   :  { %v350_v2 = vld [vmem:[%s15614_s1 + $0x800] sm:$0xff]  ;;  %v9308_v8 = vcombine.high %v486_v63, %v490_v0  ;;  %3350 = vmatprep.subr.bf16.mxu0 %v9180_v1  ;;  %v9307_v20 = vcombine.low %v486_v63, %v490_v0  ;;  %v10908_v63 = vld [vmem:[%s15615_s0 + $0x158] ss:$28 sps:$4 sm:$0xff]  }
  0x62   :  { %v354_v3 = vld [vmem:[%s15614_s1 + $0x820] sm:$0xff]  ;;  %3462 = vmatpush1.bf16.msra.mxu1 %v9315_v4  ;;  %3175 = vmatmul.mubr.bf16.gmra.mxu0 %v10777_v5 }
  0x63   :  { %v10787_v7 = vld [vmem:[%s15615_s0 + $0xe4] ss:$28 sps:$4 sm:$0xff]   ;;  %v9172_v14 = vcombine.high %v350_v2, %v354_v3  ;;  %3463 = vmatprep.subr.bf16.mxu1 %v9308_v8  ;;  %3288 = vmatmul.mubr.bf16.gmra.mxu1 %v10782_v6  ;;  %v9171_v22 = vcombine.low %v350_v2, %v354_v3  ;;  %v10913_v2 = vld [vmem:[%s15615_s0 + $0x18c] ss:$28 sps:$4 sm:$0xff]   ;;  %v10918_v3 = vld [vmem:[%s15615_s0 + $0x194] ss:$28 sps:$4 sm:$0xff]  }
  0x64   :  { %v478_v12 = vld [vmem:[%s15614_s1 + $0xc00] sm:$0xff]  ;;  %3351 = vmatpush1.bf16.msra.mxu0 %v9179_v9  ;;  %3184 = vmatprep.mubr.bf16.mxu0 %v10787_v7 }
  0x65   :  { %v482_v13 = vld [vmem:[%s15614_s1 + $0xc20] sm:$0xff]  ;;  %3352 = vmatprep.subr.bf16.mxu0 %v9172_v14  ;;  %3297 = vmatprep.mubr.bf16.mxu1 %v10798_v15 }
  0x66   :  { %v470_v16 = vld [vmem:[%s15614_s1 + $0xbc0] sm:$0xff]  ;;  %v9300_v21 = vcombine.high %v478_v12, %v482_v13  ;;  %3464 = vmatpush1.bf16.msra.mxu1 %v9307_v20  ;;  %v9299_v28 = vcombine.low %v478_v12, %v482_v13 }
  0x67   :  { %v474_v19 = vld [vmem:[%s15614_s1 + $0xbe0] sm:$0xff] }
  0x68   :  { %v9292_v25 = vcombine.high %v470_v16, %v474_v19  ;;  %v462_v26 = vld [vmem:[%s15614_s1 + $0xb80] sm:$0xff]  ;;  %3465 = vmatprep.subr.bf16.mxu1 %v9300_v21  ;;  %3353 = vmatpush1.bf16.msra.mxu0 %v9171_v22  ;;  %v9291_v34 = vcombine.low %v470_v16, %v474_v19  ;;  %v10944_v19 = vld [vmem:[%s15615_s0 + $0x190] ss:$28 sps:$4 sm:$0xff]  }
  0x69   :  { %v466_v27 = vld [vmem:[%s15614_s1 + $0xba0] sm:$0xff]  ;;  %v10949_v22 = vld [vmem:[%s15615_s0 + $0x14] ss:$28 sps:$4 sm:$0xff]  }
  0x6a   :  { %v10829_v29 = vld [vmem:[%s15615_s0 + $0xe0] ss:$28 sps:$4 sm:$0xff]   ;;  %v10836_v33 = vld [vmem:[%s15615_s0 + $0xe8] ss:$28 sps:$4 sm:$0xff]   ;;  %3354 = vmatprep.subr.bf16.mxu0 %v9292_v25  ;;  %v9284_v35 = vcombine.high %v462_v26, %v466_v27  ;;  %3466 = vmatpush1.bf16.msra.mxu1 %v9299_v28  ;;  %v9283_v42 = vcombine.low %v462_v26, %v466_v27 }
  0x6b   :  { %v10846_v39 = vld [vmem:[%s15615_s0 + $0x124] ss:$28 sps:$4 sm:$0xff]   ;;  %3185 = vmatmul.mubr.bf16.gmra.mxu0 %v10829_v29  ;;  %3677 = vmatprep.subr.bf16.mxu1 %v9102_v32  ;;  %v151_v25 = vld [vmem:[%s15614_s1 + $0x1c8] sm:$0xff]  ;;  %v15623_v32 = vmov 0  }
  0x6c   :  { %v454_v40 = vld [vmem:[%s15614_s1 + $0xb40] sm:$0xff]  ;;  %3298 = vmatmul.mubr.bf16.gmra.mxu1 %v10836_v33  ;;  %3355 = vmatpush2.bf16.msra.mxu0 %v9291_v34  ;;  %v155_v26 = vld [vmem:[%s15614_s1 + $0x1e8] sm:$0xff] }
  0x6d   :  { %v458_v41 = vld [vmem:[%s15614_s1 + $0xb60] sm:$0xff]  ;;  %3356 = vmatprep.subr.bf16.mxu0 %v9284_v35  ;;  %3194 = vmatprep.mubr.bf16.mxu0 %v10841_v38  ;;  %v8974_v28 = vcombine.high %v151_v25, %v155_v26  ;;  %v143_v34 = vld [vmem:[%s15614_s1 + $0x188] sm:$0xff] }
  0x6e   :  { %v9276_v43 = vcombine.high %v454_v40, %v458_v41  ;;  %3307 = vmatprep.mubr.bf16.mxu1 %v10846_v39  ;;  %v446_v44 = vld [vmem:[%s15614_s1 + $0xb00] sm:$0xff]  ;;  %v9275_v49 = vcombine.low %v454_v40, %v458_v41  ;;  %v147_v35 = vld [vmem:[%s15614_s1 + $0x1a8] sm:$0xff] }
  0x6f   :  { %v450_v46 = vld [vmem:[%s15614_s1 + $0xb20] sm:$0xff]  ;;  %v10970_v40 = vld [vmem:[%s15615_s0 + $0x10] ss:$28 sps:$4 sm:$0xff]  }
  0x70   :  { %3357 = vmatpush2.bf16.msra.mxu0 %v9283_v42  ;;  %v10872_v48 = vld [vmem:[%s15615_s0 + $0x120] ss:$28 sps:$4 sm:$0xff]   ;;  %v9268_v51 = vcombine.high %v446_v44, %v450_v46  ;;  %v9267_v58 = vcombine.low %v446_v44, %v450_v46  ;;  %v10939_v16 = vld [vmem:[%s15615_s0 + $0x188] ss:$28 sps:$4 sm:$0xff]   ;;  %v8973_v44 = vcombine.low %v151_v25, %v155_v26  ;;  %v9101_v46 = vcombine.low %v10811_v23, %v10816_v24 }
  0x71   :  { %3358 = vmatprep.subr.bf16.mxu0 %v9276_v43  ;;  %v438_v54 = vld [vmem:[%s15614_s1 + $0xac0] sm:$0xff]  ;;  %v271_v41 = vld [vmem:[%s15614_s1 + $0x588] sm:$0xff]  ;;  %v10981_v43 = vld [vmem:[%s15615_s0 + $0x18] ss:$28 sps:$4 sm:$0xff]  }
  0x72   :  { %v442_v55 = vld [vmem:[%s15614_s1 + $0xae0] sm:$0xff]  ;;  %v275_v42 = vld [vmem:[%s15614_s1 + $0x5a8] sm:$0xff] }
  0x73   :  { %3195 = vmatmul.mubr.bf16.gmra.mxu0 %v10867_v47  ;;  %v9260_v59 = vcombine.high %v438_v54, %v442_v55  ;;  %v430_v60 = vld [vmem:[%s15614_s1 + $0xa80] sm:$0xff]  ;;  %v9259_v0 = vcombine.low %v438_v54, %v442_v55  ;;  %v10988_v54 = vld [vmem:[%s15615_s0 + $0x4c] ss:$28 sps:$4 sm:$0xff]  }
  0x74   :  { %3308 = vmatmul.mubr.bf16.gmra.mxu1 %v10872_v48  ;;  %3359 = vmatpush2.bf16.msra.mxu0 %v9275_v49  ;;  %v434_v61 = vld [vmem:[%s15614_s1 + $0xaa0] sm:$0xff]  ;;  %v8966_v49 = vcombine.high %v143_v34, %v147_v35  ;;  %v135_v55 = vld [vmem:[%s15614_s1 + $0x148] sm:$0xff] }
  0x75   :  { %3360 = vmatprep.subr.bf16.mxu0 %v9268_v51  ;;  %3204 = vmatprep.mubr.bf16.mxu0 %v10877_v52  ;;  %v9252_v1 = vcombine.high %v430_v60, %v434_v61  ;;  %v422_v4 = vld [vmem:[%s15614_s1 + $0xa40] sm:$0xff]  ;;  %v9251_v9 = vcombine.low %v430_v60, %v434_v61  ;;  %v9094_v51 = vcombine.high %v271_v41, %v275_v42  ;;  %v263_v23 = vld [vmem:[%s15614_s1 + $0x548] sm:$0xff] }
  0x76   :  { %3317 = vmatprep.mubr.bf16.mxu1 %v10882_v53  ;;  %v426_v8 = vld [vmem:[%s15614_s1 + $0xa60] sm:$0xff]  ;;  %v267_v24 = vld [vmem:[%s15614_s1 + $0x568] sm:$0xff]  ;;  %v9093_v60 = vcombine.low %v271_v41, %v275_v42 }
  0x77   :  { %v9244_v12 = vcombine.high %v422_v4, %v426_v8  ;;  %v414_v13 = vld [vmem:[%s15614_s1 + $0xa00] sm:$0xff]  ;;  %v9243_v20 = vcombine.low %v422_v4, %v426_v8  ;;  %v131_v4 = vld [vmem:[%s15614_s1 + $0x128] sm:$0xff] }
  0x78   :  { %3361 = vmatpush2.bf16.msra.mxu0 %v9267_v58  ;;  %v418_v14 = vld [vmem:[%s15614_s1 + $0xa20] sm:$0xff]  ;;  %v139_v58 = vld [vmem:[%s15614_s1 + $0x168] sm:$0xff] }
  0x79   :  { %3362 = vmatprep.subr.bf16.mxu0 %v9260_v59  ;;  %v9236_v21 = vcombine.high %v414_v13, %v418_v14  ;;  %v9235_v27 = vcombine.low %v414_v13, %v418_v14  ;;  %v8965_v59 = vcombine.low %v143_v34, %v147_v35  ;;  %v8958_v61 = vcombine.high %v135_v55, %v139_v58  ;;  %v11015_v8 = vld [vmem:[%s15615_s0 + $0x48] ss:$28 sps:$4 sm:$0xff]   ;;  %v11026_v13 = vld [vmem:[%s15615_s0 + $0x50] ss:$28 sps:$4 sm:$0xff]  }
  0x7a   :  { %v8957_v14 = vcombine.low %v135_v55, %v139_v58  ;;  %v11031_v26 = vld [vmem:[%s15615_s0 + $0x84] ss:$28 sps:$4 sm:$0xff]   ;;  %v247_v34 = vld [vmem:[%s15614_s1 + $0x4c8] sm:$0xff] }
  0x7b   :  { %3205 = vmatmul.mubr.bf16.gmra.mxu0 %v10903_v62  ;;  %v251_v35 = vld [vmem:[%s15614_s1 + $0x4e8] sm:$0xff]  ;;  %v11058_v55 = vld [vmem:[%s15615_s0 + $0x80] ss:$28 sps:$4 sm:$0xff]  }
  0x7c   :  { %3318 = vmatmul.mubr.bf16.gmra.mxu1 %v10908_v63  ;;  %3363 = vmatpush2.bf16.msra.mxu0 %v9259_v0  ;;  %v9086_v0 = vcombine.high %v263_v23, %v267_v24  ;;  %v239_v58 = vld [vmem:[%s15614_s1 + $0x488] sm:$0xff] }
  0x7d   :  { %3364 = vmatprep.subr.bf16.mxu0 %v9252_v1  ;;  %3214 = vmatprep.mubr.bf16.mxu0 %v10913_v2  ;;  %v127_v1 = vld [vmem:[%s15614_s1 + $0x108] sm:$0xff] }
  0x7e   :  { %3327 = vmatprep.mubr.bf16.mxu1 %v10918_v3  ;;  %v8949_v41 = vcombine.low %v127_v1, %v131_v4 }
  0x80   :  { %3365 = vmatpush2.bf16.msra.mxu0 %v9251_v9  ;;  %v255_v9 = vld [vmem:[%s15614_s1 + $0x508] sm:$0xff] }
  0x81   :  { %3366 = vmatprep.subr.bf16.mxu0 %v9244_v12  ;;  %v259_v12 = vld [vmem:[%s15614_s1 + $0x528] sm:$0xff] }
  0x82   :  { %v9078_v25 = vcombine.high %v255_v9, %v259_v12  ;;  %v9077_v42 = vcombine.low %v255_v9, %v259_v12  ;;  %v107_v9 = vld [vmem:[%s15614_s1 + $0x68] sm:$0xff] }
  0x83   :  { %3215 = vmatmul.mubr.bf16.gmra.mxu0 %v10939_v16  ;;  %v231_v12 = vld [vmem:[%s15614_s1 + $0x448] sm:$0xff] }
  0x84   :  { %3328 = vmatmul.mubr.bf16.gmra.mxu1 %v10944_v19  ;;  %3367 = vmatpush2.bf16.msra.mxu0 %v9243_v20  ;;  %v9085_v20 = vcombine.low %v263_v23, %v267_v24  ;;  %v243_v23 = vld [vmem:[%s15614_s1 + $0x4a8] sm:$0xff] }
  0x85   :  { %3368 = vmatprep.subr.bf16.mxu0 %v9236_v21  ;;  %3370 = vmatprep.mubr.bf16.mxu0 %v10949_v22  ;;  %v8950_v21 = vcombine.high %v127_v1, %v131_v4  ;;  %v11069_v24 = vld [vmem:[%s15615_s0 + $0x88] ss:$28 sps:$4 sm:$0xff]   ;;  %v11074_v1 = vld [vmem:[%s15615_s0 + $0xbc] ss:$28 sps:$4 sm:$0xff]  }
  0x86   :  { %3483 = vmatprep.mubr.bf16.mxu1 %v15623_v32  ;;  %v103_v4 = vld [vmem:[%s15614_s1 + $0x48] sm:$0xff] }
  0x88   :  { %3369 = vmatpush2.bf16.msra.mxu0 %v9235_v27  ;;  %v119_v27 = vld [vmem:[%s15614_s1 + $0xc8] sm:$0xff] }
  0x89   :  { %3564 = vmatprep.subr.bf16.mxu0 %v8974_v28  ;;  %v123_v28 = vld [vmem:[%s15614_s1 + $0xe8] sm:$0xff] }
  0x8b   :  { %3371 = vmatmul.mubr.bf16.vlgmr.msra.gmra.mxu0 %v10970_v40 }
  0x8c   :  { %3484 = vmatmul.mubr.bf16.vlgmr.msra.gmra.mxu1 %v10981_v43  ;;  %3565 = vmatpush1.bf16.msra.mxu0 %v8973_v44  ;;  %v8942_v44 = vcombine.high %v119_v27, %v123_v28 }
  0x8d   :  { %3678 = vmatpush1.bf16.msra.mxu1 %v9101_v46  ;;  %3566 = vmatprep.subr.bf16.mxu0 %v8966_v49  ;;  %v9070_v46 = vcombine.high %v247_v34, %v251_v35  ;;  %v111_v49 = vld [vmem:[%s15614_s1 + $0x88] sm:$0xff] }
  0x8e   :  { %3679 = vmatprep.subr.bf16.mxu1 %v9094_v51  ;;  %3380 = vmatprep.mubr.bf16.mxu0 %v10988_v54  ;;  %v115_v51 = vld [vmem:[%s15614_s1 + $0xa8] sm:$0xff] }
  0x8f   :  { %3493 = vmatprep.mubr.bf16.mxu1 %v15623_v32 }
  0x90   :  { %3567 = vmatpush1.bf16.msra.mxu0 %v8965_v59  ;;  %v8941_v59 = vcombine.low %v119_v27, %v123_v28  ;;  %v95_v28 = vld [vmem:[%s15614_s1 + $0x8] sm:$0xff] }
  0x91   :  { %3680 = vmatpush1.bf16.msra.mxu1 %v9093_v60  ;;  %3568 = vmatprep.subr.bf16.mxu0 %v8958_v61  ;;  %v9069_v60 = vcombine.low %v247_v34, %v251_v35  ;;  %v8934_v61 = vcombine.high %v111_v49, %v115_v51  ;;  %v99_v34 = vld [vmem:[%s15614_s1 + $0x28] sm:$0xff]  ;;  %v11101_v35 = vld [vmem:[%s15615_s0 + $0xb8] ss:$28 sps:$4 sm:$0xff]  }
  0x92   :  { %3681 = vmatprep.subr.bf16.mxu1 %v9086_v0  ;;  %v9062_v0 = vcombine.high %v239_v58, %v243_v23 }
  0x93   :  { %3381 = vmatmul.mubr.bf16.gmra.mxu0 %v11015_v8 }
  0x94   :  { %3494 = vmatmul.mubr.bf16.gmra.mxu1 %v11026_v13  ;;  %3569 = vmatpush1.bf16.msra.mxu0 %v8957_v14  ;;  %v235_v14 = vld [vmem:[%s15614_s1 + $0x468] sm:$0xff] }
  0x95   :  { %3682 = vmatpush1.bf16.msra.mxu1 %v9085_v20  ;;  %3570 = vmatprep.subr.bf16.mxu0 %v8950_v21  ;;  %v8933_v20 = vcombine.low %v111_v49, %v115_v51  ;;  %v9061_v21 = vcombine.low %v239_v58, %v243_v23  ;;  %v9054_v27 = vcombine.high %v231_v12, %v235_v14  ;;  %v11117_v23 = vld [vmem:[%s15615_s0 + $0xf4] ss:$28 sps:$4 sm:$0xff]  }
  0x96   :  { %3683 = vmatprep.subr.bf16.mxu1 %v9078_v25  ;;  %3390 = vmatprep.mubr.bf16.mxu0 %v11031_v26  ;;  %v8926_v25 = vcombine.high %v103_v4, %v107_v9  ;;  %v9053_v49 = vcombine.low %v231_v12, %v235_v14  ;;  %v8918_v51 = vcombine.high %v95_v28, %v99_v34 }
  0x97   :  { %3503 = vmatprep.mubr.bf16.mxu1 %v15623_v32 }
  0x98   :  { %3571 = vmatpush1.bf16.msra.mxu0 %v8949_v41  ;;  %v223_v41 = vld [vmem:[%s15614_s1 + $0x408] sm:$0xff] }
  0x99   :  { %3684 = vmatpush1.bf16.msra.mxu1 %v9077_v42  ;;  %3572 = vmatprep.subr.bf16.mxu0 %v8942_v44  ;;  %v227_v42 = vld [vmem:[%s15614_s1 + $0x428] sm:$0xff]  ;;  %v11112_v44 = vld [vmem:[%s15615_s0 + $0xc0] ss:$28 sps:$4 sm:$0xff]  }
  0x9a   :  { %3685 = vmatprep.subr.bf16.mxu1 %v9070_v46  ;;  %v8925_v46 = vcombine.low %v103_v4, %v107_v9  ;;  %v9046_v58 = vcombine.high %v223_v41, %v227_v42  ;;  %v8917_v4 = vcombine.low %v95_v28, %v99_v34  ;;  %v9045_v9 = vcombine.low %v223_v41, %v227_v42  ;;  %v339_v28 = vld [vmem:[%s15614_s1 + $0x7a8] sm:$0xff]  ;;  %v11155_v34 = vld [vmem:[%s15615_s0 + $0xf8] ss:$28 sps:$4 sm:$0xff]  }
  0x9b   :  { %3391 = vmatmul.mubr.bf16.gmra.mxu0 %v11058_v55  ;;  %15688 = vst [vmem:[#allocation3_spill] sm:$0xff] %v11155_v34 }
  0x9c   :  { %3504 = vmatmul.mubr.bf16.gmra.mxu1 %v11069_v24  ;;  %3573 = vmatpush1.bf16.msra.mxu0 %v8941_v59  ;;  %v215_v59 = vld [vmem:[%s15614_s1 + $0x3c8] sm:$0xff] }
  0x9d   :  { %3686 = vmatpush1.bf16.msra.mxu1 %v9069_v60  ;;  %3574 = vmatprep.subr.bf16.mxu0 %v8934_v61  ;;  %v219_v60 = vld [vmem:[%s15614_s1 + $0x3e8] sm:$0xff] }
  0x9e   :  { %3687 = vmatprep.subr.bf16.mxu1 %v9062_v0  ;;  %3400 = vmatprep.mubr.bf16.mxu0 %v11074_v1  ;;  %v343_v61 = vld [vmem:[%s15614_s1 + $0x7c8] sm:$0xff]  ;;  %v9038_v12 = vcombine.high %v215_v59, %v219_v60  ;;  %v9037_v41 = vcombine.low %v215_v59, %v219_v60 }
  0x9f   :  { %3513 = vmatprep.mubr.bf16.mxu1 %v15623_v32  ;;  %v347_v0 = vld [vmem:[%s15614_s1 + $0x7e8] sm:$0xff] }
  0xa0   :  { %3575 = vmatpush1.bf16.msra.mxu0 %v8933_v20  ;;  %v9166_v14 = vcombine.high %v343_v61, %v347_v0  ;;  %v207_v20 = vld [vmem:[%s15614_s1 + $0x388] sm:$0xff]  ;;  %v9165_v42 = vcombine.low %v343_v61, %v347_v0 }
  0xa1   :  { %3688 = vmatpush1.bf16.msra.mxu1 %v9061_v21  ;;  %3576 = vmatprep.subr.bf16.mxu0 %v8926_v25  ;;  %v211_v21 = vld [vmem:[%s15614_s1 + $0x3a8] sm:$0xff] }
  0xa2   :  { %3689 = vmatprep.subr.bf16.mxu1 %v9054_v27  ;;  %v11144_v25 = vld [vmem:[%s15615_s0 + $0xf0] ss:$28 sps:$4 sm:$0xff]   ;;  %v9029_v61 = vcombine.low %v207_v20, %v211_v21 }
  0xa3   :  { %3401 = vmatmul.mubr.bf16.gmra.mxu0 %v11101_v35  ;;  %15687 = vst [vmem:[#allocation2_spill] sm:$0xff] %v11144_v25  ;;  %v335_v27 = vld [vmem:[%s15614_s1 + $0x788] sm:$0xff] }
  0xa4   :  { %3514 = vmatmul.mubr.bf16.gmra.mxu1 %v11112_v44  ;;  %3577 = vmatpush1.bf16.msra.mxu0 %v8925_v46  ;;  %v9030_v46 = vcombine.high %v207_v20, %v211_v21  ;;  %v327_v59 = vld [vmem:[%s15614_s1 + $0x748] sm:$0xff]  ;;  %v9157_v0 = vcombine.low %v335_v27, %v339_v28 }
  0xa5   :  { %3690 = vmatpush1.bf16.msra.mxu1 %v9053_v49  ;;  %3578 = vmatprep.subr.bf16.mxu0 %v8918_v51  ;;  %v9158_v49 = vcombine.high %v335_v27, %v339_v28  ;;  %v11160_v51 = vld [vmem:[%s15615_s0 + $0x12c] ss:$28 sps:$4 sm:$0xff]  }
  0xa6   :  { %3691 = vmatprep.subr.bf16.mxu1 %v9046_v58  ;;  %3410 = vmatprep.mubr.bf16.mxu0 %v11117_v23  ;;  %15689 = vst [vmem:[#allocation4_spill] sm:$0xff] %v11160_v51  ;;  %v199_v58 = vld [vmem:[%s15614_s1 + $0x348] sm:$0xff] }
  0xa7   :  { %3523 = vmatprep.mubr.bf16.mxu1 %v15623_v32  ;;  %v331_v60 = vld [vmem:[%s15614_s1 + $0x768] sm:$0xff] }
  0xa8   :  { %3579 = vmatpush1.bf16.msra.mxu0 %v8917_v4  ;;  %v203_v4 = vld [vmem:[%s15614_s1 + $0x368] sm:$0xff] }
  0xa9   :  { %3692 = vmatpush1.bf16.msra.mxu1 %v9045_v9  ;;  %3580 = vmatprep.subr.bf16.mxu0 %v9038_v12  ;;  %v9022_v9 = vcombine.high %v199_v58, %v203_v4  ;;  %v9150_v12 = vcombine.high %v327_v59, %v331_v60  ;;  %v195_v32 = vld [vmem:[%s15614_s1 + $0x328] sm:$0xff] }
  0xaa   :  { %3693 = vmatprep.subr.bf16.mxu1 %v9166_v14  ;;  %v191_v14 = vld [vmem:[%s15614_s1 + $0x308] sm:$0xff] }
  0xab   :  { %3411 = vmatmul.mubr.bf16.gmra.mxu0 %v11144_v25  ;;  %v15690_v25 = vmov 0   ;;  %v11187_v20 = vld [vmem:[%s15615_s0 + $0x128] ss:$28 sps:$4 sm:$0xff]   ;;  %v11198_v28 = vld [vmem:[%s15615_s0 + $0x130] ss:$28 sps:$4 sm:$0xff]  }
  0xac   :  { %3524 = vmatmul.mubr.bf16.gmra.mxu1 %v11155_v34  ;;  %3581 = vmatpush2.bf16.msra.mxu0 %v9037_v41  ;;  %15691 = vst [vmem:[#allocation5_spill] sm:$0xff] %v11187_v20  ;;  %v319_v21 = vld [vmem:[%s15614_s1 + $0x708] sm:$0xff]  ;;  %15692 = vst [vmem:[#allocation6_spill] sm:$0xff] %v11198_v28  ;;  %v9021_v41 = vcombine.low %v199_v58, %v203_v4 }
  0xad   :  { %3694 = vmatpush2.bf16.msra.mxu1 %v9165_v42  ;;  %3582 = vmatprep.subr.bf16.mxu0 %v9030_v46  ;;  %v323_v27 = vld [vmem:[%s15614_s1 + $0x728] sm:$0xff]  ;;  %v9149_v42 = vcombine.low %v327_v59, %v331_v60  ;;  %v9014_v46 = vcombine.high %v191_v14, %v195_v32  ;;  %v9013_v59 = vcombine.low %v191_v14, %v195_v32  ;;  %v9758_v32 = vld [vmem:[%s15615_s0 + $0x160] ss:$28 sps:$4 sm:$0xff]  }
  0xae   :  { %3695 = vmatprep.subr.bf16.mxu1 %v9158_v49  ;;  %3420 = vmatprep.mubr.bf16.mxu0 %v11160_v51  ;;  %v9142_v49 = vcombine.high %v319_v21, %v323_v27  ;;  %v9756_v51 = vld [vmem:[%s15615_s0 + $0x164] ss:$28 sps:$4 sm:$0xff]   ;;  %v187_v34 = vld [vmem:[%s15614_s1 + $0x2e8] sm:$0xff]  ;;  %v9141_v60 = vcombine.low %v319_v21, %v323_v27 }
  0xaf   :  { %3533 = vmatprep.mubr.bf16.mxu1 %v15690_v25  ;;  %v311_v58 = vld [vmem:[%s15614_s1 + $0x6c8] sm:$0xff] }
  0xb0   :  { %3583 = vmatpush2.bf16.msra.mxu0 %v9029_v61  ;;  %v183_v61 = vld [vmem:[%s15614_s1 + $0x2c8] sm:$0xff] }
  0xb1   :  { %3696 = vmatpush2.bf16.msra.mxu1 %v9157_v0  ;;  %3584 = vmatprep.subr.bf16.mxu0 %v9022_v9  ;;  %v315_v4 = vld [vmem:[%s15614_s1 + $0x6e8] sm:$0xff]  ;;  %v9006_v0 = vcombine.high %v183_v61, %v187_v34  ;;  %v9005_v27 = vcombine.low %v183_v61, %v187_v34 }
  0xb2   :  { %3697 = vmatprep.subr.bf16.mxu1 %v9150_v12  ;;  %v9134_v9 = vcombine.high %v311_v58, %v315_v4  ;;  %v175_v12 = vld [vmem:[%s15614_s1 + $0x288] sm:$0xff] }
  0xb3   :  { %3421 = vmatmul.mubr.bf16.gmra.mxu0 %v11187_v20  ;;  %v179_v20 = vld [vmem:[%s15614_s1 + $0x2a8] sm:$0xff] }
  0xb4   :  { %3534 = vmatmul.mubr.bf16.gmra.mxu1 %v11198_v28  ;;  %3585 = vmatpush2.bf16.msra.mxu0 %v9021_v41  ;;  %v303_v14 = vld [vmem:[%s15614_s1 + $0x688] sm:$0xff]  ;;  %v9133_v41 = vcombine.low %v311_v58, %v315_v4  ;;  %v8997_v58 = vcombine.low %v175_v12, %v179_v20 }
  0xb5   :  { %3698 = vmatpush2.bf16.msra.mxu1 %v9149_v42  ;;  %3586 = vmatprep.subr.bf16.mxu0 %v9014_v46  ;;  %v9759_v21 = vld [vmem:[%s15615_s0 + $0x168] ss:$28 sps:$4 sm:$0xff]   ;;  %v8998_v42 = vcombine.high %v175_v12, %v179_v20  ;;  %v9762_v20 = vld [vmem:[%s15615_s0 + $0x198] ss:$28 sps:$4 sm:$0xff]  }
  0xb6   :  { %3699 = vmatprep.subr.bf16.mxu1 %v9142_v49  ;;  %3430 = vmatprep.mubr.bf16.mxu0 %v9756_v51  ;;  %v307_v51 = vld [vmem:[%s15614_s1 + $0x6a8] sm:$0xff]  ;;  %v9760_v49 = vld [vmem:[%s15615_s0 + $0x19c] ss:$28 sps:$4 sm:$0xff]  }
  0xb7   :  { %3543 = vmatprep.mubr.bf16.mxu1 %v15690_v25  ;;  %v9126_v46 = vcombine.high %v303_v14, %v307_v51  ;;  %v167_v28 = vld [vmem:[%s15614_s1 + $0x248] sm:$0xff]  ;;  %v9125_v4 = vcombine.low %v303_v14, %v307_v51  ;;  %v9763_v51 = vld [vmem:[%s15615_s0 + $0x1a0] ss:$28 sps:$4 sm:$0xff]  }
  0xb8   :  { %3587 = vmatpush2.bf16.msra.mxu0 %v9013_v59  ;;  %v171_v59 = vld [vmem:[%s15614_s1 + $0x268] sm:$0xff] }
  0xb9   :  { %3700 = vmatpush2.bf16.msra.mxu1 %v9141_v60  ;;  %3588 = vmatprep.subr.bf16.mxu0 %v9006_v0  ;;  %v295_v34 = vld [vmem:[%s15614_s1 + $0x648] sm:$0xff]  ;;  %v8990_v60 = vcombine.high %v167_v28, %v171_v59 }
  0xba   :  { %3701 = vmatprep.subr.bf16.mxu1 %v9134_v9  ;;  %v299_v61 = vld [vmem:[%s15614_s1 + $0x668] sm:$0xff] }
  0xbb   :  { %3431 = vmatmul.mubr.bf16.gmra.mxu0 %v9758_v32  ;;  %v9118_v0 = vcombine.high %v295_v34, %v299_v61  ;;  %v159_v9 = vld [vmem:[%s15614_s1 + $0x208] sm:$0xff] }
  0xbc   :  { %3544 = vmatmul.mubr.bf16.gmra.mxu1 %v9759_v21  ;;  %3589 = vmatpush2.bf16.msra.mxu0 %v9005_v27  ;;  %v163_v32 = vld [vmem:[%s15614_s1 + $0x228] sm:$0xff]  ;;  %v8989_v21 = vcombine.low %v167_v28, %v171_v59  ;;  %v9117_v27 = vcombine.low %v295_v34, %v299_v61 }
  0xbd   :  { %3702 = vmatpush2.bf16.msra.mxu1 %v9133_v41  ;;  %3590 = vmatprep.subr.bf16.mxu0 %v8998_v42  ;;  %v287_v12 = vld [vmem:[%s15614_s1 + $0x608] sm:$0xff]  ;;  %v8982_v41 = vcombine.high %v159_v9, %v163_v32  ;;  %v8981_v59 = vcombine.low %v159_v9, %v163_v32 }
  0xbe   :  { %3703 = vmatprep.subr.bf16.mxu1 %v9126_v46  ;;  %3440 = vmatprep.mubr.bf16.mxu0 %v9760_v49  ;;  %v291_v14 = vld [vmem:[%s15614_s1 + $0x628] sm:$0xff] }
  0xbf   :  { %3553 = vmatprep.mubr.bf16.mxu1 %v15690_v25  ;;  %v9110_v42 = vcombine.high %v287_v12, %v291_v14  ;;  %v407_v46 = vld [vmem:[%s15614_s1 + $0x9c8] sm:$0xff]  ;;  %v9109_v34 = vcombine.low %v287_v12, %v291_v14 }
  0xc0   :  { %3591 = vmatpush2.bf16.msra.mxu0 %v8997_v58  ;;  %v411_v49 = vld [vmem:[%s15614_s1 + $0x9e8] sm:$0xff] }
  0xc1   :  { %3704 = vmatpush2.bf16.msra.mxu1 %v9125_v4  ;;  %3592 = vmatprep.subr.bf16.mxu0 %v8990_v60  ;;  %v535_v58 = vld [vmem:[%s15614_s1 + $0xdc8] sm:$0xff]  ;;  %v9230_v61 = vcombine.high %v407_v46, %v411_v49  ;;  %v10244_v4 = vld [vmem:[%s15615_s0 + $0x4] ss:$28 sps:$4 sm:$0xff]   ;;  %v9229_v32 = vcombine.low %v407_v46, %v411_v49 }
  0xc2   :  { %3705 = vmatprep.subr.bf16.mxu1 %v9118_v0  ;;  %v539_v28 = vld [vmem:[%s15614_s1 + $0xde8] sm:$0xff] }
  0xc3   :  { %3441 = vmatmul.mubr.bf16.gmra.mxu0 %v9762_v20  ;;  %v9358_v60 = vcombine.high %v535_v58, %v539_v28  ;;  %v399_v0 = vld [vmem:[%s15614_s1 + $0x988] sm:$0xff] }
  0xc4   :  { %3554 = vmatmul.mubr.bf16.gmra.mxu1 %v9763_v51  ;;  %3593 = vmatpush2.bf16.msra.mxu0 %v8989_v21  ;;  %v403_v20 = vld [vmem:[%s15614_s1 + $0x9a8] sm:$0xff]  ;;  %v9357_v51 = vcombine.low %v535_v58, %v539_v28 }
  0xc5   :  { %3706 = vmatpush2.bf16.msra.mxu1 %v9117_v27  ;;  %3594 = vmatprep.subr.bf16.mxu0 %v8982_v41  ;;  %v10245_v9 = vld [vmem:[%s15615_s0 + $0xc] ss:$28 sps:$4 sm:$0xff]   ;;  %v9222_v21 = vcombine.high %v399_v0, %v403_v20  ;;  %v9221_v58 = vcombine.low %v399_v0, %v403_v20 }
  0xc6   :  { %3707 = vmatprep.subr.bf16.mxu1 %v9110_v42  ;;  %3596 = vmatprep.mubr.bf16.mxu0 %v10244_v4  ;;  %v527_v12 = vld [vmem:[%s15614_s1 + $0xd88] sm:$0xff] }
  0xc7   :  { %3709 = vmatprep.mubr.bf16.mxu1 %v10245_v9  ;;  %v531_v14 = vld [vmem:[%s15614_s1 + $0xda8] sm:$0xff] }
  0xc8   :  { %3595 = vmatpush2.bf16.msra.mxu0 %v8981_v59  ;;  %v391_v27 = vld [vmem:[%s15614_s1 + $0x948] sm:$0xff]  ;;  %v9350_v42 = vcombine.high %v527_v12, %v531_v14  ;;  %v9349_v59 = vcombine.low %v527_v12, %v531_v14 }
  0xc9   :  { %3708 = vmatpush2.bf16.msra.mxu1 %v9109_v34  ;;  %3790 = vmatprep.subr.bf16.mxu0 %v9230_v61  ;;  %v395_v41 = vld [vmem:[%s15614_s1 + $0x968] sm:$0xff] }
  0xca   :  { %3903 = vmatprep.subr.bf16.mxu1 %v9358_v60  ;;  %v519_v46 = vld [vmem:[%s15614_s1 + $0xd48] sm:$0xff]  ;;  %v9214_v28 = vcombine.high %v391_v27, %v395_v41 }
  0xcb   :  { %3597 = vmatmul.mubr.bf16.vlgmr.msra.gmra.mxu0 %v10633_v10  ;;  %v523_v49 = vld [vmem:[%s15614_s1 + $0xd68] sm:$0xff] }
  0xcc   :  { %3710 = vmatmul.mubr.bf16.vlgmr.msra.gmra.mxu1 %v10638_v11  ;;  %3791 = vmatpush1.bf16.msra.mxu0 %v9229_v32  ;;  %v383_v10 = vld [vmem:[%s15614_s1 + $0x908] sm:$0xff]  ;;  %v9342_v61 = vcombine.high %v519_v46, %v523_v49  ;;  %v9213_v11 = vcombine.low %v391_v27, %v395_v41  ;;  %v9341_v20 = vcombine.low %v519_v46, %v523_v49 }
  0xcd   :  { %3904 = vmatpush1.bf16.msra.mxu1 %v9357_v51  ;;  %3792 = vmatprep.subr.bf16.mxu0 %v9222_v21  ;;  %v387_v34 = vld [vmem:[%s15614_s1 + $0x928] sm:$0xff] }
  0xce   :  { %3606 = vmatprep.mubr.bf16.mxu0 %v10649_v17  ;;  %3719 = vmatprep.mubr.bf16.mxu1 %v10654_v18  ;;  %v511_v4 = vld [vmem:[%s15614_s1 + $0xd08] sm:$0xff]  ;;  %v9206_v18 = vcombine.high %v383_v10, %v387_v34  ;;  %v9205_v32 = vcombine.low %v383_v10, %v387_v34 }
  0xcf   :  { %3905 = vmatprep.subr.bf16.mxu1 %v9350_v42  ;;  %v515_v17 = vld [vmem:[%s15614_s1 + $0xd28] sm:$0xff] }
  0xd0   :  { %3793 = vmatpush1.bf16.msra.mxu0 %v9221_v58  ;;  %v375_v60 = vld [vmem:[%s15614_s1 + $0x8c8] sm:$0xff]  ;;  %v9334_v9 = vcombine.high %v511_v4, %v515_v17  ;;  %v9333_v21 = vcombine.low %v511_v4, %v515_v17 }
  0xd1   :  { %3794 = vmatprep.subr.bf16.mxu0 %v9214_v28  ;;  %3906 = vmatpush1.bf16.msra.mxu1 %v9349_v59  ;;  %v379_v0 = vld [vmem:[%s15614_s1 + $0x8e8] sm:$0xff] }
  0xd2   :  { %3907 = vmatprep.subr.bf16.mxu1 %v9342_v61  ;;  %v503_v12 = vld [vmem:[%s15614_s1 + $0xcc8] sm:$0xff]  ;;  %v9198_v51 = vcombine.high %v375_v60, %v379_v0  ;;  %v9197_v41 = vcombine.low %v375_v60, %v379_v0 }
  0xd3   :  { %3607 = vmatmul.mubr.bf16.gmra.mxu0 %v10681_v30  ;;  %v507_v14 = vld [vmem:[%s15614_s1 + $0xce8] sm:$0xff] }
  0xd4   :  { %3720 = vmatmul.mubr.bf16.gmra.mxu1 %v10686_v31  ;;  %3795 = vmatpush1.bf16.msra.mxu0 %v9213_v11  ;;  %v367_v30 = vld [vmem:[%s15614_s1 + $0x888] sm:$0xff]  ;;  %v9326_v27 = vcombine.high %v503_v12, %v507_v14  ;;  %v9325_v58 = vcombine.low %v503_v12, %v507_v14  ;;  %v11395_v12 = vld [vmem:[%s15614_s1 + $0x5d0] sm:$0xff] }
  0xd5   :  { %3796 = vmatprep.subr.bf16.mxu0 %v9206_v18  ;;  %3616 = vmatprep.mubr.bf16.mxu0 %v10697_v36  ;;  %v371_v31 = vld [vmem:[%s15614_s1 + $0x8a8] sm:$0xff]  ;;  %v11400_v14 = vld [vmem:[%s15614_s1 + $0x5f0] sm:$0xff] }
  0xd6   :  { %3729 = vmatprep.mubr.bf16.mxu1 %v10702_v37  ;;  %3908 = vmatpush1.bf16.msra.mxu1 %v9341_v20  ;;  %v495_v36 = vld [vmem:[%s15614_s1 + $0xc88] sm:$0xff]  ;;  %v9190_v42 = vcombine.high %v367_v30, %v371_v31  ;;  %v9189_v59 = vcombine.low %v367_v30, %v371_v31  ;;  %v9104_v31 = vcombine.high %v11395_v12, %v11400_v14 }
  0xd7   :  { %3909 = vmatprep.subr.bf16.mxu1 %v9334_v9  ;;  %v499_v37 = vld [vmem:[%s15614_s1 + $0xca8] sm:$0xff] }
  0xd8   :  { %3797 = vmatpush1.bf16.msra.mxu0 %v9205_v32  ;;  %v359_v46 = vld [vmem:[%s15614_s1 + $0x848] sm:$0xff]  ;;  %v9318_v28 = vcombine.high %v495_v36, %v499_v37  ;;  %v9317_v11 = vcombine.low %v495_v36, %v499_v37 }
  0xd9   :  { %3798 = vmatprep.subr.bf16.mxu0 %v9198_v51  ;;  %v363_v49 = vld [vmem:[%s15614_s1 + $0x868] sm:$0xff] }
  0xda   :  { %3910 = vmatpush1.bf16.msra.mxu1 %v9333_v21  ;;  %v487_v10 = vld [vmem:[%s15614_s1 + $0xc48] sm:$0xff]  ;;  %v9182_v61 = vcombine.high %v359_v46, %v363_v49  ;;  %v9181_v17 = vcombine.low %v359_v46, %v363_v49 }
  0xdb   :  { %3617 = vmatmul.mubr.bf16.gmra.mxu0 %v10722_v45  ;;  %3911 = vmatprep.subr.bf16.mxu1 %v9326_v27  ;;  %v491_v34 = vld [vmem:[%s15614_s1 + $0xc68] sm:$0xff] }
  0xdc   :  { %3730 = vmatmul.mubr.bf16.gmra.mxu1 %v10734_v50  ;;  %3799 = vmatpush1.bf16.msra.mxu0 %v9197_v41  ;;  %v351_v45 = vld [vmem:[%s15614_s1 + $0x808] sm:$0xff]  ;;  %v9310_v4 = vcombine.high %v487_v10, %v491_v34  ;;  %v9309_v20 = vcombine.low %v487_v10, %v491_v34  ;;  %v544_v10 = vlaneseq }
  0xdd   :  { %3800 = vmatprep.subr.bf16.mxu0 %v9190_v42  ;;  %3626 = vmatprep.mubr.bf16.mxu0 %v10745_v56  ;;  %v355_v50 = vld [vmem:[%s15614_s1 + $0x828] sm:$0xff] }
  0xde   :  { %3739 = vmatprep.mubr.bf16.mxu1 %v10750_v57  ;;  %3912 = vmatpush1.bf16.msra.mxu1 %v9325_v58  ;;  %v479_v56 = vld [vmem:[%s15614_s1 + $0xc08] sm:$0xff]  ;;  %v9174_v18 = vcombine.high %v351_v45, %v355_v50  ;;  %v9173_v32 = vcombine.low %v351_v45, %v355_v50 }
  0xdf   :  { %3913 = vmatprep.subr.bf16.mxu1 %v9318_v28  ;;  %v483_v57 = vld [vmem:[%s15614_s1 + $0xc28] sm:$0xff] }
  0xe0   :  { %3801 = vmatpush1.bf16.msra.mxu0 %v9189_v59  ;;  %v471_v60 = vld [vmem:[%s15614_s1 + $0xbc8] sm:$0xff]  ;;  %v9302_v9 = vcombine.high %v479_v56, %v483_v57  ;;  %v9301_v30 = vcombine.low %v479_v56, %v483_v57 }
  0xe1   :  { %3802 = vmatprep.subr.bf16.mxu0 %v9182_v61  ;;  %v475_v0 = vld [vmem:[%s15614_s1 + $0xbe8] sm:$0xff] }
  0xe2   :  { %3914 = vmatpush1.bf16.msra.mxu1 %v9317_v11  ;;  %v467_v51 = vld [vmem:[%s15614_s1 + $0xba8] sm:$0xff]  ;;  %v9293_v21 = vcombine.low %v471_v60, %v475_v0 }
  0xe3   :  { %3627 = vmatmul.mubr.bf16.gmra.mxu0 %v10777_v5  ;;  %3915 = vmatprep.subr.bf16.mxu1 %v9310_v4  ;;  %v9294_v5 = vcombine.high %v471_v60, %v475_v0  ;;  %v459_v27 = vld [vmem:[%s15614_s1 + $0xb68] sm:$0xff] }
  0xe4   :  { %3740 = vmatmul.mubr.bf16.gmra.mxu1 %v10782_v6  ;;  %3803 = vmatpush1.bf16.msra.mxu0 %v9181_v17  ;;  %v463_v6 = vld [vmem:[%s15614_s1 + $0xb88] sm:$0xff]  ;;  %v542_v17 = vld [vmem:[%s15616_s2] sm:$0xff] }
  0xe5   :  { %3804 = vmatprep.subr.bf16.mxu0 %v9174_v18  ;;  %3636 = vmatprep.mubr.bf16.mxu0 %v10787_v7  ;;  %v9286_v7 = vcombine.high %v463_v6, %v467_v51  ;;  %v9285_v41 = vcombine.low %v463_v6, %v467_v51  ;;  %v447_v37 = vld [vmem:[%s15614_s1 + $0xb08] sm:$0xff]  ;;  %v276_v18 = vld [vmem:[%s15614_s1 + $0x5b0] sm:$0xff] }
  0xe6   :  { %3749 = vmatprep.mubr.bf16.mxu1 %v10798_v15  ;;  %3916 = vmatpush1.bf16.msra.mxu1 %v9309_v20  ;;  %v455_v15 = vld [vmem:[%s15614_s1 + $0xb48] sm:$0xff]  ;;  %v9103_v20 = vcombine.low %v11395_v12, %v11400_v14  ;;  %v136_v6 = vld [vmem:[%s15614_s1 + $0x150] sm:$0xff] }
  0xe7   :  { %3917 = vmatprep.subr.bf16.mxu1 %v9302_v9  ;;  %v9278_v36 = vcombine.high %v455_v15, %v459_v27  ;;  %v451_v42 = vld [vmem:[%s15614_s1 + $0xb28] sm:$0xff]  ;;  %v140_v51 = vld [vmem:[%s15614_s1 + $0x170] sm:$0xff] }
  0xe8   :  { %3805 = vmatpush1.bf16.msra.mxu0 %v9173_v32  ;;  %v439_v46 = vld [vmem:[%s15614_s1 + $0xac8] sm:$0xff]  ;;  %v264_v12 = vld [vmem:[%s15614_s1 + $0x550] sm:$0xff] }
  0xe9   :  { %3806 = vmatprep.subr.bf16.mxu0 %v9294_v5  ;;  %v431_v58 = vld [vmem:[%s15614_s1 + $0xa88] sm:$0xff]  ;;  %v268_v14 = vld [vmem:[%s15614_s1 + $0x570] sm:$0xff] }
  0xea   :  { %3918 = vmatpush1.bf16.msra.mxu1 %v9301_v30  ;;  %v435_v28 = vld [vmem:[%s15614_s1 + $0xaa8] sm:$0xff] }
  0xeb   :  { %3637 = vmatmul.mubr.bf16.gmra.mxu0 %v10829_v29  ;;  %4129 = vmatprep.subr.bf16.mxu1 %v9104_v31  ;;  %v9277_v29 = vcombine.low %v455_v15, %v459_v27  ;;  %v423_v59 = vld [vmem:[%s15614_s1 + $0xa48] sm:$0xff] }
  0xec   :  { %3750 = vmatmul.mubr.bf16.gmra.mxu1 %v10836_v33  ;;  %3807 = vmatpush2.bf16.msra.mxu0 %v9293_v21  ;;  %v9270_v33 = vcombine.high %v447_v37, %v451_v42  ;;  %v415_v61 = vld [vmem:[%s15614_s1 + $0xa08] sm:$0xff] }
  0xed   :  { %3808 = vmatprep.subr.bf16.mxu0 %v9286_v7  ;;  %3646 = vmatprep.mubr.bf16.mxu0 %v10841_v38  ;;  %v443_v38 = vld [vmem:[%s15614_s1 + $0xae8] sm:$0xff] }
  0xee   :  { %3759 = vmatprep.mubr.bf16.mxu1 %v10846_v39  ;;  %v9269_v39 = vcombine.low %v447_v37, %v451_v42  ;;  %v9262_v49 = vcombine.high %v439_v46, %v443_v38  ;;  %v419_v45 = vld [vmem:[%s15614_s1 + $0xa28] sm:$0xff]  ;;  %v9088_v42 = vcombine.high %v264_v12, %v268_v14 }
  0xef   :  { %v9238_v50 = vcombine.high %v415_v61, %v419_v45  ;;  %v9237_v11 = vcombine.low %v415_v61, %v419_v45  ;;  %v124_v61 = vld [vmem:[%s15614_s1 + $0xf0] sm:$0xff] }
  0xf0   :  { %3809 = vmatpush2.bf16.msra.mxu0 %v9285_v41 }
  0xf1   :  { %3810 = vmatprep.subr.bf16.mxu0 %v9278_v36 }
  0xf3   :  { %3647 = vmatmul.mubr.bf16.gmra.mxu0 %v10867_v47  ;;  %v9261_v47 = vcombine.low %v439_v46, %v443_v38  ;;  %v256_v46 = vld [vmem:[%s15614_s1 + $0x510] sm:$0xff] }
  0xf4   :  { %3760 = vmatmul.mubr.bf16.gmra.mxu1 %v10872_v48  ;;  %3811 = vmatpush2.bf16.msra.mxu0 %v9277_v29  ;;  %v9254_v48 = vcombine.high %v431_v58, %v435_v28  ;;  %v132_v29 = vld [vmem:[%s15614_s1 + $0x130] sm:$0xff] }
  0xf5   :  { %3812 = vmatprep.subr.bf16.mxu0 %v9270_v33  ;;  %3656 = vmatprep.mubr.bf16.mxu0 %v10877_v52  ;;  %v427_v52 = vld [vmem:[%s15614_s1 + $0xa68] sm:$0xff] }
  0xf6   :  { %3769 = vmatprep.mubr.bf16.mxu1 %v10882_v53  ;;  %v9253_v53 = vcombine.low %v431_v58, %v435_v28  ;;  %v9246_v34 = vcombine.high %v423_v59, %v427_v52  ;;  %v8959_v58 = vcombine.low %v136_v6, %v140_v51 }
  0xf8   :  { %3813 = vmatpush2.bf16.msra.mxu0 %v9269_v39 }
  0xf9   :  { %3814 = vmatprep.subr.bf16.mxu0 %v9262_v49 }
  0xfb   :  { %3657 = vmatmul.mubr.bf16.gmra.mxu0 %v10903_v62  ;;  %v9245_v62 = vcombine.low %v423_v59, %v427_v52 }
  0xfc   :  { %3770 = vmatmul.mubr.bf16.gmra.mxu1 %v10908_v63  ;;  %3815 = vmatpush2.bf16.msra.mxu0 %v9261_v47  ;;  %v11460_v63 = vshrl.u32 %v544_v10, 7  ;;  %v9087_v47 = vcombine.low %v264_v12, %v268_v14 }
  0xfd   :  { %3816 = vmatprep.subr.bf16.mxu0 %v9254_v48  ;;  %3666 = vmatprep.mubr.bf16.mxu0 %v10913_v2  ;;  %v152_v2 = vld [vmem:[%s15614_s1 + $0x1d0] sm:$0xff] }
  0xfe   :  { %3779 = vmatprep.mubr.bf16.mxu1 %v10918_v3  ;;  %15693 = vst [vmem:[#allocation7_spill] sm:$0xff] %v11460_v63  ;;  %v156_v3 = vld [vmem:[%s15614_s1 + $0x1f0] sm:$0xff]  ;;  %v11471_v4 = vsub.s32 0, %v11460_v63  ;;  %v11479_v57 = vsub.s32 1, %v11460_v63 }
  0xff   :  { %v8976_v56 = vcombine.high %v152_v2, %v156_v3  ;;  %v8975_v0 = vcombine.low %v152_v2, %v156_v3 }
 0x100   :  { %3817 = vmatpush2.bf16.msra.mxu0 %v9253_v53  ;;  %15694 = vst [vmem:[#allocation8_spill] sm:$0xff] %v11471_v4  ;;  %15695 = vst [vmem:[#allocation9_spill] sm:$0xff] %v11479_v57  ;;  %v11494_v60 = vrot.slane %v542_v17, %v11471_v4  ;;  %v11499_v32 = vrot.slane %v542_v17, %v11479_v57 }
 0x101   :  { %3818 = vmatprep.subr.bf16.mxu0 %v9246_v34  ;;  %v120_v34 = vld [vmem:[%s15614_s1 + $0xd0] sm:$0xff] }
 0x102   :  { %v8943_v12 = vcombine.low %v120_v34, %v124_v61 }
 0x103   :  { %3667 = vmatmul.mubr.bf16.gmra.mxu0 %v10939_v16  ;;  %v144_v16 = vld [vmem:[%s15614_s1 + $0x190] sm:$0xff] }
 0x104   :  { %3780 = vmatmul.mubr.bf16.gmra.mxu1 %v10944_v19  ;;  %3819 = vmatpush2.bf16.msra.mxu0 %v9245_v62  ;;  %v148_v19 = vld [vmem:[%s15614_s1 + $0x1b0] sm:$0xff] }
 0x105   :  { %3820 = vmatprep.subr.bf16.mxu0 %v9238_v50  ;;  %3822 = vmatprep.mubr.bf16.mxu0 %v10949_v22  ;;  %v272_v22 = vld [vmem:[%s15614_s1 + $0x590] sm:$0xff]  ;;  %v8968_v9 = vcombine.high %v144_v16, %v148_v19  ;;  %v8967_v7 = vcombine.low %v144_v16, %v148_v19  ;;  %v8944_v16 = vcombine.high %v120_v34, %v124_v61 }
 0x106   :  { %3935 = vmatprep.mubr.bf16.mxu1 %v15690_v25  ;;  %v9096_v5 = vcombine.high %v272_v22, %v276_v18  ;;  %v9095_v27 = vcombine.low %v272_v22, %v276_v18  ;;  %v248_v62 = vld [vmem:[%s15614_s1 + $0x4d0] sm:$0xff] }
 0x107   :  { %v252_v50 = vld [vmem:[%s15614_s1 + $0x4f0] sm:$0xff] }
 0x108   :  { %3821 = vmatpush2.bf16.msra.mxu0 %v9237_v11  ;;  %v224_v34 = vld [vmem:[%s15614_s1 + $0x410] sm:$0xff] }
 0x109   :  { %4016 = vmatprep.subr.bf16.mxu0 %v8976_v56  ;;  %v3146_v30 = vpop.f32.mrf.mxu0  ;;  %v3259_v21 = vpop.f32.mrf.mxu1 }
 0x10a   :  { %v3147_v31 = vadd.f32 %v3146_v30, %v11494_v60 }
 0x10b   :  { %3823 = vmatmul.mubr.bf16.vlgmr.msra.gmra.mxu0 %v10970_v40  ;;  %v3148_v15 = vpop.f32.mrf.mxu0  ;;  %v8960_v40 = vcombine.high %v136_v6, %v140_v51  ;;  %v3261_v37 = vpop.f32.mrf.mxu1 }
 0x10c   :  { %3936 = vmatmul.mubr.bf16.vlgmr.msra.gmra.mxu1 %v10981_v43  ;;  %4017 = vmatpush1.bf16.msra.mxu0 %v8975_v0  ;;  %v11516_v41 = vadd.f32 %v3259_v21, %v3147_v31  ;;  %v3149_v36 = vadd.f32 %v3148_v15, %v11499_v32  ;;  %v128_v43 = vld [vmem:[%s15614_s1 + $0x110] sm:$0xff]  ;;  %v9072_v0 = vcombine.high %v248_v62, %v252_v50 }
 0x10d   :  { %4130 = vmatpush1.bf16.msra.mxu1 %v9103_v20  ;;  %4018 = vmatprep.subr.bf16.mxu0 %v8968_v9  ;;  %v3150_v33 = vpop.f32.mrf.mxu0  ;;  %v3263_v49 = vpop.f32.mrf.mxu1  ;;  %v8952_v48 = vcombine.high %v128_v43, %v132_v29  ;;  %v8951_v17 = vcombine.low %v128_v43, %v132_v29  ;;  %v116_v20 = vld [vmem:[%s15614_s1 + $0xb0] sm:$0xff]  ;;  %v9071_v31 = vcombine.low %v248_v62, %v252_v50 }
 0x10e   :  { %4131 = vmatprep.subr.bf16.mxu1 %v9096_v5  ;;  %3832 = vmatprep.mubr.bf16.mxu0 %v10988_v54  ;;  %v260_v54 = vld [vmem:[%s15614_s1 + $0x530] sm:$0xff]  ;;  %v11533_v38 = vadd.f32 %v3261_v37, %v3149_v36  ;;  %v3151_v39 = vadd.f32 %v3150_v33, %v11494_v60 }
 0x10f   :  { %3945 = vmatprep.mubr.bf16.mxu1 %v15690_v25  ;;  %v3152_v28 = vpop.f32.mrf.mxu0  ;;  %v3265_v53 = vpop.f32.mrf.mxu1  ;;  %v9080_v10 = vcombine.high %v256_v46, %v260_v54  ;;  %v240_v5 = vld [vmem:[%s15614_s1 + $0x490] sm:$0xff] }
 0x110   :  { %4019 = vmatpush1.bf16.msra.mxu0 %v8967_v7  ;;  %v11536_v59 = vadd.f32 %v3263_v49, %v3151_v39  ;;  %v3153_v52 = vadd.f32 %v3152_v28, %v11499_v32  ;;  %v104_v36 = vld [vmem:[%s15614_s1 + $0x50] sm:$0xff] }
 0x111   :  { %4132 = vmatpush1.bf16.msra.mxu1 %v9095_v27  ;;  %4020 = vmatprep.subr.bf16.mxu0 %v8960_v40  ;;  %v3156_v45 = vpop.f32.mrf.mxu0  ;;  %v108_v37 = vld [vmem:[%s15614_s1 + $0x70] sm:$0xff] }
 0x112   :  { %4133 = vmatprep.subr.bf16.mxu1 %v9088_v42  ;;  %v11552_v2 = vadd.f32 %v3265_v53, %v3153_v52  ;;  %v3157_v3 = vadd.f32 %v3156_v45, %v11494_v60  ;;  %v232_v43 = vld [vmem:[%s15614_s1 + $0x450] sm:$0xff]  ;;  %v8927_v50 = vcombine.low %v104_v36, %v108_v37 }
 0x113   :  { %3833 = vmatmul.mubr.bf16.gmra.mxu0 %v11015_v8  ;;  %v3269_v11 = vpop.f32.mrf.mxu1  ;;  %v3158_v56 = vpop.f32.mrf.mxu0  ;;  %v9079_v8 = vcombine.low %v256_v46, %v260_v54  ;;  %v236_v29 = vld [vmem:[%s15614_s1 + $0x470] sm:$0xff] }
 0x114   :  { %3946 = vmatmul.mubr.bf16.gmra.mxu1 %v11026_v13  ;;  %4021 = vmatpush1.bf16.msra.mxu0 %v8959_v58  ;;  %v11556_v19 = vadd.f32 %v3269_v11, %v3157_v3  ;;  %v3159_v22 = vadd.f32 %v3158_v56, %v11499_v32  ;;  %v112_v13 = vld [vmem:[%s15614_s1 + $0x90] sm:$0xff]  ;;  %v8928_v58 = vcombine.high %v104_v36, %v108_v37 }
 0x115   :  { %4134 = vmatpush1.bf16.msra.mxu1 %v9087_v47  ;;  %4022 = vmatprep.subr.bf16.mxu0 %v8952_v48  ;;  %v3271_v18 = vpop.f32.mrf.mxu1  ;;  %v3160_v9 = vpop.f32.mrf.mxu0  ;;  %v8936_v21 = vcombine.high %v112_v13, %v116_v20  ;;  %v8935_v39 = vcombine.low %v112_v13, %v116_v20  ;;  %v9056_v52 = vcombine.high %v232_v43, %v236_v29  ;;  %v100_v53 = vld [vmem:[%s15614_s1 + $0x30] sm:$0xff] }
 0x116   :  { %4135 = vmatprep.subr.bf16.mxu1 %v9080_v10  ;;  %3842 = vmatprep.mubr.bf16.mxu0 %v11031_v26  ;;  %v244_v26 = vld [vmem:[%s15614_s1 + $0x4b0] sm:$0xff]  ;;  %v11573_v6 = vadd.f32 %v3271_v18, %v3159_v22  ;;  %v3161_v51 = vadd.f32 %v3160_v9, %v11494_v60  ;;  %v9055_v11 = vcombine.low %v232_v43, %v236_v29 }
 0x117   :  { %3955 = vmatprep.mubr.bf16.mxu1 %v15690_v25  ;;  %v3273_v30 = vpop.f32.mrf.mxu1  ;;  %v3162_v14 = vpop.f32.mrf.mxu0  ;;  %v9064_v40 = vcombine.high %v240_v5, %v244_v26  ;;  %v216_v18 = vld [vmem:[%s15614_s1 + $0x3d0] sm:$0xff] }
 0x118   :  { %4023 = vmatpush1.bf16.msra.mxu0 %v8951_v17  ;;  %v11576_v7 = vadd.f32 %v3273_v30, %v3161_v51  ;;  %v3163_v15 = vadd.f32 %v3162_v14, %v11499_v32  ;;  %v344_v20 = vld [vmem:[%s15614_s1 + $0x7d0] sm:$0xff] }
 0x119   :  { %4136 = vmatpush1.bf16.msra.mxu1 %v9079_v8  ;;  %4024 = vmatprep.subr.bf16.mxu0 %v8944_v16  ;;  %v3275_v27 = vpop.f32.mrf.mxu1  ;;  %v348_v9 = vld [vmem:[%s15614_s1 + $0x7f0] sm:$0xff] }
 0x11a   :  { %4137 = vmatprep.subr.bf16.mxu1 %v9072_v0  ;;  %v3166_v42 = vpop.f32.mrf.mxu0  ;;  %v11592_v33 = vadd.f32 %v3275_v27, %v3163_v15  ;;  %v220_v0 = vld [vmem:[%s15614_s1 + $0x3f0] sm:$0xff]  ;;  %v9168_v27 = vcombine.high %v344_v20, %v348_v9 }
 0x11b   :  { %3843 = vmatmul.mubr.bf16.gmra.mxu0 %v11058_v55  ;;  %v3167_v46 = vadd.f32 %v3166_v42, %v11494_v60  ;;  %v3279_v54 = vpop.f32.mrf.mxu1  ;;  %v9063_v55 = vcombine.low %v240_v5, %v244_v26  ;;  %v9040_v14 = vcombine.high %v216_v18, %v220_v0  ;;  %v336_v37 = vld [vmem:[%s15614_s1 + $0x790] sm:$0xff] }
 0x11c   :  { %3956 = vmatmul.mubr.bf16.gmra.mxu1 %v11069_v24  ;;  %4025 = vmatpush1.bf16.msra.mxu0 %v8943_v12  ;;  %v3168_v49 = vpop.f32.mrf.mxu0  ;;  %v96_v24 = vld [vmem:[%s15614_s1 + $0x10] sm:$0xff] }
 0x11d   :  { %4138 = vmatpush1.bf16.msra.mxu1 %v9071_v31  ;;  %4026 = vmatprep.subr.bf16.mxu0 %v8936_v21  ;;  %v11596_v28 = vadd.f32 %v3279_v54, %v3167_v46  ;;  %v3169_v47 = vadd.f32 %v3168_v49, %v11499_v32  ;;  %v3281_v48 = vpop.f32.mrf.mxu1  ;;  %v8920_v17 = vcombine.high %v96_v24, %v100_v53 }
 0x11e   :  { %4139 = vmatprep.subr.bf16.mxu1 %v9064_v40  ;;  %3852 = vmatprep.mubr.bf16.mxu0 %v11074_v1  ;;  %v3170_v10 = vpop.f32.mrf.mxu0  ;;  %v228_v1 = vld [vmem:[%s15614_s1 + $0x430] sm:$0xff]  ;;  %v8919_v30 = vcombine.low %v96_v24, %v100_v53  ;;  %v9039_v46 = vcombine.low %v216_v18, %v220_v0 }
 0x11f   :  { %3965 = vmatprep.mubr.bf16.mxu1 %v15690_v25  ;;  %v11613_v61 = vadd.f32 %v3281_v48, %v3169_v47  ;;  %v3171_v45 = vadd.f32 %v3170_v10, %v11494_v60  ;;  %v3283_v62 = vpop.f32.mrf.mxu1  ;;  %v9048_v22 = vcombine.high %v224_v34, %v228_v1  ;;  %v212_v40 = vld [vmem:[%s15614_s1 + $0x3b0] sm:$0xff]  ;;  %v15696_v10 = vld [vmem:[#allocation2_spill] sm:$0xff] }
 0x120   :  { %4027 = vmatpush1.bf16.msra.mxu0 %v8935_v39  ;;  %v3172_v3 = vpop.f32.mrf.mxu0  ;;  %v9167_v39 = vcombine.low %v344_v20, %v348_v9  ;;  %v204_v24 = vld [vmem:[%s15614_s1 + $0x370] sm:$0xff] }
 0x121   :  { %4140 = vmatpush1.bf16.msra.mxu1 %v9063_v55  ;;  %4028 = vmatprep.subr.bf16.mxu0 %v8928_v58  ;;  %v11616_v56 = vadd.f32 %v3283_v62, %v3171_v45  ;;  %v3173_v8 = vadd.f32 %v3172_v3, %v11499_v32  ;;  %v3285_v16 = vpop.f32.mrf.mxu1  ;;  %v15697_v3 = vld [vmem:[#allocation3_spill] sm:$0xff]  ;;  %v192_v9 = vld [vmem:[%s15614_s1 + $0x310] sm:$0xff] }
 0x122   :  { %4141 = vmatprep.subr.bf16.mxu1 %v9056_v52  ;;  %v3176_v13 = vpop.f32.mrf.mxu0  ;;  %v200_v52 = vld [vmem:[%s15614_s1 + $0x350] sm:$0xff] }
 0x123   :  { %3853 = vmatmul.mubr.bf16.gmra.mxu0 %v11101_v35  ;;  %v11632_v5 = vadd.f32 %v3285_v16, %v3173_v8  ;;  %v3177_v26 = vadd.f32 %v3176_v13, %v11494_v60  ;;  %v3289_v51 = vpop.f32.mrf.mxu1  ;;  %v9047_v35 = vcombine.low %v224_v34, %v228_v1  ;;  %v328_v34 = vld [vmem:[%s15614_s1 + $0x750] sm:$0xff]  ;;  %v9024_v16 = vcombine.high %v200_v52, %v204_v24 }
 0x124   :  { %3966 = vmatmul.mubr.bf16.gmra.mxu1 %v11112_v44  ;;  %4029 = vmatpush1.bf16.msra.mxu0 %v8927_v50  ;;  %v3178_v12 = vpop.f32.mrf.mxu0  ;;  %v208_v44 = vld [vmem:[%s15614_s1 + $0x390] sm:$0xff] }
 0x125   :  { %4142 = vmatpush1.bf16.msra.mxu1 %v9055_v11  ;;  %4030 = vmatprep.subr.bf16.mxu0 %v8920_v17  ;;  %v11636_v31 = vadd.f32 %v3289_v51, %v3177_v26  ;;  %v3179_v21 = vadd.f32 %v3178_v12, %v11499_v32  ;;  %v3291_v15 = vpop.f32.mrf.mxu1  ;;  %v9032_v49 = vcombine.high %v208_v44, %v212_v40  ;;  %v332_v1 = vld [vmem:[%s15614_s1 + $0x770] sm:$0xff] }
 0x126   :  { %4143 = vmatprep.subr.bf16.mxu1 %v9048_v22  ;;  %3862 = vmatprep.mubr.bf16.mxu0 %v11117_v23  ;;  %v3180_v36 = vpop.f32.mrf.mxu0  ;;  %v340_v23 = vld [vmem:[%s15614_s1 + $0x7b0] sm:$0xff]  ;;  %v9031_v11 = vcombine.low %v208_v44, %v212_v40  ;;  %v9152_v20 = vcombine.high %v328_v34, %v332_v1  ;;  %v9151_v44 = vcombine.low %v328_v34, %v332_v1 }
 0x127   :  { %3975 = vmatprep.mubr.bf16.mxu1 %v15690_v25  ;;  %v11653_v42 = vadd.f32 %v3291_v15, %v3179_v21  ;;  %v3181_v43 = vadd.f32 %v3180_v36, %v11494_v60  ;;  %v3293_v29 = vpop.f32.mrf.mxu1  ;;  %v9160_v48 = vcombine.high %v336_v37, %v340_v23  ;;  %v9159_v8 = vcombine.low %v336_v37, %v340_v23  ;;  %v15698_v13 = vld [vmem:[#allocation4_spill] sm:$0xff] }
 0x128   :  { %4031 = vmatpush1.bf16.msra.mxu0 %v8919_v30  ;;  %v3182_v54 = vpop.f32.mrf.mxu0  ;;  %v196_v26 = vld [vmem:[%s15614_s1 + $0x330] sm:$0xff]  ;;  %v9023_v15 = vcombine.low %v200_v52, %v204_v24  ;;  %v15700_v24 = vld [vmem:[#allocation6_spill] sm:$0xff] }
 0x129   :  { %4144 = vmatpush1.bf16.msra.mxu1 %v9047_v35  ;;  %4032 = vmatprep.subr.bf16.mxu0 %v9040_v14  ;;  %v11656_v55 = vadd.f32 %v3293_v29, %v3181_v43  ;;  %v3183_v58 = vadd.f32 %v3182_v54, %v11499_v32  ;;  %v3295_v47 = vpop.f32.mrf.mxu1  ;;  %v320_v30 = vld [vmem:[%s15614_s1 + $0x710] sm:$0xff]  ;;  %v9016_v40 = vcombine.high %v192_v9, %v196_v26 }
 0x12a   :  { %4145 = vmatprep.subr.bf16.mxu1 %v9168_v27  ;;  %v324_v12 = vld [vmem:[%s15614_s1 + $0x730] sm:$0xff] }
 0x12b   :  { %v3186_v53 = vpop.f32.mrf.mxu0  ;;  %3863 = vmatmul.mubr.bf16.gmra.mxu0 %v15696_v10  ;;  %v11672_v45 = vadd.f32 %v3295_v47, %v3183_v58  ;;  %v9144_v43 = vcombine.high %v320_v30, %v324_v12  ;;  %v184_v29 = vld [vmem:[%s15614_s1 + $0x2d0] sm:$0xff]  ;;  %v9143_v34 = vcombine.low %v320_v30, %v324_v12 }
 0x12c   :  { %v3187_v62 = vadd.f32 %v3186_v53, %v11494_v60  ;;  %v3299_v50 = vpop.f32.mrf.mxu1  ;;  %3976 = vmatmul.mubr.bf16.gmra.mxu1 %v15697_v3  ;;  %4033 = vmatpush2.bf16.msra.mxu0 %v9039_v46  ;;  %v188_v46 = vld [vmem:[%s15614_s1 + $0x2f0] sm:$0xff]  ;;  %v9015_v53 = vcombine.low %v192_v9, %v196_v26 }
 0x12d   :  { %4146 = vmatpush2.bf16.msra.mxu1 %v9167_v39  ;;  %v3188_v17 = vpop.f32.mrf.mxu0  ;;  %4034 = vmatprep.subr.bf16.mxu0 %v9032_v49  ;;  %v15699_v39 = vld [vmem:[#allocation5_spill] sm:$0xff]  ;;  %v312_v49 = vld [vmem:[%s15614_s1 + $0x6d0] sm:$0xff]  ;;  %v9008_v1 = vcombine.high %v184_v29, %v188_v46 }
 0x12e   :  { %v11676_v22 = vadd.f32 %v3299_v50, %v3187_v62  ;;  %v3189_v18 = vadd.f32 %v3188_v17, %v11499_v32  ;;  %v3301_v0 = vpop.f32.mrf.mxu1  ;;  %4147 = vmatprep.subr.bf16.mxu1 %v9160_v48  ;;  %3872 = vmatprep.mubr.bf16.mxu0 %v15698_v13  ;;  %v316_v58 = vld [vmem:[%s15614_s1 + $0x6f0] sm:$0xff] }
 0x12f   :  { %v3190_v51 = vpop.f32.mrf.mxu0  ;;  %3985 = vmatprep.mubr.bf16.mxu1 %v15690_v25  ;;  %v9136_v17 = vcombine.high %v312_v49, %v316_v58  ;;  %v308_v13 = vld [vmem:[%s15614_s1 + $0x6b0] sm:$0xff]  ;;  %v9135_v12 = vcombine.low %v312_v49, %v316_v58  ;;  %v10248_v58 = vld [vmem:[%s15615_s0 + $0x168] ss:$28 sps:$4 sm:$0xff]  }
 0x130   :  { %v11693_v35 = vadd.f32 %v3301_v0, %v3189_v18  ;;  %v3191_v14 = vadd.f32 %v3190_v51, %v11494_v60  ;;  %v3303_v21 = vpop.f32.mrf.mxu1  ;;  %4035 = vmatpush2.bf16.msra.mxu0 %v9031_v11  ;;  %v10246_v11 = vld [vmem:[%s15615_s0 + $0x164] ss:$28 sps:$4 sm:$0xff]   ;;  %v304_v0 = vld [vmem:[%s15614_s1 + $0x690] sm:$0xff]  ;;  %v9007_v51 = vcombine.low %v184_v29, %v188_v46 }
 0x131   :  { %4148 = vmatpush2.bf16.msra.mxu1 %v9159_v8  ;;  %v3192_v27 = vpop.f32.mrf.mxu0  ;;  %4036 = vmatprep.subr.bf16.mxu0 %v9024_v16  ;;  %v176_v8 = vld [vmem:[%s15614_s1 + $0x290] sm:$0xff] }
 0x132   :  { %v11696_v36 = vadd.f32 %v3303_v21, %v3191_v14  ;;  %v3193_v37 = vadd.f32 %v3192_v27, %v11499_v32  ;;  %v3305_v23 = vpop.f32.mrf.mxu1  ;;  %4149 = vmatprep.subr.bf16.mxu1 %v9152_v20  ;;  %v180_v16 = vld [vmem:[%s15614_s1 + $0x2b0] sm:$0xff] }
 0x133   :  { %v3196_v54 = vpop.f32.mrf.mxu0  ;;  %3873 = vmatmul.mubr.bf16.gmra.mxu0 %v15699_v39  ;;  %v9000_v14 = vcombine.high %v176_v8, %v180_v16  ;;  %v296_v29 = vld [vmem:[%s15614_s1 + $0x650] sm:$0xff] }
 0x134   :  { %v11712_v47 = vadd.f32 %v3305_v23, %v3193_v37  ;;  %v3197_v48 = vadd.f32 %v3196_v54, %v11494_v60  ;;  %v3309_v52 = vpop.f32.mrf.mxu1  ;;  %3986 = vmatmul.mubr.bf16.gmra.mxu1 %v15700_v24  ;;  %4037 = vmatpush2.bf16.msra.mxu0 %v9023_v15  ;;  %v172_v37 = vld [vmem:[%s15614_s1 + $0x270] sm:$0xff]  ;;  %v9127_v24 = vcombine.low %v304_v0, %v308_v13 }
 0x135   :  { %4150 = vmatpush2.bf16.msra.mxu1 %v9151_v44  ;;  %v3198_v10 = vpop.f32.mrf.mxu0  ;;  %4038 = vmatprep.subr.bf16.mxu0 %v9016_v40  ;;  %v9128_v44 = vcombine.high %v304_v0, %v308_v13  ;;  %v168_v40 = vld [vmem:[%s15614_s1 + $0x250] sm:$0xff] }
 0x136   :  { %v11716_v62 = vadd.f32 %v3309_v52, %v3197_v48  ;;  %v3199_v50 = vadd.f32 %v3198_v10, %v11499_v32  ;;  %v3311_v3 = vpop.f32.mrf.mxu1  ;;  %4151 = vmatprep.subr.bf16.mxu1 %v9144_v43  ;;  %3882 = vmatprep.mubr.bf16.mxu0 %v10246_v11  ;;  %v10247_v43 = vld [vmem:[%s15615_s0 + $0x160] ss:$28 sps:$4 sm:$0xff]   ;;  %v300_v46 = vld [vmem:[%s15614_s1 + $0x670] sm:$0xff]  ;;  %v8999_v48 = vcombine.low %v176_v8, %v180_v16 }
 0x137   :  { %v3200_v18 = vpop.f32.mrf.mxu0  ;;  %3995 = vmatprep.mubr.bf16.mxu1 %v15690_v25  ;;  %v160_v11 = vld [vmem:[%s15614_s1 + $0x210] sm:$0xff] }
 0x138   :  { %v11735_v20 = vadd.f32 %v3311_v3, %v3199_v50  ;;  %v3201_v9 = vadd.f32 %v3200_v18, %v11494_v60  ;;  %v3313_v26 = vpop.f32.mrf.mxu1  ;;  %4039 = vmatpush2.bf16.msra.mxu0 %v9015_v53  ;;  %v8992_v53 = vcombine.high %v168_v40, %v172_v37  ;;  %v10249_v50 = vld [vmem:[%s15615_s0 + $0x19c] ss:$28 sps:$4 sm:$0xff]   ;;  %v9120_v3 = vcombine.high %v296_v29, %v300_v46  ;;  %v288_v16 = vld [vmem:[%s15614_s1 + $0x610] sm:$0xff] }
 0x139   :  { %4152 = vmatpush2.bf16.msra.mxu1 %v9143_v34  ;;  %v3202_v30 = vpop.f32.mrf.mxu0  ;;  %4040 = vmatprep.subr.bf16.mxu0 %v9008_v1  ;;  %v292_v18 = vld [vmem:[%s15614_s1 + $0x630] sm:$0xff] }
 0x13a   :  { %v11738_v21 = vadd.f32 %v3313_v26, %v3201_v9  ;;  %v3203_v15 = vadd.f32 %v3202_v30, %v11499_v32  ;;  %v3315_v27 = vpop.f32.mrf.mxu1  ;;  %4153 = vmatprep.subr.bf16.mxu1 %v9136_v17  ;;  %v164_v17 = vld [vmem:[%s15614_s1 + $0x230] sm:$0xff]  ;;  %v8991_v26 = vcombine.low %v168_v40, %v172_v37  ;;  %v9119_v30 = vcombine.low %v296_v29, %v300_v46 }
 0x13b   :  { %v3206_v23 = vpop.f32.mrf.mxu0  ;;  %3883 = vmatmul.mubr.bf16.gmra.mxu0 %v10247_v43  ;;  %v412_v40 = vld [vmem:[%s15614_s1 + $0x9f0] sm:$0xff] }
 0x13c   :  { %v11756_v54 = vadd.f32 %v3315_v27, %v3203_v15  ;;  %v3207_v39 = vadd.f32 %v3206_v23, %v11494_v60  ;;  %v3319_v49 = vpop.f32.mrf.mxu1  ;;  %3996 = vmatmul.mubr.bf16.gmra.mxu1 %v10248_v58  ;;  %4041 = vmatpush2.bf16.msra.mxu0 %v9007_v51  ;;  %v408_v23 = vld [vmem:[%s15614_s1 + $0x9d0] sm:$0xff] }
 0x13d   :  { %4154 = vmatpush2.bf16.msra.mxu1 %v9135_v12  ;;  %v3208_v52 = vpop.f32.mrf.mxu0  ;;  %4042 = vmatprep.subr.bf16.mxu0 %v9000_v14  ;;  %v8984_v12 = vcombine.high %v160_v11, %v164_v17  ;;  %v10250_v43 = vld [vmem:[%s15615_s0 + $0x198] ss:$28 sps:$4 sm:$0xff]  }
 0x13e   :  { %v11762_v10 = vadd.f32 %v3319_v49, %v3207_v39  ;;  %v3209_v34 = vadd.f32 %v3208_v52, %v11499_v32  ;;  %v3321_v1 = vpop.f32.mrf.mxu1  ;;  %4155 = vmatprep.subr.bf16.mxu1 %v9128_v44  ;;  %3892 = vmatprep.mubr.bf16.mxu0 %v10249_v50  ;;  %v9112_v44 = vcombine.high %v288_v16, %v292_v18  ;;  %v536_v29 = vld [vmem:[%s15614_s1 + $0xdd0] sm:$0xff] }
 0x13f   :  { %v3210_v8 = vpop.f32.mrf.mxu0  ;;  %4005 = vmatprep.mubr.bf16.mxu1 %v15690_v25  ;;  %v540_v46 = vld [vmem:[%s15614_s1 + $0xdf0] sm:$0xff]  ;;  %v8983_v52 = vcombine.low %v160_v11, %v164_v17 }
 0x140   :  { %v11781_v0 = vadd.f32 %v3321_v1, %v3209_v34  ;;  %v3211_v13 = vadd.f32 %v3210_v8, %v11494_v60  ;;  %v3323_v9 = vpop.f32.mrf.mxu1  ;;  %4043 = vmatpush2.bf16.msra.mxu0 %v8999_v48  ;;  %v10251_v48 = vld [vmem:[%s15615_s0 + $0x1a0] ss:$28 sps:$4 sm:$0xff]   ;;  %v9232_v34 = vcombine.high %v408_v23, %v412_v40  ;;  %v400_v11 = vld [vmem:[%s15614_s1 + $0x990] sm:$0xff] }
 0x141   :  { %4156 = vmatpush2.bf16.msra.mxu1 %v9127_v24  ;;  %v3212_v51 = vpop.f32.mrf.mxu0  ;;  %4044 = vmatprep.subr.bf16.mxu0 %v8992_v53  ;;  %v9111_v53 = vcombine.low %v288_v16, %v292_v18  ;;  %v10252_v8 = vld [vmem:[%s15615_s0 + $0x4] ss:$28 sps:$4 sm:$0xff]   ;;  %v404_v17 = vld [vmem:[%s15614_s1 + $0x9b0] sm:$0xff]  ;;  %v10253_v18 = vld [vmem:[%s15615_s0 + $0xc] ss:$28 sps:$4 sm:$0xff]  }
 0x142   :  { %v11784_v14 = vadd.f32 %v3323_v9, %v3211_v13  ;;  %v3213_v15 = vadd.f32 %v3212_v51, %v11499_v32  ;;  %v3325_v27 = vpop.f32.mrf.mxu1  ;;  %4157 = vmatprep.subr.bf16.mxu1 %v9120_v3  ;;  %v9360_v13 = vcombine.high %v536_v29, %v540_v46 }
 0x143   :  { %v3216_v37 = vpop.f32.mrf.mxu0  ;;  %3893 = vmatmul.mubr.bf16.gmra.mxu0 %v10250_v43 }
 0x144   :  { %v11802_v39 = vadd.f32 %v3325_v27, %v3213_v15  ;;  %v3217_v49 = vadd.f32 %v3216_v37, %v11494_v60  ;;  %v3329_v58 = vpop.f32.mrf.mxu1  ;;  %4006 = vmatmul.mubr.bf16.gmra.mxu1 %v10251_v48  ;;  %4045 = vmatpush2.bf16.msra.mxu0 %v8991_v26  ;;  %v532_v15 = vld [vmem:[%s15614_s1 + $0xdb0] sm:$0xff]  ;;  %v9224_v37 = vcombine.high %v400_v11, %v404_v17 }
 0x145   :  { %4158 = vmatpush2.bf16.msra.mxu1 %v9119_v30  ;;  %v3218_v24 = vpop.f32.mrf.mxu0  ;;  %4046 = vmatprep.subr.bf16.mxu0 %v8984_v12  ;;  %v9231_v30 = vcombine.low %v408_v23, %v412_v40  ;;  %v528_v12 = vld [vmem:[%s15614_s1 + $0xd90] sm:$0xff] }
 0x146   :  { %v11808_v1 = vadd.f32 %v3329_v58, %v3217_v49  ;;  %v3219_v50 = vadd.f32 %v3218_v24, %v11499_v32  ;;  %v3331_v3 = vpop.f32.mrf.mxu1  ;;  %4159 = vmatprep.subr.bf16.mxu1 %v9112_v44  ;;  %4048 = vmatprep.mubr.bf16.mxu0 %v10252_v8  ;;  %v9359_v44 = vcombine.low %v536_v29, %v540_v46  ;;  %v11838_v23 = vld [vmem:[%s15614_s1 + $0x950] sm:$0xff]  ;;  %v10254_v29 = vld [vmem:[%s15615_s0] ss:$28 sps:$4 sm:$0xff]  }
 0x147   :  { %v3220_v16 = vpop.f32.mrf.mxu0  ;;  %4161 = vmatprep.mubr.bf16.mxu1 %v10253_v18  ;;  %v11843_v40 = vld [vmem:[%s15614_s1 + $0x970] sm:$0xff]  ;;  %v9352_v46 = vcombine.high %v528_v12, %v532_v15 }
 0x148   :  { %v11823_v9 = vadd.f32 %v3331_v3, %v3219_v50  ;;  %v3221_v26 = vadd.f32 %v3220_v16, %v11494_v60  ;;  %v3333_v51 = vpop.f32.mrf.mxu1  ;;  %4047 = vmatpush2.bf16.msra.mxu0 %v8983_v52  ;;  %v11856_v48 = vld [vmem:[%s15614_s1 + $0xd70] sm:$0xff]  ;;  %v9223_v50 = vcombine.low %v400_v11, %v404_v17  ;;  %v9216_v8 = vcombine.high %v11838_v23, %v11843_v40  ;;  %v10257_v11 = vld [vmem:[%s15615_s0 + $0x44] ss:$28 sps:$4 sm:$0xff]  }
 0x149   :  { %4160 = vmatpush2.bf16.msra.mxu1 %v9111_v53  ;;  %v3222_v27 = vpop.f32.mrf.mxu0  ;;  %4242 = vmatprep.subr.bf16.mxu0 %v9232_v34  ;;  %v10255_v34 = vld [vmem:[%s15615_s0 + $0x8] ss:$28 sps:$4 sm:$0xff]   ;;  %v11876_v17 = vld [vmem:[%s15614_s1 + $0x910] sm:$0xff] }
 0x14a   :  { %v11832_v43 = vadd.f32 %v3333_v51, %v3221_v26  ;;  %v3223_v60 = vadd.f32 %v3222_v27, %v11499_v32  ;;  %v3335_v49 = vpop.f32.mrf.mxu1  ;;  %4355 = vmatprep.subr.bf16.mxu1 %v9360_v13  ;;  %v11851_v32 = vld [vmem:[%s15614_s1 + $0xd50] sm:$0xff]  ;;  %v9351_v13 = vcombine.low %v528_v12, %v532_v15 }
 0x14b   :  { %v3372_v58 = vpop.f32.mrf.mxu0  ;;  %4049 = vmatmul.mubr.bf16.vlgmr.msra.gmra.mxu0 %v10254_v29  ;;  %v9344_v51 = vcombine.high %v11851_v32, %v11856_v48  ;;  %v11888_v12 = vld [vmem:[%s15614_s1 + $0x8d0] sm:$0xff] }
 0x14c   :  { %v11858_v52 = vadd.f32 %v3335_v49, %v3223_v60  ;;  %v3373_v24 = vadd.f32 %v3372_v58, %v11516_v41  ;;  %v3485_v53 = vpop.f32.mrf.mxu1  ;;  %4162 = vmatmul.mubr.bf16.vlgmr.msra.gmra.mxu1 %v10255_v34  ;;  %4243 = vmatpush1.bf16.msra.mxu0 %v9231_v30  ;;  %v10256_v41 = vld [vmem:[%s15615_s0 + $0x3c] ss:$28 sps:$4 sm:$0xff]   ;;  %v11898_v60 = vld [vmem:[%s15614_s1 + $0x8f0] sm:$0xff] }
 0x14d   :  { %v3374_v3 = vpop.f32.mrf.mxu0  ;;  %4356 = vmatpush1.bf16.msra.mxu1 %v9359_v44  ;;  %4244 = vmatprep.subr.bf16.mxu0 %v9224_v37  ;;  %v9215_v37 = vcombine.low %v11838_v23, %v11843_v40  ;;  %v11903_v49 = vld [vmem:[%s15614_s1 + $0xd10] sm:$0xff] }
 0x14e   :  { %v3486_v16 = vadd.f32 %v3485_v53, %v3373_v24  ;;  %v3375_v18 = vadd.f32 %v3374_v3, %v11533_v38  ;;  %v3487_v26 = vpop.f32.mrf.mxu1  ;;  %4058 = vmatprep.mubr.bf16.mxu0 %v10256_v41  ;;  %4171 = vmatprep.mubr.bf16.mxu1 %v10257_v11  ;;  %v11881_v38 = vld [vmem:[%s15614_s1 + $0x930] sm:$0xff]  ;;  %v10259_v11 = vld [vmem:[%s15615_s0 + $0x40] ss:$28 sps:$4 sm:$0xff]  }
 0x14f   :  { %v3376_v30 = vpop.f32.mrf.mxu0  ;;  %4357 = vmatprep.subr.bf16.mxu1 %v9352_v46  ;;  %v11908_v58 = vld [vmem:[%s15614_s1 + $0xd30] sm:$0xff]  ;;  %v9208_v23 = vcombine.high %v11876_v17, %v11881_v38  ;;  %v9207_v34 = vcombine.low %v11876_v17, %v11881_v38 }
 0x150   :  { %v11890_v15 = vadd.f32 %v3487_v26, %v3375_v18  ;;  %v3377_v27 = vadd.f32 %v3376_v30, %v11536_v59  ;;  %v3489_v44 = vpop.f32.mrf.mxu1  ;;  %4245 = vmatpush1.bf16.msra.mxu0 %v9223_v50  ;;  %v5048_v59 = vmul.f32 0.2, %v3486_v16  ;;  %v11915_v40 = vld [vmem:[%s15614_s1 + $0x890] sm:$0xff]  ;;  %vm4920_vm0 = vcmp.gt.f32.partialorder %v3486_v16, 0.0 }
 0x151   :  { %v3378_v29 = vpop.f32.mrf.mxu0  ;;  %4246 = vmatprep.subr.bf16.mxu0 %v9216_v8  ;;  %4358 = vmatpush1.bf16.msra.mxu1 %v9351_v13  ;;  %v11920_v46 = vld [vmem:[%s15614_s1 + $0x8b0] sm:$0xff]  ;;  %v9343_v50 = vcombine.low %v11851_v32, %v11856_v48  ;;  %v9199_v18 = vcombine.low %v11888_v12, %v11898_v60  ;;  %v9200_v26 = vcombine.high %v11888_v12, %v11898_v60  ;;  %v10264_v12 = vld [vmem:[%s15615_s0 + $0xac] ss:$28 sps:$4 sm:$0xff]  }
 0x152   :  { %v3490_v24 = vadd.f32 %v3489_v44, %v3377_v27  ;;  %v3491_v53 = vpop.f32.mrf.mxu1  ;;  %4359 = vmatprep.subr.bf16.mxu1 %v9344_v51  ;;  %v3379_v3 = vadd.f32 %v3378_v29, %v11552_v2  ;;  %v10258_v13 = vld [vmem:[%s15615_s0 + $0x38] ss:$28 sps:$4 sm:$0xff]   ;;  %v9336_v41 = vcombine.high %v11903_v49, %v11908_v58  ;;  %v9192_v17 = vcombine.high %v11915_v40, %v11920_v46 }
 0x153   :  { %v3382_v8 = vpop.f32.mrf.mxu0  ;;  %4059 = vmatmul.mubr.bf16.gmra.mxu0 %v10258_v13  ;;  %v11945_v38 = vld [vmem:[%s15614_s1 + $0xcd0] sm:$0xff]  ;;  %vm4921_vm3 = vcmp.gt.f32.partialorder %v11890_v15, 0.0 }
 0x154   :  { %vm4928_vm1 = vcmp.gt.f32.partialorder %v3490_v24, 0.0  ;;  %v5056_v32 = vmul.f32 0.2, %v3490_v24  ;;  %v3383_v48 = vadd.f32 %v3382_v8, %v11556_v19  ;;  %v3495_v2 = vpop.f32.mrf.mxu1  ;;  %4172 = vmatmul.mubr.bf16.gmra.mxu1 %v10259_v11  ;;  %4247 = vmatpush1.bf16.msra.mxu0 %v9215_v37  ;;  %v11950_v51 = vld [vmem:[%s15614_s1 + $0xcf0] sm:$0xff]  ;;  %v5176_v19 = vsel %vm4920_vm0, %v3486_v16, %v5048_v59  ;;  %v10261_v16 = vld [vmem:[%s15615_s0 + $0x7c] ss:$28 sps:$4 sm:$0xff]  }
 0x155   :  { %v3492_v30 = vadd.f32 %v3491_v53, %v3379_v3  ;;  %v3384_v27 = vpop.f32.mrf.mxu0  ;;  %4248 = vmatprep.subr.bf16.mxu0 %v9208_v23  ;;  %v10260_v44 = vld [vmem:[%s15615_s0 + $0x74] ss:$28 sps:$4 sm:$0xff]   ;;  %v9335_v37 = vcombine.low %v11903_v49, %v11908_v58  ;;  %4181 = vmatprep.mubr.bf16.mxu1 %v10261_v16  ;;  %v5049_v53 = vmul.f32 0.2, %v11890_v15 }
 0x156   :  { %4068 = vmatprep.mubr.bf16.mxu0 %v10260_v44  ;;  %v5184_v29 = vsel %vm4928_vm1, %v3490_v24, %v5056_v32  ;;  %v3496_v8 = vadd.f32 %v3495_v2, %v3383_v48  ;;  %v3385_v13 = vadd.f32 %v3384_v27, %v11573_v6  ;;  %v3497_v11 = vpop.f32.mrf.mxu1  ;;  %4360 = vmatpush1.bf16.msra.mxu1 %v9343_v50  ;;  %v11966_v59 = vld [vmem:[%s15614_s1 + $0x850] sm:$0xff] }
 0x157   :  { %v11971_v49 = vld [vmem:[%s15614_s1 + $0x870] sm:$0xff]  ;;  %v11973_v58 = vpack.c.bf16 %v5184_v29, %v5176_v19  ;;  %vm4929_vm2 = vcmp.gt.f32.partialorder %v3492_v30, 0.0  ;;  %v5057_v6 = vmul.f32 0.2, %v3492_v30  ;;  %v3386_v23 = vpop.f32.mrf.mxu0  ;;  %4361 = vmatprep.subr.bf16.mxu1 %v9336_v41  ;;  %v9328_v24 = vcombine.high %v11945_v38, %v11950_v51 }
 0x158   :  { %v11978_v50 = vadd.f32 %v3497_v11, %v3385_v13  ;;  %v3387_v3 = vadd.f32 %v3386_v23, %v11576_v7  ;;  %v3499_v32 = vpop.f32.mrf.mxu1  ;;  %4249 = vmatpush1.bf16.msra.mxu0 %v9207_v34  ;;  %v9191_v48 = vcombine.low %v11915_v40, %v11920_v46  ;;  %v11986_v2 = vld [vmem:[%s15614_s1 + $0xc90] sm:$0xff]  ;;  %v5064_v19 = vmul.f32 0.2, %v3496_v8 }
 0x159   :  { %15701 = vst [vmem:[#allocation2_spill] sm:$0xff] %v11973_v58  ;;  %v11991_v41 = vld [vmem:[%s15614_s1 + $0xcb0] sm:$0xff]  ;;  %v3388_v27 = vpop.f32.mrf.mxu0  ;;  %4250 = vmatprep.subr.bf16.mxu0 %v9200_v26  ;;  %v9184_v34 = vcombine.high %v11966_v59, %v11971_v49  ;;  %vm4936_vm4 = vcmp.gt.f32.partialorder %v3496_v8, 0.0  ;;  %v9327_v13 = vcombine.low %v11945_v38, %v11950_v51  ;;  %v5185_v11 = vsel %vm4929_vm2, %v3492_v30, %v5057_v6 }
 0x15a   :  { %v3500_v44 = vadd.f32 %v3499_v32, %v3387_v3  ;;  %v3501_v29 = vpop.f32.mrf.mxu1  ;;  %4362 = vmatpush1.bf16.msra.mxu1 %v9335_v37  ;;  %v3389_v16 = vadd.f32 %v3388_v27, %v11592_v33  ;;  %v10262_v26 = vld [vmem:[%s15615_s0 + $0x70] ss:$28 sps:$4 sm:$0xff]   ;;  %v9319_v7 = vcombine.low %v11986_v2, %v11991_v41  ;;  %v9320_v37 = vcombine.high %v11986_v2, %v11991_v41  ;;  %v10263_v33 = vld [vmem:[%s15615_s0 + $0x78] ss:$28 sps:$4 sm:$0xff]  }
 0x15b   :  { %v3392_v23 = vpop.f32.mrf.mxu0  ;;  %4069 = vmatmul.mubr.bf16.gmra.mxu0 %v10262_v26  ;;  %4363 = vmatprep.subr.bf16.mxu1 %v9328_v24  ;;  %v12019_v30 = vld [vmem:[%s15614_s1 + $0xc50] sm:$0xff]  ;;  %v5192_v24 = vsel %vm4936_vm4, %v3496_v8, %v5064_v19  ;;  %vm4937_vm7 = vcmp.gt.f32.partialorder %v11978_v50, 0.0 }
 0x15c   :  { %vm4944_vm5 = vcmp.gt.f32.partialorder %v3500_v44, 0.0  ;;  %v5072_v3 = vmul.f32 0.2, %v3500_v44  ;;  %v3393_v38 = vadd.f32 %v3392_v23, %v11596_v28  ;;  %v3505_v51 = vpop.f32.mrf.mxu1  ;;  %4182 = vmatmul.mubr.bf16.gmra.mxu1 %v10263_v33  ;;  %4251 = vmatpush1.bf16.msra.mxu0 %v9199_v18  ;;  %v12024_v6 = vld [vmem:[%s15614_s1 + $0xc70] sm:$0xff]  ;;  %v5177_v28 = vsel %vm4921_vm3, %v11890_v15, %v5049_v53 }
 0x15d   :  { %v3502_v32 = vadd.f32 %v3501_v29, %v3389_v16  ;;  %v3394_v2 = vpop.f32.mrf.mxu0  ;;  %4252 = vmatprep.subr.bf16.mxu0 %v9192_v17  ;;  %4078 = vmatprep.mubr.bf16.mxu0 %v10264_v12  ;;  %v12039_v60 = vld [vmem:[%s15614_s1 + $0x810] sm:$0xff]  ;;  %v12046_v18 = vpack.c.bf16 %v5185_v11, %v5177_v28  ;;  %v9312_v29 = vcombine.high %v12019_v30, %v12024_v6  ;;  %v5065_v11 = vmul.f32 0.2, %v11978_v50 }
 0x15e   :  { %v12044_v15 = vld [vmem:[%s15614_s1 + $0x830] sm:$0xff]  ;;  %v5200_v40 = vsel %vm4944_vm5, %v3500_v44, %v5072_v3  ;;  %v3506_v46 = vadd.f32 %v3505_v51, %v3393_v38  ;;  %v3395_v17 = vadd.f32 %v3394_v2, %v11613_v61  ;;  %v3507_v8 = vpop.f32.mrf.mxu1  ;;  %4364 = vmatpush1.bf16.msra.mxu1 %v9327_v13 }
 0x15f   :  { %15702 = vst [vmem:[#allocation3_spill] sm:$0xff] %v12046_v18  ;;  %v10265_v53 = vld [vmem:[%s15615_s0 + $0xb4] ss:$28 sps:$4 sm:$0xff]   ;;  %v12063_v27 = vpack.c.bf16 %v5200_v40, %v5192_v24  ;;  %vm4945_vm6 = vcmp.gt.f32.partialorder %v3502_v32, 0.0  ;;  %v5073_v61 = vmul.f32 0.2, %v3502_v32  ;;  %v3396_v44 = vpop.f32.mrf.mxu0  ;;  %4365 = vmatprep.subr.bf16.mxu1 %v9320_v37  ;;  %v9176_v13 = vcombine.high %v12039_v60, %v12044_v15 }
 0x160   :  { %4191 = vmatprep.mubr.bf16.mxu1 %v10265_v53  ;;  %v12056_v41 = vld [vmem:[%s15614_s1 + $0xbd0] sm:$0xff]  ;;  %v12068_v16 = vadd.f32 %v3507_v8, %v3395_v17  ;;  %v3397_v23 = vadd.f32 %v3396_v44, %v11616_v56  ;;  %v3509_v26 = vpop.f32.mrf.mxu1  ;;  %4253 = vmatpush1.bf16.msra.mxu0 %v9191_v48  ;;  %v5080_v38 = vmul.f32 0.2, %v3506_v46  ;;  %v9175_v56 = vcombine.low %v12039_v60, %v12044_v15  ;;  %v12109_v17 = vld [vmem:[%s15614_s1 + $0x5d8] sm:$0xff] }
 0x161   :  { %v12061_v19 = vld [vmem:[%s15614_s1 + $0xbf0] sm:$0xff]  ;;  %15703 = vst [vmem:[#allocation4_spill] sm:$0xff] %v12063_v27  ;;  %v3398_v51 = vpop.f32.mrf.mxu0  ;;  %4254 = vmatprep.subr.bf16.mxu0 %v9184_v34  ;;  %vm4952_vm8 = vcmp.gt.f32.partialorder %v3506_v46, 0.0  ;;  %v9311_v24 = vcombine.low %v12019_v30, %v12024_v6  ;;  %v5201_v2 = vsel %vm4945_vm6, %v3502_v32, %v5073_v61  ;;  %v10266_v34 = vld [vmem:[%s15615_s0 + $0xa8] ss:$28 sps:$4 sm:$0xff]   ;;  %v15704_v32 = vcombine.low %v11966_v59, %v11971_v49  ;;  %v12114_v8 = vld [vmem:[%s15614_s1 + $0x5f8] sm:$0xff] }
 0x162   :  { %v12076_v3 = vld [vmem:[%s15614_s1 + $0xc10] sm:$0xff]  ;;  %v9296_v48 = vcombine.high %v12056_v41, %v12061_v19  ;;  %v3510_v33 = vadd.f32 %v3509_v26, %v3397_v23  ;;  %v3511_v28 = vpop.f32.mrf.mxu1  ;;  %4366 = vmatpush1.bf16.msra.mxu1 %v9319_v7  ;;  %v3399_v12 = vadd.f32 %v3398_v51, %v11632_v5  ;;  %v5208_v53 = vsel %vm4952_vm8, %v3506_v46, %v5080_v38  ;;  %v10268_v59 = vld [vmem:[%s15615_s0 + $0xe4] ss:$28 sps:$4 sm:$0xff]  }
 0x163   :  { %v12081_v37 = vld [vmem:[%s15614_s1 + $0xc30] sm:$0xff]  ;;  %v3402_v40 = vpop.f32.mrf.mxu0  ;;  %4079 = vmatmul.mubr.bf16.gmra.mxu0 %v10266_v34  ;;  %4367 = vmatprep.subr.bf16.mxu1 %v9312_v29  ;;  %v9106_v38 = vcombine.high %v12109_v17, %v12114_v8  ;;  %v5081_v51 = vmul.f32 0.2, %v12068_v16  ;;  %vm4953_vm11 = vcmp.gt.f32.partialorder %v12068_v16, 0.0 }
 0x164   :  { %v9303_v60 = vcombine.low %v12076_v3, %v12081_v37  ;;  %v9304_v7 = vcombine.high %v12076_v3, %v12081_v37  ;;  %vm4960_vm9 = vcmp.gt.f32.partialorder %v3510_v33, 0.0  ;;  %v5088_v15 = vmul.f32 0.2, %v3510_v33  ;;  %v3515_v6 = vpop.f32.mrf.mxu1  ;;  %v10267_v5 = vld [vmem:[%s15615_s0 + $0xb0] ss:$28 sps:$4 sm:$0xff]   ;;  %4255 = vmatpush1.bf16.msra.mxu0 %v15704_v32  ;;  %4088 = vmatprep.mubr.bf16.mxu0 %v10268_v59 }
 0x165   :  { %v3403_v30 = vadd.f32 %v3402_v40, %v11636_v31  ;;  %4192 = vmatmul.mubr.bf16.gmra.mxu1 %v10267_v5  ;;  %v5193_v31 = vsel %vm4937_vm7, %v11978_v50, %v5065_v11  ;;  %v3512_v61 = vadd.f32 %v3511_v28, %v3399_v12  ;;  %v3404_v44 = vpop.f32.mrf.mxu0  ;;  %4256 = vmatprep.subr.bf16.mxu0 %v9176_v13  ;;  %v10269_v50 = vld [vmem:[%s15615_s0 + $0xec] ss:$28 sps:$4 sm:$0xff]   ;;  %v12133_v46 = vld [vmem:[%s15614_s1 + $0xb90] sm:$0xff] }
 0x166   :  { %v12123_v49 = vpack.c.bf16 %v5201_v2, %v5193_v31  ;;  %v5216_v29 = vsel %vm4960_vm9, %v3510_v33, %v5088_v15  ;;  %v3405_v26 = vadd.f32 %v3404_v44, %v11653_v42  ;;  %v3517_v3 = vpop.f32.mrf.mxu1  ;;  %4201 = vmatprep.mubr.bf16.mxu1 %v10269_v50  ;;  %v12138_v11 = vld [vmem:[%s15614_s1 + $0xbb0] sm:$0xff]  ;;  %4368 = vmatpush1.bf16.msra.mxu1 %v9311_v24  ;;  %v10271_v31 = vld [vmem:[%s15615_s0 + $0xe8] ss:$28 sps:$4 sm:$0xff]   ;;  %v10272_v44 = vld [vmem:[%s15615_s0 + $0x11c] ss:$28 sps:$4 sm:$0xff]  }
 0x167   :  { %v3516_v23 = vadd.f32 %v3515_v6, %v3403_v30  ;;  %v12140_v13 = vpack.c.bf16 %v5216_v29, %v5208_v53  ;;  %vm4961_vm10 = vcmp.gt.f32.partialorder %v3512_v61, 0.0  ;;  %v5089_v42 = vmul.f32 0.2, %v3512_v61  ;;  %v3406_v37 = vpop.f32.mrf.mxu0  ;;  %4369 = vmatprep.subr.bf16.mxu1 %v9304_v7  ;;  %v12156_v30 = vld [vmem:[%s15614_s1 + $0xb50] sm:$0xff] }
 0x168   :  { %15705 = vst [vmem:[#allocation5_spill] sm:$0xff] %v12123_v49  ;;  %v12145_v33 = vadd.f32 %v3517_v3, %v3405_v26  ;;  %v3407_v28 = vadd.f32 %v3406_v37, %v11656_v55  ;;  %v3519_v2 = vpop.f32.mrf.mxu1  ;;  %4257 = vmatpush1.bf16.msra.mxu0 %v9175_v56  ;;  %v9295_v24 = vcombine.low %v12056_v41, %v12061_v19  ;;  %v12161_v55 = vld [vmem:[%s15614_s1 + $0xb70] sm:$0xff] }
 0x169   :  { %15706 = vst [vmem:[#allocation6_spill] sm:$0xff] %v12140_v13  ;;  %v3408_v12 = vpop.f32.mrf.mxu0  ;;  %4258 = vmatprep.subr.bf16.mxu0 %v9296_v48  ;;  %v9288_v40 = vcombine.high %v12133_v46, %v12138_v11  ;;  %v5096_v34 = vmul.f32 0.2, %v3516_v23  ;;  %v5217_v41 = vsel %vm4961_vm10, %v3512_v61, %v5089_v42  ;;  %vm4968_vm12 = vcmp.gt.f32.partialorder %v3516_v23, 0.0  ;;  %v10270_v48 = vld [vmem:[%s15615_s0 + $0xe0] ss:$28 sps:$4 sm:$0xff]  }
 0x16a   :  { %v3520_v7 = vadd.f32 %v3519_v2, %v3407_v28  ;;  %v3521_v15 = vpop.f32.mrf.mxu1  ;;  %4370 = vmatpush1.bf16.msra.mxu1 %v9303_v60  ;;  %v3409_v19 = vadd.f32 %v3408_v12, %v11672_v45  ;;  %v9287_v6 = vcombine.low %v12133_v46, %v12138_v11  ;;  %v5209_v45 = vsel %vm4953_vm11, %v12068_v16, %v5081_v51  ;;  %v10273_v46 = vld [vmem:[%s15615_s0 + $0x124] ss:$28 sps:$4 sm:$0xff]   ;;  %v448_v11 = vld [vmem:[%s15614_s1 + $0xb10] sm:$0xff] }
 0x16b   :  { %v3412_v56 = vpop.f32.mrf.mxu0  ;;  %4089 = vmatmul.mubr.bf16.gmra.mxu0 %v10270_v48  ;;  %4581 = vmatprep.subr.bf16.mxu1 %v9106_v38  ;;  %v12182_v59 = vpack.c.bf16 %v5217_v41, %v5209_v45  ;;  %v5224_v29 = vsel %vm4968_vm12, %v3516_v23, %v5096_v34  ;;  %v452_v42 = vld [vmem:[%s15614_s1 + $0xb30] sm:$0xff]  ;;  %vm4969_vm15 = vcmp.gt.f32.partialorder %v12145_v33, 0.0 }
 0x16c   :  { %vm4976_vm13 = vcmp.gt.f32.partialorder %v3520_v7, 0.0  ;;  %v5104_v5 = vmul.f32 0.2, %v3520_v7  ;;  %v3413_v32 = vadd.f32 %v3412_v56, %v11676_v22  ;;  %v3525_v60 = vpop.f32.mrf.mxu1  ;;  %4259 = vmatpush2.bf16.msra.mxu0 %v9295_v24  ;;  %v3522_v53 = vadd.f32 %v3521_v15, %v3409_v19  ;;  %4098 = vmatprep.mubr.bf16.mxu0 %v10272_v44  ;;  %v12208_v41 = vld [vmem:[%s15614_s1 + $0xad0] sm:$0xff] }
 0x16d   :  { %4202 = vmatmul.mubr.bf16.gmra.mxu1 %v10271_v31  ;;  %v3414_v61 = vpop.f32.mrf.mxu0  ;;  %4260 = vmatprep.subr.bf16.mxu0 %v9288_v40  ;;  %v9280_v22 = vcombine.high %v12156_v30, %v12161_v55  ;;  %15707 = vst [vmem:[#allocation10_spill] sm:$0xff] %v12182_v59  ;;  %v9279_v24 = vcombine.low %v12156_v30, %v12161_v55  ;;  %v10274_v56 = vld [vmem:[%s15615_s0 + $0x118] ss:$28 sps:$4 sm:$0xff]  }
 0x16e   :  { %v5232_v26 = vsel %vm4976_vm13, %v3520_v7, %v5104_v5  ;;  %v3526_v3 = vadd.f32 %v3525_v60, %v3413_v32  ;;  %v3415_v16 = vadd.f32 %v3414_v61, %v11693_v35  ;;  %v3527_v50 = vpop.f32.mrf.mxu1  ;;  %4211 = vmatprep.mubr.bf16.mxu1 %v10273_v46  ;;  %vm4977_vm14 = vcmp.gt.f32.partialorder %v3522_v53, 0.0  ;;  %v10275_v60 = vld [vmem:[%s15615_s0 + $0x120] ss:$28 sps:$4 sm:$0xff]   ;;  %v436_v46 = vld [vmem:[%s15614_s1 + $0xab0] sm:$0xff] }
 0x16f   :  { %v12196_v23 = vpack.c.bf16 %v5232_v26, %v5224_v29  ;;  %v5105_v37 = vmul.f32 0.2, %v3522_v53  ;;  %v3416_v38 = vpop.f32.mrf.mxu0  ;;  %v5097_v35 = vmul.f32 0.2, %v12145_v33  ;;  %v9272_v40 = vcombine.high %v448_v11, %v452_v42 }
 0x170   :  { %v12199_v51 = vadd.f32 %v3527_v50, %v3415_v16  ;;  %v3417_v28 = vadd.f32 %v3416_v38, %v11696_v36  ;;  %v3529_v2 = vpop.f32.mrf.mxu1  ;;  %4261 = vmatpush2.bf16.msra.mxu0 %v9287_v6  ;;  %v5112_v34 = vmul.f32 0.2, %v3526_v3  ;;  %v12213_v36 = vld [vmem:[%s15614_s1 + $0xaf0] sm:$0xff]  ;;  %vm4984_vm0 = vcmp.gt.f32.partialorder %v3526_v3, 0.0  ;;  %v10277_v16 = vld [vmem:[%s15615_s0 + $0x15c] ss:$28 sps:$4 sm:$0xff]  }
 0x171   :  { %15708 = vst [vmem:[#allocation11_spill] sm:$0xff] %v12196_v23  ;;  %v3418_v12 = vpop.f32.mrf.mxu0  ;;  %4262 = vmatprep.subr.bf16.mxu0 %v9280_v22  ;;  %v5233_v30 = vsel %vm4977_vm14, %v3522_v53, %v5105_v37  ;;  %v9271_v48 = vcombine.low %v448_v11, %v452_v42  ;;  %v10276_v53 = vld [vmem:[%s15615_s0 + $0x154] ss:$28 sps:$4 sm:$0xff]   ;;  %v12809_v23 = vld [vmem:[%s15614_s1 + $0x958] sm:$0xff] }
 0x172   :  { %v3530_v7 = vadd.f32 %v3529_v2, %v3417_v28  ;;  %v3531_v15 = vpop.f32.mrf.mxu1  ;;  %v3419_v55 = vadd.f32 %v3418_v12, %v11712_v47  ;;  %v5225_v47 = vsel %vm4969_vm15, %v12145_v33, %v5097_v35  ;;  %v5240_v44 = vsel %vm4984_vm0, %v3526_v3, %v5112_v34  ;;  %v432_v50 = vld [vmem:[%s15614_s1 + $0xa90] sm:$0xff] }
 0x173   :  { %v3422_v19 = vpop.f32.mrf.mxu0  ;;  %4099 = vmatmul.mubr.bf16.gmra.mxu0 %v10274_v56  ;;  %v12232_v61 = vpack.c.bf16 %v5233_v30, %v5225_v47  ;;  %v9263_v28 = vcombine.low %v12208_v41, %v12213_v36  ;;  %vm4985_vm3 = vcmp.gt.f32.partialorder %v12199_v51, 0.0  ;;  %v10278_v30 = vld [vmem:[%s15615_s0 + $0x150] ss:$28 sps:$4 sm:$0xff]  }
 0x174   :  { %vm4992_vm1 = vcmp.gt.f32.partialorder %v3530_v7, 0.0  ;;  %v5120_v6 = vmul.f32 0.2, %v3530_v7  ;;  %v3423_v5 = vadd.f32 %v3422_v19, %v11716_v62  ;;  %v3535_v32 = vpop.f32.mrf.mxu1  ;;  %4263 = vmatpush2.bf16.msra.mxu0 %v9279_v24  ;;  %v3532_v31 = vadd.f32 %v3531_v15, %v3419_v55  ;;  %4108 = vmatprep.mubr.bf16.mxu0 %v10276_v53 }
 0x175   :  { %4212 = vmatmul.mubr.bf16.gmra.mxu1 %v10275_v60  ;;  %v3424_v45 = vpop.f32.mrf.mxu0  ;;  %4264 = vmatprep.subr.bf16.mxu0 %v9272_v40  ;;  %v9264_v62 = vcombine.high %v12208_v41, %v12213_v36  ;;  %15709 = vst [vmem:[#allocation12_spill] sm:$0xff] %v12232_v61  ;;  %v9256_v24 = vcombine.high %v432_v50, %v436_v46  ;;  %v10280_v60 = vld [vmem:[%s15615_s0 + $0x18c] ss:$28 sps:$4 sm:$0xff]  }
 0x176   :  { %v5248_v22 = vsel %vm4992_vm1, %v3530_v7, %v5120_v6  ;;  %v3536_v29 = vadd.f32 %v3535_v32, %v3423_v5  ;;  %v3425_v33 = vadd.f32 %v3424_v45, %v11735_v20  ;;  %v3537_v26 = vpop.f32.mrf.mxu1  ;;  %4221 = vmatprep.mubr.bf16.mxu1 %v10277_v16  ;;  %vm4993_vm2 = vcmp.gt.f32.partialorder %v3532_v31, 0.0  ;;  %v12258_v7 = vld [vmem:[%s15614_s1 + $0xa50] sm:$0xff] }
 0x177   :  { %v12246_v3 = vpack.c.bf16 %v5248_v22, %v5240_v44  ;;  %v5121_v11 = vmul.f32 0.2, %v3532_v31  ;;  %v3426_v42 = vpop.f32.mrf.mxu0  ;;  %v5113_v20 = vmul.f32 0.2, %v12199_v51  ;;  %v9255_v55 = vcombine.low %v432_v50, %v436_v46  ;;  %v10279_v6 = vld [vmem:[%s15615_s0 + $0x158] ss:$28 sps:$4 sm:$0xff]  }
 0x178   :  { %v12249_v37 = vadd.f32 %v3537_v26, %v3425_v33  ;;  %v3427_v38 = vadd.f32 %v3426_v42, %v11738_v21  ;;  %v3539_v35 = vpop.f32.mrf.mxu1  ;;  %4265 = vmatpush2.bf16.msra.mxu0 %v9271_v48  ;;  %v5128_v12 = vmul.f32 0.2, %v3536_v29  ;;  %v12263_v21 = vld [vmem:[%s15614_s1 + $0xa70] sm:$0xff]  ;;  %vm5000_vm4 = vcmp.gt.f32.partialorder %v3536_v29, 0.0 }
 0x179   :  { %15710 = vst [vmem:[#allocation13_spill] sm:$0xff] %v12246_v3  ;;  %v3428_v2 = vpop.f32.mrf.mxu0  ;;  %4266 = vmatprep.subr.bf16.mxu0 %v9264_v62  ;;  %v5249_v15 = vsel %vm4993_vm2, %v3532_v31, %v5121_v11  ;;  %v10281_v44 = vld [vmem:[%s15615_s0 + $0x194] ss:$28 sps:$4 sm:$0xff]   ;;  %v15631_v16 = vsub.s32 2, %v11460_v63 }
 0x17a   :  { %v3540_v40 = vadd.f32 %v3539_v35, %v3427_v38  ;;  %v3541_v34 = vpop.f32.mrf.mxu1  ;;  %v3429_v41 = vadd.f32 %v3428_v2, %v11756_v54  ;;  %v5241_v54 = vsel %vm4985_vm3, %v12199_v51, %v5113_v20  ;;  %v5256_v31 = vsel %vm5000_vm4, %v3536_v29, %v5128_v12  ;;  %v12293_v22 = vld [vmem:[%s15614_s1 + $0xa10] sm:$0xff]  ;;  %v12312_v38 = vld [vmem:[%s15614_s1 + $0x1d8] sm:$0xff] }
 0x17b   :  { %v3432_v36 = vpop.f32.mrf.mxu0  ;;  %4109 = vmatmul.mubr.bf16.gmra.mxu0 %v10278_v30  ;;  %v12282_v47 = vpack.c.bf16 %v5249_v15, %v5241_v54  ;;  %v12298_v29 = vld [vmem:[%s15614_s1 + $0xa30] sm:$0xff]  ;;  %v5129_v50 = vmul.f32 0.2, %v12249_v37  ;;  %v9247_v20 = vcombine.low %v12258_v7, %v12263_v21  ;;  %v12317_v35 = vld [vmem:[%s15614_s1 + $0x1f8] sm:$0xff]  ;;  %vm5001_vm7 = vcmp.gt.f32.partialorder %v12249_v37, 0.0 }
 0x17c   :  { %vm5008_vm5 = vcmp.gt.f32.partialorder %v3540_v40, 0.0  ;;  %v5136_v19 = vmul.f32 0.2, %v3540_v40  ;;  %v3433_v56 = vadd.f32 %v3432_v36, %v11762_v10  ;;  %v3545_v48 = vpop.f32.mrf.mxu1  ;;  %4267 = vmatpush2.bf16.msra.mxu0 %v9263_v28  ;;  %v3542_v5 = vadd.f32 %v3541_v34, %v3429_v41  ;;  %4118 = vmatprep.mubr.bf16.mxu0 %v10280_v60  ;;  %v10283_v41 = vld [vmem:[%s15616_s2] sm:$0xff] }
 0x17d   :  { %4222 = vmatmul.mubr.bf16.gmra.mxu1 %v10279_v6  ;;  %v3434_v32 = vpop.f32.mrf.mxu0  ;;  %4268 = vmatprep.subr.bf16.mxu0 %v9256_v24  ;;  %v9248_v10 = vcombine.high %v12258_v7, %v12263_v21  ;;  %15711 = vst [vmem:[#allocation14_spill] sm:$0xff] %v12282_v47  ;;  %v10282_v21 = vld [vmem:[%s15615_s0 + $0x188] ss:$28 sps:$4 sm:$0xff]   ;;  %v9239_v15 = vcombine.low %v12293_v22, %v12298_v29 }
 0x17e   :  { %v5264_v45 = vsel %vm5008_vm5, %v3540_v40, %v5136_v19  ;;  %v3546_v53 = vadd.f32 %v3545_v48, %v3433_v56  ;;  %v3435_v51 = vadd.f32 %v3434_v32, %v11781_v0  ;;  %v3547_v62 = vpop.f32.mrf.mxu1  ;;  %4231 = vmatprep.mubr.bf16.mxu1 %v10281_v44  ;;  %vm5009_vm6 = vcmp.gt.f32.partialorder %v3542_v5, 0.0  ;;  %v10284_v56 = vld [vmem:[%s15615_s0 + $0x190] ss:$28 sps:$4 sm:$0xff]  }
 0x17f   :  { %v12300_v33 = vpack.c.bf16 %v5264_v45, %v5256_v31  ;;  %v5137_v0 = vmul.f32 0.2, %v3542_v5  ;;  %v3436_v26 = vpop.f32.mrf.mxu0  ;;  %v12334_v36 = vrot.slane %v10283_v41, %v15631_v16  ;;  %v5257_v48 = vsel %vm5001_vm7, %v12249_v37, %v5129_v50 }
 0x180   :  { %v12304_v46 = vadd.f32 %v3547_v62, %v3435_v51  ;;  %v3437_v11 = vadd.f32 %v3436_v26, %v11784_v14  ;;  %v3549_v42 = vpop.f32.mrf.mxu1  ;;  %4269 = vmatpush2.bf16.msra.mxu0 %v9255_v55  ;;  %v5144_v28 = vmul.f32 0.2, %v3546_v53  ;;  %v9240_v14 = vcombine.high %v12293_v22, %v12298_v29  ;;  %v12359_v51 = vld [vmem:[%s15614_s1 + $0x198] sm:$0xff] }
 0x181   :  { %15712 = vst [vmem:[#allocation15_spill] sm:$0xff] %v12300_v33  ;;  %v3438_v2 = vpop.f32.mrf.mxu0  ;;  %4270 = vmatprep.subr.bf16.mxu0 %v9248_v10  ;;  %vm5016_vm8 = vcmp.gt.f32.partialorder %v3546_v53, 0.0  ;;  %v5265_v40 = vsel %vm5009_vm6, %v3542_v5, %v5137_v0  ;;  %v15630_v32 = vsub.s32 3, %v11460_v63  ;;  %v12364_v62 = vld [vmem:[%s15614_s1 + $0x1b8] sm:$0xff] }
 0x182   :  { %v3550_v24 = vadd.f32 %v3549_v42, %v3437_v11  ;;  %v3551_v12 = vpop.f32.mrf.mxu1  ;;  %v3439_v34 = vadd.f32 %v3438_v2, %v11802_v39  ;;  %v8978_v39 = vcombine.high %v12312_v38, %v12317_v35  ;;  %v5272_v6 = vsel %vm5016_vm8, %v3546_v53, %v5144_v28  ;;  %v12372_v29 = vld [vmem:[%s15614_s1 + $0x598] sm:$0xff] }
 0x183   :  { %v3442_v7 = vpop.f32.mrf.mxu0  ;;  %4119 = vmatmul.mubr.bf16.gmra.mxu0 %v10282_v21  ;;  %v12350_v60 = vpack.c.bf16 %v5265_v40, %v5257_v48  ;;  %v5145_v10 = vmul.f32 0.2, %v12304_v46  ;;  %vm5017_vm10 = vcmp.gt.f32.partialorder %v12304_v46, 0.0  ;;  %v12377_v0 = vld [vmem:[%s15614_s1 + $0x5b8] sm:$0xff]  ;;  %v8977_v42 = vcombine.low %v12312_v38, %v12317_v35 }
 0x184   :  { %vm5024_vm9 = vcmp.gt.f32.partialorder %v3550_v24, 0.0  ;;  %v5152_v30 = vmul.f32 0.2, %v3550_v24  ;;  %v3443_v55 = vadd.f32 %v3442_v7, %v11808_v1  ;;  %v3555_v19 = vpop.f32.mrf.mxu1  ;;  %4271 = vmatpush2.bf16.msra.mxu0 %v9247_v20  ;;  %v3552_v54 = vadd.f32 %v3551_v12, %v3439_v34  ;;  %v10285_v1 = vld [vmem:[%s15615_s0 + $0x14] ss:$28 sps:$4 sm:$0xff]   ;;  %v12389_v28 = vld [vmem:[%s15614_s1 + $0x158] sm:$0xff] }
 0x185   :  { %4232 = vmatmul.mubr.bf16.gmra.mxu1 %v10284_v56  ;;  %v3444_v5 = vpop.f32.mrf.mxu0  ;;  %4272 = vmatprep.subr.bf16.mxu0 %v9240_v14  ;;  %15713 = vst [vmem:[#allocation16_spill] sm:$0xff] %v12350_v60  ;;  %v9105_v20 = vcombine.low %v12109_v17, %v12114_v8  ;;  %v12400_v38 = vld [vmem:[%s15614_s1 + $0x178] sm:$0xff]  ;;  %v9098_v34 = vcombine.high %v12372_v29, %v12377_v0 }
 0x186   :  { %4274 = vmatprep.mubr.bf16.mxu0 %v10285_v1  ;;  %v5280_v31 = vsel %vm5024_vm9, %v3550_v24, %v5152_v30  ;;  %v3556_v45 = vadd.f32 %v3555_v19, %v3443_v55  ;;  %v3445_v37 = vadd.f32 %v3444_v5, %v11823_v9  ;;  %v3557_v53 = vpop.f32.mrf.mxu1  ;;  %4387 = vmatprep.mubr.bf16.mxu1 %v15690_v25  ;;  %vm5025_vm11 = vcmp.gt.f32.partialorder %v3552_v54, 0.0  ;;  %v12405_v17 = vld [vmem:[%s15614_s1 + $0x558] sm:$0xff] }
 0x187   :  { %v12367_v44 = vpack.c.bf16 %v5280_v31, %v5272_v6  ;;  %v5153_v22 = vmul.f32 0.2, %v3552_v54  ;;  %v3446_v9 = vpop.f32.mrf.mxu0  ;;  %v12393_v24 = vrot.slane %v10283_v41, %v15630_v32  ;;  %v12410_v8 = vld [vmem:[%s15614_s1 + $0x578] sm:$0xff]  ;;  %v5273_v7 = vsel %vm5017_vm10, %v12304_v46, %v5145_v10  ;;  %v10286_v41 = vld [vmem:[%s15615_s0 + $0x10] ss:$28 sps:$4 sm:$0xff]  }
 0x188   :  { %v12379_v26 = vadd.f32 %v3557_v53, %v3445_v37  ;;  %v3447_v50 = vadd.f32 %v3446_v9, %v11832_v43  ;;  %v3559_v11 = vpop.f32.mrf.mxu1  ;;  %4273 = vmatpush2.bf16.msra.mxu0 %v9239_v15  ;;  %v5160_v2 = vmul.f32 0.2, %v3556_v45  ;;  %v8970_v43 = vcombine.high %v12359_v51, %v12364_v62 }
 0x189   :  { %15714 = vst [vmem:[#allocation17_spill] sm:$0xff] %v12367_v44  ;;  %v3448_v14 = vpop.f32.mrf.mxu0  ;;  %4468 = vmatprep.subr.bf16.mxu0 %v8978_v39  ;;  %v5281_v35 = vsel %vm5025_vm11, %v3552_v54, %v5153_v22  ;;  %vm5032_vm12 = vcmp.gt.f32.partialorder %v3556_v45, 0.0  ;;  %v8969_v39 = vcombine.low %v12359_v51, %v12364_v62  ;;  %v9097_v30 = vcombine.low %v12372_v29, %v12377_v0  ;;  %v129_v62 = vld [vmem:[%s15614_s1 + $0x118] sm:$0xff] }
 0x18a   :  { %v3560_v12 = vadd.f32 %v3559_v11, %v3447_v50  ;;  %v3561_v40 = vpop.f32.mrf.mxu1  ;;  %v3449_v21 = vadd.f32 %v3448_v14, %v11858_v52  ;;  %v12426_v55 = vpack.c.bf16 %v5281_v35, %v5273_v7  ;;  %v10287_v52 = vld [vmem:[%s15615_s0 + $0x18] ss:$28 sps:$4 sm:$0xff]   ;;  %v8962_v48 = vcombine.high %v12389_v28, %v12400_v38 }
 0x18b   :  { %v3598_v15 = vpop.f32.mrf.mxu0  ;;  %4275 = vmatmul.mubr.bf16.vlgmr.msra.gmra.mxu0 %v10286_v41  ;;  %v5288_v6 = vsel %vm5032_vm12, %v3556_v45, %v5160_v2  ;;  %v5161_v54 = vmul.f32 0.2, %v12379_v26  ;;  %v9090_v10 = vcombine.high %v12405_v17, %v12410_v8  ;;  %vm5033_vm14 = vcmp.gt.f32.partialorder %v12379_v26, 0.0  ;;  %v10288_v45 = vld [vmem:[%s15615_s0 + $0x4c] ss:$28 sps:$4 sm:$0xff]   ;;  %v133_v22 = vld [vmem:[%s15614_s1 + $0x138] sm:$0xff] }
 0x18c   :  { %15715 = vst [vmem:[#allocation18_spill] sm:$0xff] %v12426_v55  ;;  %vm5040_vm13 = vcmp.gt.f32.partialorder %v3560_v12, 0.0  ;;  %v5168_v19 = vmul.f32 0.2, %v3560_v12  ;;  %v3599_v46 = vadd.f32 %v3598_v15, %v12334_v36  ;;  %v3711_v56 = vpop.f32.mrf.mxu1  ;;  %4469 = vmatpush1.bf16.msra.mxu0 %v8977_v42  ;;  %v3562_v5 = vadd.f32 %v3561_v40, %v3449_v21  ;;  %4284 = vmatprep.mubr.bf16.mxu0 %v10288_v45  ;;  %v257_v50 = vld [vmem:[%s15614_s1 + $0x518] sm:$0xff] }
 0x18d   :  { %4388 = vmatmul.mubr.bf16.vlgmr.msra.gmra.mxu1 %v10287_v52  ;;  %v3600_v1 = vpop.f32.mrf.mxu0  ;;  %4470 = vmatprep.subr.bf16.mxu0 %v8970_v43  ;;  %v261_v11 = vld [vmem:[%s15614_s1 + $0x538] sm:$0xff]  ;;  %v8961_v14 = vcombine.low %v12389_v28, %v12400_v38  ;;  %v9089_v43 = vcombine.low %v12405_v17, %v12410_v8  ;;  %v5289_v40 = vsel %vm5033_vm14, %v12379_v26, %v5161_v54  ;;  %v10289_v41 = vld [vmem:[%s15615_s0 + $0x48] ss:$28 sps:$4 sm:$0xff]   ;;  %v10290_v52 = vld [vmem:[%s15615_s0 + $0x50] ss:$28 sps:$4 sm:$0xff]  }
 0x18e   :  { %4582 = vmatpush1.bf16.msra.mxu1 %v9105_v20  ;;  %v5296_v31 = vsel %vm5040_vm13, %v3560_v12, %v5168_v19  ;;  %v12440_v37 = vadd.f32 %v3711_v56, %v3599_v46  ;;  %v3601_v53 = vadd.f32 %v3600_v1, %v12393_v24  ;;  %v3713_v51 = vpop.f32.mrf.mxu1  ;;  %vm5041_vm15 = vcmp.gt.f32.partialorder %v3562_v5, 0.0  ;;  %4397 = vmatprep.mubr.bf16.mxu1 %v15690_v25  ;;  %v121_v38 = vld [vmem:[%s15614_s1 + $0xd8] sm:$0xff] }
 0x18f   :  { %4583 = vmatprep.subr.bf16.mxu1 %v9098_v34  ;;  %v12452_v9 = vpack.c.bf16 %v5296_v31, %v5288_v6  ;;  %v5169_v29 = vmul.f32 0.2, %v3562_v5  ;;  %v3602_v0 = vpop.f32.mrf.mxu0  ;;  %v8954_v12 = vcombine.high %v129_v62, %v133_v22  ;;  %v9082_v28 = vcombine.high %v257_v50, %v261_v11  ;;  %v125_v17 = vld [vmem:[%s15614_s1 + $0xf8] sm:$0xff] }
 0x190   :  { %v12461_v42 = vadd.f32 %v3713_v51, %v3601_v53  ;;  %v3603_v20 = vadd.f32 %v3602_v0, %v12334_v36  ;;  %v3715_v2 = vpop.f32.mrf.mxu1  ;;  %4471 = vmatpush1.bf16.msra.mxu0 %v8969_v39  ;;  %v249_v39 = vld [vmem:[%s15614_s1 + $0x4d8] sm:$0xff]  ;;  %v9081_v54 = vcombine.low %v257_v50, %v261_v11  ;;  %v10291_v53 = vld [vmem:[%s15615_s0 + $0x84] ss:$28 sps:$4 sm:$0xff]  }
 0x191   :  { %15716 = vst [vmem:[#allocation19_spill] sm:$0xff] %v12452_v9  ;;  %v3604_v35 = vpop.f32.mrf.mxu0  ;;  %4472 = vmatprep.subr.bf16.mxu0 %v8962_v48  ;;  %v5297_v34 = vsel %vm5041_vm15, %v3562_v5, %v5169_v29  ;;  %v8953_v48 = vcombine.low %v129_v62, %v133_v22  ;;  %v8946_v5 = vcombine.high %v121_v38, %v125_v17  ;;  %v113_v45 = vld [vmem:[%s15614_s1 + $0x98] sm:$0xff] }
 0x192   :  { %4584 = vmatpush1.bf16.msra.mxu1 %v9097_v30  ;;  %v12472_v7 = vadd.f32 %v3715_v2, %v3603_v20  ;;  %v3605_v21 = vadd.f32 %v3604_v35, %v12393_v24  ;;  %v3717_v15 = vpop.f32.mrf.mxu1  ;;  %v12481_v8 = vpack.c.bf16 %v5297_v34, %v5289_v40  ;;  %v253_v30 = vld [vmem:[%s15614_s1 + $0x4f8] sm:$0xff]  ;;  %v8945_v2 = vcombine.low %v121_v38, %v125_v17 }
 0x193   :  { %4585 = vmatprep.subr.bf16.mxu1 %v9090_v10  ;;  %v3608_v26 = vpop.f32.mrf.mxu0  ;;  %4285 = vmatmul.mubr.bf16.gmra.mxu0 %v10289_v41  ;;  %v9074_v51 = vcombine.high %v249_v39, %v253_v30  ;;  %v117_v62 = vld [vmem:[%s15614_s1 + $0xb8] sm:$0xff] }
 0x194   :  { %15717 = vst [vmem:[#allocation20_spill] sm:$0xff] %v12481_v8  ;;  %v12492_v19 = vadd.f32 %v3717_v15, %v3605_v21  ;;  %v3609_v46 = vadd.f32 %v3608_v26, %v12334_v36  ;;  %v3721_v56 = vpop.f32.mrf.mxu1  ;;  %4473 = vmatpush1.bf16.msra.mxu0 %v8961_v14  ;;  %4294 = vmatprep.mubr.bf16.mxu0 %v10291_v53  ;;  %v241_v29 = vld [vmem:[%s15614_s1 + $0x498] sm:$0xff] }
 0x195   :  { %4398 = vmatmul.mubr.bf16.gmra.mxu1 %v10290_v52  ;;  %v3610_v6 = vpop.f32.mrf.mxu0  ;;  %4474 = vmatprep.subr.bf16.mxu0 %v8954_v12  ;;  %v245_v0 = vld [vmem:[%s15614_s1 + $0x4b8] sm:$0xff]  ;;  %v8938_v35 = vcombine.high %v113_v45, %v117_v62  ;;  %v8937_v52 = vcombine.low %v113_v45, %v117_v62 }
 0x196   :  { %4586 = vmatpush1.bf16.msra.mxu1 %v9089_v43  ;;  %v12498_v1 = vadd.f32 %v3721_v56, %v3609_v46  ;;  %v3611_v10 = vadd.f32 %v3610_v6, %v12393_v24  ;;  %v3723_v31 = vpop.f32.mrf.mxu1  ;;  %4407 = vmatprep.mubr.bf16.mxu1 %v15690_v25  ;;  %v9073_v43 = vcombine.low %v249_v39, %v253_v30  ;;  %v105_v15 = vld [vmem:[%s15614_s1 + $0x58] sm:$0xff]  ;;  %v10293_v56 = vld [vmem:[%s15615_s0 + $0x88] ss:$28 sps:$4 sm:$0xff]  }
 0x197   :  { %4587 = vmatprep.subr.bf16.mxu1 %v9082_v28  ;;  %v3612_v22 = vpop.f32.mrf.mxu0  ;;  %v9066_v21 = vcombine.high %v241_v29, %v245_v0  ;;  %v109_v28 = vld [vmem:[%s15614_s1 + $0x78] sm:$0xff]  ;;  %v9065_v6 = vcombine.low %v241_v29, %v245_v0 }
 0x198   :  { %v12517_v50 = vadd.f32 %v3723_v31, %v3611_v10  ;;  %v3613_v11 = vadd.f32 %v3612_v22, %v12334_v36  ;;  %v3725_v20 = vpop.f32.mrf.mxu1  ;;  %4475 = vmatpush1.bf16.msra.mxu0 %v8953_v48  ;;  %v10292_v17 = vld [vmem:[%s15615_s0 + $0x80] ss:$28 sps:$4 sm:$0xff]  }
 0x199   :  { %v3614_v14 = vpop.f32.mrf.mxu0  ;;  %4476 = vmatprep.subr.bf16.mxu0 %v8946_v5  ;;  %v233_v26 = vld [vmem:[%s15614_s1 + $0x458] sm:$0xff] }
 0x19a   :  { %4588 = vmatpush1.bf16.msra.mxu1 %v9081_v54  ;;  %v12520_v12 = vadd.f32 %v3725_v20, %v3613_v11  ;;  %v3615_v40 = vadd.f32 %v3614_v14, %v12393_v24  ;;  %v3727_v34 = vpop.f32.mrf.mxu1  ;;  %v237_v41 = vld [vmem:[%s15614_s1 + $0x478] sm:$0xff]  ;;  %v8930_v54 = vcombine.high %v105_v15, %v109_v28  ;;  %v8929_v14 = vcombine.low %v105_v15, %v109_v28 }
 0x19b   :  { %4589 = vmatprep.subr.bf16.mxu1 %v9074_v51  ;;  %v3618_v38 = vpop.f32.mrf.mxu0  ;;  %4295 = vmatmul.mubr.bf16.gmra.mxu0 %v10292_v17  ;;  %v10294_v53 = vld [vmem:[%s15615_s0 + $0xbc] ss:$28 sps:$4 sm:$0xff]   ;;  %v9058_v51 = vcombine.high %v233_v26, %v237_v41 }
 0x19c   :  { %v12538_v39 = vadd.f32 %v3727_v34, %v3615_v40  ;;  %v3619_v30 = vadd.f32 %v3618_v38, %v12334_v36  ;;  %v3731_v46 = vpop.f32.mrf.mxu1  ;;  %4477 = vmatpush1.bf16.msra.mxu0 %v8945_v2  ;;  %4304 = vmatprep.mubr.bf16.mxu0 %v10294_v53  ;;  %v97_v45 = vld [vmem:[%s15614_s1 + $0x18] sm:$0xff] }
 0x19d   :  { %4408 = vmatmul.mubr.bf16.gmra.mxu1 %v10293_v56  ;;  %v3620_v48 = vpop.f32.mrf.mxu0  ;;  %4478 = vmatprep.subr.bf16.mxu0 %v8938_v35  ;;  %v101_v62 = vld [vmem:[%s15614_s1 + $0x38] sm:$0xff]  ;;  %v9057_v35 = vcombine.low %v233_v26, %v237_v41 }
 0x19e   :  { %4590 = vmatpush1.bf16.msra.mxu1 %v9073_v43  ;;  %v12544_v5 = vadd.f32 %v3731_v46, %v3619_v30  ;;  %v3621_v10 = vadd.f32 %v3620_v48, %v12393_v24  ;;  %v3733_v31 = vpop.f32.mrf.mxu1  ;;  %4417 = vmatprep.mubr.bf16.mxu1 %v15690_v25  ;;  %v225_v29 = vld [vmem:[%s15614_s1 + $0x418] sm:$0xff]  ;;  %v8922_v40 = vcombine.high %v97_v45, %v101_v62 }
 0x19f   :  { %4591 = vmatprep.subr.bf16.mxu1 %v9066_v21  ;;  %v3622_v22 = vpop.f32.mrf.mxu0  ;;  %v229_v0 = vld [vmem:[%s15614_s1 + $0x438] sm:$0xff] }
 0x1a0   :  { %v12563_v11 = vadd.f32 %v3733_v31, %v3621_v10  ;;  %v3623_v20 = vadd.f32 %v3622_v22, %v12334_v36  ;;  %v3735_v2 = vpop.f32.mrf.mxu1  ;;  %4479 = vmatpush1.bf16.msra.mxu0 %v8937_v52  ;;  %v9050_v17 = vcombine.high %v225_v29, %v229_v0  ;;  %v217_v30 = vld [vmem:[%s15614_s1 + $0x3d8] sm:$0xff]  ;;  %v9049_v31 = vcombine.low %v225_v29, %v229_v0 }
 0x1a1   :  { %v3624_v43 = vpop.f32.mrf.mxu0  ;;  %4480 = vmatprep.subr.bf16.mxu0 %v8930_v54  ;;  %v221_v15 = vld [vmem:[%s15614_s1 + $0x3f8] sm:$0xff]  ;;  %v8921_v54 = vcombine.low %v97_v45, %v101_v62 }
 0x1a2   :  { %4592 = vmatpush1.bf16.msra.mxu1 %v9065_v6  ;;  %v12566_v34 = vadd.f32 %v3735_v2, %v3623_v20  ;;  %v3625_v21 = vadd.f32 %v3624_v43, %v12393_v24  ;;  %v3737_v38 = vpop.f32.mrf.mxu1  ;;  %v10295_v26 = vld [vmem:[%s15615_s0 + $0xb8] ss:$28 sps:$4 sm:$0xff]   ;;  %v10296_v6 = vld [vmem:[%s15615_s0 + $0xc0] ss:$28 sps:$4 sm:$0xff]   ;;  %v9042_v53 = vcombine.high %v217_v30, %v221_v15 }
 0x1a3   :  { %4593 = vmatprep.subr.bf16.mxu1 %v9058_v51  ;;  %v3628_v28 = vpop.f32.mrf.mxu0  ;;  %4305 = vmatmul.mubr.bf16.gmra.mxu0 %v10295_v26  ;;  %v345_v41 = vld [vmem:[%s15614_s1 + $0x7d8] sm:$0xff]  ;;  %v10297_v2 = vld [vmem:[%s15615_s0 + $0xf4] ss:$28 sps:$4 sm:$0xff]  }
 0x1a4   :  { %v349_v46 = vld [vmem:[%s15614_s1 + $0x7f8] sm:$0xff]  ;;  %v12584_v56 = vadd.f32 %v3737_v38, %v3625_v21  ;;  %v3629_v52 = vadd.f32 %v3628_v28, %v12334_v36  ;;  %v3741_v48 = vpop.f32.mrf.mxu1  ;;  %4481 = vmatpush1.bf16.msra.mxu0 %v8929_v14  ;;  %4314 = vmatprep.mubr.bf16.mxu0 %v10297_v2  ;;  %v9041_v38 = vcombine.low %v217_v30, %v221_v15 }
 0x1a5   :  { %4418 = vmatmul.mubr.bf16.gmra.mxu1 %v10296_v6  ;;  %v3630_v10 = vpop.f32.mrf.mxu0  ;;  %4482 = vmatprep.subr.bf16.mxu0 %v8922_v40  ;;  %v9170_v43 = vcombine.high %v345_v41, %v349_v46  ;;  %v209_v45 = vld [vmem:[%s15614_s1 + $0x398] sm:$0xff]  ;;  %v9169_v28 = vcombine.low %v345_v41, %v349_v46  ;;  %v10298_v41 = vld [vmem:[%s15615_s0 + $0xf0] ss:$28 sps:$4 sm:$0xff]  }
 0x1a6   :  { %4594 = vmatpush1.bf16.msra.mxu1 %v9057_v35  ;;  %v12590_v51 = vadd.f32 %v3741_v48, %v3629_v52  ;;  %v3631_v22 = vadd.f32 %v3630_v10, %v12393_v24  ;;  %v3743_v20 = vpop.f32.mrf.mxu1  ;;  %v213_v62 = vld [vmem:[%s15614_s1 + $0x3b8] sm:$0xff]  ;;  %4427 = vmatprep.mubr.bf16.mxu1 %v15690_v25 }
 0x1a7   :  { %4595 = vmatprep.subr.bf16.mxu1 %v9050_v17  ;;  %v3632_v29 = vpop.f32.mrf.mxu0  ;;  %v337_v0 = vld [vmem:[%s15614_s1 + $0x798] sm:$0xff]  ;;  %v9034_v26 = vcombine.high %v209_v45, %v213_v62 }
 0x1a8   :  { %v341_v14 = vld [vmem:[%s15614_s1 + $0x7b8] sm:$0xff]  ;;  %v12609_v35 = vadd.f32 %v3743_v20, %v3631_v22  ;;  %v3633_v40 = vadd.f32 %v3632_v29, %v12334_v36  ;;  %v3745_v21 = vpop.f32.mrf.mxu1  ;;  %4483 = vmatpush1.bf16.msra.mxu0 %v8921_v54 }
 0x1a9   :  { %v3634_v17 = vpop.f32.mrf.mxu0  ;;  %4484 = vmatprep.subr.bf16.mxu0 %v9042_v53  ;;  %v9162_v10 = vcombine.high %v337_v0, %v341_v14  ;;  %v201_v22 = vld [vmem:[%s15614_s1 + $0x358] sm:$0xff] }
 0x1aa   :  { %4596 = vmatpush1.bf16.msra.mxu1 %v9049_v31  ;;  %v12612_v52 = vadd.f32 %v3745_v21, %v3633_v40  ;;  %v3635_v48 = vadd.f32 %v3634_v17, %v12393_v24  ;;  %v3747_v6 = vpop.f32.mrf.mxu1  ;;  %v205_v30 = vld [vmem:[%s15614_s1 + $0x378] sm:$0xff]  ;;  %v9161_v40 = vcombine.low %v337_v0, %v341_v14 }
 0x1ab   :  { %4597 = vmatprep.subr.bf16.mxu1 %v9170_v43  ;;  %v3638_v15 = vpop.f32.mrf.mxu0  ;;  %4315 = vmatmul.mubr.bf16.gmra.mxu0 %v10298_v41  ;;  %v329_v46 = vld [vmem:[%s15614_s1 + $0x758] sm:$0xff]  ;;  %v9033_v43 = vcombine.low %v209_v45, %v213_v62  ;;  %v9026_v21 = vcombine.high %v201_v22, %v205_v30 }
 0x1ac   :  { %v333_v54 = vld [vmem:[%s15614_s1 + $0x778] sm:$0xff]  ;;  %v12630_v31 = vadd.f32 %v3747_v6, %v3635_v48  ;;  %v3639_v53 = vadd.f32 %v3638_v15, %v12334_v36  ;;  %v3751_v20 = vpop.f32.mrf.mxu1  ;;  %4485 = vmatpush2.bf16.msra.mxu0 %v9041_v38  ;;  %v10300_v15 = vld [vmem:[%s15615_s0 + $0x12c] ss:$28 sps:$4 sm:$0xff]  }
 0x1ad   :  { %v10299_v2 = vld [vmem:[%s15615_s0 + $0xf8] ss:$28 sps:$4 sm:$0xff]   ;;  %v3640_v29 = vpop.f32.mrf.mxu0  ;;  %4486 = vmatprep.subr.bf16.mxu0 %v9034_v26  ;;  %4324 = vmatprep.mubr.bf16.mxu0 %v10300_v15  ;;  %v9154_v41 = vcombine.high %v329_v46, %v333_v54 }
 0x1ae   :  { %4428 = vmatmul.mubr.bf16.gmra.mxu1 %v10299_v2  ;;  %v12636_v17 = vadd.f32 %v3751_v20, %v3639_v53  ;;  %v3641_v48 = vadd.f32 %v3640_v29, %v12393_v24  ;;  %v3753_v6 = vpop.f32.mrf.mxu1  ;;  %v193_v45 = vld [vmem:[%s15614_s1 + $0x318] sm:$0xff]  ;;  %v9025_v53 = vcombine.low %v201_v22, %v205_v30  ;;  %v9153_v2 = vcombine.low %v329_v46, %v333_v54  ;;  %v10301_v46 = vld [vmem:[%s15615_s0 + $0x128] ss:$28 sps:$4 sm:$0xff]  }
 0x1af   :  { %4598 = vmatpush2.bf16.msra.mxu1 %v9169_v28  ;;  %v197_v62 = vld [vmem:[%s15614_s1 + $0x338] sm:$0xff]  ;;  %v3642_v0 = vpop.f32.mrf.mxu0  ;;  %4437 = vmatprep.mubr.bf16.mxu1 %v15690_v25 }
 0x1b0   :  { %4599 = vmatprep.subr.bf16.mxu1 %v9162_v10  ;;  %v321_v14 = vld [vmem:[%s15614_s1 + $0x718] sm:$0xff]  ;;  %v12655_v28 = vadd.f32 %v3753_v6, %v3641_v48  ;;  %v3643_v26 = vadd.f32 %v3642_v0, %v12334_v36  ;;  %v3755_v10 = vpop.f32.mrf.mxu1  ;;  %4487 = vmatpush2.bf16.msra.mxu0 %v9033_v43  ;;  %v9018_v29 = vcombine.high %v193_v45, %v197_v62 }
 0x1b1   :  { %v325_v38 = vld [vmem:[%s15614_s1 + $0x738] sm:$0xff]  ;;  %v3644_v20 = vpop.f32.mrf.mxu0  ;;  %4488 = vmatprep.subr.bf16.mxu0 %v9026_v21  ;;  %v9017_v0 = vcombine.low %v193_v45, %v197_v62 }
 0x1b2   :  { %v12658_v15 = vadd.f32 %v3755_v10, %v3643_v26  ;;  %v3645_v32 = vadd.f32 %v3644_v20, %v12393_v24  ;;  %v3757_v16 = vpop.f32.mrf.mxu1  ;;  %v9146_v57 = vcombine.high %v321_v14, %v325_v38  ;;  %v185_v48 = vld [vmem:[%s15614_s1 + $0x2d8] sm:$0xff]  ;;  %v9145_v10 = vcombine.low %v321_v14, %v325_v38 }
 0x1b3   :  { %4600 = vmatpush2.bf16.msra.mxu1 %v9161_v40  ;;  %v189_v22 = vld [vmem:[%s15614_s1 + $0x2f8] sm:$0xff]  ;;  %v3648_v30 = vpop.f32.mrf.mxu0  ;;  %4325 = vmatmul.mubr.bf16.gmra.mxu0 %v10301_v46 }
 0x1b4   :  { %4601 = vmatprep.subr.bf16.mxu1 %v9154_v41  ;;  %v313_v54 = vld [vmem:[%s15614_s1 + $0x6d8] sm:$0xff]  ;;  %v12676_v40 = vadd.f32 %v3757_v16, %v3645_v32  ;;  %v3649_v21 = vadd.f32 %v3648_v30, %v12334_v36  ;;  %v3761_v6 = vpop.f32.mrf.mxu1  ;;  %v10302_v41 = vld [vmem:[%s15615_s0 + $0x130] ss:$28 sps:$4 sm:$0xff]   ;;  %4489 = vmatpush2.bf16.msra.mxu0 %v9025_v53  ;;  %v9010_v20 = vcombine.high %v185_v48, %v189_v22  ;;  %v10303_v30 = vld [vmem:[%s15615_s0 + $0x164] ss:$28 sps:$4 sm:$0xff]  }
 0x1b5   :  { %v317_v43 = vld [vmem:[%s15614_s1 + $0x6f8] sm:$0xff]  ;;  %v3650_v26 = vpop.f32.mrf.mxu0  ;;  %4490 = vmatprep.subr.bf16.mxu0 %v9018_v29  ;;  %4334 = vmatprep.mubr.bf16.mxu0 %v10303_v30 }
 0x1b6   :  { %4438 = vmatmul.mubr.bf16.gmra.mxu1 %v10302_v41  ;;  %v12682_v46 = vadd.f32 %v3761_v6, %v3649_v21  ;;  %v3651_v16 = vadd.f32 %v3650_v26, %v12393_v24  ;;  %v3763_v32 = vpop.f32.mrf.mxu1  ;;  %v9138_v4 = vcombine.high %v313_v54, %v317_v43  ;;  %v177_v45 = vld [vmem:[%s15614_s1 + $0x298] sm:$0xff]  ;;  %v9009_v21 = vcombine.low %v185_v48, %v189_v22 }
 0x1b7   :  { %4602 = vmatpush2.bf16.msra.mxu1 %v9153_v2  ;;  %v181_v62 = vld [vmem:[%s15614_s1 + $0x2b8] sm:$0xff]  ;;  %v3652_v14 = vpop.f32.mrf.mxu0  ;;  %4447 = vmatprep.mubr.bf16.mxu1 %v15690_v25  ;;  %v9137_v41 = vcombine.low %v313_v54, %v317_v43 }
 0x1b8   :  { %4603 = vmatprep.subr.bf16.mxu1 %v9146_v57  ;;  %v305_v57 = vld [vmem:[%s15614_s1 + $0x698] sm:$0xff]  ;;  %v12701_v53 = vadd.f32 %v3763_v32, %v3651_v16  ;;  %v3653_v2 = vadd.f32 %v3652_v14, %v12334_v36  ;;  %v3765_v29 = vpop.f32.mrf.mxu1  ;;  %4491 = vmatpush2.bf16.msra.mxu0 %v9017_v0  ;;  %v9002_v26 = vcombine.high %v177_v45, %v181_v62  ;;  %v10305_v32 = vld [vmem:[%s15615_s0 + $0x168] ss:$28 sps:$4 sm:$0xff]  }
 0x1b9   :  { %v309_v38 = vld [vmem:[%s15614_s1 + $0x6b8] sm:$0xff]  ;;  %v3654_v6 = vpop.f32.mrf.mxu0  ;;  %4492 = vmatprep.subr.bf16.mxu0 %v9010_v20  ;;  %v9001_v14 = vcombine.low %v177_v45, %v181_v62 }
 0x1ba   :  { %v12704_v30 = vadd.f32 %v3765_v29, %v3653_v2  ;;  %v3655_v9 = vadd.f32 %v3654_v6, %v12393_v24  ;;  %v3767_v8 = vpop.f32.mrf.mxu1  ;;  %v9130_v44 = vcombine.high %v305_v57, %v309_v38  ;;  %v169_v16 = vld [vmem:[%s15614_s1 + $0x258] sm:$0xff]  ;;  %v9129_v29 = vcombine.low %v305_v57, %v309_v38 }
 0x1bb   :  { %4604 = vmatpush2.bf16.msra.mxu1 %v9145_v10  ;;  %v173_v48 = vld [vmem:[%s15614_s1 + $0x278] sm:$0xff]  ;;  %v3658_v22 = vpop.f32.mrf.mxu0 }
 0x1bc   :  { %4605 = vmatprep.subr.bf16.mxu1 %v9138_v4  ;;  %v10304_v54 = vld [vmem:[%s15615_s0 + $0x160] ss:$28 sps:$4 sm:$0xff]   ;;  %v12722_v0 = vadd.f32 %v3767_v8, %v3655_v9  ;;  %v3659_v10 = vadd.f32 %v3658_v22, %v12334_v36  ;;  %v3771_v20 = vpop.f32.mrf.mxu1  ;;  %4493 = vmatpush2.bf16.msra.mxu0 %v9009_v21  ;;  %v8994_v6 = vcombine.high %v169_v16, %v173_v48 }
 0x1bd   :  { %4335 = vmatmul.mubr.bf16.gmra.mxu0 %v10304_v54  ;;  %v297_v43 = vld [vmem:[%s15614_s1 + $0x658] sm:$0xff]  ;;  %v3660_v2 = vpop.f32.mrf.mxu0  ;;  %4494 = vmatprep.subr.bf16.mxu0 %v9002_v26 }
 0x1be   :  { %v301_v4 = vld [vmem:[%s15614_s1 + $0x678] sm:$0xff]  ;;  %4448 = vmatmul.mubr.bf16.gmra.mxu1 %v10305_v32  ;;  %v12728_v54 = vadd.f32 %v3771_v20, %v3659_v10  ;;  %v3661_v9 = vadd.f32 %v3660_v2, %v12393_v24  ;;  %v3773_v8 = vpop.f32.mrf.mxu1  ;;  %v8993_v10 = vcombine.low %v169_v16, %v173_v48 }
 0x1bf   :  { %4606 = vmatpush2.bf16.msra.mxu1 %v9137_v41  ;;  %v10306_v22 = vld [vmem:[%s15615_s0 + $0x19c] ss:$28 sps:$4 sm:$0xff]   ;;  %v9122_v55 = vcombine.high %v297_v43, %v301_v4  ;;  %v3662_v57 = vpop.f32.mrf.mxu0  ;;  %4457 = vmatprep.mubr.bf16.mxu1 %v15690_v25  ;;  %v9121_v32 = vcombine.low %v297_v43, %v301_v4 }
 0x1c0   :  { %4607 = vmatprep.subr.bf16.mxu1 %v9130_v44  ;;  %4344 = vmatprep.mubr.bf16.mxu0 %v10306_v22  ;;  %v161_v45 = vld [vmem:[%s15614_s1 + $0x218] sm:$0xff]  ;;  %v12747_v21 = vadd.f32 %v3773_v8, %v3661_v9  ;;  %v3663_v41 = vadd.f32 %v3662_v57, %v12334_v36  ;;  %v3775_v26 = vpop.f32.mrf.mxu1 }
 0x1c1   :  { %v165_v62 = vld [vmem:[%s15614_s1 + $0x238] sm:$0xff]  ;;  %4495 = vmatpush2.bf16.msra.mxu0 %v9001_v14  ;;  %v3664_v20 = vpop.f32.mrf.mxu0 }
 0x1c2   :  { %v289_v44 = vld [vmem:[%s15614_s1 + $0x618] sm:$0xff]  ;;  %4496 = vmatprep.subr.bf16.mxu0 %v8994_v6  ;;  %v8986_v2 = vcombine.high %v161_v45, %v165_v62  ;;  %v12750_v22 = vadd.f32 %v3775_v26, %v3663_v41  ;;  %v3665_v33 = vadd.f32 %v3664_v20, %v12393_v24  ;;  %v3777_v60 = vpop.f32.mrf.mxu1  ;;  %v8985_v57 = vcombine.low %v161_v45, %v165_v62  ;;  %v10309_v62 = vld [vmem:[%s15615_s0 + $0x4] ss:$28 sps:$4 sm:$0xff]  }
 0x1c3   :  { %v293_v38 = vld [vmem:[%s15614_s1 + $0x638] sm:$0xff]  ;;  %4608 = vmatpush2.bf16.msra.mxu1 %v9129_v29  ;;  %v3668_v48 = vpop.f32.mrf.mxu0 }
 0x1c4   :  { %4609 = vmatprep.subr.bf16.mxu1 %v9122_v55  ;;  %v9114_v3 = vcombine.high %v289_v44, %v293_v38  ;;  %v409_v9 = vld [vmem:[%s15614_s1 + $0x9d8] sm:$0xff]  ;;  %v12768_v14 = vadd.f32 %v3777_v60, %v3665_v33  ;;  %v3669_v29 = vadd.f32 %v3668_v48, %v12334_v36  ;;  %v3781_v6 = vpop.f32.mrf.mxu1  ;;  %v9113_v26 = vcombine.low %v289_v44, %v293_v38 }
 0x1c5   :  { %v413_v16 = vld [vmem:[%s15614_s1 + $0x9f8] sm:$0xff]  ;;  %4497 = vmatpush2.bf16.msra.mxu0 %v8993_v10  ;;  %v3670_v60 = vpop.f32.mrf.mxu0 }
 0x1c6   :  { %v10307_v43 = vld [vmem:[%s15615_s0 + $0x198] ss:$28 sps:$4 sm:$0xff]   ;;  %v10308_v8 = vld [vmem:[%s15615_s0 + $0x1a0] ss:$28 sps:$4 sm:$0xff]   ;;  %4498 = vmatprep.subr.bf16.mxu0 %v8986_v2  ;;  %v9234_v20 = vcombine.high %v409_v9, %v413_v16  ;;  %v12784_v48 = vadd.f32 %v3781_v6, %v3669_v29  ;;  %v3671_v10 = vadd.f32 %v3670_v60, %v12393_v24  ;;  %v3783_v45 = vpop.f32.mrf.mxu1 }
 0x1c7   :  { %4345 = vmatmul.mubr.bf16.gmra.mxu0 %v10307_v43  ;;  %v537_v4 = vld [vmem:[%s15614_s1 + $0xdd8] sm:$0xff]  ;;  %4458 = vmatmul.mubr.bf16.gmra.mxu1 %v10308_v8  ;;  %v3672_v38 = vpop.f32.mrf.mxu0  ;;  %v9233_v8 = vcombine.low %v409_v9, %v413_v16 }
 0x1c8   :  { %v541_v55 = vld [vmem:[%s15614_s1 + $0xdf8] sm:$0xff]  ;;  %4610 = vmatpush2.bf16.msra.mxu1 %v9121_v32  ;;  %4500 = vmatprep.mubr.bf16.mxu0 %v10309_v62  ;;  %v12801_v2 = vadd.f32 %v3783_v45, %v3671_v10  ;;  %v3673_v29 = vadd.f32 %v3672_v38, %v12334_v36  ;;  %v3785_v6 = vpop.f32.mrf.mxu1  ;;  %v10312_v38 = vld [vmem:[%s15615_s0 + $0x8] ss:$28 sps:$4 sm:$0xff]  }
 0x1c9   :  { %v12777_v41 = vld [vmem:[%s15614_s1 + $0x998] sm:$0xff]  ;;  %4611 = vmatprep.subr.bf16.mxu1 %v9114_v3  ;;  %v9362_v43 = vcombine.high %v537_v4, %v541_v55  ;;  %v10310_v3 = vld [vmem:[%s15615_s0 + $0xc] ss:$28 sps:$4 sm:$0xff]   ;;  %4499 = vmatpush2.bf16.msra.mxu0 %v8985_v57  ;;  %v3674_v60 = vpop.f32.mrf.mxu0  ;;  %v9361_v62 = vcombine.low %v537_v4, %v541_v55 }
 0x1ca   :  { %v12782_v33 = vld [vmem:[%s15614_s1 + $0x9b8] sm:$0xff]  ;;  %4613 = vmatprep.mubr.bf16.mxu1 %v10310_v3  ;;  %4694 = vmatprep.subr.bf16.mxu0 %v9234_v20  ;;  %v12816_v36 = vadd.f32 %v3785_v6, %v3673_v29  ;;  %v3675_v9 = vadd.f32 %v3674_v60, %v12393_v24  ;;  %v3787_v16 = vpop.f32.mrf.mxu1 }
 0x1cb   :  { %v12793_v32 = vld [vmem:[%s15614_s1 + $0xd98] sm:$0xff]  ;;  %v9226_v47 = vcombine.high %v12777_v41, %v12782_v33  ;;  %v3824_v57 = vpop.f32.mrf.mxu0  ;;  %v9225_v3 = vcombine.low %v12777_v41, %v12782_v33 }
 0x1cc   :  { %v533_v44 = vld [vmem:[%s15614_s1 + $0xdb8] sm:$0xff]  ;;  %4612 = vmatpush2.bf16.msra.mxu1 %v9113_v26  ;;  %v12833_v20 = vadd.f32 %v3787_v16, %v3675_v9  ;;  %v3825_v45 = vadd.f32 %v3824_v57, %v12440_v37 }
 0x1cd   :  { %v12814_v10 = vld [vmem:[%s15614_s1 + $0x978] sm:$0xff]  ;;  %4807 = vmatprep.subr.bf16.mxu1 %v9362_v43  ;;  %v9354_v24 = vcombine.high %v12793_v32, %v533_v44  ;;  %v3937_v43 = vpop.f32.mrf.mxu1  ;;  %v3826_v6 = vpop.f32.mrf.mxu0  ;;  %v9353_v60 = vcombine.low %v12793_v32, %v533_v44 }
 0x1ce   :  { %v12822_v4 = vld [vmem:[%s15614_s1 + $0xd58] sm:$0xff]  ;;  %v9218_v37 = vcombine.high %v12809_v23, %v12814_v10  ;;  %v3938_v9 = vadd.f32 %v3937_v43, %v3825_v45  ;;  %v3827_v41 = vadd.f32 %v3826_v6, %v12461_v42  ;;  %v9217_v6 = vcombine.low %v12809_v23, %v12814_v10 }
 0x1cf   :  { %v12827_v55 = vld [vmem:[%s15614_s1 + $0xd78] sm:$0xff]  ;;  %4614 = vmatmul.mubr.bf16.vlgmr.msra.gmra.mxu1 %v10312_v38  ;;  %v3939_v33 = vpop.f32.mrf.mxu1 }
 0x1d0   :  { %v10311_v26 = vld [vmem:[%s15615_s0] ss:$28 sps:$4 sm:$0xff]   ;;  %4808 = vmatpush1.bf16.msra.mxu1 %v9361_v62  ;;  %v9346_v44 = vcombine.high %v12822_v4, %v12827_v55  ;;  %v12883_v45 = vadd.f32 %v3939_v33, %v3827_v41  ;;  %vm4922_vm0 = vcmp.gt.f32.partialorder %v3938_v9, 0.0 }
 0x1d1   :  { %4501 = vmatmul.mubr.bf16.vlgmr.msra.gmra.mxu0 %v10311_v26  ;;  %v12844_v29 = vld [vmem:[%s15614_s1 + $0x918] sm:$0xff]  ;;  %v3828_v26 = vpop.f32.mrf.mxu0  ;;  %4809 = vmatprep.subr.bf16.mxu1 %v9354_v24  ;;  %v3941_v38 = vpop.f32.mrf.mxu1  ;;  %v9345_v24 = vcombine.low %v12822_v4, %v12827_v55 }
 0x1d2   :  { %4695 = vmatpush1.bf16.msra.mxu0 %v9233_v8  ;;  %v12852_v8 = vld [vmem:[%s15614_s1 + $0x938] sm:$0xff]  ;;  %v3829_v43 = vadd.f32 %v3828_v26, %v12472_v7  ;;  %vm4923_vm2 = vcmp.gt.f32.partialorder %v12883_v45, 0.0 }
 0x1d3   :  { %4696 = vmatprep.subr.bf16.mxu0 %v9226_v47  ;;  %v10313_v16 = vld [vmem:[%s15615_s0 + $0x3c] ss:$28 sps:$4 sm:$0xff]   ;;  %v10314_v47 = vld [vmem:[%s15615_s0 + $0x44] ss:$28 sps:$4 sm:$0xff]   ;;  %v9210_v61 = vcombine.high %v12844_v29, %v12852_v8  ;;  %v3943_v59 = vpop.f32.mrf.mxu1  ;;  %v9209_v4 = vcombine.low %v12844_v29, %v12852_v8 }
 0x1d4   :  { %4510 = vmatprep.mubr.bf16.mxu0 %v10313_v16  ;;  %4623 = vmatprep.mubr.bf16.mxu1 %v10314_v47  ;;  %v12864_v32 = vld [vmem:[%s15614_s1 + $0x8d8] sm:$0xff]  ;;  %v5050_v16 = vmul.f32 0.2, %v3938_v9  ;;  %v3830_v47 = vpop.f32.mrf.mxu0  ;;  %v3942_v13 = vadd.f32 %v3941_v38, %v3829_v43 }
 0x1d5   :  { %v12869_v42 = vld [vmem:[%s15614_s1 + $0x8f8] sm:$0xff]  ;;  %4810 = vmatpush1.bf16.msra.mxu1 %v9353_v60  ;;  %v3831_v10 = vadd.f32 %v3830_v47, %v12492_v19  ;;  %v3947_v8 = vpop.f32.mrf.mxu1 }
 0x1d6   :  { %v12876_v62 = vld [vmem:[%s15614_s1 + $0xd18] sm:$0xff]  ;;  %4697 = vmatpush1.bf16.msra.mxu0 %v9225_v3  ;;  %4811 = vmatprep.subr.bf16.mxu1 %v9346_v44  ;;  %v3834_v3 = vpop.f32.mrf.mxu0  ;;  %v9202_v55 = vcombine.high %v12864_v32, %v12869_v42  ;;  %vm4930_vm1 = vcmp.gt.f32.partialorder %v3942_v13, 0.0  ;;  %v5058_v33 = vmul.f32 0.2, %v3942_v13  ;;  %v5178_v38 = vsel %vm4922_vm0, %v3938_v9, %v5050_v16 }
 0x1d7   :  { %v12881_v57 = vld [vmem:[%s15614_s1 + $0xd38] sm:$0xff]  ;;  %4698 = vmatprep.subr.bf16.mxu0 %v9218_v37  ;;  %v3835_v29 = vadd.f32 %v3834_v3, %v12498_v1  ;;  %v3944_v47 = vadd.f32 %v3943_v59, %v3831_v10 }
 0x1d8   :  { %v12895_v7 = vld [vmem:[%s15614_s1 + $0xcd8] sm:$0xff]  ;;  %v9338_v41 = vcombine.high %v12876_v62, %v12881_v57  ;;  %v9337_v1 = vcombine.low %v12876_v62, %v12881_v57  ;;  %v3836_v3 = vpop.f32.mrf.mxu0  ;;  %v5186_v27 = vsel %vm4930_vm1, %v3942_v13, %v5058_v33  ;;  %v3949_v57 = vpop.f32.mrf.mxu1 }
 0x1d9   :  { %v12900_v23 = vld [vmem:[%s15614_s1 + $0xcf8] sm:$0xff]  ;;  %v3948_v49 = vadd.f32 %v3947_v8, %v3835_v29  ;;  %v3837_v62 = vadd.f32 %v3836_v3, %v12517_v50  ;;  %4812 = vmatpush1.bf16.msra.mxu1 %v9345_v24  ;;  %v12956_v9 = vpack.c.bf16 %v5186_v27, %v5178_v38  ;;  %vm4931_vm3 = vcmp.gt.f32.partialorder %v3944_v47, 0.0 }
 0x1da   :  { %v10315_v37 = vld [vmem:[%s15615_s0 + $0x38] ss:$28 sps:$4 sm:$0xff]   ;;  %v10316_v44 = vld [vmem:[%s15615_s0 + $0x40] ss:$28 sps:$4 sm:$0xff]   ;;  %4699 = vmatpush1.bf16.msra.mxu0 %v9217_v6  ;;  %v5059_v13 = vmul.f32 0.2, %v3944_v47  ;;  %v3838_v16 = vpop.f32.mrf.mxu0  ;;  %4813 = vmatprep.subr.bf16.mxu1 %v9338_v41  ;;  %v3951_v33 = vpop.f32.mrf.mxu1  ;;  %v9201_v29 = vcombine.low %v12864_v32, %v12869_v42  ;;  %v9329_v32 = vcombine.low %v12895_v7, %v12900_v23 }
 0x1db   :  { %4511 = vmatmul.mubr.bf16.gmra.mxu0 %v10315_v37  ;;  %v12913_v60 = vld [vmem:[%s15614_s1 + $0x898] sm:$0xff]  ;;  %4624 = vmatmul.mubr.bf16.gmra.mxu1 %v10316_v44  ;;  %v10317_v6 = vld [vmem:[%s15615_s0 + $0x74] ss:$28 sps:$4 sm:$0xff]   ;;  %v9330_v37 = vcombine.high %v12895_v7, %v12900_v23  ;;  %v5051_v44 = vmul.f32 0.2, %v12883_v45  ;;  %15718 = vst [vmem:[#allocation21_spill] sm:$0xff] %v12956_v9  ;;  %v12963_v10 = vadd.f32 %v3949_v57, %v3837_v62 }
 0x1dc   :  { %v12918_v19 = vld [vmem:[%s15614_s1 + $0x8b8] sm:$0xff]  ;;  %4700 = vmatprep.subr.bf16.mxu0 %v9210_v61  ;;  %4520 = vmatprep.mubr.bf16.mxu0 %v10317_v6  ;;  %v3839_v24 = vadd.f32 %v3838_v16, %v12520_v12  ;;  %v5066_v8 = vmul.f32 0.2, %v3948_v49  ;;  %v3840_v38 = vpop.f32.mrf.mxu0  ;;  %v5187_v6 = vsel %vm4931_vm3, %v3944_v47, %v5059_v13  ;;  %vm4938_vm4 = vcmp.gt.f32.partialorder %v3948_v49, 0.0  ;;  %v10319_v7 = vld [vmem:[%s15615_s0 + $0x70] ss:$28 sps:$4 sm:$0xff]  }
 0x1dd   :  { %v12929_v26 = vld [vmem:[%s15614_s1 + $0x858] sm:$0xff]  ;;  %v9193_v27 = vcombine.low %v12913_v60, %v12918_v19  ;;  %v9194_v41 = vcombine.high %v12913_v60, %v12918_v19  ;;  %4814 = vmatpush1.bf16.msra.mxu1 %v9337_v1  ;;  %v5179_v60 = vsel %vm4923_vm2, %v12883_v45, %v5051_v44  ;;  %v3841_v19 = vadd.f32 %v3840_v38, %v12538_v39 }
 0x1de   :  { %v12934_v43 = vld [vmem:[%s15614_s1 + $0x878] sm:$0xff]  ;;  %4701 = vmatpush1.bf16.msra.mxu0 %v9209_v4  ;;  %v3952_v12 = vadd.f32 %v3951_v33, %v3839_v24  ;;  %v3953_v4 = vpop.f32.mrf.mxu1  ;;  %v3844_v1 = vpop.f32.mrf.mxu0  ;;  %4815 = vmatprep.subr.bf16.mxu1 %v9330_v37  ;;  %v12996_v47 = vpack.c.bf16 %v5187_v6, %v5179_v60  ;;  %v5194_v44 = vsel %vm4938_vm4, %v3948_v49, %v5066_v8  ;;  %v10321_v24 = vld [vmem:[%s15615_s0 + $0xac] ss:$28 sps:$4 sm:$0xff]   ;;  %v10322_v49 = vld [vmem:[%s15615_s0 + $0xb4] ss:$28 sps:$4 sm:$0xff]   ;;  %vm4939_vm6 = vcmp.gt.f32.partialorder %v12963_v10, 0.0 }
 0x1df   :  { %v10318_v59 = vld [vmem:[%s15615_s0 + $0x7c] ss:$28 sps:$4 sm:$0xff]   ;;  %4702 = vmatprep.subr.bf16.mxu0 %v9202_v55  ;;  %v9186_v3 = vcombine.high %v12929_v26, %v12934_v43  ;;  %v3845_v57 = vadd.f32 %v3844_v1, %v12544_v5  ;;  %v3954_v13 = vadd.f32 %v3953_v4, %v3841_v19 }
 0x1e0   :  { %4633 = vmatprep.mubr.bf16.mxu1 %v10318_v59  ;;  %v12953_v61 = vld [vmem:[%s15614_s1 + $0xc98] sm:$0xff]  ;;  %15719 = vst [vmem:[#allocation22_spill] sm:$0xff] %v12996_v47  ;;  %vm4946_vm5 = vcmp.gt.f32.partialorder %v3952_v12, 0.0  ;;  %v5074_v62 = vmul.f32 0.2, %v3952_v12  ;;  %v3957_v59 = vpop.f32.mrf.mxu1  ;;  %v3846_v16 = vpop.f32.mrf.mxu0 }
 0x1e1   :  { %v12961_v50 = vld [vmem:[%s15614_s1 + $0xcb8] sm:$0xff]  ;;  %v3958_v6 = vadd.f32 %v3957_v59, %v3845_v57  ;;  %4816 = vmatpush1.bf16.msra.mxu1 %v9329_v32  ;;  %vm4947_vm7 = vcmp.gt.f32.partialorder %v3954_v13, 0.0 }
 0x1e2   :  { %v12980_v42 = vld [vmem:[%s15614_s1 + $0xc58] sm:$0xff]  ;;  %v9322_v23 = vcombine.high %v12953_v61, %v12961_v50  ;;  %4703 = vmatpush1.bf16.msra.mxu0 %v9201_v29  ;;  %v9321_v5 = vcombine.low %v12953_v61, %v12961_v50  ;;  %v5067_v29 = vmul.f32 0.2, %v12963_v10  ;;  %v5202_v38 = vsel %vm4946_vm5, %v3952_v12, %v5074_v62  ;;  %v3959_v50 = vpop.f32.mrf.mxu1  ;;  %v3848_v4 = vpop.f32.mrf.mxu0 }
 0x1e3   :  { %v12985_v55 = vld [vmem:[%s15614_s1 + $0xc78] sm:$0xff]  ;;  %4521 = vmatmul.mubr.bf16.gmra.mxu0 %v10319_v7  ;;  %4704 = vmatprep.subr.bf16.mxu0 %v9194_v41  ;;  %v3847_v61 = vadd.f32 %v3846_v16, %v12563_v11  ;;  %v13032_v41 = vpack.c.bf16 %v5202_v38, %v5194_v44  ;;  %v5075_v12 = vmul.f32 0.2, %v3954_v13  ;;  %v3849_v1 = vadd.f32 %v3848_v4, %v12566_v34 }
 0x1e4   :  { %v10320_v39 = vld [vmem:[%s15615_s0 + $0x78] ss:$28 sps:$4 sm:$0xff]   ;;  %4530 = vmatprep.mubr.bf16.mxu0 %v10321_v24  ;;  %v9314_v33 = vcombine.high %v12980_v42, %v12985_v55  ;;  %4817 = vmatprep.subr.bf16.mxu1 %v9322_v23  ;;  %v3961_v7 = vpop.f32.mrf.mxu1  ;;  %v9185_v62 = vcombine.low %v12929_v26, %v12934_v43  ;;  %v5082_v57 = vmul.f32 0.2, %v3958_v6  ;;  %v3850_v59 = vpop.f32.mrf.mxu0  ;;  %vm4954_vm8 = vcmp.gt.f32.partialorder %v3958_v6, 0.0 }
 0x1e5   :  { %4634 = vmatmul.mubr.bf16.gmra.mxu1 %v10320_v39  ;;  %v13005_v45 = vld [vmem:[%s15614_s1 + $0x818] sm:$0xff]  ;;  %15720 = vst [vmem:[#allocation23_spill] sm:$0xff] %v13032_v41  ;;  %v13049_v19 = vadd.f32 %v3959_v50, %v3847_v61  ;;  %v5203_v44 = vsel %vm4947_vm7, %v3954_v13, %v5075_v12  ;;  %v3962_v16 = vadd.f32 %v3961_v7, %v3849_v1  ;;  %v10325_v61 = vld [vmem:[%s15615_s0 + $0xe4] ss:$28 sps:$4 sm:$0xff]  }
 0x1e6   :  { %v13010_v37 = vld [vmem:[%s15614_s1 + $0x838] sm:$0xff]  ;;  %4643 = vmatprep.mubr.bf16.mxu1 %v10322_v49  ;;  %4705 = vmatpush1.bf16.msra.mxu0 %v9193_v27  ;;  %v3963_v24 = vpop.f32.mrf.mxu1  ;;  %v9313_v34 = vcombine.low %v12980_v42, %v12985_v55  ;;  %v5195_v26 = vsel %vm4939_vm6, %v12963_v10, %v5067_v29  ;;  %v3851_v43 = vadd.f32 %v3850_v59, %v12584_v56  ;;  %v3854_v27 = vpop.f32.mrf.mxu0  ;;  %v10324_v56 = vld [vmem:[%s15615_s0 + $0xb0] ss:$28 sps:$4 sm:$0xff]  }
 0x1e7   :  { %v13029_v8 = vld [vmem:[%s15614_s1 + $0xc18] sm:$0xff]  ;;  %4706 = vmatprep.subr.bf16.mxu0 %v9186_v3  ;;  %v9177_v23 = vcombine.low %v13005_v45, %v13010_v37  ;;  %v9178_v39 = vcombine.high %v13005_v45, %v13010_v37  ;;  %4818 = vmatpush1.bf16.msra.mxu1 %v9321_v5  ;;  %v10323_v3 = vld [vmem:[%s15615_s0 + $0xa8] ss:$28 sps:$4 sm:$0xff]   ;;  %v13070_v37 = vpack.c.bf16 %v5203_v44, %v5195_v26  ;;  %vm4962_vm9 = vcmp.gt.f32.partialorder %v3962_v16, 0.0 }
 0x1e8   :  { %v13037_v11 = vld [vmem:[%s15614_s1 + $0xbd8] sm:$0xff]  ;;  %4819 = vmatprep.subr.bf16.mxu1 %v9314_v33  ;;  %v5090_v42 = vmul.f32 0.2, %v3962_v16  ;;  %v3855_v55 = vadd.f32 %v3854_v27, %v12590_v51  ;;  %v3967_v5 = vpop.f32.mrf.mxu1  ;;  %v5210_v51 = vsel %vm4954_vm8, %v3958_v6, %v5082_v57  ;;  %v3964_v29 = vadd.f32 %v3963_v24, %v3851_v43  ;;  %v3856_v38 = vpop.f32.mrf.mxu0  ;;  %v10326_v6 = vld [vmem:[%s15615_s0 + $0xec] ss:$28 sps:$4 sm:$0xff]  }
 0x1e9   :  { %v13042_v32 = vld [vmem:[%s15614_s1 + $0xbf8] sm:$0xff]  ;;  %15721 = vst [vmem:[#allocation24_spill] sm:$0xff] %v13070_v37  ;;  %v5083_v49 = vmul.f32 0.2, %v13049_v19  ;;  %v3857_v1 = vadd.f32 %v3856_v38, %v12609_v35  ;;  %vm4955_vm10 = vcmp.gt.f32.partialorder %v13049_v19, 0.0 }
 0x1ea   :  { %v13047_v60 = vld [vmem:[%s15614_s1 + $0xc38] sm:$0xff]  ;;  %4707 = vmatpush1.bf16.msra.mxu0 %v9185_v62  ;;  %v9298_v10 = vcombine.high %v13037_v11, %v13042_v32  ;;  %v5218_v12 = vsel %vm4962_vm9, %v3962_v16, %v5090_v42  ;;  %v3968_v4 = vadd.f32 %v3967_v5, %v3855_v55  ;;  %v3969_v7 = vpop.f32.mrf.mxu1  ;;  %v9769_v62 = vld [vmem:[%s15617_s3 + $0x2e4] ss:$16 sps:$4 sm:$0xff]   ;;  %vm4963_vm11 = vcmp.gt.f32.partialorder %v3964_v29, 0.0  ;;  %v3858_v57 = vpop.f32.mrf.mxu0 }
 0x1eb   :  { %4531 = vmatmul.mubr.bf16.gmra.mxu0 %v10323_v3  ;;  %v9306_v45 = vcombine.high %v13029_v8, %v13047_v60  ;;  %v13081_v13 = vld [vmem:[%s15614_s1 + $0xb98] sm:$0xff]  ;;  %4708 = vmatprep.subr.bf16.mxu0 %v9178_v39  ;;  %v9305_v50 = vcombine.low %v13029_v8, %v13047_v60  ;;  %v13104_v8 = vpack.c.bf16 %v5218_v12, %v5210_v51  ;;  %v5091_v60 = vmul.f32 0.2, %v3964_v29 }
 0x1ec   :  { %v13086_v33 = vld [vmem:[%s15614_s1 + $0xbb8] sm:$0xff]  ;;  %4540 = vmatprep.mubr.bf16.mxu0 %v10325_v61  ;;  %4820 = vmatpush1.bf16.msra.mxu1 %v9313_v34  ;;  %v13106_v35 = vadd.f32 %v3969_v7, %v3857_v1  ;;  %v3859_v59 = vadd.f32 %v3858_v57, %v12612_v52  ;;  %v3971_v39 = vpop.f32.mrf.mxu1  ;;  %v9297_v44 = vcombine.low %v13037_v11, %v13042_v32  ;;  %v5098_v16 = vmul.f32 0.2, %v3968_v4  ;;  %v3860_v24 = vpop.f32.mrf.mxu0 }
 0x1ed   :  { %4644 = vmatmul.mubr.bf16.gmra.mxu1 %v10324_v56  ;;  %15722 = vst [vmem:[#allocation25_spill] sm:$0xff] %v13104_v8  ;;  %4821 = vmatprep.subr.bf16.mxu1 %v9306_v45  ;;  %v9290_v34 = vcombine.high %v13081_v13, %v13086_v33  ;;  %v5219_v26 = vsel %vm4963_vm11, %v3964_v29, %v5091_v60  ;;  %vm4970_vm12 = vcmp.gt.f32.partialorder %v3968_v4, 0.0  ;;  %v13116_v3 = vld [vmem:[%s15614_s1 + $0xb58] sm:$0xff] }
 0x1ee   :  { %4653 = vmatprep.mubr.bf16.mxu1 %v10326_v6  ;;  %4709 = vmatpush1.bf16.msra.mxu0 %v9177_v23  ;;  %v3972_v43 = vadd.f32 %v3971_v39, %v3859_v59  ;;  %v3973_v27 = vpop.f32.mrf.mxu1  ;;  %v13121_v52 = vld [vmem:[%s15614_s1 + $0xb78] sm:$0xff]  ;;  %v5211_v11 = vsel %vm4955_vm10, %v13049_v19, %v5083_v49  ;;  %v3861_v32 = vadd.f32 %v3860_v24, %v12630_v31  ;;  %v3864_v23 = vpop.f32.mrf.mxu0  ;;  %v10328_v19 = vld [vmem:[%s15615_s0 + $0xe8] ss:$28 sps:$4 sm:$0xff]   ;;  %vm4971_vm14 = vcmp.gt.f32.partialorder %v13106_v35, 0.0 }
 0x1ef   :  { %4710 = vmatprep.subr.bf16.mxu0 %v9298_v10  ;;  %v10327_v45 = vld [vmem:[%s15615_s0 + $0xe0] ss:$28 sps:$4 sm:$0xff]   ;;  %v13130_v42 = vpack.c.bf16 %v5219_v26, %v5211_v11  ;;  %v3865_v5 = vadd.f32 %v3864_v23, %v12636_v17  ;;  %v9289_v31 = vcombine.low %v13081_v13, %v13086_v33  ;;  %v5226_v51 = vsel %vm4970_vm12, %v3968_v4, %v5098_v16  ;;  %v10331_v11 = vld [vmem:[%s15615_s0 + $0x118] ss:$28 sps:$4 sm:$0xff]  }
 0x1f0   :  { %4822 = vmatpush1.bf16.msra.mxu1 %v9305_v50  ;;  %vm4978_vm13 = vcmp.gt.f32.partialorder %v3972_v43, 0.0  ;;  %v5106_v55 = vmul.f32 0.2, %v3972_v43  ;;  %v3977_v56 = vpop.f32.mrf.mxu1  ;;  %v13141_v10 = vld [vmem:[%s15614_s1 + $0xb18] sm:$0xff]  ;;  %v3974_v29 = vadd.f32 %v3973_v27, %v3861_v32  ;;  %v3866_v38 = vpop.f32.mrf.mxu0  ;;  %v9282_v61 = vcombine.high %v13116_v3, %v13121_v52  ;;  %v10330_v4 = vld [vmem:[%s15615_s0 + $0x124] ss:$28 sps:$4 sm:$0xff]  }
 0x1f1   :  { %7039 = vmatprep.subr.bf16.mxu1 %v9769_v62  ;;  %15723 = vst [vmem:[#allocation26_spill] sm:$0xff] %v13130_v42  ;;  %v10329_v17 = vld [vmem:[%s15615_s0 + $0x11c] ss:$28 sps:$4 sm:$0xff]   ;;  %v5099_v13 = vmul.f32 0.2, %v13106_v35  ;;  %v3978_v50 = vadd.f32 %v3977_v56, %v3865_v5  ;;  %v3867_v49 = vadd.f32 %v3866_v38, %v12655_v28  ;;  %v9281_v59 = vcombine.low %v13116_v3, %v13121_v52 }
 0x1f2   :  { %4711 = vmatpush2.bf16.msra.mxu0 %v9297_v44  ;;  %v5234_v33 = vsel %vm4978_vm13, %v3972_v43, %v5106_v55  ;;  %v3979_v12 = vpop.f32.mrf.mxu1  ;;  %v453_v1 = vld [vmem:[%s15614_s1 + $0xb38] sm:$0xff]  ;;  %vm4979_vm15 = vcmp.gt.f32.partialorder %v3974_v29, 0.0  ;;  %v5107_v6 = vmul.f32 0.2, %v3974_v29  ;;  %v3868_v62 = vpop.f32.mrf.mxu0 }
 0x1f3   :  { %4541 = vmatmul.mubr.bf16.gmra.mxu0 %v10327_v45  ;;  %4712 = vmatprep.subr.bf16.mxu0 %v9290_v34  ;;  %v13159_v7 = vpack.c.bf16 %v5234_v33, %v5226_v51  ;;  %v13161_v60 = vadd.f32 %v3979_v12, %v3867_v49  ;;  %v3869_v28 = vadd.f32 %v3868_v62, %v12658_v15  ;;  %v5114_v39 = vmul.f32 0.2, %v3978_v50  ;;  %v13170_v43 = vld [vmem:[%s15614_s1 + $0xad8] sm:$0xff] }
 0x1f4   :  { %4550 = vmatprep.mubr.bf16.mxu0 %v10329_v17  ;;  %v3981_v57 = vpop.f32.mrf.mxu1  ;;  %v3870_v44 = vpop.f32.mrf.mxu0  ;;  %v9274_v16 = vcombine.high %v13141_v10, %v453_v1  ;;  %v5235_v24 = vsel %vm4979_vm15, %v3974_v29, %v5107_v6  ;;  %vm4986_vm0 = vcmp.gt.f32.partialorder %v3978_v50, 0.0  ;;  %v13175_v15 = vld [vmem:[%s15614_s1 + $0xaf8] sm:$0xff]  ;;  %v5227_v27 = vsel %vm4971_vm14, %v13106_v35, %v5099_v13 }
 0x1f5   :  { %4654 = vmatmul.mubr.bf16.gmra.mxu1 %v10328_v19  ;;  %15724 = vst [vmem:[#allocation27_spill] sm:$0xff] %v13159_v7  ;;  %v3982_v34 = vadd.f32 %v3981_v57, %v3869_v28  ;;  %v3871_v3 = vadd.f32 %v3870_v44, %v12676_v40  ;;  %v13184_v32 = vpack.c.bf16 %v5235_v24, %v5227_v27  ;;  %v10332_v5 = vld [vmem:[%s15615_s0 + $0x120] ss:$28 sps:$4 sm:$0xff]   ;;  %vm4987_vm2 = vcmp.gt.f32.partialorder %v13161_v60, 0.0 }
 0x1f6   :  { %4663 = vmatprep.mubr.bf16.mxu1 %v10330_v4  ;;  %4713 = vmatpush2.bf16.msra.mxu0 %v9289_v31  ;;  %v3983_v26 = vpop.f32.mrf.mxu1  ;;  %v3874_v52 = vpop.f32.mrf.mxu0  ;;  %v9273_v40 = vcombine.low %v13141_v10, %v453_v1  ;;  %v13194_v35 = vld [vmem:[%s15614_s1 + $0xa98] sm:$0xff]  ;;  %v5242_v56 = vsel %vm4986_vm0, %v3978_v50, %v5114_v39  ;;  %v9266_v51 = vcombine.high %v13170_v43, %v13175_v15  ;;  %v5115_v10 = vmul.f32 0.2, %v13161_v60 }
 0x1f7   :  { %4714 = vmatprep.subr.bf16.mxu0 %v9282_v61  ;;  %15725 = vst [vmem:[#allocation28_spill] sm:$0xff] %v13184_v32  ;;  %vm4994_vm1 = vcmp.gt.f32.partialorder %v3982_v34, 0.0  ;;  %v5122_v23 = vmul.f32 0.2, %v3982_v34  ;;  %v3875_v45 = vadd.f32 %v3874_v52, %v12682_v46  ;;  %v3984_v19 = vadd.f32 %v3983_v26, %v3871_v3  ;;  %v10333_v46 = vld [vmem:[%s15615_s0 + $0x154] ss:$28 sps:$4 sm:$0xff]  }
 0x1f8   :  { %v3987_v55 = vpop.f32.mrf.mxu1  ;;  %v3876_v31 = vpop.f32.mrf.mxu0  ;;  %v10334_v13 = vld [vmem:[%s15615_s0 + $0x15c] ss:$28 sps:$4 sm:$0xff]   ;;  %v9265_v6 = vcombine.low %v13170_v43, %v13175_v15  ;;  %v5243_v24 = vsel %vm4987_vm2, %v13161_v60, %v5115_v10  ;;  %v10335_v43 = vld [vmem:[%s15615_s0 + $0x150] ss:$28 sps:$4 sm:$0xff]  }
 0x1f9   :  { %v5250_v29 = vsel %vm4994_vm1, %v3982_v34, %v5122_v23  ;;  %v3988_v38 = vadd.f32 %v3987_v55, %v3875_v45  ;;  %v3877_v17 = vadd.f32 %v3876_v31, %v12701_v53  ;;  %v437_v33 = vld [vmem:[%s15614_s1 + $0xab8] sm:$0xff]  ;;  %vm4995_vm3 = vcmp.gt.f32.partialorder %v3984_v19, 0.0 }
 0x1fa   :  { %4715 = vmatpush2.bf16.msra.mxu0 %v9281_v59  ;;  %v3989_v61 = vpop.f32.mrf.mxu1  ;;  %v13212_v50 = vpack.c.bf16 %v5250_v29, %v5242_v56  ;;  %v5123_v49 = vmul.f32 0.2, %v3984_v19  ;;  %v3878_v12 = vpop.f32.mrf.mxu0  ;;  %v9258_v57 = vcombine.high %v13194_v35, %v437_v33  ;;  %v13245_v60 = vld [vmem:[%s15614_s1 + $0xa18] sm:$0xff] }
 0x1fb   :  { %4551 = vmatmul.mubr.bf16.gmra.mxu0 %v10331_v11  ;;  %4716 = vmatprep.subr.bf16.mxu0 %v9274_v16  ;;  %v13214_v4 = vadd.f32 %v3989_v61, %v3877_v17  ;;  %v3879_v53 = vadd.f32 %v3878_v12, %v12704_v30  ;;  %v5130_v62 = vmul.f32 0.2, %v3988_v38  ;;  %vm5002_vm4 = vcmp.gt.f32.partialorder %v3988_v38, 0.0  ;;  %v13223_v16 = vld [vmem:[%s15614_s1 + $0xa58] sm:$0xff] }
 0x1fc   :  { %4560 = vmatprep.mubr.bf16.mxu0 %v10333_v46  ;;  %15726 = vst [vmem:[#allocation29_spill] sm:$0xff] %v13212_v50  ;;  %v3991_v1 = vpop.f32.mrf.mxu1  ;;  %v3880_v28 = vpop.f32.mrf.mxu0  ;;  %v5251_v59 = vsel %vm4995_vm3, %v3984_v19, %v5123_v49  ;;  %v429_v30 = vld [vmem:[%s15614_s1 + $0xa78] sm:$0xff]  ;;  %v10338_v46 = vld [vmem:[%s15615_s0 + $0x194] ss:$28 sps:$4 sm:$0xff]  }
 0x1fd   :  { %4664 = vmatmul.mubr.bf16.gmra.mxu1 %v10332_v5  ;;  %v3992_v39 = vadd.f32 %v3991_v1, %v3879_v53  ;;  %v3881_v34 = vadd.f32 %v3880_v28, %v12722_v0  ;;  %v13235_v15 = vpack.c.bf16 %v5251_v59, %v5243_v24  ;;  %v10336_v11 = vld [vmem:[%s15615_s0 + $0x158] ss:$28 sps:$4 sm:$0xff]   ;;  %v9257_v0 = vcombine.low %v13194_v35, %v437_v33 }
 0x1fe   :  { %4673 = vmatprep.mubr.bf16.mxu1 %v10334_v13  ;;  %4717 = vmatpush2.bf16.msra.mxu0 %v9273_v40  ;;  %v3993_v44 = vpop.f32.mrf.mxu1  ;;  %v3884_v26 = vpop.f32.mrf.mxu0  ;;  %v5258_v23 = vsel %vm5002_vm4, %v3988_v38, %v5130_v62  ;;  %v9250_v5 = vcombine.high %v13223_v16, %v429_v30  ;;  %v5131_v40 = vmul.f32 0.2, %v13214_v4  ;;  %vm5003_vm6 = vcmp.gt.f32.partialorder %v13214_v4, 0.0 }
 0x1ff   :  { %4718 = vmatprep.subr.bf16.mxu0 %v9266_v51  ;;  %15727 = vst [vmem:[#allocation30_spill] sm:$0xff] %v13235_v15  ;;  %vm5010_vm5 = vcmp.gt.f32.partialorder %v3992_v39, 0.0  ;;  %v5138_v27 = vmul.f32 0.2, %v3992_v39  ;;  %v3885_v3 = vadd.f32 %v3884_v26, %v12728_v54  ;;  %v3994_v45 = vadd.f32 %v3993_v44, %v3881_v34  ;;  %v10337_v54 = vld [vmem:[%s15615_s0 + $0x18c] ss:$28 sps:$4 sm:$0xff]  }
 0x200   :  { %v3997_v52 = vpop.f32.mrf.mxu1  ;;  %v3886_v55 = vpop.f32.mrf.mxu0  ;;  %v421_v51 = vld [vmem:[%s15614_s1 + $0xa38] sm:$0xff]  ;;  %v9249_v13 = vcombine.low %v13223_v16, %v429_v30  ;;  %v5259_v62 = vsel %vm5003_vm6, %v13214_v4, %v5131_v40  ;;  %v10340_v4 = vld [vmem:[%s15615_s0 + $0x190] ss:$28 sps:$4 sm:$0xff]  }
 0x201   :  { %v5266_v35 = vsel %vm5010_vm5, %v3992_v39, %v5138_v27  ;;  %v3998_v56 = vadd.f32 %v3997_v52, %v3885_v3  ;;  %v3887_v19 = vadd.f32 %v3886_v55, %v12747_v21  ;;  %vm5011_vm7 = vcmp.gt.f32.partialorder %v3994_v45, 0.0 }
 0x202   :  { %4719 = vmatpush2.bf16.msra.mxu0 %v9265_v6  ;;  %v3999_v31 = vpop.f32.mrf.mxu1  ;;  %v13262_v10 = vpack.c.bf16 %v5266_v35, %v5258_v23  ;;  %v5139_v29 = vmul.f32 0.2, %v3994_v45  ;;  %v3888_v38 = vpop.f32.mrf.mxu0  ;;  %v9242_v12 = vcombine.high %v13245_v60, %v421_v51  ;;  %v9241_v59 = vcombine.low %v13245_v60, %v421_v51 }
 0x203   :  { %4561 = vmatmul.mubr.bf16.gmra.mxu0 %v10335_v43  ;;  %4720 = vmatprep.subr.bf16.mxu0 %v9258_v57  ;;  %v13264_v17 = vadd.f32 %v3999_v31, %v3887_v19  ;;  %v3889_v21 = vadd.f32 %v3888_v38, %v12750_v22  ;;  %v5146_v33 = vmul.f32 0.2, %v3998_v56  ;;  %vm5018_vm8 = vcmp.gt.f32.partialorder %v3998_v56, 0.0  ;;  %v10339_v57 = vld [vmem:[%s15615_s0 + $0x188] ss:$28 sps:$4 sm:$0xff]  }
 0x204   :  { %4570 = vmatprep.mubr.bf16.mxu0 %v10337_v54  ;;  %15728 = vst [vmem:[#allocation31_spill] sm:$0xff] %v13262_v10  ;;  %v4001_v61 = vpop.f32.mrf.mxu1  ;;  %v3890_v49 = vpop.f32.mrf.mxu0  ;;  %v5267_v53 = vsel %vm5011_vm7, %v3994_v45, %v5139_v29  ;;  %v10341_v43 = vld [vmem:[%s15615_s0 + $0x14] ss:$28 sps:$4 sm:$0xff]   ;;  %v566_v27 = vsub.s32 5, %v11460_v63 }
 0x205   :  { %4674 = vmatmul.mubr.bf16.gmra.mxu1 %v10336_v11  ;;  %v4002_v1 = vadd.f32 %v4001_v61, %v3889_v21  ;;  %v3891_v28 = vadd.f32 %v3890_v49, %v12768_v14  ;;  %v13277_v39 = vpack.c.bf16 %v5267_v53, %v5259_v62  ;;  %v562_v14 = vsub.s32 4, %v11460_v63  ;;  %v9775_v61 = vld [vmem:[%s15617_s3 + $0x2c4] ss:$16 sps:$4 sm:$0xff]  }
 0x206   :  { %4683 = vmatprep.mubr.bf16.mxu1 %v10338_v46  ;;  %4721 = vmatpush2.bf16.msra.mxu0 %v9257_v0  ;;  %v4003_v6 = vpop.f32.mrf.mxu1  ;;  %v3894_v22 = vpop.f32.mrf.mxu0  ;;  %v5274_v24 = vsel %vm5018_vm8, %v3998_v56, %v5146_v33  ;;  %v5147_v3 = vmul.f32 0.2, %v13264_v17  ;;  %vm5019_vm10 = vcmp.gt.f32.partialorder %v13264_v17, 0.0  ;;  %v9764_v56 = vld [vmem:[%s15617_s3 + $0xe0] ss:$16 sps:$4 sm:$0xff]  }
 0x207   :  { %4722 = vmatprep.subr.bf16.mxu0 %v9250_v5  ;;  %15729 = vst [vmem:[#allocation32_spill] sm:$0xff] %v13277_v39  ;;  %vm5026_vm9 = vcmp.gt.f32.partialorder %v4002_v1, 0.0  ;;  %v5154_v44 = vmul.f32 0.2, %v4002_v1  ;;  %v3895_v16 = vadd.f32 %v3894_v22, %v12784_v48  ;;  %v4004_v34 = vadd.f32 %v4003_v6, %v3891_v28  ;;  %v9766_v48 = vld [vmem:[%s15617_s3 + $0xe4] ss:$16 sps:$4 sm:$0xff]  }
 0x208   :  { %v4007_v30 = vpop.f32.mrf.mxu1  ;;  %v3896_v26 = vpop.f32.mrf.mxu0  ;;  %v9767_v46 = vld [vmem:[%s15617_s3 + $0x2e0] ss:$16 sps:$4 sm:$0xff]   ;;  %v10344_v28 = vld [vmem:[%s15615_s0 + $0x18] ss:$28 sps:$4 sm:$0xff]  }
 0x209   :  { %v5282_v52 = vsel %vm5026_vm9, %v4002_v1, %v5154_v44  ;;  %v4008_v11 = vadd.f32 %v4007_v30, %v3895_v16  ;;  %v3897_v0 = vadd.f32 %v3896_v26, %v12801_v2  ;;  %vm5027_vm11 = vcmp.gt.f32.partialorder %v4004_v34, 0.0  ;;  %v10342_v2 = vld [vmem:[%s15616_s2] sm:$0xff] }
 0x20a   :  { %4723 = vmatpush2.bf16.msra.mxu0 %v9249_v13  ;;  %v4009_v60 = vpop.f32.mrf.mxu1  ;;  %v13297_v23 = vpack.c.bf16 %v5282_v52, %v5274_v24  ;;  %v5155_v45 = vmul.f32 0.2, %v4004_v34  ;;  %v3898_v55 = vpop.f32.mrf.mxu0  ;;  %v13305_v35 = vrot.slane %v10342_v2, %v562_v14  ;;  %v13316_v21 = vrot.slane %v10342_v2, %v566_v27  ;;  %v9773_v44 = vld [vmem:[%s15617_s3 + $0x2c0] ss:$16 sps:$4 sm:$0xff]   ;;  %v9778_v16 = vld [vmem:[%s15617_s3 + $0xa4] ss:$16 sps:$4 sm:$0xff]  }
 0x20b   :  { %4571 = vmatmul.mubr.bf16.gmra.mxu0 %v10339_v57  ;;  %4724 = vmatprep.subr.bf16.mxu0 %v9242_v12  ;;  %v13299_v54 = vadd.f32 %v4009_v60, %v3897_v0  ;;  %v3899_v5 = vadd.f32 %v3898_v55, %v12816_v36  ;;  %v5162_v19 = vmul.f32 0.2, %v4008_v11  ;;  %v9772_v36 = vld [vmem:[%s15617_s3 + $0xc4] ss:$16 sps:$4 sm:$0xff]   ;;  %vm5034_vm12 = vcmp.gt.f32.partialorder %v4008_v11, 0.0 }
 0x20c   :  { %4726 = vmatprep.mubr.bf16.mxu0 %v10341_v43  ;;  %15730 = vst [vmem:[#allocation33_spill] sm:$0xff] %v13297_v23  ;;  %v4011_v40 = vpop.f32.mrf.mxu1  ;;  %v3900_v31 = vpop.f32.mrf.mxu0  ;;  %v5283_v51 = vsel %vm5027_vm11, %v4004_v34, %v5155_v45  ;;  %v5275_v13 = vsel %vm5019_vm10, %v13264_v17, %v5147_v3  ;;  %v10343_v12 = vld [vmem:[%s15615_s0 + $0x10] ss:$28 sps:$4 sm:$0xff]   ;;  %v9781_v26 = vld [vmem:[%s15617_s3 + $0x2a4] ss:$16 sps:$4 sm:$0xff]  }
 0x20d   :  { %4684 = vmatmul.mubr.bf16.gmra.mxu1 %v10340_v4  ;;  %v4012_v29 = vadd.f32 %v4011_v40, %v3899_v5  ;;  %v3901_v33 = vadd.f32 %v3900_v31, %v12833_v20  ;;  %v13328_v53 = vpack.c.bf16 %v5283_v51, %v5275_v13  ;;  %v9770_v20 = vld [vmem:[%s15617_s3 + $0xc0] ss:$16 sps:$4 sm:$0xff]   ;;  %v5290_v17 = vsel %vm5034_vm12, %v4008_v11, %v5162_v19  ;;  %v10345_v34 = vld [vmem:[%s15615_s0 + $0x4c] ss:$28 sps:$4 sm:$0xff]   ;;  %v9784_v55 = vld [vmem:[%s15617_s3 + $0x84] ss:$16 sps:$4 sm:$0xff]  }
 0x20e   :  { %4839 = vmatprep.mubr.bf16.mxu1 %v15690_v25  ;;  %4725 = vmatpush2.bf16.msra.mxu0 %v9241_v59  ;;  %v4013_v38 = vpop.f32.mrf.mxu1  ;;  %v4050_v49 = vpop.f32.mrf.mxu0  ;;  %v5163_v22 = vmul.f32 0.2, %v13299_v54  ;;  %vm5035_vm14 = vcmp.gt.f32.partialorder %v13299_v54, 0.0  ;;  %v9776_v0 = vld [vmem:[%s15617_s3 + $0xa0] ss:$16 sps:$4 sm:$0xff]  }
 0x20f   :  { %6926 = vmatprep.subr.bf16.mxu0 %v9766_v48  ;;  %15731 = vst [vmem:[#allocation34_spill] sm:$0xff] %v13328_v53  ;;  %vm5042_vm13 = vcmp.gt.f32.partialorder %v4012_v29, 0.0  ;;  %v5170_v1 = vmul.f32 0.2, %v4012_v29  ;;  %v4051_v6 = vadd.f32 %v4050_v49, %v13305_v35  ;;  %v4014_v57 = vadd.f32 %v4013_v38, %v3901_v33  ;;  %v9779_v45 = vld [vmem:[%s15617_s3 + $0x2a0] ss:$16 sps:$4 sm:$0xff]  }
 0x210   :  { %v4163_v62 = vpop.f32.mrf.mxu1  ;;  %v4052_v59 = vpop.f32.mrf.mxu0  ;;  %v5291_v5 = vsel %vm5035_vm14, %v13299_v54, %v5163_v22  ;;  %v9787_v31 = vld [vmem:[%s15617_s3 + $0x284] ss:$16 sps:$4 sm:$0xff]   ;;  %v9782_v13 = vld [vmem:[%s15617_s3 + $0x80] ss:$16 sps:$4 sm:$0xff]  }
 0x211   :  { %v5298_v30 = vsel %vm5042_vm13, %v4012_v29, %v5170_v1  ;;  %v13347_v4 = vadd.f32 %v4163_v62, %v4051_v6  ;;  %v4053_v14 = vadd.f32 %v4052_v59, %v13316_v21  ;;  %vm5043_vm15 = vcmp.gt.f32.partialorder %v4014_v57, 0.0  ;;  %v10346_v51 = vld [vmem:[%s15615_s0 + $0x48] ss:$28 sps:$4 sm:$0xff]   ;;  %v9785_v49 = vld [vmem:[%s15617_s3 + $0x280] ss:$16 sps:$4 sm:$0xff]  }
 0x212   :  { %v4165_v24 = vpop.f32.mrf.mxu1  ;;  %v13356_v43 = vpack.c.bf16 %v5298_v30, %v5290_v17  ;;  %v5171_v48 = vmul.f32 0.2, %v4014_v57  ;;  %v4054_v27 = vpop.f32.mrf.mxu0  ;;  %v9791_v30 = vld [vmem:[%s15617_s3 + $0x260] ss:$16 sps:$4 sm:$0xff]  }
 0x213   :  { %4727 = vmatmul.mubr.bf16.vlgmr.msra.gmra.mxu0 %v10343_v12  ;;  %v13359_v3 = vadd.f32 %v4165_v24, %v4053_v14  ;;  %v4055_v52 = vadd.f32 %v4054_v27, %v13305_v35  ;;  %v9790_v12 = vld [vmem:[%s15617_s3 + $0x64] ss:$16 sps:$4 sm:$0xff]  }
 0x214   :  { %6927 = vmatpush1.bf16.msra.mxu0 %v9764_v56  ;;  %4736 = vmatprep.mubr.bf16.mxu0 %v10345_v34  ;;  %15732 = vst [vmem:[#allocation35_spill] sm:$0xff] %v13356_v43  ;;  %v4167_v11 = vpop.f32.mrf.mxu1  ;;  %v4056_v60 = vpop.f32.mrf.mxu0  ;;  %v5299_v40 = vsel %vm5043_vm15, %v4014_v57, %v5171_v48  ;;  %v9796_v14 = vld [vmem:[%s15617_s3 + $0x44] ss:$16 sps:$4 sm:$0xff]  }
 0x215   :  { %4840 = vmatmul.mubr.bf16.vlgmr.msra.gmra.mxu1 %v10344_v28  ;;  %6928 = vmatprep.subr.bf16.mxu0 %v9772_v36  ;;  %v13374_v2 = vadd.f32 %v4167_v11, %v4055_v52  ;;  %v4057_v56 = vadd.f32 %v4056_v60, %v13316_v21  ;;  %v10348_v28 = vld [vmem:[%s15615_s0 + $0x84] ss:$28 sps:$4 sm:$0xff]  }
 0x216   :  { %7040 = vmatpush1.bf16.msra.mxu1 %v9767_v46  ;;  %4849 = vmatprep.mubr.bf16.mxu1 %v15690_v25  ;;  %v4169_v19 = vpop.f32.mrf.mxu1  ;;  %v13380_v46 = vpack.c.bf16 %v5299_v40, %v5291_v5  ;;  %v4060_v36 = vpop.f32.mrf.mxu0  ;;  %v9799_v48 = vld [vmem:[%s15617_s3 + $0x244] ss:$16 sps:$4 sm:$0xff]   ;;  %v10349_v52 = vld [vmem:[%s15615_s0 + $0x80] ss:$28 sps:$4 sm:$0xff]  }
 0x217   :  { %7041 = vmatprep.subr.bf16.mxu1 %v9775_v61  ;;  %v13385_v54 = vadd.f32 %v4169_v19, %v4057_v56  ;;  %v4061_v29 = vadd.f32 %v4060_v36, %v13305_v35  ;;  %v10347_v61 = vld [vmem:[%s15615_s0 + $0x50] ss:$28 sps:$4 sm:$0xff]   ;;  %v9802_v56 = vld [vmem:[%s15617_s3 + $0x24] ss:$16 sps:$4 sm:$0xff]  }
 0x218   :  { %6929 = vmatpush1.bf16.msra.mxu0 %v9770_v20  ;;  %15733 = vst [vmem:[#allocation36_spill] sm:$0xff] %v13380_v46  ;;  %v4173_v38 = vpop.f32.mrf.mxu1  ;;  %v4062_v33 = vpop.f32.mrf.mxu0  ;;  %v9793_v20 = vld [vmem:[%s15617_s3 + $0x264] ss:$16 sps:$4 sm:$0xff]   ;;  %v9797_v40 = vld [vmem:[%s15617_s3 + $0x240] ss:$16 sps:$4 sm:$0xff]  }
 0x219   :  { %6930 = vmatprep.subr.bf16.mxu0 %v9778_v16  ;;  %v13400_v1 = vadd.f32 %v4173_v38, %v4061_v29  ;;  %v4063_v6 = vadd.f32 %v4062_v33, %v13316_v21  ;;  %v9805_v29 = vld [vmem:[%s15617_s3 + $0x224] ss:$16 sps:$4 sm:$0xff]  }
 0x21a   :  { %7042 = vmatpush1.bf16.msra.mxu1 %v9773_v44  ;;  %v4175_v62 = vpop.f32.mrf.mxu1  ;;  %v4064_v17 = vpop.f32.mrf.mxu0  ;;  %v9788_v44 = vld [vmem:[%s15617_s3 + $0x60] ss:$16 sps:$4 sm:$0xff]  }
 0x21b   :  { %7043 = vmatprep.subr.bf16.mxu1 %v9781_v26  ;;  %4737 = vmatmul.mubr.bf16.gmra.mxu0 %v10346_v51  ;;  %v13410_v22 = vadd.f32 %v4175_v62, %v4063_v6  ;;  %v4065_v57 = vadd.f32 %v4064_v17, %v13305_v35  ;;  %v10351_v51 = vld [vmem:[%s15615_s0 + $0xbc] ss:$28 sps:$4 sm:$0xff]   ;;  %v9803_v6 = vld [vmem:[%s15617_s3 + $0x220] ss:$16 sps:$4 sm:$0xff]   ;;  %v9808_v62 = vld [vmem:[%s15617_s3 + $0x4] ss:$16 sps:$4 sm:$0xff]  }
 0x21c   :  { %6931 = vmatpush1.bf16.msra.mxu0 %v9776_v0  ;;  %4746 = vmatprep.mubr.bf16.mxu0 %v10348_v28  ;;  %v4177_v59 = vpop.f32.mrf.mxu1  ;;  %v4066_v16 = vpop.f32.mrf.mxu0 }
 0x21d   :  { %4850 = vmatmul.mubr.bf16.gmra.mxu1 %v10347_v61  ;;  %6932 = vmatprep.subr.bf16.mxu0 %v9784_v55  ;;  %v13422_v24 = vadd.f32 %v4177_v59, %v4065_v57  ;;  %v4067_v34 = vadd.f32 %v4066_v16, %v13316_v21  ;;  %v9794_v55 = vld [vmem:[%s15617_s3 + $0x40] ss:$16 sps:$4 sm:$0xff]   ;;  %v9811_v57 = vld [vmem:[%s15617_s3 + $0x204] ss:$16 sps:$4 sm:$0xff]  }
 0x21e   :  { %7044 = vmatpush1.bf16.msra.mxu1 %v9779_v45  ;;  %4859 = vmatprep.mubr.bf16.mxu1 %v15690_v25  ;;  %v4179_v26 = vpop.f32.mrf.mxu1  ;;  %v4070_v27 = vpop.f32.mrf.mxu0  ;;  %v10350_v45 = vld [vmem:[%s15615_s0 + $0x88] ss:$28 sps:$4 sm:$0xff]  }
 0x21f   :  { %7045 = vmatprep.subr.bf16.mxu1 %v9787_v31  ;;  %v13431_v11 = vadd.f32 %v4179_v26, %v4067_v34  ;;  %v4071_v0 = vadd.f32 %v4070_v27, %v13305_v35  ;;  %v10353_v34 = vld [vmem:[%s15615_s0 + $0xc0] ss:$28 sps:$4 sm:$0xff]  }
 0x220   :  { %6933 = vmatpush1.bf16.msra.mxu0 %v9782_v13  ;;  %v4183_v60 = vpop.f32.mrf.mxu1  ;;  %v4072_v5 = vpop.f32.mrf.mxu0  ;;  %v9806_v26 = vld [vmem:[%s15617_s3] ss:$16 sps:$4 sm:$0xff]  }
 0x221   :  { %6934 = vmatprep.subr.bf16.mxu0 %v9790_v12  ;;  %v13446_v19 = vadd.f32 %v4183_v60, %v4071_v0  ;;  %v4073_v31 = vadd.f32 %v4072_v5, %v13316_v21  ;;  %v9809_v27 = vld [vmem:[%s15617_s3 + $0x200] ss:$16 sps:$4 sm:$0xff]   ;;  %v9817_v5 = vld [vmem:[%s15617_s3 + $0x3e4] ss:$16 sps:$4 sm:$0xff]  }
 0x222   :  { %7046 = vmatpush1.bf16.msra.mxu1 %v9785_v49  ;;  %v4185_v36 = vpop.f32.mrf.mxu1  ;;  %v4074_v38 = vpop.f32.mrf.mxu0  ;;  %v9800_v49 = vld [vmem:[%s15617_s3 + $0x20] ss:$16 sps:$4 sm:$0xff]  }
 0x223   :  { %7047 = vmatprep.subr.bf16.mxu1 %v9793_v20  ;;  %4747 = vmatmul.mubr.bf16.gmra.mxu0 %v10349_v52  ;;  %v13456_v61 = vadd.f32 %v4185_v36, %v4073_v31  ;;  %v4075_v13 = vadd.f32 %v4074_v38, %v13305_v35  ;;  %v9814_v52 = vld [vmem:[%s15617_s3 + $0x1e4] ss:$16 sps:$4 sm:$0xff]   ;;  %v9815_v38 = vld [vmem:[%s15617_s3 + $0x3e0] ss:$16 sps:$4 sm:$0xff]  }
 0x224   :  { %6935 = vmatpush1.bf16.msra.mxu0 %v9788_v44  ;;  %4756 = vmatprep.mubr.bf16.mxu0 %v10351_v51  ;;  %v4187_v33 = vpop.f32.mrf.mxu1  ;;  %v4076_v12 = vpop.f32.mrf.mxu0  ;;  %v10352_v44 = vld [vmem:[%s15615_s0 + $0xb8] ss:$28 sps:$4 sm:$0xff]   ;;  %v9812_v51 = vld [vmem:[%s15617_s3 + $0x1e0] ss:$16 sps:$4 sm:$0xff]  }
 0x225   :  { %4860 = vmatmul.mubr.bf16.gmra.mxu1 %v10350_v45  ;;  %6936 = vmatprep.subr.bf16.mxu0 %v9796_v14  ;;  %v13468_v28 = vadd.f32 %v4187_v33, %v4075_v13  ;;  %v4077_v20 = vadd.f32 %v4076_v12, %v13316_v21  ;;  %v9820_v13 = vld [vmem:[%s15617_s3 + $0x1c4] ss:$16 sps:$4 sm:$0xff]  }
 0x226   :  { %7048 = vmatpush1.bf16.msra.mxu1 %v9791_v30  ;;  %4869 = vmatprep.mubr.bf16.mxu1 %v15690_v25  ;;  %v4189_v17 = vpop.f32.mrf.mxu1  ;;  %v4080_v59 = vpop.f32.mrf.mxu0 }
 0x227   :  { %7049 = vmatprep.subr.bf16.mxu1 %v9799_v48  ;;  %v13477_v16 = vadd.f32 %v4189_v17, %v4077_v20  ;;  %v4081_v30 = vadd.f32 %v4080_v59, %v13305_v35  ;;  %v10355_v20 = vld [vmem:[%s15615_s0 + $0xf0] ss:$28 sps:$4 sm:$0xff]  }
 0x228   :  { %6937 = vmatpush1.bf16.msra.mxu0 %v9794_v55  ;;  %v4193_v14 = vpop.f32.mrf.mxu1  ;;  %v4082_v48 = vpop.f32.mrf.mxu0  ;;  %v10354_v55 = vld [vmem:[%s15615_s0 + $0xf4] ss:$28 sps:$4 sm:$0xff]  }
 0x229   :  { %6938 = vmatprep.subr.bf16.mxu0 %v9802_v56  ;;  %v13492_v0 = vadd.f32 %v4193_v14, %v4081_v30  ;;  %v4083_v60 = vadd.f32 %v4082_v48, %v13316_v21  ;;  %v9818_v30 = vld [vmem:[%s15617_s3 + $0x1c0] ss:$16 sps:$4 sm:$0xff]  }
 0x22a   :  { %7050 = vmatpush1.bf16.msra.mxu1 %v9797_v40  ;;  %v4195_v45 = vpop.f32.mrf.mxu1  ;;  %v4084_v40 = vpop.f32.mrf.mxu0 }
 0x22b   :  { %7051 = vmatprep.subr.bf16.mxu1 %v9805_v29  ;;  %4757 = vmatmul.mubr.bf16.gmra.mxu0 %v10352_v44  ;;  %v13502_v56 = vadd.f32 %v4195_v45, %v4083_v60  ;;  %v4085_v31 = vadd.f32 %v4084_v40, %v13305_v35  ;;  %v10356_v44 = vld [vmem:[%s15615_s0 + $0xf8] ss:$28 sps:$4 sm:$0xff]   ;;  %v10357_v60 = vld [vmem:[%s15615_s0 + $0x12c] ss:$28 sps:$4 sm:$0xff]  }
 0x22c   :  { %6939 = vmatpush1.bf16.msra.mxu0 %v9800_v49  ;;  %4766 = vmatprep.mubr.bf16.mxu0 %v10354_v55  ;;  %v4197_v36 = vpop.f32.mrf.mxu1  ;;  %v4086_v29 = vpop.f32.mrf.mxu0  ;;  %v9829_v45 = vld [vmem:[%s15617_s3 + $0x3a4] ss:$16 sps:$4 sm:$0xff]  }
 0x22d   :  { %4870 = vmatmul.mubr.bf16.gmra.mxu1 %v10353_v34  ;;  %6940 = vmatprep.subr.bf16.mxu0 %v9808_v62  ;;  %v13514_v33 = vadd.f32 %v4197_v36, %v4085_v31  ;;  %v4087_v49 = vadd.f32 %v4086_v29, %v13316_v21  ;;  %v9821_v34 = vld [vmem:[%s15617_s3 + $0x3c0] ss:$16 sps:$4 sm:$0xff]  }
 0x22e   :  { %7052 = vmatpush1.bf16.msra.mxu1 %v9803_v6  ;;  %4879 = vmatprep.mubr.bf16.mxu1 %v15690_v25  ;;  %v4199_v12 = vpop.f32.mrf.mxu1  ;;  %v9823_v6 = vld [vmem:[%s15617_s3 + $0x3c4] ss:$16 sps:$4 sm:$0xff]   ;;  %v4090_v62 = vpop.f32.mrf.mxu0  ;;  %v9824_v36 = vld [vmem:[%s15617_s3 + $0x1a0] ss:$16 sps:$4 sm:$0xff]  }
 0x22f   :  { %7053 = vmatprep.subr.bf16.mxu1 %v9811_v57  ;;  %v13523_v17 = vadd.f32 %v4199_v12, %v4087_v49  ;;  %v4091_v57 = vadd.f32 %v4090_v62, %v13305_v35  ;;  %v9827_v29 = vld [vmem:[%s15617_s3 + $0x3a0] ss:$16 sps:$4 sm:$0xff]  }
 0x230   :  { %6941 = vmatpush1.bf16.msra.mxu0 %v9806_v26  ;;  %v4203_v59 = vpop.f32.mrf.mxu1  ;;  %v4092_v14 = vpop.f32.mrf.mxu0  ;;  %v9826_v26 = vld [vmem:[%s15617_s3 + $0x1a4] ss:$16 sps:$4 sm:$0xff]  }
 0x231   :  { %6942 = vmatprep.subr.bf16.mxu0 %v9814_v52  ;;  %v13538_v48 = vadd.f32 %v4203_v59, %v4091_v57 }
 0x232   :  { %7054 = vmatpush1.bf16.msra.mxu1 %v9809_v27  ;;  %v4093_v27 = vadd.f32 %v4092_v14, %v13316_v21  ;;  %v4205_v52 = vpop.f32.mrf.mxu1  ;;  %v4094_v55 = vpop.f32.mrf.mxu0  ;;  %v9830_v14 = vld [vmem:[%s15617_s3 + $0x180] ss:$16 sps:$4 sm:$0xff]  }
 0x233   :  { %7055 = vmatprep.subr.bf16.mxu1 %v9817_v5  ;;  %4767 = vmatmul.mubr.bf16.gmra.mxu0 %v10355_v20  ;;  %v4095_v40 = vadd.f32 %v4094_v55, %v13305_v35  ;;  %v10358_v20 = vld [vmem:[%s15615_s0 + $0x128] ss:$28 sps:$4 sm:$0xff]  }
 0x234   :  { %6943 = vmatpush2.bf16.msra.mxu0 %v9812_v51  ;;  %4776 = vmatprep.mubr.bf16.mxu0 %v10357_v60  ;;  %v13548_v5 = vadd.f32 %v4205_v52, %v4093_v27  ;;  %v4207_v31 = vpop.f32.mrf.mxu1  ;;  %v4096_v51 = vpop.f32.mrf.mxu0  ;;  %v9838_v27 = vld [vmem:[%s15617_s3 + $0x164] ss:$16 sps:$4 sm:$0xff]  }
 0x235   :  { %4880 = vmatmul.mubr.bf16.gmra.mxu1 %v10356_v44  ;;  %6944 = vmatprep.subr.bf16.mxu0 %v9820_v13  ;;  %v13560_v13 = vadd.f32 %v4207_v31, %v4095_v40  ;;  %v4097_v49 = vadd.f32 %v4096_v51, %v13316_v21  ;;  %v10360_v55 = vld [vmem:[%s15615_s0 + $0x164] ss:$28 sps:$4 sm:$0xff]  }
 0x236   :  { %7056 = vmatpush2.bf16.msra.mxu1 %v9815_v38  ;;  %4889 = vmatprep.mubr.bf16.mxu1 %v15690_v25  ;;  %v9832_v38 = vld [vmem:[%s15617_s3 + $0x184] ss:$16 sps:$4 sm:$0xff]   ;;  %v4209_v12 = vpop.f32.mrf.mxu1  ;;  %v4100_v62 = vpop.f32.mrf.mxu0 }
 0x237   :  { %7057 = vmatprep.subr.bf16.mxu1 %v9823_v6  ;;  %v9835_v6 = vld [vmem:[%s15617_s3 + $0x384] ss:$16 sps:$4 sm:$0xff]   ;;  %v13569_v57 = vadd.f32 %v4209_v12, %v4097_v49  ;;  %v4101_v59 = vadd.f32 %v4100_v62, %v13305_v35  ;;  %v9839_v12 = vld [vmem:[%s15617_s3 + $0x360] ss:$16 sps:$4 sm:$0xff]  }
 0x238   :  { %6945 = vmatpush2.bf16.msra.mxu0 %v9818_v30  ;;  %v4213_v44 = vpop.f32.mrf.mxu1  ;;  %v10359_v30 = vld [vmem:[%s15615_s0 + $0x130] ss:$28 sps:$4 sm:$0xff]   ;;  %v9841_v40 = vld [vmem:[%s15617_s3 + $0x364] ss:$16 sps:$4 sm:$0xff]  }
 0x239   :  { %6946 = vmatprep.subr.bf16.mxu0 %v9826_v26  ;;  %v9833_v26 = vld [vmem:[%s15617_s3 + $0x380] ss:$16 sps:$4 sm:$0xff]   ;;  %v13584_v52 = vadd.f32 %v4213_v44, %v4101_v59  ;;  %v9847_v44 = vld [vmem:[%s15617_s3 + $0x344] ss:$16 sps:$4 sm:$0xff]  }
 0x23a   :  { %7058 = vmatpush2.bf16.msra.mxu1 %v9821_v34  ;;  %v4102_v34 = vpop.f32.mrf.mxu0 }
 0x23b   :  { %7059 = vmatprep.subr.bf16.mxu1 %v9829_v45  ;;  %4777 = vmatmul.mubr.bf16.gmra.mxu0 %v10358_v20  ;;  %v4103_v60 = vadd.f32 %v4102_v34, %v13316_v21  ;;  %v4215_v45 = vpop.f32.mrf.mxu1 }
 0x23c   :  { %6947 = vmatpush2.bf16.msra.mxu0 %v9824_v36  ;;  %4786 = vmatprep.mubr.bf16.mxu0 %v10360_v55  ;;  %v4104_v31 = vpop.f32.mrf.mxu0 }
 0x23d   :  { %4890 = vmatmul.mubr.bf16.gmra.mxu1 %v10359_v30  ;;  %6948 = vmatprep.subr.bf16.mxu0 %v9832_v38  ;;  %v13594_v36 = vadd.f32 %v4215_v45, %v4103_v60  ;;  %v4105_v51 = vadd.f32 %v4104_v31, %v13305_v35  ;;  %v9836_v38 = vld [vmem:[%s15617_s3 + $0x160] ss:$16 sps:$4 sm:$0xff]   ;;  %v10362_v60 = vld [vmem:[%s15615_s0 + $0x168] ss:$28 sps:$4 sm:$0xff]  }
 0x23e   :  { %7060 = vmatpush2.bf16.msra.mxu1 %v9827_v29  ;;  %4899 = vmatprep.mubr.bf16.mxu1 %v15690_v25  ;;  %v4217_v29 = vpop.f32.mrf.mxu1  ;;  %v4106_v49 = vpop.f32.mrf.mxu0  ;;  %v9842_v45 = vld [vmem:[%s15617_s3 + $0x140] ss:$16 sps:$4 sm:$0xff]   ;;  %v9850_v31 = vld [vmem:[%s15617_s3 + $0x124] ss:$16 sps:$4 sm:$0xff]  }
 0x23f   :  { %7061 = vmatprep.subr.bf16.mxu1 %v9835_v6  ;;  %v9844_v6 = vld [vmem:[%s15617_s3 + $0x144] ss:$16 sps:$4 sm:$0xff]   ;;  %v13606_v62 = vadd.f32 %v4217_v29, %v4105_v51  ;;  %v4107_v20 = vadd.f32 %v4106_v49, %v13316_v21  ;;  %v10363_v49 = vld [vmem:[%s15615_s0 + $0x19c] ss:$28 sps:$4 sm:$0xff]  }
 0x240   :  { %6949 = vmatpush2.bf16.msra.mxu0 %v9830_v14  ;;  %v4219_v59 = vpop.f32.mrf.mxu1  ;;  %v4110_v30 = vpop.f32.mrf.mxu0  ;;  %v10361_v14 = vld [vmem:[%s15615_s0 + $0x160] ss:$28 sps:$4 sm:$0xff]  }
 0x241   :  { %6950 = vmatprep.subr.bf16.mxu0 %v9838_v27  ;;  %v13615_v34 = vadd.f32 %v4219_v59, %v4107_v20 }
 0x242   :  { %7062 = vmatpush2.bf16.msra.mxu1 %v9833_v26  ;;  %v4111_v26 = vadd.f32 %v4110_v30, %v13305_v35  ;;  %v4223_v27 = vpop.f32.mrf.mxu1  ;;  %v4112_v55 = vpop.f32.mrf.mxu0 }
 0x243   :  { %7063 = vmatprep.subr.bf16.mxu1 %v9841_v40  ;;  %4787 = vmatmul.mubr.bf16.gmra.mxu0 %v10361_v14  ;;  %v9845_v40 = vld [vmem:[%s15617_s3 + $0x340] ss:$16 sps:$4 sm:$0xff]   ;;  %v4113_v29 = vadd.f32 %v4112_v55, %v13316_v21 }
 0x244   :  { %6951 = vmatpush2.bf16.msra.mxu0 %v9836_v38  ;;  %v13630_v51 = vadd.f32 %v4223_v27, %v4111_v26  ;;  %v4225_v38 = vpop.f32.mrf.mxu1  ;;  %4796 = vmatprep.mubr.bf16.mxu0 %v10363_v49  ;;  %v9851_v26 = vld [vmem:[%s15617_s3 + $0x320] ss:$16 sps:$4 sm:$0xff]  }
 0x245   :  { %4900 = vmatmul.mubr.bf16.gmra.mxu1 %v10362_v60  ;;  %6952 = vmatprep.subr.bf16.mxu0 %v9844_v6  ;;  %v4114_v6 = vpop.f32.mrf.mxu0  ;;  %v13640_v20 = vadd.f32 %v4225_v38, %v4113_v29 }
 0x246   :  { %7064 = vmatpush2.bf16.msra.mxu1 %v9839_v12  ;;  %v9853_v12 = vld [vmem:[%s15617_s3 + $0x324] ss:$16 sps:$4 sm:$0xff]   ;;  %4909 = vmatprep.mubr.bf16.mxu1 %v15690_v25  ;;  %v4115_v59 = vadd.f32 %v4114_v6, %v13305_v35  ;;  %v4227_v30 = vpop.f32.mrf.mxu1  ;;  %v9854_v6 = vld [vmem:[%s15617_s3 + $0x100] ss:$16 sps:$4 sm:$0xff]  }
 0x247   :  { %7065 = vmatprep.subr.bf16.mxu1 %v9847_v44  ;;  %v9848_v44 = vld [vmem:[%s15617_s3 + $0x120] ss:$16 sps:$4 sm:$0xff]   ;;  %v4116_v14 = vpop.f32.mrf.mxu0 }
 0x248   :  { %6953 = vmatpush2.bf16.msra.mxu0 %v9842_v45  ;;  %v13649_v27 = vadd.f32 %v4227_v30, %v4115_v59  ;;  %v4117_v25 = vadd.f32 %v4116_v14, %v13316_v21  ;;  %v4229_v60 = vpop.f32.mrf.mxu1  ;;  %v9856_v45 = vld [vmem:[%s15617_s3 + $0x104] ss:$16 sps:$4 sm:$0xff]   ;;  %v9857_v30 = vld [vmem:[%s15617_s3 + $0x300] ss:$16 sps:$4 sm:$0xff]  }
 0x249   :  { %6954 = vmatprep.subr.bf16.mxu0 %v9850_v31  ;;  %v4120_v55 = vpop.f32.mrf.mxu0  ;;  %v9859_v31 = vld [vmem:[%s15617_s3 + $0x304] ss:$16 sps:$4 sm:$0xff]  }
 0x24a   :  { %7066 = vmatpush2.bf16.msra.mxu1 %v9845_v40  ;;  %v10364_v40 = vld [vmem:[%s15615_s0 + $0x198] ss:$28 sps:$4 sm:$0xff]   ;;  %v13661_v29 = vadd.f32 %v4229_v60, %v4117_v25  ;;  %v4121_v38 = vadd.f32 %v4120_v55, %v13305_v35  ;;  %v4233_v49 = vpop.f32.mrf.mxu1 }
 0x24b   :  { %7067 = vmatprep.subr.bf16.mxu1 %v9853_v12  ;;  %4797 = vmatmul.mubr.bf16.gmra.mxu0 %v10364_v40  ;;  %v10365_v12 = vld [vmem:[%s15615_s0 + $0x1a0] ss:$28 sps:$4 sm:$0xff]   ;;  %v4122_v59 = vpop.f32.mrf.mxu0  ;;  %v9862_v14 = vld [vmem:[%s15617_s3 + $0x4e4] ss:$16 sps:$4 sm:$0xff]  }
 0x24c   :  { %6955 = vmatpush2.bf16.msra.mxu0 %v9848_v44  ;;  %6958 = vmatprep.mubr.bf16.mxu0 %v12046_v18  ;;  %v13677_v25 = vadd.f32 %v4233_v49, %v4121_v38  ;;  %v4123_v44 = vadd.f32 %v4122_v59, %v13316_v21  ;;  %v4235_v60 = vpop.f32.mrf.mxu1  ;;  %v9860_v49 = vld [vmem:[%s15617_s3 + $0x4e0] ss:$16 sps:$4 sm:$0xff]  }
 0x24d   :  { %4910 = vmatmul.mubr.bf16.gmra.mxu1 %v10365_v12  ;;  %6956 = vmatprep.subr.bf16.mxu0 %v9856_v45  ;;  %v4124_v55 = vpop.f32.mrf.mxu0 }
 0x24e   :  { %7068 = vmatpush2.bf16.msra.mxu1 %v9851_v26  ;;  %7071 = vmatprep.mubr.bf16.mxu1 %v12996_v47  ;;  %v9925_v26 = vld [vmem:[%s15617_s3 + $0x6e4] ss:$16 sps:$4 sm:$0xff]   ;;  %v13684_v40 = vadd.f32 %v4235_v60, %v4123_v44  ;;  %v4125_v12 = vadd.f32 %v4124_v55, %v13305_v35  ;;  %v4237_v18 = vpop.f32.mrf.mxu1  ;;  %v9923_v35 = vld [vmem:[%s15617_s3 + $0x6e0] ss:$16 sps:$4 sm:$0xff]   ;;  %v15734_v44 = vld [vmem:[#allocation5_spill] sm:$0xff] }
 0x24f   :  { %7069 = vmatprep.subr.bf16.mxu1 %v9859_v31  ;;  %v4126_v38 = vpop.f32.mrf.mxu0  ;;  %v9865_v31 = vld [vmem:[%s15617_s3 + $0x4c4] ss:$16 sps:$4 sm:$0xff]  }
 0x250   :  { %6957 = vmatpush2.bf16.msra.mxu0 %v9854_v6  ;;  %v13690_v45 = vadd.f32 %v4237_v18, %v4125_v12  ;;  %v4127_v59 = vadd.f32 %v4126_v38, %v13316_v21  ;;  %v4239_v47 = vpop.f32.mrf.mxu1  ;;  %v9931_v18 = vld [vmem:[%s15617_s3 + $0x6c4] ss:$16 sps:$4 sm:$0xff]   ;;  %v9929_v38 = vld [vmem:[%s15617_s3 + $0x6c0] ss:$16 sps:$4 sm:$0xff]  }
 0x251   :  { %7152 = vmatprep.subr.bf16.mxu0 %v9862_v14  ;;  %v4276_v6 = vpop.f32.mrf.mxu0 }
 0x252   :  { %7070 = vmatpush2.bf16.msra.mxu1 %v9857_v30  ;;  %v13703_v30 = vadd.f32 %v4239_v47, %v4127_v59  ;;  %v4277_v21 = vadd.f32 %v4276_v6, %v13347_v4  ;;  %v4389_v14 = vpop.f32.mrf.mxu1  ;;  %v9868_v4 = vld [vmem:[%s15617_s3 + $0x4a4] ss:$16 sps:$4 sm:$0xff]  }
 0x253   :  { %7265 = vmatprep.subr.bf16.mxu1 %v9925_v26  ;;  %6959 = vmatmul.mubr.bf16.vlgmr.msra.gmra.mxu0 %v11973_v58  ;;  %v4278_v60 = vpop.f32.mrf.mxu0  ;;  %v9863_v26 = vld [vmem:[%s15617_s3 + $0x4c0] ss:$16 sps:$4 sm:$0xff]   ;;  %v9937_v59 = vld [vmem:[%s15617_s3 + $0x6a4] ss:$16 sps:$4 sm:$0xff]  }
 0x254   :  { %6968 = vmatprep.mubr.bf16.mxu0 %v15734_v44  ;;  %7153 = vmatpush1.bf16.msra.mxu0 %v9860_v49  ;;  %v4390_v55 = vadd.f32 %v4389_v14, %v4277_v21  ;;  %v4279_v12 = vadd.f32 %v4278_v60, %v13359_v3  ;;  %v4391_v47 = vpop.f32.mrf.mxu1 }
 0x255   :  { %7072 = vmatmul.mubr.bf16.vlgmr.msra.gmra.mxu1 %v12956_v9  ;;  %7154 = vmatprep.subr.bf16.mxu0 %v9865_v31  ;;  %v4280_v49 = vpop.f32.mrf.mxu0  ;;  %v15735_v9 = vld [vmem:[#allocation4_spill] sm:$0xff] }
 0x256   :  { %7081 = vmatprep.mubr.bf16.mxu1 %v13070_v37  ;;  %7266 = vmatpush1.bf16.msra.mxu1 %v9923_v35  ;;  %v4281_v6 = vadd.f32 %v4280_v49, %v13374_v2  ;;  %v4393_v3 = vpop.f32.mrf.mxu1  ;;  %v5052_v21 = vmul.f32 0.2, %v4390_v55  ;;  %v9866_v35 = vld [vmem:[%s15617_s3 + $0x4a0] ss:$16 sps:$4 sm:$0xff]   ;;  %vm4924_vm0 = vcmp.gt.f32.partialorder %v4390_v55, 0.0  ;;  %v4392_v14 = vadd.f32 %v4391_v47, %v4279_v12 }
 0x257   :  { %7267 = vmatprep.subr.bf16.mxu1 %v9931_v18  ;;  %v4282_v31 = vpop.f32.mrf.mxu0  ;;  %v9871_v18 = vld [vmem:[%s15617_s3 + $0x484] ss:$16 sps:$4 sm:$0xff]   ;;  %v9935_v2 = vld [vmem:[%s15617_s3 + $0x6a0] ss:$16 sps:$4 sm:$0xff]  }
 0x258   :  { %7155 = vmatpush1.bf16.msra.mxu0 %v9863_v26  ;;  %v4394_v60 = vadd.f32 %v4393_v3, %v4281_v6  ;;  %v4395_v37 = vpop.f32.mrf.mxu1  ;;  %v4283_v26 = vadd.f32 %v4282_v31, %v13385_v54  ;;  %v9943_v12 = vld [vmem:[%s15617_s3 + $0x684] ss:$16 sps:$4 sm:$0xff]   ;;  %v5180_v3 = vsel %vm4924_vm0, %v4390_v55, %v5052_v21  ;;  %v9869_v31 = vld [vmem:[%s15617_s3 + $0x480] ss:$16 sps:$4 sm:$0xff]   ;;  %vm4925_vm2 = vcmp.gt.f32.partialorder %v4392_v14, 0.0 }
 0x259   :  { %7156 = vmatprep.subr.bf16.mxu0 %v9868_v4  ;;  %v4286_v49 = vpop.f32.mrf.mxu0  ;;  %v9874_v55 = vld [vmem:[%s15617_s3 + $0x464] ss:$16 sps:$4 sm:$0xff]  }
 0x25a   :  { %7268 = vmatpush1.bf16.msra.mxu1 %v9929_v38  ;;  %vm4932_vm1 = vcmp.gt.f32.partialorder %v4394_v60, 0.0  ;;  %v5060_v47 = vmul.f32 0.2, %v4394_v60  ;;  %v4287_v4 = vadd.f32 %v4286_v49, %v13400_v1  ;;  %v4399_v6 = vpop.f32.mrf.mxu1  ;;  %v15736_v38 = vld [vmem:[#allocation10_spill] sm:$0xff]  ;;  %v4396_v54 = vadd.f32 %v4395_v37, %v4283_v26 }
 0x25b   :  { %6969 = vmatmul.mubr.bf16.gmra.mxu0 %v15735_v9  ;;  %7269 = vmatprep.subr.bf16.mxu1 %v9937_v59  ;;  %v4288_v59 = vpop.f32.mrf.mxu0  ;;  %v5053_v9 = vmul.f32 0.2, %v4392_v14  ;;  %v9941_v37 = vld [vmem:[%s15617_s3 + $0x680] ss:$16 sps:$4 sm:$0xff]  }
 0x25c   :  { %6978 = vmatprep.mubr.bf16.mxu0 %v15736_v38  ;;  %7157 = vmatpush1.bf16.msra.mxu0 %v9866_v35  ;;  %v5188_v44 = vsel %vm4932_vm1, %v4394_v60, %v5060_v47  ;;  %v4400_v58 = vadd.f32 %v4399_v6, %v4287_v4  ;;  %v4289_v1 = vadd.f32 %v4288_v59, %v13410_v22  ;;  %v4401_v49 = vpop.f32.mrf.mxu1  ;;  %vm4933_vm3 = vcmp.gt.f32.partialorder %v4396_v54, 0.0  ;;  %v9949_v22 = vld [vmem:[%s15617_s3 + $0x664] ss:$16 sps:$4 sm:$0xff]   ;;  %v9872_v4 = vld [vmem:[%s15617_s3 + $0x460] ss:$16 sps:$4 sm:$0xff]  }
 0x25d   :  { %7082 = vmatmul.mubr.bf16.gmra.mxu1 %v13032_v41  ;;  %7158 = vmatprep.subr.bf16.mxu0 %v9871_v18  ;;  %v13752_v21 = vpack.c.bf16 %v5188_v44, %v5180_v3  ;;  %v5061_v35 = vmul.f32 0.2, %v4396_v54  ;;  %v4290_v60 = vpop.f32.mrf.mxu0 }
 0x25e   :  { %7091 = vmatprep.mubr.bf16.mxu1 %v13130_v42  ;;  %7270 = vmatpush1.bf16.msra.mxu1 %v9935_v2  ;;  %v4291_v18 = vadd.f32 %v4290_v60, %v13422_v24  ;;  %v4403_v26 = vpop.f32.mrf.mxu1  ;;  %v5068_v47 = vmul.f32 0.2, %v4400_v58  ;;  %vm4940_vm4 = vcmp.gt.f32.partialorder %v4400_v58, 0.0  ;;  %v4402_v6 = vadd.f32 %v4401_v49, %v4289_v1  ;;  %v9955_v49 = vld [vmem:[%s15617_s3 + $0x644] ss:$16 sps:$4 sm:$0xff]  }
 0x25f   :  { %15737 = vst [vmem:[#allocation10_spill] sm:$0xff] %v13752_v21  ;;  %7271 = vmatprep.subr.bf16.mxu1 %v9943_v12  ;;  %v4292_v2 = vpop.f32.mrf.mxu0  ;;  %v5189_v44 = vsel %vm4933_vm3, %v4396_v54, %v5061_v35  ;;  %v9877_v12 = vld [vmem:[%s15617_s3 + $0x444] ss:$16 sps:$4 sm:$0xff]   ;;  %v5181_v24 = vsel %vm4925_vm2, %v4392_v14, %v5053_v9 }
 0x260   :  { %7159 = vmatpush1.bf16.msra.mxu0 %v9869_v31  ;;  %v4404_v3 = vadd.f32 %v4403_v26, %v4291_v18  ;;  %v4405_v59 = vpop.f32.mrf.mxu1  ;;  %v9947_v31 = vld [vmem:[%s15617_s3 + $0x660] ss:$16 sps:$4 sm:$0xff]   ;;  %v4293_v60 = vadd.f32 %v4292_v2, %v13431_v11  ;;  %v13770_v1 = vpack.c.bf16 %v5189_v44, %v5181_v24  ;;  %v5196_v11 = vsel %vm4940_vm4, %v4400_v58, %v5068_v47  ;;  %v9880_v58 = vld [vmem:[%s15617_s3 + $0x424] ss:$16 sps:$4 sm:$0xff]  }
 0x261   :  { %7160 = vmatprep.subr.bf16.mxu0 %v9874_v55  ;;  %v4296_v42 = vpop.f32.mrf.mxu0  ;;  %v15738_v54 = vld [vmem:[#allocation6_spill] sm:$0xff]  ;;  %v5069_v26 = vmul.f32 0.2, %v4402_v6  ;;  %vm4941_vm6 = vcmp.gt.f32.partialorder %v4402_v6, 0.0 }
 0x262   :  { %7272 = vmatpush1.bf16.msra.mxu1 %v9941_v37  ;;  %15739 = vst [vmem:[#allocation6_spill] sm:$0xff] %v13770_v1  ;;  %vm4948_vm5 = vcmp.gt.f32.partialorder %v4404_v3, 0.0  ;;  %v5076_v55 = vmul.f32 0.2, %v4404_v3  ;;  %v4297_v9 = vadd.f32 %v4296_v42, %v13446_v19  ;;  %v4409_v14 = vpop.f32.mrf.mxu1  ;;  %v15740_v37 = vld [vmem:[#allocation12_spill] sm:$0xff]  ;;  %v4406_v35 = vadd.f32 %v4405_v59, %v4293_v60 }
 0x263   :  { %6979 = vmatmul.mubr.bf16.gmra.mxu0 %v15738_v54  ;;  %7273 = vmatprep.subr.bf16.mxu1 %v9949_v22  ;;  %v4298_v22 = vpop.f32.mrf.mxu0  ;;  %v9875_v18 = vld [vmem:[%s15617_s3 + $0x440] ss:$16 sps:$4 sm:$0xff]  }
 0x264   :  { %6988 = vmatprep.mubr.bf16.mxu0 %v15740_v37  ;;  %7161 = vmatpush1.bf16.msra.mxu0 %v9872_v4  ;;  %v5204_v2 = vsel %vm4948_vm5, %v4404_v3, %v5076_v55  ;;  %v4410_v44 = vadd.f32 %v4409_v14, %v4297_v9  ;;  %v4299_v42 = vadd.f32 %v4298_v22, %v13456_v61  ;;  %v4411_v19 = vpop.f32.mrf.mxu1  ;;  %v9953_v47 = vld [vmem:[%s15617_s3 + $0x640] ss:$16 sps:$4 sm:$0xff]   ;;  %vm4949_vm7 = vcmp.gt.f32.partialorder %v4406_v35, 0.0  ;;  %v9961_v61 = vld [vmem:[%s15617_s3 + $0x624] ss:$16 sps:$4 sm:$0xff]  }
 0x265   :  { %7092 = vmatmul.mubr.bf16.gmra.mxu1 %v13104_v8  ;;  %7162 = vmatprep.subr.bf16.mxu0 %v9877_v12  ;;  %v13790_v4 = vpack.c.bf16 %v5204_v2, %v5196_v11  ;;  %v5077_v59 = vmul.f32 0.2, %v4406_v35  ;;  %v4300_v3 = vpop.f32.mrf.mxu0  ;;  %v9878_v55 = vld [vmem:[%s15617_s3 + $0x420] ss:$16 sps:$4 sm:$0xff]  }
 0x266   :  { %7101 = vmatprep.mubr.bf16.mxu1 %v13184_v32  ;;  %7274 = vmatpush1.bf16.msra.mxu1 %v9947_v31  ;;  %v4301_v12 = vadd.f32 %v4300_v3, %v13468_v28  ;;  %v4413_v24 = vpop.f32.mrf.mxu1  ;;  %v5084_v60 = vmul.f32 0.2, %v4410_v44  ;;  %vm4956_vm8 = vcmp.gt.f32.partialorder %v4410_v44, 0.0  ;;  %v4412_v14 = vadd.f32 %v4411_v19, %v4299_v42  ;;  %v9967_v19 = vld [vmem:[%s15617_s3 + $0x604] ss:$16 sps:$4 sm:$0xff]  }
 0x267   :  { %15741 = vst [vmem:[#allocation12_spill] sm:$0xff] %v13790_v4  ;;  %7275 = vmatprep.subr.bf16.mxu1 %v9955_v49  ;;  %v4302_v31 = vpop.f32.mrf.mxu0  ;;  %v5205_v9 = vsel %vm4949_vm7, %v4406_v35, %v5077_v59  ;;  %v9883_v49 = vld [vmem:[%s15617_s3 + $0x404] ss:$16 sps:$4 sm:$0xff]   ;;  %v5197_v28 = vsel %vm4941_vm6, %v4402_v6, %v5069_v26  ;;  %v15742_v35 = vld [vmem:[#allocation11_spill] sm:$0xff] }
 0x268   :  { %7163 = vmatpush1.bf16.msra.mxu0 %v9875_v18  ;;  %v4414_v11 = vadd.f32 %v4413_v24, %v4301_v12  ;;  %v4415_v22 = vpop.f32.mrf.mxu1  ;;  %v9959_v18 = vld [vmem:[%s15617_s3 + $0x620] ss:$16 sps:$4 sm:$0xff]   ;;  %v4303_v2 = vadd.f32 %v4302_v31, %v13477_v16  ;;  %v13808_v42 = vpack.c.bf16 %v5205_v9, %v5197_v28  ;;  %v5212_v16 = vsel %vm4956_vm8, %v4410_v44, %v5084_v60  ;;  %v9886_v44 = vld [vmem:[%s15617_s3 + $0x5e4] ss:$16 sps:$4 sm:$0xff]  }
 0x269   :  { %7164 = vmatprep.subr.bf16.mxu0 %v9880_v58  ;;  %v4306_v3 = vpop.f32.mrf.mxu0  ;;  %v9881_v12 = vld [vmem:[%s15617_s3 + $0x400] ss:$16 sps:$4 sm:$0xff]   ;;  %v5085_v24 = vmul.f32 0.2, %v4412_v14  ;;  %vm4957_vm10 = vcmp.gt.f32.partialorder %v4412_v14, 0.0 }
 0x26a   :  { %7276 = vmatpush1.bf16.msra.mxu1 %v9953_v47  ;;  %15743 = vst [vmem:[#allocation11_spill] sm:$0xff] %v13808_v42  ;;  %vm4964_vm9 = vcmp.gt.f32.partialorder %v4414_v11, 0.0  ;;  %v5092_v58 = vmul.f32 0.2, %v4414_v11  ;;  %v4307_v6 = vadd.f32 %v4306_v3, %v13492_v0  ;;  %v4419_v26 = vpop.f32.mrf.mxu1  ;;  %v15744_v47 = vld [vmem:[#allocation14_spill] sm:$0xff]  ;;  %v4416_v59 = vadd.f32 %v4415_v22, %v4303_v2 }
 0x26b   :  { %6989 = vmatmul.mubr.bf16.gmra.mxu0 %v15742_v35  ;;  %7277 = vmatprep.subr.bf16.mxu1 %v9961_v61  ;;  %v4308_v61 = vpop.f32.mrf.mxu0  ;;  %v9965_v60 = vld [vmem:[%s15617_s3 + $0x600] ss:$16 sps:$4 sm:$0xff]  }
 0x26c   :  { %6998 = vmatprep.mubr.bf16.mxu0 %v15744_v47  ;;  %7165 = vmatpush1.bf16.msra.mxu0 %v9878_v55  ;;  %v5220_v31 = vsel %vm4964_vm9, %v4414_v11, %v5092_v58  ;;  %v4420_v9 = vadd.f32 %v4419_v26, %v4307_v6  ;;  %v4309_v0 = vadd.f32 %v4308_v61, %v13502_v56  ;;  %v4421_v28 = vpop.f32.mrf.mxu1  ;;  %vm4965_vm11 = vcmp.gt.f32.partialorder %v4416_v59, 0.0  ;;  %v9973_v56 = vld [vmem:[%s15617_s3 + $0x7e4] ss:$16 sps:$4 sm:$0xff]   ;;  %v9884_v58 = vld [vmem:[%s15617_s3 + $0x5e0] ss:$16 sps:$4 sm:$0xff]  }
 0x26d   :  { %7102 = vmatmul.mubr.bf16.gmra.mxu1 %v13159_v7  ;;  %7166 = vmatprep.subr.bf16.mxu0 %v9883_v49  ;;  %v13828_v55 = vpack.c.bf16 %v5220_v31, %v5212_v16  ;;  %v5093_v22 = vmul.f32 0.2, %v4416_v59  ;;  %v4310_v11 = vpop.f32.mrf.mxu0 }
 0x26e   :  { %7111 = vmatprep.mubr.bf16.mxu1 %v13235_v15  ;;  %7278 = vmatpush1.bf16.msra.mxu1 %v9959_v18  ;;  %v4311_v49 = vadd.f32 %v4310_v11, %v13514_v33  ;;  %v4423_v2 = vpop.f32.mrf.mxu1  ;;  %v5100_v3 = vmul.f32 0.2, %v4420_v9  ;;  %vm4972_vm12 = vcmp.gt.f32.partialorder %v4420_v9, 0.0  ;;  %v4422_v26 = vadd.f32 %v4421_v28, %v4309_v0  ;;  %v9979_v28 = vld [vmem:[%s15617_s3 + $0x7c4] ss:$16 sps:$4 sm:$0xff]  }
 0x26f   :  { %15745 = vst [vmem:[#allocation14_spill] sm:$0xff] %v13828_v55  ;;  %7279 = vmatprep.subr.bf16.mxu1 %v9967_v19  ;;  %v4312_v18 = vpop.f32.mrf.mxu0  ;;  %v5221_v6 = vsel %vm4965_vm11, %v4416_v59, %v5093_v22  ;;  %v9889_v19 = vld [vmem:[%s15617_s3 + $0x5c4] ss:$16 sps:$4 sm:$0xff]   ;;  %v5213_v33 = vsel %vm4957_vm10, %v4412_v14, %v5085_v24  ;;  %v15746_v59 = vld [vmem:[#allocation13_spill] sm:$0xff] }
 0x270   :  { %7167 = vmatpush1.bf16.msra.mxu0 %v9881_v12  ;;  %v4424_v16 = vadd.f32 %v4423_v2, %v4311_v49  ;;  %v4425_v61 = vpop.f32.mrf.mxu1  ;;  %v9971_v12 = vld [vmem:[%s15617_s3 + $0x7e0] ss:$16 sps:$4 sm:$0xff]   ;;  %v4313_v31 = vadd.f32 %v4312_v18, %v13523_v17  ;;  %v13846_v0 = vpack.c.bf16 %v5221_v6, %v5213_v33  ;;  %v5228_v17 = vsel %vm4972_vm12, %v4420_v9, %v5100_v3  ;;  %v9892_v9 = vld [vmem:[%s15617_s3 + $0x5a4] ss:$16 sps:$4 sm:$0xff]  }
 0x271   :  { %7168 = vmatprep.subr.bf16.mxu0 %v9886_v44  ;;  %v4316_v11 = vpop.f32.mrf.mxu0  ;;  %v9887_v49 = vld [vmem:[%s15617_s3 + $0x5c0] ss:$16 sps:$4 sm:$0xff]   ;;  %v5101_v2 = vmul.f32 0.2, %v4422_v26  ;;  %vm4973_vm14 = vcmp.gt.f32.partialorder %v4422_v26, 0.0 }
 0x272   :  { %7280 = vmatpush1.bf16.msra.mxu1 %v9965_v60  ;;  %15747 = vst [vmem:[#allocation13_spill] sm:$0xff] %v13846_v0  ;;  %vm4980_vm13 = vcmp.gt.f32.partialorder %v4424_v16, 0.0  ;;  %v5108_v44 = vmul.f32 0.2, %v4424_v16  ;;  %v4317_v14 = vadd.f32 %v4316_v11, %v13538_v48  ;;  %v4429_v24 = vpop.f32.mrf.mxu1  ;;  %v15748_v60 = vld [vmem:[#allocation16_spill] sm:$0xff]  ;;  %v4426_v22 = vadd.f32 %v4425_v61, %v4313_v31 }
 0x273   :  { %6999 = vmatmul.mubr.bf16.gmra.mxu0 %v15746_v59  ;;  %7281 = vmatprep.subr.bf16.mxu1 %v9973_v56  ;;  %v4318_v56 = vpop.f32.mrf.mxu0  ;;  %v9977_v3 = vld [vmem:[%s15617_s3 + $0x7c0] ss:$16 sps:$4 sm:$0xff]  }
 0x274   :  { %7008 = vmatprep.mubr.bf16.mxu0 %v15748_v60  ;;  %7169 = vmatpush2.bf16.msra.mxu0 %v9884_v58  ;;  %v5236_v18 = vsel %vm4980_vm13, %v4424_v16, %v5108_v44  ;;  %v4430_v6 = vadd.f32 %v4429_v24, %v4317_v14  ;;  %v4319_v48 = vadd.f32 %v4318_v56, %v13548_v5  ;;  %v4431_v33 = vpop.f32.mrf.mxu1  ;;  %vm4981_vm15 = vcmp.gt.f32.partialorder %v4426_v22, 0.0  ;;  %v9985_v5 = vld [vmem:[%s15617_s3 + $0x7a4] ss:$16 sps:$4 sm:$0xff]   ;;  %v9890_v44 = vld [vmem:[%s15617_s3 + $0x5a0] ss:$16 sps:$4 sm:$0xff]  }
 0x275   :  { %7112 = vmatmul.mubr.bf16.gmra.mxu1 %v13212_v50  ;;  %7170 = vmatprep.subr.bf16.mxu0 %v9889_v19  ;;  %v13866_v58 = vpack.c.bf16 %v5236_v18, %v5228_v17  ;;  %v5109_v61 = vmul.f32 0.2, %v4426_v22  ;;  %v4320_v16 = vpop.f32.mrf.mxu0 }
 0x276   :  { %7121 = vmatprep.mubr.bf16.mxu1 %v13277_v39  ;;  %7282 = vmatpush2.bf16.msra.mxu1 %v9971_v12  ;;  %v4321_v19 = vadd.f32 %v4320_v16, %v13560_v13  ;;  %v4433_v31 = vpop.f32.mrf.mxu1  ;;  %v5116_v11 = vmul.f32 0.2, %v4430_v6  ;;  %vm4988_vm0 = vcmp.gt.f32.partialorder %v4430_v6, 0.0  ;;  %v4432_v24 = vadd.f32 %v4431_v33, %v4319_v48  ;;  %v9991_v33 = vld [vmem:[%s15617_s3 + $0x784] ss:$16 sps:$4 sm:$0xff]  }
 0x277   :  { %15749 = vst [vmem:[#allocation16_spill] sm:$0xff] %v13866_v58  ;;  %7283 = vmatprep.subr.bf16.mxu1 %v9979_v28  ;;  %v4322_v12 = vpop.f32.mrf.mxu0  ;;  %v5237_v14 = vsel %vm4981_vm15, %v4426_v22, %v5109_v61  ;;  %v9895_v28 = vld [vmem:[%s15617_s3 + $0x584] ss:$16 sps:$4 sm:$0xff]   ;;  %v5229_v13 = vsel %vm4973_vm14, %v4422_v26, %v5101_v2  ;;  %v15750_v22 = vld [vmem:[#allocation15_spill] sm:$0xff] }
 0x278   :  { %7171 = vmatpush2.bf16.msra.mxu0 %v9887_v49  ;;  %v4434_v17 = vadd.f32 %v4433_v31, %v4321_v19  ;;  %v4435_v56 = vpop.f32.mrf.mxu1  ;;  %v9983_v49 = vld [vmem:[%s15617_s3 + $0x7a0] ss:$16 sps:$4 sm:$0xff]   ;;  %v4323_v18 = vadd.f32 %v4322_v12, %v13569_v57  ;;  %v13884_v48 = vpack.c.bf16 %v5237_v14, %v5229_v13  ;;  %v5244_v57 = vsel %vm4988_vm0, %v4430_v6, %v5116_v11  ;;  %v9898_v6 = vld [vmem:[%s15617_s3 + $0x564] ss:$16 sps:$4 sm:$0xff]  }
 0x279   :  { %7172 = vmatprep.subr.bf16.mxu0 %v9892_v9  ;;  %v4326_v16 = vpop.f32.mrf.mxu0  ;;  %v9893_v19 = vld [vmem:[%s15617_s3 + $0x580] ss:$16 sps:$4 sm:$0xff]   ;;  %v5117_v31 = vmul.f32 0.2, %v4432_v24  ;;  %vm4989_vm2 = vcmp.gt.f32.partialorder %v4432_v24, 0.0 }
 0x27a   :  { %7284 = vmatpush2.bf16.msra.mxu1 %v9977_v3  ;;  %15751 = vst [vmem:[#allocation15_spill] sm:$0xff] %v13884_v48  ;;  %vm4996_vm1 = vcmp.gt.f32.partialorder %v4434_v17, 0.0  ;;  %v5124_v9 = vmul.f32 0.2, %v4434_v17  ;;  %v4327_v26 = vadd.f32 %v4326_v16, %v13584_v52  ;;  %v4439_v2 = vpop.f32.mrf.mxu1  ;;  %v15752_v3 = vld [vmem:[#allocation18_spill] sm:$0xff]  ;;  %v4436_v61 = vadd.f32 %v4435_v56, %v4323_v18 }
 0x27b   :  { %7009 = vmatmul.mubr.bf16.gmra.mxu0 %v15750_v22  ;;  %7285 = vmatprep.subr.bf16.mxu1 %v9985_v5  ;;  %v4328_v5 = vpop.f32.mrf.mxu0  ;;  %v9989_v11 = vld [vmem:[%s15617_s3 + $0x780] ss:$16 sps:$4 sm:$0xff]  }
 0x27c   :  { %7018 = vmatprep.mubr.bf16.mxu0 %v15752_v3  ;;  %7173 = vmatpush2.bf16.msra.mxu0 %v9890_v44  ;;  %v5252_v12 = vsel %vm4996_vm1, %v4434_v17, %v5124_v9  ;;  %v4440_v14 = vadd.f32 %v4439_v2, %v4327_v26  ;;  %v4329_v52 = vadd.f32 %v4328_v5, %v13594_v36  ;;  %v4441_v13 = vpop.f32.mrf.mxu1  ;;  %vm4997_vm3 = vcmp.gt.f32.partialorder %v4436_v61, 0.0  ;;  %v9997_v36 = vld [vmem:[%s15617_s3 + $0x764] ss:$16 sps:$4 sm:$0xff]   ;;  %v9896_v9 = vld [vmem:[%s15617_s3 + $0x560] ss:$16 sps:$4 sm:$0xff]  }
 0x27d   :  { %7122 = vmatmul.mubr.bf16.gmra.mxu1 %v13262_v10  ;;  %7174 = vmatprep.subr.bf16.mxu0 %v9895_v28  ;;  %v13904_v44 = vpack.c.bf16 %v5252_v12, %v5244_v57  ;;  %v5125_v56 = vmul.f32 0.2, %v4436_v61  ;;  %v4330_v17 = vpop.f32.mrf.mxu0 }
 0x27e   :  { %7131 = vmatprep.mubr.bf16.mxu1 %v13328_v53  ;;  %7286 = vmatpush2.bf16.msra.mxu1 %v9983_v49  ;;  %v4331_v28 = vadd.f32 %v4330_v17, %v13606_v62  ;;  %v4443_v18 = vpop.f32.mrf.mxu1  ;;  %v5132_v16 = vmul.f32 0.2, %v4440_v14  ;;  %vm5004_vm4 = vcmp.gt.f32.partialorder %v4440_v14, 0.0  ;;  %v4442_v2 = vadd.f32 %v4441_v13, %v4329_v52  ;;  %v10003_v13 = vld [vmem:[%s15617_s3 + $0x744] ss:$16 sps:$4 sm:$0xff]  }
 0x27f   :  { %15753 = vst [vmem:[#allocation18_spill] sm:$0xff] %v13904_v44  ;;  %7287 = vmatprep.subr.bf16.mxu1 %v9991_v33  ;;  %v4332_v49 = vpop.f32.mrf.mxu0  ;;  %v5253_v26 = vsel %vm4997_vm3, %v4436_v61, %v5125_v56  ;;  %v9901_v33 = vld [vmem:[%s15617_s3 + $0x544] ss:$16 sps:$4 sm:$0xff]   ;;  %v5245_v62 = vsel %vm4989_vm2, %v4432_v24, %v5117_v31  ;;  %v15754_v61 = vld [vmem:[#allocation17_spill] sm:$0xff] }
 0x280   :  { %7175 = vmatpush2.bf16.msra.mxu0 %v9893_v19  ;;  %v4444_v57 = vadd.f32 %v4443_v18, %v4331_v28  ;;  %v4445_v5 = vpop.f32.mrf.mxu1  ;;  %v9995_v19 = vld [vmem:[%s15617_s3 + $0x760] ss:$16 sps:$4 sm:$0xff]   ;;  %v4333_v12 = vadd.f32 %v4332_v49, %v13615_v34  ;;  %v13922_v52 = vpack.c.bf16 %v5253_v26, %v5245_v62  ;;  %v5260_v34 = vsel %vm5004_vm4, %v4440_v14, %v5132_v16  ;;  %v9904_v14 = vld [vmem:[%s15617_s3 + $0x524] ss:$16 sps:$4 sm:$0xff]  }
 0x281   :  { %7176 = vmatprep.subr.bf16.mxu0 %v9898_v6  ;;  %v4336_v17 = vpop.f32.mrf.mxu0  ;;  %v9899_v28 = vld [vmem:[%s15617_s3 + $0x540] ss:$16 sps:$4 sm:$0xff]   ;;  %v5133_v18 = vmul.f32 0.2, %v4442_v2  ;;  %vm5005_vm6 = vcmp.gt.f32.partialorder %v4442_v2, 0.0 }
 0x282   :  { %7288 = vmatpush2.bf16.msra.mxu1 %v9989_v11  ;;  %15755 = vst [vmem:[#allocation17_spill] sm:$0xff] %v13922_v52  ;;  %vm5012_vm5 = vcmp.gt.f32.partialorder %v4444_v57, 0.0  ;;  %v5140_v6 = vmul.f32 0.2, %v4444_v57  ;;  %v4337_v24 = vadd.f32 %v4336_v17, %v13630_v51  ;;  %v4449_v31 = vpop.f32.mrf.mxu1  ;;  %v15756_v11 = vld [vmem:[#allocation20_spill] sm:$0xff]  ;;  %v4446_v56 = vadd.f32 %v4445_v5, %v4333_v12 }
 0x283   :  { %7019 = vmatmul.mubr.bf16.gmra.mxu0 %v15754_v61  ;;  %7289 = vmatprep.subr.bf16.mxu1 %v9997_v36  ;;  %v4338_v36 = vpop.f32.mrf.mxu0  ;;  %v10001_v16 = vld [vmem:[%s15617_s3 + $0x740] ss:$16 sps:$4 sm:$0xff]  }
 0x284   :  { %7028 = vmatprep.mubr.bf16.mxu0 %v15756_v11  ;;  %7177 = vmatpush2.bf16.msra.mxu0 %v9896_v9  ;;  %v5268_v49 = vsel %vm5012_vm5, %v4444_v57, %v5140_v6  ;;  %v4450_v26 = vadd.f32 %v4449_v31, %v4337_v24  ;;  %v4339_v51 = vadd.f32 %v4338_v36, %v13640_v20  ;;  %v4451_v62 = vpop.f32.mrf.mxu1  ;;  %vm5013_vm7 = vcmp.gt.f32.partialorder %v4446_v56, 0.0  ;;  %v10009_v20 = vld [vmem:[%s15617_s3 + $0x724] ss:$16 sps:$4 sm:$0xff]   ;;  %v9902_v6 = vld [vmem:[%s15617_s3 + $0x520] ss:$16 sps:$4 sm:$0xff]  }
 0x285   :  { %7132 = vmatmul.mubr.bf16.gmra.mxu1 %v13297_v23  ;;  %7178 = vmatprep.subr.bf16.mxu0 %v9901_v33  ;;  %v13942_v9 = vpack.c.bf16 %v5268_v49, %v5260_v34  ;;  %v5141_v5 = vmul.f32 0.2, %v4446_v56  ;;  %v4340_v57 = vpop.f32.mrf.mxu0 }
 0x286   :  { %7141 = vmatprep.mubr.bf16.mxu1 %v13380_v46  ;;  %7290 = vmatpush2.bf16.msra.mxu1 %v9995_v19  ;;  %v4341_v33 = vadd.f32 %v4340_v57, %v13649_v27  ;;  %v4453_v12 = vpop.f32.mrf.mxu1  ;;  %v5148_v17 = vmul.f32 0.2, %v4450_v26  ;;  %vm5020_vm8 = vcmp.gt.f32.partialorder %v4450_v26, 0.0  ;;  %v4452_v31 = vadd.f32 %v4451_v62, %v4339_v51  ;;  %v10015_v62 = vld [vmem:[%s15617_s3 + $0x704] ss:$16 sps:$4 sm:$0xff]  }
 0x287   :  { %15757 = vst [vmem:[#allocation20_spill] sm:$0xff] %v13942_v9  ;;  %7291 = vmatprep.subr.bf16.mxu1 %v10003_v13  ;;  %v4342_v19 = vpop.f32.mrf.mxu0  ;;  %v5269_v24 = vsel %vm5013_vm7, %v4446_v56, %v5141_v5  ;;  %v9907_v13 = vld [vmem:[%s15617_s3 + $0x504] ss:$16 sps:$4 sm:$0xff]   ;;  %v5261_v27 = vsel %vm5005_vm6, %v4442_v2, %v5133_v18  ;;  %v15758_v56 = vld [vmem:[#allocation19_spill] sm:$0xff] }
 0x288   :  { %7179 = vmatpush2.bf16.msra.mxu0 %v9899_v28  ;;  %v4454_v34 = vadd.f32 %v4453_v12, %v4341_v33  ;;  %v4455_v36 = vpop.f32.mrf.mxu1  ;;  %v10007_v28 = vld [vmem:[%s15617_s3 + $0x720] ss:$16 sps:$4 sm:$0xff]   ;;  %v4343_v49 = vadd.f32 %v4342_v19, %v13661_v29  ;;  %v13960_v51 = vpack.c.bf16 %v5269_v24, %v5261_v27  ;;  %v570_v29 = vsub.s32 6, %v11460_v63 }
 0x289   :  { %7180 = vmatprep.subr.bf16.mxu0 %v9904_v14  ;;  %v4346_v57 = vpop.f32.mrf.mxu0  ;;  %v9905_v33 = vld [vmem:[%s15617_s3 + $0x500] ss:$16 sps:$4 sm:$0xff]   ;;  %v574_v12 = vsub.s32 7, %v11460_v63  ;;  %v5149_v19 = vmul.f32 0.2, %v4452_v31  ;;  %vm5021_vm10 = vcmp.gt.f32.partialorder %v4452_v31, 0.0 }
 0x28a   :  { %7292 = vmatpush2.bf16.msra.mxu1 %v10001_v16  ;;  %15759 = vst [vmem:[#allocation37_spill] sm:$0xff] %v13960_v51  ;;  %vm5028_vm9 = vcmp.gt.f32.partialorder %v4454_v34, 0.0  ;;  %v5156_v14 = vmul.f32 0.2, %v4454_v34  ;;  %v4347_v2 = vadd.f32 %v4346_v57, %v13677_v25  ;;  %v4459_v18 = vpop.f32.mrf.mxu1  ;;  %v5276_v16 = vsel %vm5020_vm8, %v4450_v26, %v5148_v17  ;;  %v9910_v26 = vld [vmem:[%s15617_s3 + $0xec] ss:$16 sps:$4 sm:$0xff]  }
 0x28b   :  { %7029 = vmatmul.mubr.bf16.gmra.mxu0 %v15758_v56  ;;  %7293 = vmatprep.subr.bf16.mxu1 %v10009_v20  ;;  %v4456_v5 = vadd.f32 %v4455_v36, %v4343_v49  ;;  %v4348_v20 = vpop.f32.mrf.mxu0  ;;  %v10013_v17 = vld [vmem:[%s15617_s3 + $0x700] ss:$16 sps:$4 sm:$0xff]  }
 0x28c   :  { %7184 = vmatprep.mubr.bf16.mxu0 %v13770_v1  ;;  %7181 = vmatpush2.bf16.msra.mxu0 %v9902_v6  ;;  %v5284_v25 = vsel %vm5028_vm9, %v4454_v34, %v5156_v14  ;;  %v4460_v24 = vadd.f32 %v4459_v18, %v4347_v2  ;;  %v4349_v27 = vadd.f32 %v4348_v20, %v13684_v40  ;;  %v4461_v57 = vpop.f32.mrf.mxu1  ;;  %v10021_v40 = vld [vmem:[%s15617_s3 + $0x2ec] ss:$16 sps:$4 sm:$0xff]  }
 0x28d   :  { %7142 = vmatmul.mubr.bf16.gmra.mxu1 %v13356_v43  ;;  %7182 = vmatprep.subr.bf16.mxu0 %v9907_v13  ;;  %v13981_v6 = vpack.c.bf16 %v5284_v25, %v5276_v16  ;;  %vm5029_vm11 = vcmp.gt.f32.partialorder %v4456_v5, 0.0  ;;  %v5157_v36 = vmul.f32 0.2, %v4456_v5  ;;  %v4350_v34 = vpop.f32.mrf.mxu0 }
 0x28e   :  { %7294 = vmatpush2.bf16.msra.mxu1 %v10007_v28  ;;  %v4351_v13 = vadd.f32 %v4350_v34, %v13690_v45  ;;  %v4463_v49 = vpop.f32.mrf.mxu1  ;;  %v10366_v28 = vld [vmem:[%s15616_s2] sm:$0xff]  ;;  %v5164_v2 = vmul.f32 0.2, %v4460_v24  ;;  %v4462_v18 = vadd.f32 %v4461_v57, %v4349_v27  ;;  %vm5036_vm12 = vcmp.gt.f32.partialorder %v4460_v24, 0.0 }
 0x28f   :  { %15760 = vst [vmem:[#allocation38_spill] sm:$0xff] %v13981_v6  ;;  %7295 = vmatprep.subr.bf16.mxu1 %v10015_v62  ;;  %v13990_v14 = vrot.slane %v10366_v28, %v570_v29  ;;  %v4352_v16 = vpop.f32.mrf.mxu0  ;;  %v9908_v62 = vld [vmem:[%s15617_s3 + $0xe8] ss:$16 sps:$4 sm:$0xff]   ;;  %v5285_v20 = vsel %vm5029_vm11, %v4456_v5, %v5157_v36  ;;  %v13995_v45 = vrot.slane %v10366_v28, %v574_v12  ;;  %v9913_v29 = vld [vmem:[%s15617_s3 + $0xcc] ss:$16 sps:$4 sm:$0xff]  }
 0x290   :  { %7183 = vmatpush2.bf16.msra.mxu0 %v9905_v33  ;;  %v4464_v25 = vadd.f32 %v4463_v49, %v4351_v13  ;;  %v4465_v63 = vpop.f32.mrf.mxu1  ;;  %v5277_v34 = vsel %vm5021_vm10, %v4452_v31, %v5149_v19  ;;  %v4353_v33 = vadd.f32 %v4352_v16, %v13703_v30  ;;  %v5292_v12 = vsel %vm5036_vm12, %v4460_v24, %v5164_v2  ;;  %v9911_v30 = vld [vmem:[%s15617_s3 + $0xc8] ss:$16 sps:$4 sm:$0xff]  }
 0x291   :  { %7378 = vmatprep.subr.bf16.mxu0 %v9910_v26  ;;  %v4502_v27 = vpop.f32.mrf.mxu0  ;;  %v14002_v57 = vpack.c.bf16 %v5285_v20, %v5277_v34  ;;  %v5165_v13 = vmul.f32 0.2, %v4462_v18  ;;  %vm5037_vm14 = vcmp.gt.f32.partialorder %v4462_v18, 0.0 }
 0x292   :  { %7296 = vmatpush2.bf16.msra.mxu1 %v10013_v17  ;;  %vm5044_vm13 = vcmp.gt.f32.partialorder %v4464_v25, 0.0  ;;  %v5172_v5 = vmul.f32 0.2, %v4464_v25  ;;  %v4503_v36 = vadd.f32 %v4502_v27, %v13990_v14  ;;  %v4615_v26 = vpop.f32.mrf.mxu1  ;;  %v4466_v49 = vadd.f32 %v4465_v63, %v4353_v33  ;;  %v9916_v63 = vld [vmem:[%s15617_s3 + $0xac] ss:$16 sps:$4 sm:$0xff]  }
 0x293   :  { %15761 = vst [vmem:[#allocation39_spill] sm:$0xff] %v14002_v57  ;;  %7491 = vmatprep.subr.bf16.mxu1 %v10021_v40  ;;  %7185 = vmatmul.mubr.bf16.vlgmr.msra.gmra.mxu0 %v13752_v21  ;;  %v4504_v31 = vpop.f32.mrf.mxu0  ;;  %v5293_v33 = vsel %vm5037_vm14, %v4462_v18, %v5165_v13  ;;  %v9917_v13 = vld [vmem:[%s15617_s3 + $0x88] ss:$16 sps:$4 sm:$0xff]  }
 0x294   :  { %7194 = vmatprep.mubr.bf16.mxu0 %v13808_v42  ;;  %7379 = vmatpush1.bf16.msra.mxu0 %v9908_v62  ;;  %v5300_v19 = vsel %vm5044_vm13, %v4464_v25, %v5172_v5  ;;  %v14011_v17 = vadd.f32 %v4615_v26, %v4503_v36  ;;  %v4505_v40 = vadd.f32 %v4504_v31, %v13995_v45  ;;  %v4617_v28 = vpop.f32.mrf.mxu1  ;;  %vm5045_vm15 = vcmp.gt.f32.partialorder %v4466_v49, 0.0  ;;  %v9919_v26 = vld [vmem:[%s15617_s3 + $0x8c] ss:$16 sps:$4 sm:$0xff]  }
 0x295   :  { %7380 = vmatprep.subr.bf16.mxu0 %v9913_v29  ;;  %v14017_v24 = vpack.c.bf16 %v5300_v19, %v5292_v12  ;;  %v5173_v2 = vmul.f32 0.2, %v4466_v49  ;;  %v4506_v16 = vpop.f32.mrf.mxu0  ;;  %v9914_v29 = vld [vmem:[%s15617_s3 + $0xa8] ss:$16 sps:$4 sm:$0xff]  }
 0x296   :  { %v14019_v62 = vadd.f32 %v4617_v28, %v4505_v40  ;;  %v4507_v20 = vadd.f32 %v4506_v16, %v13990_v14  ;;  %v4619_v25 = vpop.f32.mrf.mxu1 }
 0x297   :  { %15762 = vst [vmem:[#allocation40_spill] sm:$0xff] %v14017_v24  ;;  %v14022_v34 = vpop.f32.mrf.mxu0  ;;  %v5301_v27 = vsel %vm5045_vm15, %v4466_v49, %v5173_v2 }
 0x298   :  { %7381 = vmatpush1.bf16.msra.mxu0 %v9911_v30  ;;  %v14028_v5 = vadd.f32 %v4619_v25, %v4507_v20  ;;  %v14030_v36 = vpop.f32.mrf.mxu1  ;;  %v14035_v12 = vpack.c.bf16 %v5301_v27, %v5293_v33  ;;  %v9920_v33 = vld [vmem:[%s15617_s3 + $0x68] ss:$16 sps:$4 sm:$0xff]  }
 0x299   :  { %7382 = vmatprep.subr.bf16.mxu0 %v9916_v63  ;;  %v9922_v63 = vld [vmem:[%s15617_s3 + $0x6c] ss:$16 sps:$4 sm:$0xff]  }
 0x29a   :  { %15763 = vst [vmem:[#allocation41_spill] sm:$0xff] %v14035_v12 }
 0x29b   :  { %v4512_v31 = vpop.f32.mrf.mxu0  ;;  %v4625_v19 = vpop.f32.mrf.mxu1  ;;  %7195 = vmatmul.mubr.bf16.gmra.mxu0 %v13790_v4 }
 0x29c   :  { %v4513_v30 = vadd.f32 %v4512_v31, %v13990_v14  ;;  %7204 = vmatprep.mubr.bf16.mxu0 %v13846_v0  ;;  %7383 = vmatpush1.bf16.msra.mxu0 %v9914_v29  ;;  %v9928_v31 = vld [vmem:[%s15617_s3 + $0x4c] ss:$16 sps:$4 sm:$0xff]  }
 0x29d   :  { %v4514_v18 = vpop.f32.mrf.mxu0  ;;  %v4627_v28 = vpop.f32.mrf.mxu1  ;;  %7384 = vmatprep.subr.bf16.mxu0 %v9919_v26 }
 0x29e   :  { %v14043_v49 = vadd.f32 %v4625_v19, %v4513_v30  ;;  %v4515_v40 = vadd.f32 %v4514_v18, %v13995_v45 }
 0x29f   :  { %v4516_v2 = vpop.f32.mrf.mxu0  ;;  %v4629_v25 = vpop.f32.mrf.mxu1 }
 0x2a0   :  { %v14049_v16 = vadd.f32 %v4627_v28, %v4515_v40  ;;  %v4517_v20 = vadd.f32 %v4516_v2, %v13990_v14  ;;  %7385 = vmatpush1.bf16.msra.mxu0 %v9917_v13  ;;  %v9926_v40 = vld [vmem:[%s15617_s3 + $0x48] ss:$16 sps:$4 sm:$0xff]  }
 0x2a1   :  { %v14052_v29 = vpop.f32.mrf.mxu0  ;;  %v14059_v26 = vpop.f32.mrf.mxu1  ;;  %7386 = vmatprep.subr.bf16.mxu0 %v9922_v63 }
 0x2a2   :  { %v14057_v27 = vadd.f32 %v4629_v25, %v4517_v20  ;;  %v9934_v20 = vld [vmem:[%s15617_s3 + $0x2c] ss:$16 sps:$4 sm:$0xff]   ;;  %v4519_v56 = vadd.f32 %v14052_v29, %v13995_v45 }
 0x2a3   :  { %v4522_v30 = vpop.f32.mrf.mxu0  ;;  %7205 = vmatmul.mubr.bf16.gmra.mxu0 %v13828_v55 }
 0x2a4   :  { %v4523_v19 = vadd.f32 %v4522_v30, %v13990_v14  ;;  %7214 = vmatprep.mubr.bf16.mxu0 %v13884_v48  ;;  %7387 = vmatpush1.bf16.msra.mxu0 %v9920_v33 }
 0x2a5   :  { %v4635_v18 = vpop.f32.mrf.mxu1  ;;  %v4524_v13 = vpop.f32.mrf.mxu0  ;;  %7388 = vmatprep.subr.bf16.mxu0 %v9928_v31 }
 0x2a6   :  { %v14070_v28 = vadd.f32 %v4635_v18, %v4523_v19  ;;  %v4525_v63 = vadd.f32 %v4524_v13, %v13995_v45  ;;  %v9932_v19 = vld [vmem:[%s15617_s3 + $0x28] ss:$16 sps:$4 sm:$0xff]   ;;  %v9940_v13 = vld [vmem:[%s15617_s3 + $0xc] ss:$16 sps:$4 sm:$0xff]  }
 0x2a7   :  { %v4637_v2 = vpop.f32.mrf.mxu1  ;;  %v4526_v25 = vpop.f32.mrf.mxu0 }
 0x2a8   :  { %v14076_v30 = vadd.f32 %v4637_v2, %v4525_v63  ;;  %v4527_v33 = vadd.f32 %v4526_v25, %v13990_v14  ;;  %7389 = vmatpush1.bf16.msra.mxu0 %v9926_v40 }
 0x2a9   :  { %v4639_v43 = vpop.f32.mrf.mxu1  ;;  %v14079_v46 = vpop.f32.mrf.mxu0  ;;  %7390 = vmatprep.subr.bf16.mxu0 %v9934_v20 }
 0x2aa   :  { %v14084_v18 = vadd.f32 %v4639_v43, %v4527_v33  ;;  %v9938_v43 = vld [vmem:[%s15617_s3 + $0x8] ss:$16 sps:$4 sm:$0xff]  }
 0x2ab   :  { %v14086_v31 = vpop.f32.mrf.mxu1  ;;  %v4532_v63 = vpop.f32.mrf.mxu0  ;;  %7215 = vmatmul.mubr.bf16.gmra.mxu0 %v13866_v58 }
 0x2ac   :  { %v4533_v2 = vadd.f32 %v4532_v63, %v13990_v14  ;;  %7224 = vmatprep.mubr.bf16.mxu0 %v13922_v52  ;;  %7391 = vmatpush1.bf16.msra.mxu0 %v9932_v19  ;;  %v9946_v63 = vld [vmem:[%s15617_s3 + $0x1ec] ss:$16 sps:$4 sm:$0xff]  }
 0x2ad   :  { %v4645_v25 = vpop.f32.mrf.mxu1  ;;  %v4534_v40 = vpop.f32.mrf.mxu0  ;;  %7392 = vmatprep.subr.bf16.mxu0 %v9940_v13 }
 0x2ae   :  { %v14097_v33 = vadd.f32 %v4645_v25, %v4533_v2  ;;  %v4535_v20 = vadd.f32 %v4534_v40, %v13995_v45  ;;  %v9944_v2 = vld [vmem:[%s15617_s3 + $0x1e8] ss:$16 sps:$4 sm:$0xff]  }
 0x2af   :  { %v4647_v23 = vpop.f32.mrf.mxu1  ;;  %v4536_v53 = vpop.f32.mrf.mxu0 }
 0x2b0   :  { %v14103_v10 = vadd.f32 %v4647_v23, %v4535_v20  ;;  %v4537_v19 = vadd.f32 %v4536_v53, %v13990_v14  ;;  %7393 = vmatpush1.bf16.msra.mxu0 %v9938_v43  ;;  %v9952_v23 = vld [vmem:[%s15617_s3 + $0x1cc] ss:$16 sps:$4 sm:$0xff]  }
 0x2b1   :  { %v4649_v39 = vpop.f32.mrf.mxu1  ;;  %v14106_v50 = vpop.f32.mrf.mxu0  ;;  %7394 = vmatprep.subr.bf16.mxu0 %v9946_v63 }
 0x2b2   :  { %v14111_v25 = vadd.f32 %v4649_v39, %v4537_v19  ;;  %v9950_v39 = vld [vmem:[%s15617_s3 + $0x1c8] ss:$16 sps:$4 sm:$0xff]  }
 0x2b3   :  { %v14113_v13 = vpop.f32.mrf.mxu1  ;;  %v4542_v40 = vpop.f32.mrf.mxu0  ;;  %7225 = vmatmul.mubr.bf16.gmra.mxu0 %v13904_v44 }
 0x2b4   :  { %v4543_v53 = vadd.f32 %v4542_v40, %v13990_v14  ;;  %7234 = vmatprep.mubr.bf16.mxu0 %v13960_v51  ;;  %7395 = vmatpush2.bf16.msra.mxu0 %v9944_v2  ;;  %v9958_v40 = vld [vmem:[%s15617_s3 + $0x1ac] ss:$16 sps:$4 sm:$0xff]  }
 0x2b5   :  { %v4655_v20 = vpop.f32.mrf.mxu1  ;;  %v4544_v43 = vpop.f32.mrf.mxu0  ;;  %7396 = vmatprep.subr.bf16.mxu0 %v9952_v23 }
 0x2b6   :  { %v14124_v19 = vadd.f32 %v4655_v20, %v4543_v53  ;;  %v4545_v63 = vadd.f32 %v4544_v43, %v13995_v45  ;;  %v9956_v53 = vld [vmem:[%s15617_s3 + $0x1a8] ss:$16 sps:$4 sm:$0xff]  }
 0x2b7   :  { %v4657_v15 = vpop.f32.mrf.mxu1  ;;  %v4546_v7 = vpop.f32.mrf.mxu0 }
 0x2b8   :  { %v14130_v32 = vadd.f32 %v4657_v15, %v4545_v63  ;;  %v4547_v2 = vadd.f32 %v4546_v7, %v13990_v14  ;;  %7397 = vmatpush2.bf16.msra.mxu0 %v9950_v39  ;;  %v9964_v15 = vld [vmem:[%s15617_s3 + $0x18c] ss:$16 sps:$4 sm:$0xff]  }
 0x2b9   :  { %v4659_v51 = vpop.f32.mrf.mxu1  ;;  %v14133_v8 = vpop.f32.mrf.mxu0  ;;  %7398 = vmatprep.subr.bf16.mxu0 %v9958_v40 }
 0x2ba   :  { %v14138_v20 = vadd.f32 %v4659_v51, %v4547_v2  ;;  %v9962_v51 = vld [vmem:[%s15617_s3 + $0x188] ss:$16 sps:$4 sm:$0xff]  }
 0x2bb   :  { %v14140_v23 = vpop.f32.mrf.mxu1  ;;  %v4552_v43 = vpop.f32.mrf.mxu0  ;;  %7235 = vmatmul.mubr.bf16.gmra.mxu0 %v13942_v9 }
 0x2bc   :  { %v4553_v7 = vadd.f32 %v4552_v43, %v13990_v14  ;;  %7244 = vmatprep.mubr.bf16.mxu0 %v14002_v57  ;;  %7399 = vmatpush2.bf16.msra.mxu0 %v9956_v53  ;;  %v9970_v43 = vld [vmem:[%s15617_s3 + $0x16c] ss:$16 sps:$4 sm:$0xff]  }
 0x2bd   :  { %v4665_v63 = vpop.f32.mrf.mxu1  ;;  %v4554_v39 = vpop.f32.mrf.mxu0  ;;  %7400 = vmatprep.subr.bf16.mxu0 %v9964_v15 }
 0x2be   :  { %v14151_v2 = vadd.f32 %v4665_v63, %v4553_v7  ;;  %v4555_v40 = vadd.f32 %v4554_v39, %v13995_v45  ;;  %v9968_v7 = vld [vmem:[%s15617_s3 + $0x168] ss:$16 sps:$4 sm:$0xff]  }
 0x2bf   :  { %v4667_v44 = vpop.f32.mrf.mxu1  ;;  %v4556_v52 = vpop.f32.mrf.mxu0 }
 0x2c0   :  { %v14157_v9 = vadd.f32 %v4667_v44, %v4555_v40  ;;  %v4557_v53 = vadd.f32 %v4556_v52, %v13990_v14  ;;  %7401 = vmatpush2.bf16.msra.mxu0 %v9962_v51  ;;  %v9976_v44 = vld [vmem:[%s15617_s3 + $0x14c] ss:$16 sps:$4 sm:$0xff]  }
 0x2c1   :  { %v4669_v57 = vpop.f32.mrf.mxu1  ;;  %v14160_v41 = vpop.f32.mrf.mxu0  ;;  %7402 = vmatprep.subr.bf16.mxu0 %v9970_v43 }
 0x2c2   :  { %v14165_v63 = vadd.f32 %v4669_v57, %v4557_v53  ;;  %v9974_v57 = vld [vmem:[%s15617_s3 + $0x148] ss:$16 sps:$4 sm:$0xff]  }
 0x2c3   :  { %v14167_v15 = vpop.f32.mrf.mxu1  ;;  %v4562_v39 = vpop.f32.mrf.mxu0  ;;  %7245 = vmatmul.mubr.bf16.gmra.mxu0 %v13981_v6 }
 0x2c4   :  { %v4563_v52 = vadd.f32 %v4562_v39, %v13990_v14  ;;  %7254 = vmatprep.mubr.bf16.mxu0 %v14035_v12  ;;  %7403 = vmatpush2.bf16.msra.mxu0 %v9968_v7  ;;  %v9982_v39 = vld [vmem:[%s15617_s3 + $0x12c] ss:$16 sps:$4 sm:$0xff]  }
 0x2c5   :  { %v4675_v40 = vpop.f32.mrf.mxu1  ;;  %v4564_v51 = vpop.f32.mrf.mxu0  ;;  %7404 = vmatprep.subr.bf16.mxu0 %v9976_v44 }
 0x2c6   :  { %v14178_v53 = vadd.f32 %v4675_v40, %v4563_v52  ;;  %v4565_v43 = vadd.f32 %v4564_v51, %v13995_v45  ;;  %v9980_v52 = vld [vmem:[%s15617_s3 + $0x128] ss:$16 sps:$4 sm:$0xff]  }
 0x2c7   :  { %v4677_v58 = vpop.f32.mrf.mxu1  ;;  %v4566_v48 = vpop.f32.mrf.mxu0 }
 0x2c8   :  { %v14184_v6 = vadd.f32 %v4677_v58, %v4565_v43  ;;  %v4567_v7 = vadd.f32 %v4566_v48, %v13990_v14  ;;  %7405 = vmatpush2.bf16.msra.mxu0 %v9974_v57  ;;  %v9988_v58 = vld [vmem:[%s15617_s3 + $0x10c] ss:$16 sps:$4 sm:$0xff]  }
 0x2c9   :  { %v4679_v12 = vpop.f32.mrf.mxu1  ;;  %v14187_v55 = vpop.f32.mrf.mxu0  ;;  %7406 = vmatprep.subr.bf16.mxu0 %v9982_v39  ;;  %v15764_v57 = vld [vmem:[#allocation3_spill] sm:$0xff] }
 0x2ca   :  { %v14192_v40 = vadd.f32 %v4679_v12, %v4567_v7  ;;  %v9986_v12 = vld [vmem:[%s15617_s3 + $0x108] ss:$16 sps:$4 sm:$0xff]  }
 0x2cb   :  { %v14194_v44 = vpop.f32.mrf.mxu1  ;;  %v4572_v51 = vpop.f32.mrf.mxu0  ;;  %7255 = vmatmul.mubr.bf16.gmra.mxu0 %v14017_v24 }
 0x2cc   :  { %v4573_v48 = vadd.f32 %v4572_v51, %v13990_v14  ;;  %7407 = vmatpush2.bf16.msra.mxu0 %v9980_v52  ;;  %7410 = vmatprep.mubr.bf16.mxu0 %v15764_v57  ;;  %v9994_v51 = vld [vmem:[%s15617_s3 + $0x4ec] ss:$16 sps:$4 sm:$0xff]  }
 0x2cd   :  { %v4685_v43 = vpop.f32.mrf.mxu1  ;;  %v4574_v0 = vpop.f32.mrf.mxu0  ;;  %7408 = vmatprep.subr.bf16.mxu0 %v9988_v58 }
 0x2ce   :  { %v14205_v7 = vadd.f32 %v4685_v43, %v4573_v48  ;;  %v4575_v39 = vadd.f32 %v4574_v0, %v13995_v45  ;;  %v9992_v48 = vld [vmem:[%s15617_s3 + $0x4e8] ss:$16 sps:$4 sm:$0xff]  }
 0x2cf   :  { %v4687_v4 = vpop.f32.mrf.mxu1  ;;  %v4576_v42 = vpop.f32.mrf.mxu0 }
 0x2d0   :  { %v14211_v24 = vadd.f32 %v4687_v4, %v4575_v39  ;;  %v4577_v52 = vadd.f32 %v4576_v42, %v13990_v14  ;;  %7409 = vmatpush2.bf16.msra.mxu0 %v9986_v12  ;;  %v10000_v4 = vld [vmem:[%s15617_s3 + $0x4cc] ss:$16 sps:$4 sm:$0xff]   ;;  %v15769_v12 = vld [vmem:[#allocation2_spill] sm:$0xff]  ;;  %v4509_v39 = vadd.f32 %v14022_v34, %v13995_v45 }
 0x2d1   :  { %v4689_v57 = vpop.f32.mrf.mxu1  ;;  %v14214_v21 = vpop.f32.mrf.mxu0  ;;  %7604 = vmatprep.subr.bf16.mxu0 %v9994_v51  ;;  %v9998_v51 = vld [vmem:[%s15617_s3 + $0x4c8] ss:$16 sps:$4 sm:$0xff]  }
 0x2d2   :  { %15765 = vst [vmem:[#allocation3_spill] sm:$0xff] %v14211_v24  ;;  %15766 = vst [vmem:[#allocation42_spill] sm:$0xff] %v14214_v21  ;;  %v14219_v0 = vadd.f32 %v4689_v57, %v4577_v52  ;;  %v15770_v24 = vld [vmem:[#allocation5_spill] sm:$0xff]  ;;  %v15771_v21 = vld [vmem:[#allocation4_spill] sm:$0xff] }
 0x2d3   :  { %v14221_v58 = vpop.f32.mrf.mxu1  ;;  %v4728_v43 = vpop.f32.mrf.mxu0  ;;  %7411 = vmatmul.mubr.bf16.vlgmr.msra.gmra.mxu0 %v15769_v12 }
 0x2d4   :  { %15767 = vst [vmem:[#allocation43_spill] sm:$0xff] %v14219_v0  ;;  %15768 = vst [vmem:[#allocation44_spill] sm:$0xff] %v14221_v58  ;;  %v4729_v42 = vadd.f32 %v4728_v43, %v14011_v17  ;;  %7420 = vmatprep.mubr.bf16.mxu0 %v15770_v24  ;;  %7605 = vmatpush1.bf16.msra.mxu0 %v9992_v48  ;;  %v10006_v17 = vld [vmem:[%s15617_s3 + $0x4ac] ss:$16 sps:$4 sm:$0xff]   ;;  %v4622_v24 = vadd.f32 %v14030_v36, %v4509_v39 }
 0x2d5   :  { %v4841_v14 = vpop.f32.mrf.mxu1  ;;  %v4730_v52 = vpop.f32.mrf.mxu0  ;;  %7606 = vmatprep.subr.bf16.mxu0 %v10000_v4 }
 0x2d6   :  { %v4842_v57 = vadd.f32 %v4841_v14, %v4729_v42  ;;  %v4731_v58 = vadd.f32 %v4730_v52, %v14019_v62  ;;  %v10004_v42 = vld [vmem:[%s15617_s3 + $0x4a8] ss:$16 sps:$4 sm:$0xff]   ;;  %v10012_v52 = vld [vmem:[%s15617_s3 + $0x48c] ss:$16 sps:$4 sm:$0xff]  }
 0x2d7   :  { %v4843_v0 = vpop.f32.mrf.mxu1  ;;  %v4732_v43 = vpop.f32.mrf.mxu0 }
 0x2d8   :  { %v4733_v34 = vadd.f32 %v4732_v43, %v14028_v5  ;;  %v5054_v48 = vmul.f32 0.2, %v4842_v57  ;;  %7607 = vmatpush1.bf16.msra.mxu0 %v9998_v51  ;;  %vm4926_vm0 = vcmp.gt.f32.partialorder %v4842_v57, 0.0  ;;  %v4844_v62 = vadd.f32 %v4843_v0, %v4731_v58 }
 0x2d9   :  { %v4845_v12 = vpop.f32.mrf.mxu1  ;;  %v4734_v1 = vpop.f32.mrf.mxu0  ;;  %7608 = vmatprep.subr.bf16.mxu0 %v10006_v17 }
 0x2da   :  { %v4846_v4 = vadd.f32 %v4845_v12, %v4733_v34  ;;  %v4735_v5 = vadd.f32 %v4734_v1, %v4622_v24  ;;  %v5182_v0 = vsel %vm4926_vm0, %v4842_v57, %v5054_v48  ;;  %v10010_v1 = vld [vmem:[%s15617_s3 + $0x488] ss:$16 sps:$4 sm:$0xff]   ;;  %v5055_v34 = vmul.f32 0.2, %v4844_v62 }
 0x2db   :  { %v4847_v14 = vpop.f32.mrf.mxu1  ;;  %v4738_v43 = vpop.f32.mrf.mxu0  ;;  %7421 = vmatmul.mubr.bf16.gmra.mxu0 %v15771_v21  ;;  %v10018_v21 = vld [vmem:[%s15617_s3 + $0x46c] ss:$16 sps:$4 sm:$0xff]   ;;  %vm4927_vm2 = vcmp.gt.f32.partialorder %v4844_v62, 0.0 }
 0x2dc   :  { %vm4934_vm1 = vcmp.gt.f32.partialorder %v4846_v4, 0.0  ;;  %v5062_v36 = vmul.f32 0.2, %v4846_v4  ;;  %v4739_v39 = vadd.f32 %v4738_v43, %v14043_v49  ;;  %v4848_v58 = vadd.f32 %v4847_v14, %v4735_v5  ;;  %7430 = vmatprep.mubr.bf16.mxu0 %v15736_v38  ;;  %7609 = vmatpush1.bf16.msra.mxu0 %v10004_v42 }
 0x2dd   :  { %v4851_v51 = vpop.f32.mrf.mxu1  ;;  %v4740_v17 = vpop.f32.mrf.mxu0  ;;  %7610 = vmatprep.subr.bf16.mxu0 %v10012_v52 }
 0x2de   :  { %v5190_v12 = vsel %vm4934_vm1, %v4846_v4, %v5062_v36  ;;  %v4852_v24 = vadd.f32 %v4851_v51, %v4739_v39  ;;  %v4741_v49 = vadd.f32 %v4740_v17, %v14049_v16  ;;  %vm4935_vm3 = vcmp.gt.f32.partialorder %v4848_v58, 0.0 }
 0x2df   :  { %v4853_v43 = vpop.f32.mrf.mxu1  ;;  %v14258_v29 = vpack.c.bf16 %v5190_v12, %v5182_v0  ;;  %v5063_v38 = vmul.f32 0.2, %v4848_v58  ;;  %v4742_v57 = vpop.f32.mrf.mxu0  ;;  %v4632_v4 = vadd.f32 %v14059_v26, %v4519_v56  ;;  %v5183_v51 = vsel %vm4927_vm2, %v4844_v62, %v5055_v34  ;;  %v10016_v0 = vld [vmem:[%s15617_s3 + $0x468] ss:$16 sps:$4 sm:$0xff]   ;;  %v10024_v26 = vld [vmem:[%s15617_s3 + $0x44c] ss:$16 sps:$4 sm:$0xff]  }
 0x2e0   :  { %v4743_v48 = vadd.f32 %v4742_v57, %v14057_v27  ;;  %v5070_v14 = vmul.f32 0.2, %v4852_v24  ;;  %7611 = vmatpush1.bf16.msra.mxu0 %v10010_v1  ;;  %vm4942_vm4 = vcmp.gt.f32.partialorder %v4852_v24, 0.0  ;;  %v4854_v52 = vadd.f32 %v4853_v43, %v4741_v49  ;;  %v10019_v56 = vld [vmem:[%s15617_s3 + $0x2e8] ss:$16 sps:$4 sm:$0xff]  }
 0x2e1   :  { %v4855_v42 = vpop.f32.mrf.mxu1  ;;  %v4744_v16 = vpop.f32.mrf.mxu0  ;;  %v5191_v5 = vsel %vm4935_vm3, %v4848_v58, %v5063_v38  ;;  %7612 = vmatprep.subr.bf16.mxu0 %v10018_v21  ;;  %v10027_v34 = vld [vmem:[%s15617_s3 + $0x2cc] ss:$16 sps:$4 sm:$0xff]   ;;  %v4529_v49 = vadd.f32 %v14079_v46, %v13995_v45  ;;  %v10022_v46 = vld [vmem:[%s15617_s3 + $0x448] ss:$16 sps:$4 sm:$0xff]  }
 0x2e2   :  { %v4856_v36 = vadd.f32 %v4855_v42, %v4743_v48  ;;  %v4745_v17 = vadd.f32 %v4744_v16, %v4632_v4  ;;  %v14266_v12 = vpack.c.bf16 %v5191_v5, %v5183_v51  ;;  %v5198_v43 = vsel %vm4942_vm4, %v4852_v24, %v5070_v14  ;;  %v10025_v24 = vld [vmem:[%s15617_s3 + $0x2c8] ss:$16 sps:$4 sm:$0xff]  }
 0x2e3   :  { %v4857_v39 = vpop.f32.mrf.mxu1  ;;  %v4748_v27 = vpop.f32.mrf.mxu0  ;;  %7431 = vmatmul.mubr.bf16.gmra.mxu0 %v15738_v54  ;;  %v5071_v57 = vmul.f32 0.2, %v4854_v52  ;;  %vm4943_vm6 = vcmp.gt.f32.partialorder %v4854_v52, 0.0 }
 0x2e4   :  { %vm4950_vm5 = vcmp.gt.f32.partialorder %v4856_v36, 0.0  ;;  %v5078_v58 = vmul.f32 0.2, %v4856_v36  ;;  %v4749_v62 = vadd.f32 %v4748_v27, %v14070_v28  ;;  %v4858_v21 = vadd.f32 %v4857_v39, %v4745_v17  ;;  %7297 = vmatprep.mubr.bf16.mxu1 %v14266_v12  ;;  %7440 = vmatprep.mubr.bf16.mxu0 %v15740_v37 }
 0x2e5   :  { %v4861_v1 = vpop.f32.mrf.mxu1  ;;  %v4750_v38 = vpop.f32.mrf.mxu0  ;;  %7298 = vmatmul.mubr.bf16.vlgmr.msra.gmra.mxu1 %v14258_v29  ;;  %7613 = vmatpush1.bf16.msra.mxu0 %v10016_v0  ;;  %v4642_v39 = vadd.f32 %v14086_v31, %v4529_v49  ;;  %v10031_v31 = vld [vmem:[%s15617_s3 + $0x2a8] ss:$16 sps:$4 sm:$0xff]   ;;  %v10036_v49 = vld [vmem:[%s15617_s3 + $0x40c] ss:$16 sps:$4 sm:$0xff]  }
 0x2e6   :  { %v5206_v28 = vsel %vm4950_vm5, %v4856_v36, %v5078_v58  ;;  %v4862_v48 = vadd.f32 %v4861_v1, %v4749_v62  ;;  %v4751_v54 = vadd.f32 %v4750_v38, %v14076_v30  ;;  %vm4951_vm7 = vcmp.gt.f32.partialorder %v4858_v21, 0.0  ;;  %7492 = vmatpush1.bf16.msra.mxu1 %v10019_v56  ;;  %7614 = vmatprep.subr.bf16.mxu0 %v10024_v26  ;;  %v10030_v30 = vld [vmem:[%s15617_s3 + $0x42c] ss:$16 sps:$4 sm:$0xff]  }
 0x2e7   :  { %v4863_v42 = vpop.f32.mrf.mxu1  ;;  %v14292_v37 = vpack.c.bf16 %v5206_v28, %v5198_v43  ;;  %v5079_v4 = vmul.f32 0.2, %v4858_v21  ;;  %v4752_v14 = vpop.f32.mrf.mxu0  ;;  %7493 = vmatprep.subr.bf16.mxu1 %v10027_v34  ;;  %v10033_v36 = vld [vmem:[%s15617_s3 + $0x2ac] ss:$16 sps:$4 sm:$0xff]   ;;  %v5199_v58 = vsel %vm4943_vm6, %v4854_v52, %v5071_v57  ;;  %v4539_v57 = vadd.f32 %v14106_v50, %v13995_v45  ;;  %v10034_v50 = vld [vmem:[%s15617_s3 + $0x408] ss:$16 sps:$4 sm:$0xff]  }
 0x2e8   :  { %v4753_v16 = vadd.f32 %v4752_v14, %v14084_v18  ;;  %v5086_v51 = vmul.f32 0.2, %v4862_v48  ;;  %vm4958_vm8 = vcmp.gt.f32.partialorder %v4862_v48, 0.0  ;;  %v4864_v27 = vadd.f32 %v4863_v42, %v4751_v54  ;;  %v10028_v18 = vld [vmem:[%s15617_s3 + $0x428] ss:$16 sps:$4 sm:$0xff]  }
 0x2e9   :  { %v4865_v5 = vpop.f32.mrf.mxu1  ;;  %v4754_v0 = vpop.f32.mrf.mxu0  ;;  %v5207_v17 = vsel %vm4951_vm7, %v4858_v21, %v5079_v4  ;;  %7615 = vmatpush1.bf16.msra.mxu0 %v10022_v46  ;;  %v10039_v38 = vld [vmem:[%s15617_s3 + $0x28c] ss:$16 sps:$4 sm:$0xff]  }
 0x2ea   :  { %v4866_v56 = vadd.f32 %v4865_v5, %v4753_v16  ;;  %v4755_v62 = vadd.f32 %v4754_v0, %v4642_v39  ;;  %7494 = vmatpush1.bf16.msra.mxu1 %v10025_v24  ;;  %v14306_v34 = vpack.c.bf16 %v5207_v17, %v5199_v58  ;;  %7616 = vmatprep.subr.bf16.mxu0 %v10030_v30  ;;  %vm4959_vm10 = vcmp.gt.f32.partialorder %v4864_v27, 0.0 }
 0x2eb   :  { %v4867_v26 = vpop.f32.mrf.mxu1  ;;  %v4758_v1 = vpop.f32.mrf.mxu0  ;;  %7441 = vmatmul.mubr.bf16.gmra.mxu0 %v15742_v35  ;;  %7495 = vmatprep.subr.bf16.mxu1 %v10033_v36  ;;  %v5214_v28 = vsel %vm4958_vm8, %v4862_v48, %v5086_v51  ;;  %v10037_v48 = vld [vmem:[%s15617_s3 + $0x288] ss:$16 sps:$4 sm:$0xff]   ;;  %v10045_v36 = vld [vmem:[%s15617_s3 + $0x26c] ss:$16 sps:$4 sm:$0xff]   ;;  %v4652_v39 = vadd.f32 %v14113_v13, %v4539_v57 }
 0x2ec   :  { %vm4966_vm9 = vcmp.gt.f32.partialorder %v4866_v56, 0.0  ;;  %v5094_v52 = vmul.f32 0.2, %v4866_v56  ;;  %v4759_v43 = vadd.f32 %v4758_v1, %v14097_v33  ;;  %v4868_v54 = vadd.f32 %v4867_v26, %v4755_v62  ;;  %7307 = vmatprep.mubr.bf16.mxu1 %v14306_v34  ;;  %7450 = vmatprep.mubr.bf16.mxu0 %v15744_v47  ;;  %v10043_v13 = vld [vmem:[%s15617_s3 + $0x268] ss:$16 sps:$4 sm:$0xff]  }
 0x2ed   :  { %v4871_v21 = vpop.f32.mrf.mxu1  ;;  %v4760_v42 = vpop.f32.mrf.mxu0  ;;  %v5087_v33 = vmul.f32 0.2, %v4864_v27  ;;  %7308 = vmatmul.mubr.bf16.gmra.mxu1 %v14292_v37  ;;  %7617 = vmatpush1.bf16.msra.mxu0 %v10028_v18 }
 0x2ee   :  { %v5222_v46 = vsel %vm4966_vm9, %v4866_v56, %v5094_v52  ;;  %v4872_v24 = vadd.f32 %v4871_v21, %v4759_v43  ;;  %v4761_v35 = vadd.f32 %v4760_v42, %v14103_v10  ;;  %vm4967_vm11 = vcmp.gt.f32.partialorder %v4868_v54, 0.0  ;;  %7496 = vmatpush1.bf16.msra.mxu1 %v10031_v31  ;;  %7618 = vmatprep.subr.bf16.mxu0 %v10036_v49  ;;  %v10042_v10 = vld [vmem:[%s15617_s3 + $0x5ec] ss:$16 sps:$4 sm:$0xff]  }
 0x2ef   :  { %v4873_v4 = vpop.f32.mrf.mxu1  ;;  %v14332_v47 = vpack.c.bf16 %v5222_v46, %v5214_v28  ;;  %v5095_v14 = vmul.f32 0.2, %v4868_v54  ;;  %v4762_v30 = vpop.f32.mrf.mxu0  ;;  %7497 = vmatprep.subr.bf16.mxu1 %v10039_v38  ;;  %v5215_v18 = vsel %vm4959_vm10, %v4864_v27, %v5087_v33  ;;  %v10048_v49 = vld [vmem:[%s15617_s3 + $0x5cc] ss:$16 sps:$4 sm:$0xff]   ;;  %v4549_v38 = vadd.f32 %v14133_v8, %v13995_v45 }
 0x2f0   :  { %v4763_v16 = vadd.f32 %v4762_v30, %v14111_v25  ;;  %v5102_v51 = vmul.f32 0.2, %v4872_v24  ;;  %vm4974_vm12 = vcmp.gt.f32.partialorder %v4872_v24, 0.0  ;;  %v4874_v56 = vadd.f32 %v4873_v4, %v4761_v35  ;;  %v10040_v25 = vld [vmem:[%s15617_s3 + $0x5e8] ss:$16 sps:$4 sm:$0xff]  }
 0x2f1   :  { %v4875_v5 = vpop.f32.mrf.mxu1  ;;  %v4764_v0 = vpop.f32.mrf.mxu0  ;;  %v5223_v17 = vsel %vm4967_vm11, %v4868_v54, %v5095_v14  ;;  %7619 = vmatpush1.bf16.msra.mxu0 %v10034_v50  ;;  %v10051_v21 = vld [vmem:[%s15617_s3 + $0x24c] ss:$16 sps:$4 sm:$0xff]  }
 0x2f2   :  { %v4876_v26 = vadd.f32 %v4875_v5, %v4763_v16  ;;  %v4765_v62 = vadd.f32 %v4764_v0, %v4652_v39  ;;  %7498 = vmatpush1.bf16.msra.mxu1 %v10037_v48  ;;  %v14346_v31 = vpack.c.bf16 %v5223_v17, %v5215_v18  ;;  %7620 = vmatprep.subr.bf16.mxu0 %v10042_v10  ;;  %v10054_v8 = vld [vmem:[%s15617_s3 + $0x5ac] ss:$16 sps:$4 sm:$0xff]   ;;  %v5103_v42 = vmul.f32 0.2, %v4874_v56 }
 0x2f3   :  { %v4877_v58 = vpop.f32.mrf.mxu1  ;;  %v4768_v1 = vpop.f32.mrf.mxu0  ;;  %7451 = vmatmul.mubr.bf16.gmra.mxu0 %v15746_v59  ;;  %7499 = vmatprep.subr.bf16.mxu1 %v10045_v36  ;;  %v5230_v57 = vsel %vm4974_vm12, %v4872_v24, %v5102_v51  ;;  %v10046_v59 = vld [vmem:[%s15617_s3 + $0x5c8] ss:$16 sps:$4 sm:$0xff]   ;;  %v10057_v35 = vld [vmem:[%s15617_s3 + $0x22c] ss:$16 sps:$4 sm:$0xff]   ;;  %vm4975_vm14 = vcmp.gt.f32.partialorder %v4874_v56, 0.0  ;;  %v4662_v10 = vadd.f32 %v14140_v23, %v4549_v38 }
 0x2f4   :  { %vm4982_vm13 = vcmp.gt.f32.partialorder %v4876_v26, 0.0  ;;  %v5110_v27 = vmul.f32 0.2, %v4876_v26  ;;  %v4769_v52 = vadd.f32 %v4768_v1, %v14124_v19  ;;  %v4878_v28 = vadd.f32 %v4877_v58, %v4765_v62  ;;  %7317 = vmatprep.mubr.bf16.mxu1 %v14346_v31  ;;  %7460 = vmatprep.mubr.bf16.mxu0 %v15748_v60  ;;  %v10049_v19 = vld [vmem:[%s15617_s3 + $0x248] ss:$16 sps:$4 sm:$0xff]  }
 0x2f5   :  { %v4881_v43 = vpop.f32.mrf.mxu1  ;;  %v4770_v54 = vpop.f32.mrf.mxu0  ;;  %7318 = vmatmul.mubr.bf16.gmra.mxu1 %v14332_v47  ;;  %7621 = vmatpush2.bf16.msra.mxu0 %v10040_v25  ;;  %v10055_v51 = vld [vmem:[%s15617_s3 + $0x228] ss:$16 sps:$4 sm:$0xff]   ;;  %v10063_v23 = vld [vmem:[%s15617_s3 + $0x20c] ss:$16 sps:$4 sm:$0xff]  }
 0x2f6   :  { %v5238_v33 = vsel %vm4982_vm13, %v4876_v26, %v5110_v27  ;;  %v4882_v46 = vadd.f32 %v4881_v43, %v4769_v52  ;;  %v4771_v60 = vadd.f32 %v4770_v54, %v14130_v32  ;;  %vm4983_vm15 = vcmp.gt.f32.partialorder %v4878_v28, 0.0  ;;  %7500 = vmatpush1.bf16.msra.mxu1 %v10043_v13  ;;  %7622 = vmatprep.subr.bf16.mxu0 %v10048_v49  ;;  %v10052_v32 = vld [vmem:[%s15617_s3 + $0x5a8] ss:$16 sps:$4 sm:$0xff]   ;;  %v10066_v43 = vld [vmem:[%s15617_s3 + $0x56c] ss:$16 sps:$4 sm:$0xff]  }
 0x2f7   :  { %v4883_v24 = vpop.f32.mrf.mxu1  ;;  %v14379_v4 = vpack.c.bf16 %v5238_v33, %v5230_v57  ;;  %v5111_v50 = vmul.f32 0.2, %v4878_v28  ;;  %v4772_v48 = vpop.f32.mrf.mxu0  ;;  %7501 = vmatprep.subr.bf16.mxu1 %v10051_v21  ;;  %v5231_v26 = vsel %vm4975_vm14, %v4874_v56, %v5103_v42  ;;  %v10058_v56 = vld [vmem:[%s15617_s3 + $0x588] ss:$16 sps:$4 sm:$0xff]   ;;  %v4559_v49 = vadd.f32 %v14160_v41, %v13995_v45 }
 0x2f8   :  { %v4773_v14 = vadd.f32 %v4772_v48, %v14138_v20  ;;  %v5118_v16 = vmul.f32 0.2, %v4882_v46  ;;  %v4884_v5 = vadd.f32 %v4883_v24, %v4771_v60  ;;  %v10060_v20 = vld [vmem:[%s15617_s3 + $0x58c] ss:$16 sps:$4 sm:$0xff]   ;;  %vm4990_vm0 = vcmp.gt.f32.partialorder %v4882_v46, 0.0 }
 0x2f9   :  { %v4885_v30 = vpop.f32.mrf.mxu1  ;;  %v4774_v36 = vpop.f32.mrf.mxu0  ;;  %v5239_v39 = vsel %vm4983_vm15, %v4878_v28, %v5111_v50  ;;  %7623 = vmatpush2.bf16.msra.mxu0 %v10046_v59  ;;  %v4672_v33 = vadd.f32 %v14167_v15, %v4559_v49  ;;  %v10067_v50 = vld [vmem:[%s15617_s3 + $0x3e8] ss:$16 sps:$4 sm:$0xff]   ;;  %v10075_v15 = vld [vmem:[%s15617_s3 + $0x3cc] ss:$16 sps:$4 sm:$0xff]  }
 0x2fa   :  { %v4886_v0 = vadd.f32 %v4885_v30, %v4773_v14  ;;  %v4775_v58 = vadd.f32 %v4774_v36, %v4662_v10  ;;  %7502 = vmatpush1.bf16.msra.mxu1 %v10049_v19  ;;  %v14396_v25 = vpack.c.bf16 %v5239_v39, %v5231_v26  ;;  %7624 = vmatprep.subr.bf16.mxu0 %v10054_v8  ;;  %vm4991_vm2 = vcmp.gt.f32.partialorder %v4884_v5, 0.0  ;;  %v10078_v26 = vld [vmem:[%s15617_s3 + $0x52c] ss:$16 sps:$4 sm:$0xff]  }
 0x2fb   :  { %v4887_v17 = vpop.f32.mrf.mxu1  ;;  %v4778_v18 = vpop.f32.mrf.mxu0  ;;  %7461 = vmatmul.mubr.bf16.gmra.mxu0 %v15750_v22  ;;  %7503 = vmatprep.subr.bf16.mxu1 %v10057_v35  ;;  %v5246_v27 = vsel %vm4990_vm0, %v4882_v46, %v5118_v16  ;;  %v10061_v22 = vld [vmem:[%s15617_s3 + $0x208] ss:$16 sps:$4 sm:$0xff]   ;;  %v5119_v21 = vmul.f32 0.2, %v4884_v5 }
 0x2fc   :  { %vm4998_vm1 = vcmp.gt.f32.partialorder %v4886_v0, 0.0  ;;  %v5126_v62 = vmul.f32 0.2, %v4886_v0  ;;  %v4779_v1 = vadd.f32 %v4778_v18, %v14151_v2  ;;  %v4888_v52 = vadd.f32 %v4887_v17, %v4775_v58  ;;  %7327 = vmatprep.mubr.bf16.mxu1 %v14396_v25  ;;  %7470 = vmatprep.mubr.bf16.mxu0 %v15752_v3  ;;  %v10069_v3 = vld [vmem:[%s15617_s3 + $0x3ec] ss:$16 sps:$4 sm:$0xff]  }
 0x2fd   :  { %v4891_v13 = vpop.f32.mrf.mxu1  ;;  %v4780_v2 = vpop.f32.mrf.mxu0  ;;  %7328 = vmatmul.mubr.bf16.gmra.mxu1 %v14379_v4  ;;  %7625 = vmatpush2.bf16.msra.mxu0 %v10052_v32  ;;  %v5247_v30 = vsel %vm4991_vm2, %v4884_v5, %v5119_v21  ;;  %v10070_v5 = vld [vmem:[%s15617_s3 + $0x548] ss:$16 sps:$4 sm:$0xff]  }
 0x2fe   :  { %v5254_v41 = vsel %vm4998_vm1, %v4886_v0, %v5126_v62  ;;  %v4892_v38 = vadd.f32 %v4891_v13, %v4779_v1  ;;  %v4781_v57 = vadd.f32 %v4780_v2, %v14157_v9  ;;  %vm4999_vm3 = vcmp.gt.f32.partialorder %v4888_v52, 0.0  ;;  %7504 = vmatpush1.bf16.msra.mxu1 %v10055_v51  ;;  %7626 = vmatprep.subr.bf16.mxu0 %v10060_v20  ;;  %v10064_v9 = vld [vmem:[%s15617_s3 + $0x568] ss:$16 sps:$4 sm:$0xff]  }
 0x2ff   :  { %v4893_v28 = vpop.f32.mrf.mxu1  ;;  %v14420_v54 = vpack.c.bf16 %v5254_v41, %v5246_v27  ;;  %v5127_v59 = vmul.f32 0.2, %v4888_v52  ;;  %v4782_v19 = vpop.f32.mrf.mxu0  ;;  %7505 = vmatprep.subr.bf16.mxu1 %v10063_v23  ;;  %v4569_v20 = vadd.f32 %v14187_v55, %v13995_v45  ;;  %v10079_v41 = vld [vmem:[%s15617_s3 + $0x3a8] ss:$16 sps:$4 sm:$0xff]  }
 0x300   :  { %v4783_v8 = vadd.f32 %v4782_v19, %v14165_v63  ;;  %v5134_v46 = vmul.f32 0.2, %v4892_v38  ;;  %v4894_v60 = vadd.f32 %v4893_v28, %v4781_v57  ;;  %v10072_v63 = vld [vmem:[%s15617_s3 + $0x54c] ss:$16 sps:$4 sm:$0xff]   ;;  %vm5006_vm4 = vcmp.gt.f32.partialorder %v4892_v38, 0.0 }
 0x301   :  { %v4895_v42 = vpop.f32.mrf.mxu1  ;;  %v4784_v24 = vpop.f32.mrf.mxu0  ;;  %v5255_v35 = vsel %vm4999_vm3, %v4888_v52, %v5127_v59  ;;  %7627 = vmatpush2.bf16.msra.mxu0 %v10058_v56  ;;  %v4682_v52 = vadd.f32 %v14194_v44, %v4569_v20  ;;  %v10087_v44 = vld [vmem:[%s15617_s3 + $0x38c] ss:$16 sps:$4 sm:$0xff]  }
 0x302   :  { %v4896_v48 = vadd.f32 %v4895_v42, %v4783_v8  ;;  %v4785_v32 = vadd.f32 %v4784_v24, %v4672_v33  ;;  %7506 = vmatpush1.bf16.msra.mxu1 %v10061_v22  ;;  %v14437_v16 = vpack.c.bf16 %v5255_v35, %v5247_v30  ;;  %7628 = vmatprep.subr.bf16.mxu0 %v10066_v43  ;;  %vm5007_vm6 = vcmp.gt.f32.partialorder %v4894_v60, 0.0  ;;  %v15772_v33 = vld [vmem:[#allocation19_spill] sm:$0xff] }
 0x303   :  { %v4897_v14 = vpop.f32.mrf.mxu1  ;;  %v4788_v10 = vpop.f32.mrf.mxu0  ;;  %7471 = vmatmul.mubr.bf16.gmra.mxu0 %v15754_v61  ;;  %7507 = vmatprep.subr.bf16.mxu1 %v10069_v3  ;;  %v5262_v0 = vsel %vm5006_vm4, %v4892_v38, %v5134_v46  ;;  %v10073_v61 = vld [vmem:[%s15617_s3 + $0x3c8] ss:$16 sps:$4 sm:$0xff]   ;;  %v5135_v23 = vmul.f32 0.2, %v4894_v60 }
 0x304   :  { %vm5014_vm5 = vcmp.gt.f32.partialorder %v4896_v48, 0.0  ;;  %v5142_v36 = vmul.f32 0.2, %v4896_v48  ;;  %v4789_v39 = vadd.f32 %v4788_v10, %v14178_v53  ;;  %v4898_v17 = vadd.f32 %v4897_v14, %v4785_v32  ;;  %7337 = vmatprep.mubr.bf16.mxu1 %v14437_v16  ;;  %7480 = vmatprep.mubr.bf16.mxu0 %v15756_v11  ;;  %v10081_v11 = vld [vmem:[%s15617_s3 + $0x3ac] ss:$16 sps:$4 sm:$0xff]  }
 0x305   :  { %v4901_v51 = vpop.f32.mrf.mxu1  ;;  %v4790_v53 = vpop.f32.mrf.mxu0  ;;  %7338 = vmatmul.mubr.bf16.gmra.mxu1 %v14420_v54  ;;  %7629 = vmatpush2.bf16.msra.mxu0 %v10064_v9  ;;  %v5263_v28 = vsel %vm5007_vm6, %v4894_v60, %v5135_v23  ;;  %v10082_v46 = vld [vmem:[%s15617_s3 + $0x508] ss:$16 sps:$4 sm:$0xff]   ;;  %v15773_v60 = vld [vmem:[#allocation42_spill] sm:$0xff]  ;;  %v10090_v23 = vld [vmem:[%s15617_s3 + $0x36c] ss:$16 sps:$4 sm:$0xff]  }
 0x306   :  { %v5270_v55 = vsel %vm5014_vm5, %v4896_v48, %v5142_v36  ;;  %v4902_v58 = vadd.f32 %v4901_v51, %v4789_v39  ;;  %v4791_v18 = vadd.f32 %v4790_v53, %v14184_v6  ;;  %vm5015_vm7 = vcmp.gt.f32.partialorder %v4898_v17, 0.0  ;;  %7508 = vmatpush2.bf16.msra.mxu1 %v10067_v50  ;;  %7630 = vmatprep.subr.bf16.mxu0 %v10072_v63  ;;  %v10076_v6 = vld [vmem:[%s15617_s3 + $0x528] ss:$16 sps:$4 sm:$0xff]   ;;  %v15774_v63 = vld [vmem:[#allocation6_spill] sm:$0xff] }
 0x307   :  { %v4903_v62 = vpop.f32.mrf.mxu1  ;;  %v14461_v1 = vpack.c.bf16 %v5270_v55, %v5262_v0  ;;  %v5143_v13 = vmul.f32 0.2, %v4898_v17  ;;  %v4792_v56 = vpop.f32.mrf.mxu0  ;;  %7509 = vmatprep.subr.bf16.mxu1 %v10075_v15  ;;  %v4579_v24 = vadd.f32 %v15773_v60, %v13995_v45  ;;  %v10085_v48 = vld [vmem:[%s15617_s3 + $0x388] ss:$16 sps:$4 sm:$0xff]   ;;  %v5624_v14 = vld [vmem:[%s15619_s4] sm:$0xf] }
 0x308   :  { %v4793_v49 = vadd.f32 %v4792_v56, %v14192_v40  ;;  %v5150_v2 = vmul.f32 0.2, %v4902_v58  ;;  %v4904_v22 = vadd.f32 %v4903_v62, %v4791_v18  ;;  %v10084_v40 = vld [vmem:[%s15617_s3 + $0x50c] ss:$16 sps:$4 sm:$0xff]   ;;  %vm5022_vm8 = vcmp.gt.f32.partialorder %v4902_v58, 0.0  ;;  %v15778_v55 = vld [vmem:[#allocation44_spill] sm:$0xff] }
 0x309   :  { %v4905_v27 = vpop.f32.mrf.mxu1  ;;  %v4794_v43 = vpop.f32.mrf.mxu0  ;;  %v5271_v21 = vsel %vm5015_vm7, %v4898_v17, %v5143_v13  ;;  %7631 = vmatpush2.bf16.msra.mxu0 %v10070_v5  ;;  %v10150_v45 = vld [vmem:[%s15618_s5 + $0x74] ss:$8 sps:$4 sm:$0xff]   ;;  %v15775_v10 = vld [vmem:[#allocation3_spill] sm:$0xff] }
 0x30a   :  { %v4906_v38 = vadd.f32 %v4905_v27, %v4793_v49  ;;  %v4795_v3 = vadd.f32 %v4794_v43, %v4682_v52  ;;  %7510 = vmatpush2.bf16.msra.mxu1 %v10073_v61  ;;  %v14478_v19 = vpack.c.bf16 %v5271_v21, %v5263_v28  ;;  %7632 = vmatprep.subr.bf16.mxu0 %v10078_v26  ;;  %vm5023_vm10 = vcmp.gt.f32.partialorder %v4904_v22, 0.0  ;;  %v15776_v0 = vld [vmem:[#allocation43_spill] sm:$0xff]  ;;  %v15777_v61 = vld [vmem:[#allocation8_spill] sm:$0xff] }
 0x30b   :  { %v4907_v57 = vpop.f32.mrf.mxu1  ;;  %v4798_v59 = vpop.f32.mrf.mxu0  ;;  %7481 = vmatmul.mubr.bf16.gmra.mxu0 %v15772_v33  ;;  %7511 = vmatprep.subr.bf16.mxu1 %v10081_v11  ;;  %v5278_v35 = vsel %vm5022_vm8, %v4902_v58, %v5150_v2  ;;  %v5151_v30 = vmul.f32 0.2, %v4904_v22  ;;  %v14506_v26 = vrot.slane %v5624_v14, %v15777_v61  ;;  %v4692_v58 = vadd.f32 %v15778_v55, %v4579_v24  ;;  %v15781_v60 = vld [vmem:[#allocation11_spill] sm:$0xff] }
 0x30c   :  { %vm5030_vm9 = vcmp.gt.f32.partialorder %v4906_v38, 0.0  ;;  %v5158_v8 = vmul.f32 0.2, %v4906_v38  ;;  %v4799_v42 = vadd.f32 %v4798_v59, %v14205_v7  ;;  %v4908_v50 = vadd.f32 %v4907_v57, %v4795_v3  ;;  %7347 = vmatprep.mubr.bf16.mxu1 %v14478_v19  ;;  %7636 = vmatprep.mubr.bf16.mxu0 %v15774_v63 }
 0x30d   :  { %v4911_v9 = vpop.f32.mrf.mxu1  ;;  %v4800_v7 = vpop.f32.mrf.mxu0  ;;  %7348 = vmatmul.mubr.bf16.gmra.mxu1 %v14461_v1  ;;  %7633 = vmatpush2.bf16.msra.mxu0 %v10076_v6  ;;  %v5279_v27 = vsel %vm5023_vm10, %v4904_v22, %v5151_v30  ;;  %v15779_v6 = vld [vmem:[#allocation9_spill] sm:$0xff] }
 0x30e   :  { %v5286_v15 = vsel %vm5030_vm9, %v4906_v38, %v5158_v8  ;;  %v4912_v32 = vadd.f32 %v4911_v9, %v4799_v42  ;;  %v4801_v36 = vadd.f32 %v4800_v7, %v15775_v10  ;;  %vm5031_vm11 = vcmp.gt.f32.partialorder %v4908_v50, 0.0  ;;  %7512 = vmatpush2.bf16.msra.mxu1 %v10079_v41  ;;  %7634 = vmatprep.subr.bf16.mxu0 %v10084_v40  ;;  %v10088_v41 = vld [vmem:[%s15617_s3 + $0x368] ss:$16 sps:$4 sm:$0xff]   ;;  %v10093_v40 = vld [vmem:[%s15617_s3 + $0x34c] ss:$16 sps:$4 sm:$0xff]   ;;  %v15780_v42 = vld [vmem:[#allocation10_spill] sm:$0xff] }
 0x30f   :  { %v4913_v39 = vpop.f32.mrf.mxu1  ;;  %v14502_v51 = vpack.c.bf16 %v5286_v15, %v5278_v35  ;;  %v5159_v5 = vmul.f32 0.2, %v4908_v50  ;;  %v4802_v20 = vpop.f32.mrf.mxu0  ;;  %7513 = vmatprep.subr.bf16.mxu1 %v10087_v44  ;;  %v14514_v52 = vrot.slane %v5624_v14, %v15779_v6  ;;  %v10148_v22 = vld [vmem:[%s15618_s5 + $0x70] ss:$8 sps:$4 sm:$0xff]   ;;  %v10153_v44 = vld [vmem:[%s15618_s5 + $0x64] ss:$8 sps:$4 sm:$0xff]  }
 0x310   :  { %v4803_v17 = vadd.f32 %v4802_v20, %v15776_v0  ;;  %v5166_v18 = vmul.f32 0.2, %v4912_v32  ;;  %v4914_v62 = vadd.f32 %v4913_v39, %v4801_v36  ;;  %vm5038_vm12 = vcmp.gt.f32.partialorder %v4912_v32, 0.0  ;;  %v10151_v14 = vld [vmem:[%s15618_s5 + $0x60] ss:$8 sps:$4 sm:$0xff]   ;;  %v15808_v6 = vld [vmem:[#allocation32_spill] sm:$0xff] }
 0x311   :  { %v4915_v53 = vpop.f32.mrf.mxu1  ;;  %v4804_v11 = vpop.f32.mrf.mxu0  ;;  %v5287_v13 = vsel %vm5031_vm11, %v4908_v50, %v5159_v5  ;;  %7635 = vmatpush2.bf16.msra.mxu0 %v10082_v46  ;;  %v10091_v50 = vld [vmem:[%s15617_s3 + $0x348] ss:$16 sps:$4 sm:$0xff]   ;;  %v10156_v5 = vld [vmem:[%s15618_s5 + $0x54] ss:$8 sps:$4 sm:$0xff]  }
 0x312   :  { %v4916_v56 = vadd.f32 %v4915_v53, %v4803_v17  ;;  %v4805_v2 = vadd.f32 %v4804_v11, %v4692_v58  ;;  %7514 = vmatpush2.bf16.msra.mxu1 %v10085_v48  ;;  %v14516_v21 = vpack.c.bf16 %v5287_v13, %v5279_v27  ;;  %8450 = vmatprep.subr.bf16.mxu0 %v10150_v45  ;;  %v5167_v59 = vmul.f32 0.2, %v4914_v62  ;;  %v15782_v11 = vld [vmem:[#allocation12_spill] sm:$0xff]  ;;  %v15783_v27 = vld [vmem:[#allocation13_spill] sm:$0xff] }
 0x313   :  { %v4917_v49 = vpop.f32.mrf.mxu1  ;;  %v6960_v43 = vpop.f32.mrf.mxu0  ;;  %7515 = vmatprep.subr.bf16.mxu1 %v10090_v23  ;;  %v5294_v3 = vsel %vm5038_vm12, %v4912_v32, %v5166_v18  ;;  %vm5039_vm14 = vcmp.gt.f32.partialorder %v4914_v62, 0.0  ;;  %v10096_v32 = vld [vmem:[%s15617_s3 + $0x32c] ss:$16 sps:$4 sm:$0xff]   ;;  %v10094_v23 = vld [vmem:[%s15617_s3 + $0x328] ss:$16 sps:$4 sm:$0xff]  }
 0x314   :  { %vm5046_vm13 = vcmp.gt.f32.partialorder %v4916_v56, 0.0  ;;  %v5174_v38 = vmul.f32 0.2, %v4916_v56  ;;  %v6961_v57 = vadd.f32 %v6960_v43, %v14506_v26  ;;  %v4918_v8 = vadd.f32 %v4917_v49, %v4805_v2  ;;  %7357 = vmatprep.mubr.bf16.mxu1 %v14516_v21  ;;  %7637 = vmatmul.mubr.bf16.vlgmr.msra.gmra.mxu0 %v15780_v42  ;;  %v10099_v18 = vld [vmem:[%s15617_s3 + $0x30c] ss:$16 sps:$4 sm:$0xff]  }
 0x315   :  { %v7073_v28 = vpop.f32.mrf.mxu1  ;;  %v6962_v9 = vpop.f32.mrf.mxu0  ;;  %7358 = vmatmul.mubr.bf16.gmra.mxu1 %v14502_v51  ;;  %7646 = vmatprep.mubr.bf16.mxu0 %v15781_v60  ;;  %v5295_v36 = vsel %vm5039_vm14, %v4914_v62, %v5167_v59  ;;  %v10154_v62 = vld [vmem:[%s15618_s5 + $0x50] ss:$8 sps:$4 sm:$0xff]  }
 0x316   :  { %v5302_v33 = vsel %vm5046_vm13, %v4916_v56, %v5174_v38  ;;  %v14534_v46 = vadd.f32 %v7073_v28, %v6961_v57  ;;  %v6963_v24 = vadd.f32 %v6962_v9, %v14514_v52  ;;  %vm5047_vm15 = vcmp.gt.f32.partialorder %v4918_v8, 0.0  ;;  %7516 = vmatpush2.bf16.msra.mxu1 %v10088_v41  ;;  %8451 = vmatpush1.bf16.msra.mxu0 %v10148_v22  ;;  %v10159_v56 = vld [vmem:[%s15618_s5 + $0x44] ss:$8 sps:$4 sm:$0xff]   ;;  %v10097_v22 = vld [vmem:[%s15617_s3 + $0x308] ss:$16 sps:$4 sm:$0xff]  }
 0x317   :  { %v7075_v35 = vpop.f32.mrf.mxu1  ;;  %v14542_v63 = vpack.c.bf16 %v5302_v33, %v5294_v3  ;;  %v5175_v7 = vmul.f32 0.2, %v4918_v8  ;;  %v6964_v48 = vpop.f32.mrf.mxu0  ;;  %7517 = vmatprep.subr.bf16.mxu1 %v10093_v40  ;;  %8452 = vmatprep.subr.bf16.mxu0 %v10153_v44  ;;  %v15784_v41 = vld [vmem:[#allocation22_spill] sm:$0xff]  ;;  %v10102_v44 = vld [vmem:[%s15617_s3 + $0x6ec] ss:$16 sps:$4 sm:$0xff]  }
 0x318   :  { %v14547_v45 = vadd.f32 %v7075_v35, %v6963_v24  ;;  %v6965_v30 = vadd.f32 %v6964_v48, %v14506_v26  ;;  %v10157_v3 = vld [vmem:[%s15618_s5 + $0x40] ss:$8 sps:$4 sm:$0xff]  }
 0x319   :  { %v7077_v15 = vpop.f32.mrf.mxu1  ;;  %v14553_v10 = vpop.f32.mrf.mxu0  ;;  %v5303_v39 = vsel %vm5047_vm15, %v4918_v8, %v5175_v7  ;;  %v10162_v8 = vld [vmem:[%s15618_s5 + $0x34] ss:$8 sps:$4 sm:$0xff]   ;;  %v10100_v60 = vld [vmem:[%s15617_s3 + $0x6e8] ss:$16 sps:$4 sm:$0xff]   ;;  %v15785_v48 = vld [vmem:[#allocation14_spill] sm:$0xff] }
 0x31a   :  { %v14559_v20 = vadd.f32 %v7077_v15, %v6965_v30  ;;  %v14563_v17 = vpack.c.bf16 %v5303_v39, %v5295_v36  ;;  %7518 = vmatpush2.bf16.msra.mxu1 %v10091_v50  ;;  %8453 = vmatpush1.bf16.msra.mxu0 %v10151_v14  ;;  %v10105_v50 = vld [vmem:[%s15617_s3 + $0x6cc] ss:$16 sps:$4 sm:$0xff]   ;;  %v10160_v7 = vld [vmem:[%s15618_s5 + $0x30] ss:$8 sps:$4 sm:$0xff]  }
 0x31b   :  { %v14561_v0 = vpop.f32.mrf.mxu1  ;;  %v6970_v53 = vpop.f32.mrf.mxu0  ;;  %7519 = vmatprep.subr.bf16.mxu1 %v10096_v32  ;;  %8454 = vmatprep.subr.bf16.mxu0 %v10156_v5  ;;  %v10165_v30 = vld [vmem:[%s15618_s5 + $0x24] ss:$8 sps:$4 sm:$0xff]   ;;  %v15786_v32 = vld [vmem:[#allocation21_spill] sm:$0xff] }
 0x31c   :  { %v6971_v55 = vadd.f32 %v6970_v53, %v14506_v26  ;;  %7367 = vmatprep.mubr.bf16.mxu1 %v14563_v17  ;;  %7647 = vmatmul.mubr.bf16.gmra.mxu0 %v15782_v11  ;;  %v15787_v36 = vld [vmem:[#allocation15_spill] sm:$0xff]  ;;  %v15788_v53 = vld [vmem:[#allocation24_spill] sm:$0xff] }
 0x31d   :  { %v7083_v58 = vpop.f32.mrf.mxu1  ;;  %v6972_v13 = vpop.f32.mrf.mxu0  ;;  %7368 = vmatmul.mubr.bf16.gmra.mxu1 %v14542_v63  ;;  %7656 = vmatprep.mubr.bf16.mxu0 %v15783_v27  ;;  %v10108_v11 = vld [vmem:[%s15617_s3 + $0x6ac] ss:$16 sps:$4 sm:$0xff]  }
 0x31e   :  { %v14580_v49 = vadd.f32 %v7083_v58, %v6971_v55  ;;  %v6973_v2 = vadd.f32 %v6972_v13, %v14514_v52  ;;  %7520 = vmatpush2.bf16.msra.mxu1 %v10094_v23  ;;  %7523 = vmatprep.mubr.bf16.mxu1 %v15784_v41  ;;  %v10103_v55 = vld [vmem:[%s15617_s3 + $0x6c8] ss:$16 sps:$4 sm:$0xff]   ;;  %v10168_v27 = vld [vmem:[%s15618_s5 + $0x14] ss:$8 sps:$4 sm:$0xff]  }
 0x31f   :  { %v7085_v43 = vpop.f32.mrf.mxu1  ;;  %v6974_v40 = vpop.f32.mrf.mxu0  ;;  %7521 = vmatprep.subr.bf16.mxu1 %v10099_v18  ;;  %8455 = vmatpush1.bf16.msra.mxu0 %v10154_v62  ;;  %v10163_v13 = vld [vmem:[%s15618_s5 + $0x20] ss:$8 sps:$4 sm:$0xff]  }
 0x320   :  { %v14589_v38 = vadd.f32 %v7085_v43, %v6973_v2  ;;  %v6975_v57 = vadd.f32 %v6974_v40, %v14506_v26  ;;  %8456 = vmatprep.subr.bf16.mxu0 %v10159_v56  ;;  %v10106_v40 = vld [vmem:[%s15617_s3 + $0x6a8] ss:$16 sps:$4 sm:$0xff]  }
 0x321   :  { %v7087_v28 = vpop.f32.mrf.mxu1  ;;  %v14598_v59 = vpop.f32.mrf.mxu0 }
 0x322   :  { %v14603_v42 = vadd.f32 %v7087_v28, %v6975_v57  ;;  %7522 = vmatpush2.bf16.msra.mxu1 %v10097_v22  ;;  %v10111_v28 = vld [vmem:[%s15617_s3 + $0x68c] ss:$16 sps:$4 sm:$0xff]  }
 0x323   :  { %v14605_v9 = vpop.f32.mrf.mxu1  ;;  %v6980_v33 = vpop.f32.mrf.mxu0  ;;  %7717 = vmatprep.subr.bf16.mxu1 %v10102_v44  ;;  %8457 = vmatpush1.bf16.msra.mxu0 %v10157_v3  ;;  %v10166_v44 = vld [vmem:[%s15618_s5 + $0x10] ss:$8 sps:$4 sm:$0xff]  }
 0x324   :  { %v6981_v24 = vadd.f32 %v6980_v33, %v14506_v26  ;;  %7657 = vmatmul.mubr.bf16.gmra.mxu0 %v15785_v48  ;;  %8458 = vmatprep.subr.bf16.mxu0 %v10162_v8  ;;  %v15789_v3 = vld [vmem:[#allocation16_spill] sm:$0xff]  ;;  %v10171_v33 = vld [vmem:[%s15618_s5 + $0x4] ss:$8 sps:$4 sm:$0xff]  }
 0x325   :  { %v7093_v35 = vpop.f32.mrf.mxu1  ;;  %v6982_v14 = vpop.f32.mrf.mxu0  ;;  %7524 = vmatmul.mubr.bf16.vlgmr.msra.gmra.mxu1 %v15786_v32  ;;  %7666 = vmatprep.mubr.bf16.mxu0 %v15787_v36  ;;  %v15792_v48 = vld [vmem:[#allocation26_spill] sm:$0xff] }
 0x326   :  { %v14621_v15 = vadd.f32 %v7093_v35, %v6981_v24  ;;  %v6983_v39 = vadd.f32 %v6982_v14, %v14514_v52  ;;  %7533 = vmatprep.mubr.bf16.mxu1 %v15788_v53  ;;  %7718 = vmatpush1.bf16.msra.mxu1 %v10100_v60  ;;  %v15790_v24 = vld [vmem:[#allocation23_spill] sm:$0xff]  ;;  %v15791_v35 = vld [vmem:[#allocation17_spill] sm:$0xff] }
 0x327   :  { %v7095_v5 = vpop.f32.mrf.mxu1  ;;  %v6984_v23 = vpop.f32.mrf.mxu0  ;;  %7719 = vmatprep.subr.bf16.mxu1 %v10105_v50  ;;  %8459 = vmatpush1.bf16.msra.mxu0 %v10160_v7  ;;  %v10169_v53 = vld [vmem:[%s15618_s5] ss:$8 sps:$4 sm:$0xff]  }
 0x328   :  { %v14630_v58 = vadd.f32 %v7095_v5, %v6983_v39  ;;  %v6985_v18 = vadd.f32 %v6984_v23, %v14506_v26  ;;  %8460 = vmatprep.subr.bf16.mxu0 %v10165_v30  ;;  %v10109_v30 = vld [vmem:[%s15617_s3 + $0x688] ss:$16 sps:$4 sm:$0xff]   ;;  %v10114_v5 = vld [vmem:[%s15617_s3 + $0x66c] ss:$16 sps:$4 sm:$0xff]  }
 0x329   :  { %v7097_v62 = vpop.f32.mrf.mxu1  ;;  %v14639_v56 = vpop.f32.mrf.mxu0 }
 0x32a   :  { %v14644_v2 = vadd.f32 %v7097_v62, %v6985_v18  ;;  %7720 = vmatpush1.bf16.msra.mxu1 %v10103_v55  ;;  %v10174_v55 = vld [vmem:[%s15618_s5 + $0xf4] ss:$8 sps:$4 sm:$0xff]  }
 0x32b   :  { %v14646_v43 = vpop.f32.mrf.mxu1  ;;  %v6990_v41 = vpop.f32.mrf.mxu0  ;;  %7721 = vmatprep.subr.bf16.mxu1 %v10108_v11  ;;  %8461 = vmatpush1.bf16.msra.mxu0 %v10163_v13  ;;  %v10112_v13 = vld [vmem:[%s15617_s3 + $0x668] ss:$16 sps:$4 sm:$0xff]  }
 0x32c   :  { %v6991_v22 = vadd.f32 %v6990_v41, %v14506_v26  ;;  %7667 = vmatmul.mubr.bf16.gmra.mxu0 %v15789_v3  ;;  %8462 = vmatprep.subr.bf16.mxu0 %v10168_v27 }
 0x32d   :  { %v7103_v57 = vpop.f32.mrf.mxu1  ;;  %v6992_v8 = vpop.f32.mrf.mxu0  ;;  %7534 = vmatmul.mubr.bf16.gmra.mxu1 %v15790_v24  ;;  %7676 = vmatprep.mubr.bf16.mxu0 %v15791_v35 }
 0x32e   :  { %v14662_v60 = vadd.f32 %v7103_v57, %v6991_v22  ;;  %v6993_v50 = vadd.f32 %v6992_v8, %v14514_v52  ;;  %7543 = vmatprep.mubr.bf16.mxu1 %v15792_v48  ;;  %7722 = vmatpush1.bf16.msra.mxu1 %v10106_v40  ;;  %v10117_v40 = vld [vmem:[%s15617_s3 + $0x64c] ss:$16 sps:$4 sm:$0xff]   ;;  %v10172_v22 = vld [vmem:[%s15618_s5 + $0xf0] ss:$8 sps:$4 sm:$0xff]   ;;  %v15793_v57 = vld [vmem:[#allocation18_spill] sm:$0xff] }
 0x32f   :  { %v7105_v7 = vpop.f32.mrf.mxu1  ;;  %v6994_v14 = vpop.f32.mrf.mxu0  ;;  %7723 = vmatprep.subr.bf16.mxu1 %v10111_v28  ;;  %8463 = vmatpush1.bf16.msra.mxu0 %v10166_v44  ;;  %v10177_v44 = vld [vmem:[%s15618_s5 + $0xe4] ss:$8 sps:$4 sm:$0xff]   ;;  %v15794_v8 = vld [vmem:[#allocation25_spill] sm:$0xff] }
 0x330   :  { %v14671_v32 = vadd.f32 %v7105_v7, %v6993_v50  ;;  %v6995_v36 = vadd.f32 %v6994_v14, %v14506_v26  ;;  %8464 = vmatprep.subr.bf16.mxu0 %v10171_v33  ;;  %v15795_v33 = vld [vmem:[#allocation37_spill] sm:$0xff]  ;;  %v15796_v50 = vld [vmem:[#allocation28_spill] sm:$0xff] }
 0x331   :  { %v7107_v39 = vpop.f32.mrf.mxu1  ;;  %v14680_v23 = vpop.f32.mrf.mxu0  ;;  %v10115_v48 = vld [vmem:[%s15617_s3 + $0x648] ss:$16 sps:$4 sm:$0xff]  }
 0x332   :  { %v14685_v18 = vadd.f32 %v7107_v39, %v6995_v36  ;;  %7724 = vmatpush1.bf16.msra.mxu1 %v10109_v30  ;;  %v10120_v39 = vld [vmem:[%s15617_s3 + $0x62c] ss:$16 sps:$4 sm:$0xff]  }
 0x333   :  { %v14687_v62 = vpop.f32.mrf.mxu1  ;;  %v7000_v11 = vpop.f32.mrf.mxu0  ;;  %7725 = vmatprep.subr.bf16.mxu1 %v10114_v5  ;;  %8465 = vmatpush1.bf16.msra.mxu0 %v10169_v53  ;;  %v10175_v5 = vld [vmem:[%s15618_s5 + $0xe0] ss:$8 sps:$4 sm:$0xff]  }
 0x334   :  { %v7001_v27 = vadd.f32 %v7000_v11, %v14506_v26  ;;  %7677 = vmatmul.mubr.bf16.gmra.mxu0 %v15793_v57  ;;  %8466 = vmatprep.subr.bf16.mxu0 %v10174_v55  ;;  %v10180_v55 = vld [vmem:[%s15618_s5 + $0xd4] ss:$8 sps:$4 sm:$0xff]  }
 0x335   :  { %v7113_v41 = vpop.f32.mrf.mxu1  ;;  %v7002_v28 = vpop.f32.mrf.mxu0  ;;  %7544 = vmatmul.mubr.bf16.gmra.mxu1 %v15794_v8  ;;  %7686 = vmatprep.mubr.bf16.mxu0 %v15795_v33  ;;  %v10123_v57 = vld [vmem:[%s15617_s3 + $0x60c] ss:$16 sps:$4 sm:$0xff]  }
 0x336   :  { %v14703_v3 = vadd.f32 %v7113_v41, %v7001_v27  ;;  %v7003_v24 = vadd.f32 %v7002_v28, %v14514_v52  ;;  %7553 = vmatprep.mubr.bf16.mxu1 %v15796_v50  ;;  %7726 = vmatpush1.bf16.msra.mxu1 %v10112_v13  ;;  %v10118_v41 = vld [vmem:[%s15617_s3 + $0x628] ss:$16 sps:$4 sm:$0xff]   ;;  %v10183_v33 = vld [vmem:[%s15618_s5 + $0xc4] ss:$8 sps:$4 sm:$0xff]  }
 0x337   :  { %v7115_v35 = vpop.f32.mrf.mxu1  ;;  %v7004_v7 = vpop.f32.mrf.mxu0  ;;  %7727 = vmatprep.subr.bf16.mxu1 %v10117_v40  ;;  %8467 = vmatpush2.bf16.msra.mxu0 %v10172_v22  ;;  %v10178_v28 = vld [vmem:[%s15618_s5 + $0xd0] ss:$8 sps:$4 sm:$0xff]   ;;  %v15799_v50 = vld [vmem:[#allocation39_spill] sm:$0xff] }
 0x338   :  { %v14712_v14 = vadd.f32 %v7115_v35, %v7003_v24  ;;  %v7005_v30 = vadd.f32 %v7004_v7, %v14506_v26  ;;  %8468 = vmatprep.subr.bf16.mxu0 %v10177_v44  ;;  %v15797_v44 = vld [vmem:[#allocation20_spill] sm:$0xff]  ;;  %v15798_v35 = vld [vmem:[#allocation27_spill] sm:$0xff] }
 0x339   :  { %v7117_v36 = vpop.f32.mrf.mxu1  ;;  %v14721_v53 = vpop.f32.mrf.mxu0 }
 0x33a   :  { %v14726_v11 = vadd.f32 %v7117_v36, %v7005_v30  ;;  %7728 = vmatpush1.bf16.msra.mxu1 %v10115_v48  ;;  %v15800_v30 = vld [vmem:[#allocation30_spill] sm:$0xff] }
 0x33b   :  { %v14728_v13 = vpop.f32.mrf.mxu1  ;;  %v7010_v27 = vpop.f32.mrf.mxu0  ;;  %7729 = vmatprep.subr.bf16.mxu1 %v10120_v39  ;;  %8469 = vmatpush2.bf16.msra.mxu0 %v10175_v5  ;;  %v10121_v39 = vld [vmem:[%s15617_s3 + $0x608] ss:$16 sps:$4 sm:$0xff]  }
 0x33c   :  { %v7011_v40 = vadd.f32 %v7010_v27, %v14506_v26  ;;  %7687 = vmatmul.mubr.bf16.gmra.mxu0 %v15797_v44  ;;  %8470 = vmatprep.subr.bf16.mxu0 %v10180_v55  ;;  %v10186_v44 = vld [vmem:[%s15618_s5 + $0xb4] ss:$8 sps:$4 sm:$0xff]  }
 0x33d   :  { %v7123_v22 = vpop.f32.mrf.mxu1  ;;  %v7012_v8 = vpop.f32.mrf.mxu0  ;;  %7554 = vmatmul.mubr.bf16.gmra.mxu1 %v15798_v35  ;;  %7696 = vmatprep.mubr.bf16.mxu0 %v15799_v50 }
 0x33e   :  { %v14744_v24 = vadd.f32 %v7123_v22, %v7011_v40  ;;  %v7013_v7 = vadd.f32 %v7012_v8, %v14514_v52  ;;  %7563 = vmatprep.mubr.bf16.mxu1 %v15800_v30  ;;  %7730 = vmatpush1.bf16.msra.mxu1 %v10118_v41  ;;  %v10126_v40 = vld [vmem:[%s15617_s3 + $0x7ec] ss:$16 sps:$4 sm:$0xff]   ;;  %v10181_v41 = vld [vmem:[%s15618_s5 + $0xc0] ss:$8 sps:$4 sm:$0xff]  }
 0x33f   :  { %v7125_v48 = vpop.f32.mrf.mxu1  ;;  %v7014_v36 = vpop.f32.mrf.mxu0  ;;  %7731 = vmatprep.subr.bf16.mxu1 %v10123_v57  ;;  %8471 = vmatpush2.bf16.msra.mxu0 %v10178_v28  ;;  %v10124_v28 = vld [vmem:[%s15617_s3 + $0x7e8] ss:$16 sps:$4 sm:$0xff]   ;;  %v15804_v30 = vld [vmem:[#allocation38_spill] sm:$0xff] }
 0x340   :  { %v14753_v5 = vadd.f32 %v7125_v48, %v7013_v7  ;;  %v7015_v55 = vadd.f32 %v7014_v36, %v14506_v26  ;;  %8472 = vmatprep.subr.bf16.mxu0 %v10183_v33  ;;  %v10129_v33 = vld [vmem:[%s15617_s3 + $0x7cc] ss:$16 sps:$4 sm:$0xff]   ;;  %v10184_v48 = vld [vmem:[%s15618_s5 + $0xb0] ss:$8 sps:$4 sm:$0xff]  }
 0x341   :  { %v7127_v27 = vpop.f32.mrf.mxu1  ;;  %v14762_v22 = vpop.f32.mrf.mxu0 }
 0x342   :  { %15801 = vst [vmem:[#allocation2_spill] sm:$0xff] %v14753_v5  ;;  %v14767_v8 = vadd.f32 %v7127_v27, %v7015_v55  ;;  %7732 = vmatpush1.bf16.msra.mxu1 %v10121_v39  ;;  %v10189_v39 = vld [vmem:[%s15618_s5 + $0xa4] ss:$8 sps:$4 sm:$0xff]   ;;  %v15806_v27 = vld [vmem:[#allocation29_spill] sm:$0xff] }
 0x343   :  { %v14769_v35 = vpop.f32.mrf.mxu1  ;;  %v7020_v57 = vpop.f32.mrf.mxu0  ;;  %7733 = vmatprep.subr.bf16.mxu1 %v10126_v40  ;;  %8473 = vmatpush2.bf16.msra.mxu0 %v10181_v41  ;;  %v15807_v40 = vld [vmem:[#allocation41_spill] sm:$0xff] }
 0x344   :  { %15802 = vst [vmem:[#allocation5_spill] sm:$0xff] %v14767_v8  ;;  %15803 = vst [vmem:[#allocation4_spill] sm:$0xff] %v14769_v35  ;;  %v7021_v50 = vadd.f32 %v7020_v57, %v14506_v26  ;;  %7697 = vmatmul.mubr.bf16.gmra.mxu0 %v15804_v30  ;;  %8474 = vmatprep.subr.bf16.mxu0 %v10186_v44  ;;  %v10127_v44 = vld [vmem:[%s15617_s3 + $0x7c8] ss:$16 sps:$4 sm:$0xff]   ;;  %v10201_v8 = vld [vmem:[%s15618_s5 + $0x164] ss:$8 sps:$4 sm:$0xff]  }
 0x345   :  { %v7133_v7 = vpop.f32.mrf.mxu1  ;;  %v7022_v36 = vpop.f32.mrf.mxu0  ;;  %7564 = vmatmul.mubr.bf16.gmra.mxu1 %v15806_v27  ;;  %7706 = vmatprep.mubr.bf16.mxu0 %v15807_v40  ;;  %v10132_v27 = vld [vmem:[%s15617_s3 + $0x7ac] ss:$16 sps:$4 sm:$0xff]  }
 0x346   :  { %v14785_v55 = vadd.f32 %v7133_v7, %v7021_v50  ;;  %v7023_v41 = vadd.f32 %v7022_v36, %v14514_v52  ;;  %7573 = vmatprep.mubr.bf16.mxu1 %v15808_v6  ;;  %7734 = vmatpush2.bf16.msra.mxu1 %v10124_v28  ;;  %v10187_v6 = vld [vmem:[%s15618_s5 + $0xa0] ss:$8 sps:$4 sm:$0xff]   ;;  %v10192_v36 = vld [vmem:[%s15618_s5 + $0x94] ss:$8 sps:$4 sm:$0xff]  }
 0x347   :  { %v7135_v57 = vpop.f32.mrf.mxu1  ;;  %v7024_v61 = vpop.f32.mrf.mxu0  ;;  %7735 = vmatprep.subr.bf16.mxu1 %v10129_v33  ;;  %8475 = vmatpush2.bf16.msra.mxu0 %v10184_v48  ;;  %v10130_v48 = vld [vmem:[%s15617_s3 + $0x7a8] ss:$16 sps:$4 sm:$0xff]  }
 0x348   :  { %15805 = vst [vmem:[#allocation19_spill] sm:$0xff] %v14785_v55  ;;  %v14794_v30 = vadd.f32 %v7135_v57, %v7023_v41  ;;  %v7025_v50 = vadd.f32 %v7024_v61, %v14506_v26  ;;  %8476 = vmatprep.subr.bf16.mxu0 %v10189_v39  ;;  %v10135_v39 = vld [vmem:[%s15617_s3 + $0x78c] ss:$16 sps:$4 sm:$0xff]  }
 0x349   :  { %v7137_v7 = vpop.f32.mrf.mxu1  ;;  %v14803_v28 = vpop.f32.mrf.mxu0 }
 0x34a   :  { %15809 = vst [vmem:[#allocation42_spill] sm:$0xff] %v14794_v30  ;;  %15810 = vst [vmem:[#allocation6_spill] sm:$0xff] %v14803_v28  ;;  %v14808_v40 = vadd.f32 %v7137_v7, %v7025_v50  ;;  %7736 = vmatpush2.bf16.msra.mxu1 %v10127_v44  ;;  %v10190_v50 = vld [vmem:[%s15618_s5 + $0x90] ss:$8 sps:$4 sm:$0xff]  }
 0x34b   :  { %v14810_v61 = vpop.f32.mrf.mxu1  ;;  %v7030_v33 = vpop.f32.mrf.mxu0  ;;  %7737 = vmatprep.subr.bf16.mxu1 %v10132_v27  ;;  %8477 = vmatpush2.bf16.msra.mxu0 %v10187_v6  ;;  %v15813_v7 = vld [vmem:[#allocation40_spill] sm:$0xff]  ;;  %v15815_v27 = vld [vmem:[#allocation31_spill] sm:$0xff]  ;;  %v15816_v6 = vld [vmem:[#allocation34_spill] sm:$0xff] }
 0x34c   :  { %15811 = vst [vmem:[#allocation3_spill] sm:$0xff] %v14808_v40  ;;  %15812 = vst [vmem:[#allocation43_spill] sm:$0xff] %v14810_v61  ;;  %v7031_v41 = vadd.f32 %v7030_v33, %v14506_v26  ;;  %7707 = vmatmul.mubr.bf16.gmra.mxu0 %v15813_v7  ;;  %8478 = vmatprep.subr.bf16.mxu0 %v10192_v36  ;;  %v10195_v40 = vld [vmem:[%s15618_s5 + $0x84] ss:$8 sps:$4 sm:$0xff]   ;;  %v10133_v7 = vld [vmem:[%s15617_s3 + $0x788] ss:$16 sps:$4 sm:$0xff]  }
 0x34d   :  { %v7143_v57 = vpop.f32.mrf.mxu1  ;;  %v7032_v44 = vpop.f32.mrf.mxu0  ;;  %7574 = vmatmul.mubr.bf16.gmra.mxu1 %v15815_v27 }
 0x34e   :  { %v14826_v33 = vadd.f32 %v7143_v57, %v7031_v41  ;;  %v7033_v61 = vadd.f32 %v7032_v44, %v14514_v52  ;;  %7583 = vmatprep.mubr.bf16.mxu1 %v15816_v6  ;;  %7738 = vmatpush2.bf16.msra.mxu1 %v10130_v48  ;;  %v10138_v41 = vld [vmem:[%s15617_s3 + $0x76c] ss:$16 sps:$4 sm:$0xff]   ;;  %v10193_v57 = vld [vmem:[%s15618_s5 + $0x80] ss:$8 sps:$4 sm:$0xff]  }
 0x34f   :  { %v7145_v30 = vpop.f32.mrf.mxu1  ;;  %v7034_v55 = vpop.f32.mrf.mxu0  ;;  %7739 = vmatprep.subr.bf16.mxu1 %v10135_v39  ;;  %8479 = vmatpush2.bf16.msra.mxu0 %v10190_v50  ;;  %v10144_v6 = vld [vmem:[%s15617_s3 + $0x72c] ss:$16 sps:$4 sm:$0xff]  }
 0x350   :  { %15814 = vst [vmem:[#allocation44_spill] sm:$0xff] %v14826_v33  ;;  %v14834_v36 = vadd.f32 %v7145_v30, %v7033_v61  ;;  %v7035_v28 = vadd.f32 %v7034_v55, %v14506_v26  ;;  %8480 = vmatprep.subr.bf16.mxu0 %v10195_v40  ;;  %v10136_v26 = vld [vmem:[%s15617_s3 + $0x768] ss:$16 sps:$4 sm:$0xff]   ;;  %v10141_v30 = vld [vmem:[%s15617_s3 + $0x74c] ss:$16 sps:$4 sm:$0xff]   ;;  %v15821_v40 = vld [vmem:[#allocation36_spill] sm:$0xff] }
 0x351   :  { %v7147_v48 = vpop.f32.mrf.mxu1  ;;  %v14843_v44 = vpop.f32.mrf.mxu0  ;;  %v15820_v61 = vld [vmem:[#allocation33_spill] sm:$0xff] }
 0x352   :  { %15817 = vst [vmem:[#allocation10_spill] sm:$0xff] %v14834_v36  ;;  %15818 = vst [vmem:[#allocation11_spill] sm:$0xff] %v14843_v44  ;;  %v14845_v27 = vadd.f32 %v7147_v48, %v7035_v28  ;;  %7740 = vmatpush2.bf16.msra.mxu1 %v10133_v7  ;;  %v10139_v28 = vld [vmem:[%s15617_s3 + $0x748] ss:$16 sps:$4 sm:$0xff]   ;;  %v10147_v48 = vld [vmem:[%s15617_s3 + $0x70c] ss:$16 sps:$4 sm:$0xff]  }
 0x353   :  { %v14850_v55 = vpop.f32.mrf.mxu0  ;;  %7741 = vmatprep.subr.bf16.mxu1 %v10138_v41  ;;  %8481 = vmatpush2.bf16.msra.mxu0 %v10193_v57  ;;  %v10142_v41 = vld [vmem:[%s15617_s3 + $0x728] ss:$16 sps:$4 sm:$0xff]   ;;  %v10198_v33 = vld [vmem:[%s15618_s5 + $0x174] ss:$8 sps:$4 sm:$0xff]  }
 0x354   :  { %15819 = vst [vmem:[#allocation12_spill] sm:$0xff] %v14845_v27  ;;  %v10199_v44 = vld [vmem:[%s15618_s5 + $0x160] ss:$8 sps:$4 sm:$0xff]  }
 0x355   :  { %7584 = vmatmul.mubr.bf16.gmra.mxu1 %v15820_v61  ;;  %v14856_v39 = vpop.f32.mrf.mxu0  ;;  %v10145_v61 = vld [vmem:[%s15617_s3 + $0x708] ss:$16 sps:$4 sm:$0xff]  }
 0x356   :  { %7593 = vmatprep.mubr.bf16.mxu1 %v15821_v40  ;;  %7742 = vmatpush2.bf16.msra.mxu1 %v10136_v26  ;;  %v15822_v26 = vld [vmem:[#allocation35_spill] sm:$0xff] }
 0x357   :  { %v14862_v50 = vpop.f32.mrf.mxu0  ;;  %7743 = vmatprep.subr.bf16.mxu1 %v10141_v30 }
 0x359   :  { %v14867_v7 = vpop.f32.mrf.mxu0 }
 0x35a   :  { %7744 = vmatpush2.bf16.msra.mxu1 %v10139_v28 }
 0x35b   :  { %v14872_v57 = vpop.f32.mrf.mxu0  ;;  %7745 = vmatprep.subr.bf16.mxu1 %v10144_v6 }
 0x35d   :  { %7594 = vmatmul.mubr.bf16.gmra.mxu1 %v15822_v26  ;;  %v14878_v30 = vpop.f32.mrf.mxu0 }
 0x35e   :  { %7746 = vmatpush2.bf16.msra.mxu1 %v10142_v41  ;;  %7749 = vmatprep.mubr.bf16.mxu1 %v14266_v12 }
 0x35f   :  { %v14884_v40 = vpop.f32.mrf.mxu0  ;;  %7747 = vmatprep.subr.bf16.mxu1 %v10147_v48 }
 0x361   :  { %v14886_v28 = vpop.f32.mrf.mxu0 }
 0x362   :  { %7748 = vmatpush2.bf16.msra.mxu1 %v10145_v61 }
 0x363   :  { %v14888_v6 = vpop.f32.mrf.mxu0  ;;  %8563 = vmatprep.subr.bf16.mxu1 %v10198_v33  ;;  %v10204_v33 = vld [vmem:[%s15618_s5 + $0x154] ss:$8 sps:$4 sm:$0xff]  }
 0x365   :  { %7750 = vmatmul.mubr.bf16.vlgmr.msra.gmra.mxu1 %v14258_v29  ;;  %v14891_v26 = vpop.f32.mrf.mxu0 }
 0x366   :  { %7759 = vmatprep.mubr.bf16.mxu1 %v14306_v34  ;;  %v10196_v34 = vld [vmem:[%s15618_s5 + $0x170] ss:$8 sps:$4 sm:$0xff]  }
 0x367   :  { %v14894_v41 = vpop.f32.mrf.mxu0  ;;  %8564 = vmatpush1.bf16.msra.mxu1 %v10196_v34 }
 0x368   :  { %8565 = vmatprep.subr.bf16.mxu1 %v10201_v8  ;;  %v10205_v8 = vld [vmem:[%s15618_s5 + $0x140] ss:$8 sps:$4 sm:$0xff]  }
 0x369   :  { %v14896_v12 = vpop.f32.mrf.mxu0 }
 0x36b   :  { %v14898_v27 = vpop.f32.mrf.mxu0  ;;  %8566 = vmatpush1.bf16.msra.mxu1 %v10199_v44  ;;  %v10207_v44 = vld [vmem:[%s15618_s5 + $0x144] ss:$8 sps:$4 sm:$0xff]  }
 0x36c   :  { %8567 = vmatprep.subr.bf16.mxu1 %v10204_v33 }
 0x36d   :  { %7760 = vmatmul.mubr.bf16.gmra.mxu1 %v14292_v37  ;;  %v14901_v48 = vpop.f32.mrf.mxu0 }
 0x36e   :  { %7769 = vmatprep.mubr.bf16.mxu1 %v14346_v31 }
 0x36f   :  { %v14904_v61 = vpop.f32.mrf.mxu0 }
 0x371   :  { %v14906_v36 = vpop.f32.mrf.mxu0 }
 0x373   :  { %v14908_v29 = vpop.f32.mrf.mxu0 }
 0x375   :  { %7770 = vmatmul.mubr.bf16.gmra.mxu1 %v14332_v47  ;;  %v14917_v37 = vpop.f32.mrf.mxu0 }
 0x376   :  { %7779 = vmatprep.mubr.bf16.mxu1 %v14396_v25  ;;  %v10202_v25 = vld [vmem:[%s15618_s5 + $0x150] ss:$8 sps:$4 sm:$0xff]  }
 0x377   :  { %v14920_v31 = vpop.f32.mrf.mxu0  ;;  %8568 = vmatpush1.bf16.msra.mxu1 %v10202_v25  ;;  %v10210_v25 = vld [vmem:[%s15618_s5 + $0x134] ss:$8 sps:$4 sm:$0xff]  }
 0x378   :  { %8569 = vmatprep.subr.bf16.mxu1 %v10207_v44  ;;  %v10213_v44 = vld [vmem:[%s15618_s5 + $0x124] ss:$8 sps:$4 sm:$0xff]  }
 0x379   :  { %v14928_v35 = vpop.f32.mrf.mxu0 }
 0x37b   :  { %v14930_v47 = vpop.f32.mrf.mxu0  ;;  %8570 = vmatpush1.bf16.msra.mxu1 %v10205_v8  ;;  %v10211_v8 = vld [vmem:[%s15618_s5 + $0x120] ss:$8 sps:$4 sm:$0xff]  }
 0x37c   :  { %15823 = vst [vmem:[#allocation13_spill] sm:$0xff] %v14930_v47  ;;  %8571 = vmatprep.subr.bf16.mxu1 %v10210_v25 }
 0x37d   :  { %7780 = vmatmul.mubr.bf16.gmra.mxu1 %v14379_v4  ;;  %v14939_v34 = vpop.f32.mrf.mxu0 }
 0x37e   :  { %7789 = vmatprep.mubr.bf16.mxu1 %v14437_v16  ;;  %v10208_v16 = vld [vmem:[%s15618_s5 + $0x130] ss:$8 sps:$4 sm:$0xff]  }
 0x37f   :  { %v14942_v5 = vpop.f32.mrf.mxu0  ;;  %8572 = vmatpush1.bf16.msra.mxu1 %v10208_v16  ;;  %v10216_v16 = vld [vmem:[%s15618_s5 + $0x114] ss:$8 sps:$4 sm:$0xff]  }
 0x380   :  { %8573 = vmatprep.subr.bf16.mxu1 %v10213_v44  ;;  %v10219_v44 = vld [vmem:[%s15618_s5 + $0x104] ss:$8 sps:$4 sm:$0xff]  }
 0x381   :  { %v14950_v47 = vpop.f32.mrf.mxu0 }
 0x382   :  { %15824 = vst [vmem:[#allocation22_spill] sm:$0xff] %v14950_v47 }
 0x383   :  { %v14952_v4 = vpop.f32.mrf.mxu0  ;;  %8574 = vmatpush1.bf16.msra.mxu1 %v10211_v8  ;;  %v10217_v8 = vld [vmem:[%s15618_s5 + $0x100] ss:$8 sps:$4 sm:$0xff]  }
 0x384   :  { %15825 = vst [vmem:[#allocation14_spill] sm:$0xff] %v14952_v4  ;;  %8575 = vmatprep.subr.bf16.mxu1 %v10216_v16 }
 0x385   :  { %7790 = vmatmul.mubr.bf16.gmra.mxu1 %v14420_v54  ;;  %v14961_v33 = vpop.f32.mrf.mxu0 }
 0x386   :  { %7799 = vmatprep.mubr.bf16.mxu1 %v14478_v19  ;;  %v10214_v19 = vld [vmem:[%s15618_s5 + $0x110] ss:$8 sps:$4 sm:$0xff]  }
 0x387   :  { %v14964_v47 = vpop.f32.mrf.mxu0  ;;  %8576 = vmatpush1.bf16.msra.mxu1 %v10214_v19  ;;  %v10222_v19 = vld [vmem:[%s15618_s5 + $0x1f4] ss:$8 sps:$4 sm:$0xff]  }
 0x388   :  { %15826 = vst [vmem:[#allocation21_spill] sm:$0xff] %v14964_v47  ;;  %8577 = vmatprep.subr.bf16.mxu1 %v10219_v44  ;;  %v10225_v44 = vld [vmem:[%s15618_s5 + $0x1e4] ss:$8 sps:$4 sm:$0xff]  }
 0x389   :  { %v14972_v4 = vpop.f32.mrf.mxu0 }
 0x38a   :  { %15827 = vst [vmem:[#allocation15_spill] sm:$0xff] %v14972_v4 }
 0x38b   :  { %v14974_v54 = vpop.f32.mrf.mxu0  ;;  %8578 = vmatpush1.bf16.msra.mxu1 %v10217_v8  ;;  %v10223_v8 = vld [vmem:[%s15618_s5 + $0x1e0] ss:$8 sps:$4 sm:$0xff]  }
 0x38c   :  { %15828 = vst [vmem:[#allocation24_spill] sm:$0xff] %v14974_v54  ;;  %8579 = vmatprep.subr.bf16.mxu1 %v10222_v19 }
 0x38d   :  { %7800 = vmatmul.mubr.bf16.gmra.mxu1 %v14461_v1  ;;  %v14983_v25 = vpop.f32.mrf.mxu0 }
 0x38e   :  { %15829 = vst [vmem:[#allocation16_spill] sm:$0xff] %v14983_v25  ;;  %7809 = vmatprep.mubr.bf16.mxu1 %v14516_v21  ;;  %v10220_v21 = vld [vmem:[%s15618_s5 + $0x1f0] ss:$8 sps:$4 sm:$0xff]  }
 0x38f   :  { %v14986_v4 = vpop.f32.mrf.mxu0  ;;  %8580 = vmatpush2.bf16.msra.mxu1 %v10220_v21  ;;  %v10228_v21 = vld [vmem:[%s15618_s5 + $0x1d4] ss:$8 sps:$4 sm:$0xff]  }
 0x390   :  { %15830 = vst [vmem:[#allocation23_spill] sm:$0xff] %v14986_v4  ;;  %8581 = vmatprep.subr.bf16.mxu1 %v10225_v44  ;;  %v10231_v44 = vld [vmem:[%s15618_s5 + $0x1c4] ss:$8 sps:$4 sm:$0xff]  }
 0x391   :  { %v14994_v54 = vpop.f32.mrf.mxu0 }
 0x392   :  { %15831 = vst [vmem:[#allocation17_spill] sm:$0xff] %v14994_v54 }
 0x393   :  { %v14996_v1 = vpop.f32.mrf.mxu0  ;;  %8582 = vmatpush2.bf16.msra.mxu1 %v10223_v8  ;;  %v10229_v8 = vld [vmem:[%s15618_s5 + $0x1c0] ss:$8 sps:$4 sm:$0xff]  }
 0x394   :  { %15832 = vst [vmem:[#allocation26_spill] sm:$0xff] %v14996_v1  ;;  %8583 = vmatprep.subr.bf16.mxu1 %v10228_v21  ;;  %v6967_v21 = vadd.f32 %v14553_v10, %v14514_v52 }
 0x395   :  { %7810 = vmatmul.mubr.bf16.gmra.mxu1 %v14502_v51  ;;  %v15005_v16 = vpop.f32.mrf.mxu0 }
 0x396   :  { %15833 = vst [vmem:[#allocation18_spill] sm:$0xff] %v15005_v16  ;;  %7819 = vmatprep.mubr.bf16.mxu1 %v14563_v17  ;;  %v10226_v17 = vld [vmem:[%s15618_s5 + $0x1d0] ss:$8 sps:$4 sm:$0xff]  }
 0x397   :  { %v15008_v54 = vpop.f32.mrf.mxu0  ;;  %8584 = vmatpush2.bf16.msra.mxu1 %v10226_v17  ;;  %v7187_v17 = vadd.f32 %v14850_v55, %v14534_v46  ;;  %v7080_v46 = vadd.f32 %v14561_v0, %v6967_v21  ;;  %v7191_v55 = vadd.f32 %v14862_v50, %v14559_v20  ;;  %v10235_v0 = vld [vmem:[%s15618_s5 + $0x1a0] ss:$8 sps:$4 sm:$0xff]   ;;  %v6977_v20 = vadd.f32 %v14598_v59, %v14514_v52  ;;  %v10240_v59 = vld [vmem:[%s15618_s5 + $0x194] ss:$8 sps:$4 sm:$0xff]  }
 0x398   :  { %15834 = vst [vmem:[#allocation25_spill] sm:$0xff] %v15008_v54  ;;  %8585 = vmatprep.subr.bf16.mxu1 %v10231_v44  ;;  %v7197_v21 = vadd.f32 %v14872_v57, %v14580_v49  ;;  %v10238_v49 = vld [vmem:[%s15618_s5 + $0x190] ss:$8 sps:$4 sm:$0xff]   ;;  %v7199_v57 = vadd.f32 %v14878_v30, %v14589_v38  ;;  %v10243_v38 = vld [vmem:[%s15618_s5 + $0x184] ss:$8 sps:$4 sm:$0xff]  }
 0x399   :  { %v15016_v1 = vpop.f32.mrf.mxu0 }
 0x39a   :  { %15835 = vst [vmem:[#allocation37_spill] sm:$0xff] %v15016_v1 }
 0x39b   :  { %v15018_v51 = vpop.f32.mrf.mxu0  ;;  %8586 = vmatpush2.bf16.msra.mxu1 %v10229_v8  ;;  %v7189_v8 = vadd.f32 %v14856_v39, %v14547_v45  ;;  %v7193_v45 = vadd.f32 %v14867_v7, %v7080_v46 }
 0x39c   :  { %15836 = vst [vmem:[#allocation28_spill] sm:$0xff] %v15018_v51  ;;  %v15039_v51 = vpop.f32.mrf.mxu1 }
 0x39d   :  { %7820 = vmatmul.mubr.bf16.gmra.mxu1 %v14542_v63  ;;  %v15027_v19 = vpop.f32.mrf.mxu0  ;;  %15840 = vst [vmem:[#allocation30_spill] sm:$0xff] %v15039_v51 }
 0x39e   :  { %15837 = vst [vmem:[#allocation20_spill] sm:$0xff] %v15027_v19 }
 0x39f   :  { %v15029_v54 = vpop.f32.mrf.mxu0 }
 0x3a0   :  { %15838 = vst [vmem:[#allocation27_spill] sm:$0xff] %v15029_v54  ;;  %v10232_v54 = vld [vmem:[%s15618_s5 + $0x1b0] ss:$8 sps:$4 sm:$0xff]  }
 0x3a1   :  { %v15037_v1 = vpop.f32.mrf.mxu0 }
 0x3a2   :  { %15839 = vst [vmem:[#allocation39_spill] sm:$0xff] %v15037_v1  ;;  %v10234_v1 = vld [vmem:[%s15618_s5 + $0x1b4] ss:$8 sps:$4 sm:$0xff]  }
 0x3a3   :  { %v15041_v63 = vpop.f32.mrf.mxu0  ;;  %8587 = vmatprep.subr.bf16.mxu1 %v10234_v1  ;;  %v10237_v1 = vld [vmem:[%s15618_s5 + $0x1a4] ss:$8 sps:$4 sm:$0xff]  }
 0x3a4   :  { %15841 = vst [vmem:[#allocation38_spill] sm:$0xff] %v15041_v63  ;;  %8588 = vmatpush2.bf16.msra.mxu1 %v10232_v54 }
 0x3a5   :  { %v7299_v44 = vpop.f32.mrf.mxu1  ;;  %v15053_v19 = vpop.f32.mrf.mxu0  ;;  %8589 = vmatprep.subr.bf16.mxu1 %v10237_v1 }
 0x3a6   :  { %v7300_v16 = vadd.f32 %v7299_v44, %v7187_v17 }
 0x3a7   :  { %v7301_v10 = vpop.f32.mrf.mxu1  ;;  %v15057_v63 = vpop.f32.mrf.mxu0 }
 0x3a8   :  { %v7894_v4 = vmul.f32 0.2, %v7300_v16  ;;  %v7302_v51 = vadd.f32 %v7301_v10, %v7189_v8  ;;  %vm7830_vm0 = vcmp.gt.f32.partialorder %v7300_v16, 0.0  ;;  %8590 = vmatpush2.bf16.msra.mxu1 %v10235_v0  ;;  %v7090_v0 = vadd.f32 %v14605_v9, %v6977_v20 }
 0x3a9   :  { %v7303_v25 = vpop.f32.mrf.mxu1  ;;  %v15062_v47 = vpop.f32.mrf.mxu0  ;;  %8591 = vmatprep.subr.bf16.mxu1 %v10240_v59 }
 0x3aa   :  { %15842 = vst [vmem:[#allocation29_spill] sm:$0xff] %v15062_v47  ;;  %v7304_v39 = vadd.f32 %v7303_v25, %v7191_v55  ;;  %v7958_v7 = vsel %vm7830_vm0, %v7300_v16, %v7894_v4  ;;  %v7895_v25 = vmul.f32 0.2, %v7302_v51  ;;  %vm7831_vm3 = vcmp.gt.f32.partialorder %v7302_v51, 0.0 }
 0x3ab   :  { %v7305_v50 = vpop.f32.mrf.mxu1  ;;  %v15073_v54 = vpop.f32.mrf.mxu0  ;;  %v7203_v30 = vadd.f32 %v14886_v28, %v7090_v0  ;;  %v7209_v0 = vadd.f32 %v14891_v26, %v14630_v58 }
 0x3ac   :  { %vm7834_vm1 = vcmp.gt.f32.partialorder %v7304_v39, 0.0  ;;  %v7898_v17 = vmul.f32 0.2, %v7304_v39  ;;  %v7306_v44 = vadd.f32 %v7305_v50, %v7193_v45  ;;  %8592 = vmatpush2.bf16.msra.mxu1 %v10238_v49  ;;  %v7959_v9 = vsel %vm7831_vm3, %v7302_v51, %v7895_v25 }
 0x3ad   :  { %v7309_v8 = vpop.f32.mrf.mxu1  ;;  %v15077_v10 = vpop.f32.mrf.mxu0  ;;  %8593 = vmatprep.subr.bf16.mxu1 %v10243_v38 }
 0x3ae   :  { %v7962_v46 = vsel %vm7834_vm1, %v7304_v39, %v7898_v17  ;;  %vm7835_vm2 = vcmp.gt.f32.partialorder %v7306_v44, 0.0  ;;  %v7899_v55 = vmul.f32 0.2, %v7306_v44  ;;  %v7310_v1 = vadd.f32 %v7309_v8, %v7197_v21 }
 0x3af   :  { %v8022_v4 = vpack.c.bf16 %v7962_v46, %v7958_v7  ;;  %v7311_v16 = vpop.f32.mrf.mxu1  ;;  %v15087_v45 = vpop.f32.mrf.mxu0  ;;  %v7201_v39 = vadd.f32 %v14884_v40, %v14603_v42  ;;  %v10241_v42 = vld [vmem:[%s15618_s5 + $0x180] ss:$8 sps:$4 sm:$0xff]   ;;  %v6987_v40 = vadd.f32 %v14639_v56, %v14514_v52  ;;  %v7207_v46 = vadd.f32 %v14888_v6, %v14621_v15 }
 0x3b0   :  { %v7902_v50 = vmul.f32 0.2, %v7310_v1  ;;  %v7312_v21 = vadd.f32 %v7311_v16, %v7199_v57  ;;  %v7963_v47 = vsel %vm7835_vm2, %v7306_v44, %v7899_v55  ;;  %vm7838_vm4 = vcmp.gt.f32.partialorder %v7310_v1, 0.0  ;;  %8594 = vmatpush2.bf16.msra.mxu1 %v10241_v42 }
 0x3b1   :  { %v7313_v17 = vpop.f32.mrf.mxu1  ;;  %v15092_v8 = vpop.f32.mrf.mxu0  ;;  %v8023_v59 = vpack.c.bf16 %v7963_v47, %v7959_v9  ;;  %v6997_v42 = vadd.f32 %v14680_v23, %v14514_v52 }
 0x3b2   :  { %v7314_v7 = vadd.f32 %v7313_v17, %v7201_v39  ;;  %v7966_v51 = vsel %vm7838_vm4, %v7310_v1, %v7902_v50  ;;  %v7903_v25 = vmul.f32 0.2, %v7312_v21  ;;  %vm7839_vm7 = vcmp.gt.f32.partialorder %v7312_v21, 0.0 }
 0x3b3   :  { %v7315_v20 = vpop.f32.mrf.mxu1  ;;  %v15105_v44 = vpop.f32.mrf.mxu0  ;;  %8482 = vmatprep.mubr.bf16.mxu0 %v8023_v59  ;;  %v7100_v1 = vadd.f32 %v14646_v43, %v6987_v40  ;;  %v7211_v50 = vadd.f32 %v14894_v41, %v14644_v2  ;;  %v7217_v2 = vadd.f32 %v14898_v27, %v14662_v60 }
 0x3b4   :  { %vm7842_vm5 = vcmp.gt.f32.partialorder %v7314_v7, 0.0  ;;  %v7906_v28 = vmul.f32 0.2, %v7314_v7  ;;  %v7316_v55 = vadd.f32 %v7315_v20, %v7203_v30  ;;  %8483 = vmatmul.mubr.bf16.vlgmr.msra.gmra.mxu0 %v8022_v4  ;;  %v7967_v26 = vsel %vm7839_vm7, %v7312_v21, %v7903_v25 }
 0x3b5   :  { %v7319_v49 = vpop.f32.mrf.mxu1  ;;  %v15109_v57 = vpop.f32.mrf.mxu0  ;;  %v7213_v9 = vadd.f32 %v14896_v12, %v7100_v1  ;;  %v7219_v25 = vadd.f32 %v14901_v48, %v14671_v32 }
 0x3b6   :  { %v7970_v16 = vsel %vm7842_vm5, %v7314_v7, %v7906_v28  ;;  %vm7843_vm6 = vcmp.gt.f32.partialorder %v7316_v55, 0.0  ;;  %v7907_v56 = vmul.f32 0.2, %v7316_v55  ;;  %v7320_v47 = vadd.f32 %v7319_v49, %v7207_v46 }
 0x3b7   :  { %v8026_v15 = vpack.c.bf16 %v7970_v16, %v7966_v51  ;;  %v7321_v6 = vpop.f32.mrf.mxu1  ;;  %v15113_v39 = vpop.f32.mrf.mxu0  ;;  %v7110_v16 = vadd.f32 %v14687_v62, %v6997_v42  ;;  %v7227_v62 = vadd.f32 %v14908_v29, %v14703_v3 }
 0x3b8   :  { %v7910_v17 = vmul.f32 0.2, %v7320_v47  ;;  %v7322_v38 = vadd.f32 %v7321_v6, %v7209_v0  ;;  %v7971_v4 = vsel %vm7843_vm6, %v7316_v55, %v7907_v56  ;;  %vm7846_vm8 = vcmp.gt.f32.partialorder %v7320_v47, 0.0 }
 0x3b9   :  { %v7323_v30 = vpop.f32.mrf.mxu1  ;;  %v15118_v7 = vpop.f32.mrf.mxu0  ;;  %v8027_v59 = vpack.c.bf16 %v7971_v4, %v7967_v26  ;;  %v7221_v56 = vadd.f32 %v14904_v61, %v14685_v18 }
 0x3ba   :  { %v7324_v58 = vadd.f32 %v7323_v30, %v7211_v50  ;;  %v7974_v46 = vsel %vm7846_vm8, %v7320_v47, %v7910_v17  ;;  %v7911_v28 = vmul.f32 0.2, %v7322_v38  ;;  %vm7847_vm11 = vcmp.gt.f32.partialorder %v7322_v38, 0.0 }
 0x3bb   :  { %v7325_v20 = vpop.f32.mrf.mxu1  ;;  %v15123_v43 = vpop.f32.mrf.mxu0  ;;  %8492 = vmatprep.mubr.bf16.mxu0 %v8027_v59  ;;  %v7223_v50 = vadd.f32 %v14906_v36, %v7110_v16  ;;  %v7007_v17 = vadd.f32 %v14721_v53, %v14514_v52  ;;  %v7229_v53 = vadd.f32 %v14917_v37, %v14712_v14  ;;  %v7017_v14 = vadd.f32 %v14762_v22, %v14514_v52 }
 0x3bc   :  { %vm7850_vm9 = vcmp.gt.f32.partialorder %v7324_v58, 0.0  ;;  %v7914_v41 = vmul.f32 0.2, %v7324_v58  ;;  %v7326_v40 = vadd.f32 %v7325_v20, %v7213_v9  ;;  %8493 = vmatmul.mubr.bf16.gmra.mxu0 %v8026_v15  ;;  %v7975_v48 = vsel %vm7847_vm11, %v7322_v38, %v7911_v28 }
 0x3bd   :  { %v7329_v12 = vpop.f32.mrf.mxu1  ;;  %v15127_v55 = vpop.f32.mrf.mxu0  ;;  %v7120_v29 = vadd.f32 %v14728_v13, %v7007_v17  ;;  %v15843_v13 = vld [vmem:[#allocation13_spill] sm:$0xff] }
 0x3be   :  { %v7978_v21 = vsel %vm7850_vm9, %v7324_v58, %v7914_v41  ;;  %vm7851_vm10 = vcmp.gt.f32.partialorder %v7326_v40, 0.0  ;;  %v7915_v51 = vmul.f32 0.2, %v7326_v40  ;;  %v7330_v23 = vadd.f32 %v7329_v12, %v7217_v2  ;;  %v15847_v17 = vld [vmem:[#allocation5_spill] sm:$0xff] }
 0x3bf   :  { %v8030_v49 = vpack.c.bf16 %v7978_v21, %v7974_v46  ;;  %v7331_v60 = vpop.f32.mrf.mxu1  ;;  %v15131_v27 = vpop.f32.mrf.mxu0  ;;  %v7231_v2 = vadd.f32 %v14920_v31, %v14726_v11  ;;  %v7233_v21 = vadd.f32 %v14928_v35, %v7120_v29 }
 0x3c0   :  { %v7918_v47 = vmul.f32 0.2, %v7330_v23  ;;  %v7332_v0 = vadd.f32 %v7331_v60, %v7219_v25  ;;  %v7979_v15 = vsel %vm7851_vm10, %v7326_v40, %v7915_v51  ;;  %vm7854_vm12 = vcmp.gt.f32.partialorder %v7330_v23, 0.0  ;;  %v15844_v60 = vld [vmem:[#allocation2_spill] sm:$0xff] }
 0x3c1   :  { %v7333_v6 = vpop.f32.mrf.mxu1  ;;  %v15136_v1 = vpop.f32.mrf.mxu0  ;;  %v8031_v4 = vpack.c.bf16 %v7979_v15, %v7975_v48  ;;  %v7239_v16 = vadd.f32 %v14939_v34, %v15844_v60  ;;  %v15855_v60 = vld [vmem:[#allocation3_spill] sm:$0xff] }
 0x3c2   :  { %v7334_v32 = vadd.f32 %v7333_v6, %v7221_v56  ;;  %v7982_v9 = vsel %vm7854_vm12, %v7330_v23, %v7918_v47  ;;  %v7919_v58 = vmul.f32 0.2, %v7332_v0  ;;  %vm7855_vm15 = vcmp.gt.f32.partialorder %v7332_v0, 0.0 }
 0x3c3   :  { %v7335_v30 = vpop.f32.mrf.mxu1  ;;  %8502 = vmatprep.mubr.bf16.mxu0 %v8031_v4  ;;  %v15143_v26 = vpop.f32.mrf.mxu0 }
 0x3c4   :  { %vm7858_vm13 = vcmp.gt.f32.partialorder %v7334_v32, 0.0  ;;  %v7922_v18 = vmul.f32 0.2, %v7334_v32  ;;  %v7336_v61 = vadd.f32 %v7335_v30, %v7223_v50  ;;  %8503 = vmatmul.mubr.bf16.gmra.mxu0 %v8030_v49  ;;  %v7983_v23 = vsel %vm7855_vm15, %v7332_v0, %v7919_v58 }
 0x3c5   :  { %v7339_v36 = vpop.f32.mrf.mxu1  ;;  %v15150_v40 = vpop.f32.mrf.mxu0  ;;  %v7237_v49 = vadd.f32 %v15843_v13, %v14744_v24  ;;  %v7241_v30 = vadd.f32 %v14942_v5, %v15847_v17  ;;  %v15854_v13 = vld [vmem:[#allocation43_spill] sm:$0xff] }
 0x3c6   :  { %v7986_v42 = vsel %vm7858_vm13, %v7334_v32, %v7922_v18  ;;  %vm7859_vm14 = vcmp.gt.f32.partialorder %v7336_v61, 0.0  ;;  %v7923_v38 = vmul.f32 0.2, %v7336_v61  ;;  %v7340_v20 = vadd.f32 %v7339_v36, %v7227_v62  ;;  %v15846_v32 = vld [vmem:[#allocation4_spill] sm:$0xff]  ;;  %v15858_v17 = vld [vmem:[#allocation11_spill] sm:$0xff] }
 0x3c7   :  { %v8034_v59 = vpack.c.bf16 %v7986_v42, %v7982_v9  ;;  %v7341_v3 = vpop.f32.mrf.mxu1  ;;  %v15159_v35 = vpop.f32.mrf.mxu0  ;;  %v7130_v48 = vadd.f32 %v15846_v32, %v7017_v14  ;;  %v15849_v9 = vld [vmem:[#allocation22_spill] sm:$0xff]  ;;  %v15857_v32 = vld [vmem:[#allocation15_spill] sm:$0xff] }
 0x3c8   :  { %v7926_v41 = vmul.f32 0.2, %v7340_v20  ;;  %v7342_v46 = vadd.f32 %v7341_v3, %v7229_v53  ;;  %v7987_v12 = vsel %vm7859_vm14, %v7336_v61, %v7923_v38  ;;  %vm7862_vm0 = vcmp.gt.f32.partialorder %v7340_v20, 0.0  ;;  %15845 = vst [vmem:[#allocation41_spill] sm:$0xff] %v15159_v35  ;;  %v15850_v38 = vld [vmem:[#allocation6_spill] sm:$0xff]  ;;  %v15851_v53 = vld [vmem:[#allocation19_spill] sm:$0xff] }
 0x3c9   :  { %v7343_v28 = vpop.f32.mrf.mxu1  ;;  %v8035_v25 = vpack.c.bf16 %v7987_v12, %v7983_v23  ;;  %v15164_v4 = vpop.f32.mrf.mxu0  ;;  %v7243_v58 = vadd.f32 %v15849_v9, %v7130_v48  ;;  %v15853_v12 = vld [vmem:[#allocation42_spill] sm:$0xff] }
 0x3ca   :  { %v7344_v51 = vadd.f32 %v7343_v28, %v7231_v2  ;;  %v7990_v56 = vsel %vm7862_vm0, %v7340_v20, %v7926_v41  ;;  %v7927_v47 = vmul.f32 0.2, %v7342_v46  ;;  %vm7863_vm3 = vcmp.gt.f32.partialorder %v7342_v46, 0.0  ;;  %15848 = vst [vmem:[#allocation32_spill] sm:$0xff] %v15164_v4 }
 0x3cb   :  { %v7345_v37 = vpop.f32.mrf.mxu1  ;;  %8512 = vmatprep.mubr.bf16.mxu0 %v8035_v25  ;;  %v7027_v20 = vadd.f32 %v15850_v38, %v14514_v52  ;;  %v15862_v38 = vld [vmem:[#allocation16_spill] sm:$0xff] }
 0x3cc   :  { %vm7866_vm1 = vcmp.gt.f32.partialorder %v7344_v51, 0.0  ;;  %v7930_v11 = vmul.f32 0.2, %v7344_v51  ;;  %v7346_v31 = vadd.f32 %v7345_v37, %v7233_v21  ;;  %8513 = vmatmul.mubr.bf16.gmra.mxu0 %v8034_v59  ;;  %v7991_v42 = vsel %vm7863_vm3, %v7342_v46, %v7927_v47  ;;  %v15852_v59 = vld [vmem:[#allocation14_spill] sm:$0xff] }
 0x3cd   :  { %v7349_v0 = vpop.f32.mrf.mxu1  ;;  %v7247_v3 = vadd.f32 %v15852_v59, %v15851_v53  ;;  %v7249_v21 = vadd.f32 %v14961_v33, %v15853_v12  ;;  %v15865_v12 = vld [vmem:[#allocation7_spill] sm:$0xff] }
 0x3ce   :  { %v7994_v6 = vsel %vm7866_vm1, %v7344_v51, %v7930_v11  ;;  %vm7867_vm2 = vcmp.gt.f32.partialorder %v7346_v31, 0.0  ;;  %v7931_v22 = vmul.f32 0.2, %v7346_v31  ;;  %v7350_v15 = vadd.f32 %v7349_v0, %v7237_v49  ;;  %v15173_v51 = vpop.f32.mrf.mxu0 }
 0x3cf   :  { %v8038_v50 = vpack.c.bf16 %v7994_v6, %v7990_v56  ;;  %v7351_v24 = vpop.f32.mrf.mxu1  ;;  %v7140_v49 = vadd.f32 %v15854_v13, %v7027_v20 }
 0x3d0   :  { %v7352_v34 = vadd.f32 %v7351_v24, %v7239_v16  ;;  %v7934_v62 = vmul.f32 0.2, %v7350_v15  ;;  %v7995_v61 = vsel %vm7867_vm2, %v7346_v31, %v7931_v22  ;;  %vm7870_vm4 = vcmp.gt.f32.partialorder %v7350_v15, 0.0  ;;  %v15856_v16 = vld [vmem:[#allocation21_spill] sm:$0xff]  ;;  %v15178_v6 = vpop.f32.mrf.mxu0 }
 0x3d1   :  { %v7353_v18 = vpop.f32.mrf.mxu1  ;;  %v8039_v2 = vpack.c.bf16 %v7995_v61, %v7991_v42  ;;  %v7251_v56 = vadd.f32 %v15856_v16, %v15855_v60  ;;  %v7253_v48 = vadd.f32 %v15857_v32, %v7140_v49  ;;  %v15861_v42 = vld [vmem:[#allocation10_spill] sm:$0xff] }
 0x3d2   :  { %v7354_v36 = vadd.f32 %v7353_v18, %v7241_v30  ;;  %v7935_v5 = vmul.f32 0.2, %v7352_v34  ;;  %v7998_v23 = vsel %vm7870_vm4, %v7350_v15, %v7934_v62  ;;  %vm7871_vm6 = vcmp.gt.f32.partialorder %v7352_v34, 0.0  ;;  %v15859_v62 = vld [vmem:[#allocation44_spill] sm:$0xff]  ;;  %v15187_v53 = vpop.f32.mrf.mxu0 }
 0x3d3   :  { %v7355_v29 = vpop.f32.mrf.mxu1  ;;  %8522 = vmatprep.mubr.bf16.mxu0 %v8039_v2  ;;  %v7037_v30 = vadd.f32 %v15858_v17, %v14514_v52  ;;  %v15860_v18 = vld [vmem:[#allocation24_spill] sm:$0xff]  ;;  %v7259_v20 = vadd.f32 %v15862_v38, %v15861_v42  ;;  %15863 = vst [vmem:[#allocation40_spill] sm:$0xff] %v15187_v53 }
 0x3d4   :  { %vm7874_vm5 = vcmp.gt.f32.partialorder %v7354_v36, 0.0  ;;  %v7938_v41 = vmul.f32 0.2, %v7354_v36  ;;  %v7356_v28 = vadd.f32 %v7355_v29, %v7243_v58  ;;  %8523 = vmatmul.mubr.bf16.gmra.mxu0 %v8038_v50  ;;  %v7999_v33 = vsel %vm7871_vm6, %v7352_v34, %v7935_v5  ;;  %v15864_v5 = vld [vmem:[#allocation30_spill] sm:$0xff] }
 0x3d5   :  { %v7359_v46 = vpop.f32.mrf.mxu1  ;;  %v7257_v61 = vadd.f32 %v15860_v18, %v15859_v62  ;;  %v15873_v18 = vld [vmem:[#allocation18_spill] sm:$0xff] }
 0x3d6   :  { %v8002_v14 = vsel %vm7874_vm5, %v7354_v36, %v7938_v41  ;;  %vm7875_vm7 = vcmp.gt.f32.partialorder %v7356_v28, 0.0  ;;  %v7939_v37 = vmul.f32 0.2, %v7356_v28  ;;  %v7360_v25 = vadd.f32 %v7359_v46, %v7247_v3 }
 0x3d7   :  { %v8042_v11 = vpack.c.bf16 %v8002_v14, %v7998_v23  ;;  %v7361_v31 = vpop.f32.mrf.mxu1  ;;  %v7150_v41 = vadd.f32 %v15864_v5, %v7037_v30 }
 0x3d8   :  { %v7362_v47 = vadd.f32 %v7361_v31, %v7249_v21  ;;  %v8003_v0 = vsel %vm7875_vm7, %v7356_v28, %v7939_v37  ;;  %v7942_v22 = vmul.f32 0.2, %v7360_v25  ;;  %vm7878_vm8 = vcmp.gt.f32.partialorder %v7360_v25, 0.0  ;;  %v10367_v28 = vld [vmem:[%s15619_s4] sm:$0xf]  ;;  %v15867_v37 = vld [vmem:[#allocation12_spill] sm:$0xff] }
 0x3d9   :  { %v7363_v15 = vpop.f32.mrf.mxu1  ;;  %v8043_v24 = vpack.c.bf16 %v8003_v0, %v7999_v33  ;;  %v15866_v21 = vsub.s32 2, %v15865_v12 }
 0x3da   :  { %v7364_v50 = vadd.f32 %v7363_v15, %v7251_v56  ;;  %v7943_v58 = vmul.f32 0.2, %v7362_v47  ;;  %v8006_v59 = vsel %vm7878_vm8, %v7360_v25, %v7942_v22  ;;  %vm7879_vm10 = vcmp.gt.f32.partialorder %v7362_v47, 0.0  ;;  %v15868_v25 = vld [vmem:[#allocation23_spill] sm:$0xff]  ;;  %v15203_v56 = vpop.f32.mrf.mxu0  ;;  %v15871_v15 = vld [vmem:[#allocation17_spill] sm:$0xff] }
 0x3db   :  { %v7365_v9 = vpop.f32.mrf.mxu1  ;;  %8532 = vmatprep.mubr.bf16.mxu0 %v8043_v24  ;;  %v15195_v23 = vrot.slane %v10367_v28, %v15866_v21  ;;  %v7261_v13 = vadd.f32 %v15868_v25, %v15867_v37  ;;  %15870 = vst [vmem:[#allocation31_spill] sm:$0xff] %v15203_v56  ;;  %v7263_v24 = vadd.f32 %v15871_v15, %v7150_v41  ;;  %v15875_v37 = vld [vmem:[#allocation20_spill] sm:$0xff] }
 0x3dc   :  { %vm7882_vm9 = vcmp.gt.f32.partialorder %v7364_v50, 0.0  ;;  %v7946_v34 = vmul.f32 0.2, %v7364_v50  ;;  %v7366_v36 = vadd.f32 %v7365_v9, %v7253_v48  ;;  %8533 = vmatmul.mubr.bf16.gmra.mxu0 %v8042_v11  ;;  %v8007_v31 = vsel %vm7879_vm10, %v7362_v47, %v7943_v58  ;;  %v15872_v48 = vld [vmem:[#allocation26_spill] sm:$0xff]  ;;  %v15210_v9 = vpop.f32.mrf.mxu0 }
 0x3dd   :  { %v7369_v3 = vpop.f32.mrf.mxu1  ;;  %v15869_v11 = vsub.s32 3, %v15865_v12  ;;  %v15874_v12 = vld [vmem:[#allocation28_spill] sm:$0xff] }
 0x3de   :  { %v8010_v29 = vsel %vm7882_vm9, %v7364_v50, %v7946_v34  ;;  %vm7883_vm11 = vcmp.gt.f32.partialorder %v7366_v36, 0.0  ;;  %v7947_v52 = vmul.f32 0.2, %v7366_v36  ;;  %v7370_v2 = vadd.f32 %v7369_v3, %v7257_v61  ;;  %v15216_v5 = vpop.f32.mrf.mxu0 }
 0x3df   :  { %v8046_v46 = vpack.c.bf16 %v8010_v29, %v8006_v59  ;;  %v7371_v14 = vpop.f32.mrf.mxu1  ;;  %v15201_v16 = vrot.slane %v10367_v28, %v15869_v11  ;;  %v7413_v50 = vadd.f32 %v15872_v48, %v15195_v23  ;;  %v7423_v21 = vadd.f32 %v15874_v12, %v15195_v23 }
 0x3e0   :  { %v7372_v49 = vadd.f32 %v7371_v14, %v7259_v20  ;;  %v8011_v60 = vsel %vm7883_vm11, %v7366_v36, %v7947_v52  ;;  %v7950_v33 = vmul.f32 0.2, %v7370_v2  ;;  %vm7886_vm12 = vcmp.gt.f32.partialorder %v7370_v2, 0.0 }
 0x3e1   :  { %v7373_v0 = vpop.f32.mrf.mxu1  ;;  %v8047_v22 = vpack.c.bf16 %v8011_v60, %v8007_v31  ;;  %v7415_v61 = vadd.f32 %v15873_v18, %v15201_v16  ;;  %v7425_v25 = vadd.f32 %v15875_v37, %v15201_v16  ;;  %v7443_v18 = vadd.f32 %v15073_v54, %v15195_v23 }
 0x3e2   :  { %v7374_v32 = vadd.f32 %v7373_v0, %v7261_v13  ;;  %v7951_v47 = vmul.f32 0.2, %v7372_v49  ;;  %v8014_v58 = vsel %vm7886_vm12, %v7370_v2, %v7950_v33  ;;  %vm7887_vm14 = vcmp.gt.f32.partialorder %v7372_v49, 0.0  ;;  %v15876_v0 = vld [vmem:[#allocation38_spill] sm:$0xff] }
 0x3e3   :  { %v7375_v17 = vpop.f32.mrf.mxu1  ;;  %8542 = vmatprep.mubr.bf16.mxu0 %v8047_v22  ;;  %v7433_v22 = vadd.f32 %v15876_v0, %v15195_v23  ;;  %v7453_v54 = vadd.f32 %v15105_v44, %v15195_v23  ;;  %v7463_v44 = vadd.f32 %v15123_v43, %v15195_v23  ;;  %v7473_v43 = vadd.f32 %v15143_v26, %v15195_v23 }
 0x3e4   :  { %vm7890_vm13 = vcmp.gt.f32.partialorder %v7374_v32, 0.0  ;;  %v7954_v30 = vmul.f32 0.2, %v7374_v32  ;;  %v7376_v62 = vadd.f32 %v7375_v17, %v7263_v24  ;;  %8543 = vmatmul.mubr.bf16.gmra.mxu0 %v8046_v46  ;;  %v8015_v29 = vsel %vm7887_vm14, %v7372_v49, %v7951_v47  ;;  %v15224_v46 = vpop.f32.mrf.mxu0 }
 0x3e5   :  { %v7525_v34 = vpop.f32.mrf.mxu1  ;;  %v7483_v26 = vadd.f32 %v15173_v51, %v15195_v23  ;;  %v15888_v51 = vld [vmem:[#allocation37_spill] sm:$0xff] }
 0x3e6   :  { %v8018_v36 = vsel %vm7890_vm13, %v7374_v32, %v7954_v30  ;;  %vm7891_vm15 = vcmp.gt.f32.partialorder %v7376_v62, 0.0  ;;  %v7955_v42 = vmul.f32 0.2, %v7376_v62  ;;  %v15212_v38 = vadd.f32 %v7525_v34, %v7413_v50  ;;  %v15232_v60 = vpop.f32.mrf.mxu0 }
 0x3e7   :  { %v8050_v20 = vpack.c.bf16 %v8018_v36, %v8014_v58  ;;  %v7527_v59 = vpop.f32.mrf.mxu1  ;;  %v7435_v32 = vadd.f32 %v15053_v19, %v15201_v16  ;;  %v7445_v19 = vadd.f32 %v15077_v10, %v15201_v16  ;;  %v7455_v10 = vadd.f32 %v15109_v57, %v15201_v16 }
 0x3e8   :  { %v15214_v3 = vadd.f32 %v7527_v59, %v7415_v61  ;;  %v8019_v52 = vsel %vm7891_vm15, %v7376_v62, %v7955_v42  ;;  %v15240_v15 = vpop.f32.mrf.mxu0  ;;  %v7465_v57 = vadd.f32 %v15127_v55, %v15201_v16  ;;  %v7475_v55 = vadd.f32 %v15150_v40, %v15201_v16 }
 0x3e9   :  { %v15218_v41 = vpop.f32.mrf.mxu1  ;;  %v8051_v28 = vpack.c.bf16 %v8019_v52, %v8015_v29  ;;  %v7485_v40 = vadd.f32 %v15178_v6, %v15201_v16 }
 0x3ea   :  { %v15248_v47 = vpop.f32.mrf.mxu0 }
 0x3eb   :  { %v15220_v2 = vpop.f32.mrf.mxu1  ;;  %8552 = vmatprep.mubr.bf16.mxu0 %v8051_v28 }
 0x3ec   :  { %8553 = vmatmul.mubr.bf16.gmra.mxu0 %v8050_v20  ;;  %v15256_v61 = vpop.f32.mrf.mxu0 }
 0x3ed   :  { %v7535_v14 = vpop.f32.mrf.mxu1 }
 0x3ee   :  { %v15228_v13 = vadd.f32 %v7535_v14, %v7423_v21  ;;  %v15264_v20 = vpop.f32.mrf.mxu0 }
 0x3ef   :  { %v7537_v49 = vpop.f32.mrf.mxu1 }
 0x3f0   :  { %v15230_v31 = vadd.f32 %v7537_v49, %v7425_v25  ;;  %v15272_v52 = vpop.f32.mrf.mxu0 }
 0x3f1   :  { %v15234_v11 = vpop.f32.mrf.mxu1 }
 0x3f2   :  { %v15280_v37 = vpop.f32.mrf.mxu0 }
 0x3f3   :  { %v15236_v33 = vpop.f32.mrf.mxu1 }
 0x3f4   :  { %v15288_v0 = vpop.f32.mrf.mxu0 }
 0x3f5   :  { %v7545_v24 = vpop.f32.mrf.mxu1 }
 0x3f6   :  { %v15244_v48 = vadd.f32 %v7545_v24, %v7433_v22 }
 0x3f7   :  { %v7547_v50 = vpop.f32.mrf.mxu1 }
 0x3f8   :  { %v15246_v17 = vadd.f32 %v7547_v50, %v7435_v32 }
 0x3f9   :  { %v15250_v30 = vpop.f32.mrf.mxu1 }
 0x3fb   :  { %v15252_v62 = vpop.f32.mrf.mxu1 }
 0x3fd   :  { %v7555_v58 = vpop.f32.mrf.mxu1 }
 0x3fe   :  { %v15260_v34 = vadd.f32 %v7555_v58, %v7443_v18  ;;  %v15296_v18 = vpop.f32.mrf.mxu0 }
 0x3ff   :  { %v7557_v36 = vpop.f32.mrf.mxu1 }
 0x400   :  { %v15262_v42 = vadd.f32 %v7557_v36, %v7445_v19  ;;  %v15304_v36 = vpop.f32.mrf.mxu0 }
 0x401   :  { %v15266_v59 = vpop.f32.mrf.mxu1 }
 0x403   :  { %v15268_v29 = vpop.f32.mrf.mxu1 }
 0x405   :  { %v7565_v28 = vpop.f32.mrf.mxu1 }
 0x406   :  { %v15276_v12 = vadd.f32 %v7565_v28, %v7453_v54 }
 0x407   :  { %v7567_v21 = vpop.f32.mrf.mxu1 }
 0x408   :  { %v15278_v14 = vadd.f32 %v7567_v21, %v7455_v10 }
 0x409   :  { %v15282_v25 = vpop.f32.mrf.mxu1 }
 0x40b   :  { %v15284_v49 = vpop.f32.mrf.mxu1 }
 0x40d   :  { %v7575_v22 = vpop.f32.mrf.mxu1 }
 0x40e   :  { %v15292_v24 = vadd.f32 %v7575_v22, %v7463_v44  ;;  %v15312_v44 = vpop.f32.mrf.mxu0 }
 0x40f   :  { %v7577_v32 = vpop.f32.mrf.mxu1 }
 0x410   :  { %15877 = vst [vmem:[#allocation34_spill] sm:$0xff] %v15292_v24  ;;  %v15294_v50 = vadd.f32 %v7577_v32, %v7465_v57  ;;  %v15320_v32 = vpop.f32.mrf.mxu0 }
 0x411   :  { %v15298_v58 = vpop.f32.mrf.mxu1 }
 0x413   :  { %v15300_v19 = vpop.f32.mrf.mxu1 }
 0x414   :  { %15878 = vst [vmem:[#allocation33_spill] sm:$0xff] %v15300_v19 }
 0x415   :  { %v7585_v54 = vpop.f32.mrf.mxu1 }
 0x416   :  { %v15308_v28 = vadd.f32 %v7585_v54, %v7473_v43 }
 0x417   :  { %v7587_v10 = vpop.f32.mrf.mxu1 }
 0x418   :  { %15879 = vst [vmem:[#allocation36_spill] sm:$0xff] %v15308_v28  ;;  %v15310_v21 = vadd.f32 %v7587_v10, %v7475_v55  ;;  %v15328_v10 = vpop.f32.mrf.mxu0  ;;  %v15886_v28 = vld [vmem:[#allocation25_spill] sm:$0xff] }
 0x419   :  { %v15314_v22 = vpop.f32.mrf.mxu1 }
 0x41a   :  { %15880 = vst [vmem:[#allocation35_spill] sm:$0xff] %v15310_v21  ;;  %15881 = vst [vmem:[#allocation13_spill] sm:$0xff] %v15314_v22  ;;  %v7419_v22 = vadd.f32 %v15888_v51, %v15201_v16  ;;  %v15339_v6 = vpop.f32.mrf.mxu0 }
 0x41b   :  { %v15316_v57 = vpop.f32.mrf.mxu1 }
 0x41c   :  { %15882 = vst [vmem:[#allocation2_spill] sm:$0xff] %v15316_v57  ;;  %v7417_v57 = vadd.f32 %v15886_v28, %v15195_v23 }
 0x41d   :  { %v7595_v56 = vpop.f32.mrf.mxu1 }
 0x41e   :  { %v15324_v43 = vadd.f32 %v7595_v56, %v7483_v26  ;;  %v7530_v4 = vadd.f32 %v15218_v41, %v7417_v57  ;;  %v7532_v26 = vadd.f32 %v15220_v2, %v7419_v22  ;;  %v15890_v22 = vld [vmem:[#allocation39_spill] sm:$0xff] }
 0x41f   :  { %v7597_v54 = vpop.f32.mrf.mxu1 }
 0x420   :  { %15883 = vst [vmem:[#allocation4_spill] sm:$0xff] %v15324_v43  ;;  %v15326_v55 = vadd.f32 %v7597_v54, %v7485_v40  ;;  %v7641_v40 = vadd.f32 %v15216_v5, %v15214_v3  ;;  %v7639_v54 = vadd.f32 %v15210_v9, %v15212_v38  ;;  %v7645_v2 = vadd.f32 %v15232_v60, %v7532_v26 }
 0x421   :  { %v15330_v53 = vpop.f32.mrf.mxu1  ;;  %v7429_v3 = vadd.f32 %v15890_v22, %v15201_v16 }
 0x422   :  { %15884 = vst [vmem:[#allocation5_spill] sm:$0xff] %v15326_v55  ;;  %15885 = vst [vmem:[#allocation22_spill] sm:$0xff] %v15330_v53  ;;  %v15889_v55 = vld [vmem:[#allocation27_spill] sm:$0xff]  ;;  %v15349_v53 = vpop.f32.mrf.mxu0 }
 0x423   :  { %v15334_v21 = vpop.f32.mrf.mxu1  ;;  %v7427_v51 = vadd.f32 %v15889_v55, %v15195_v23  ;;  %v7542_v60 = vadd.f32 %v15236_v33, %v7429_v3 }
 0x424   :  { %15887 = vst [vmem:[#allocation6_spill] sm:$0xff] %v15334_v21  ;;  %v7643_v21 = vadd.f32 %v15224_v46, %v7530_v4  ;;  %v15355_v46 = vpop.f32.mrf.mxu0 }
 0x425   :  { %v7751_v56 = vpop.f32.mrf.mxu1  ;;  %v7540_v5 = vadd.f32 %v15234_v11, %v7427_v51  ;;  %v7649_v11 = vadd.f32 %v15240_v15, %v15228_v13  ;;  %v15891_v13 = vld [vmem:[#allocation29_spill] sm:$0xff] }
 0x426   :  { %v7752_v41 = vadd.f32 %v7751_v56, %v7639_v54  ;;  %v15365_v24 = vpop.f32.mrf.mxu0  ;;  %v7439_v15 = vadd.f32 %v15891_v13, %v15201_v16 }
 0x427   :  { %v7753_v43 = vpop.f32.mrf.mxu1 }
 0x428   :  { %v7754_v28 = vadd.f32 %v7753_v43, %v7641_v40  ;;  %v7896_v55 = vmul.f32 0.2, %v7752_v41  ;;  %vm7832_vm2 = vcmp.gt.f32.partialorder %v7752_v41, 0.0 }
 0x429   :  { %v7755_v57 = vpop.f32.mrf.mxu1 }
 0x42a   :  { %v7756_v35 = vadd.f32 %v7755_v57, %v7643_v21  ;;  %v7897_v38 = vmul.f32 0.2, %v7754_v28  ;;  %vm7833_vm1 = vcmp.gt.f32.partialorder %v7754_v28, 0.0  ;;  %v7651_v21 = vadd.f32 %v15248_v47, %v15230_v31 }
 0x42b   :  { %v7757_v9 = vpop.f32.mrf.mxu1  ;;  %v7653_v57 = vadd.f32 %v15256_v61, %v7540_v5  ;;  %v7960_v31 = vsel %vm7832_vm2, %v7752_v41, %v7896_v55  ;;  %v15371_v41 = vpop.f32.mrf.mxu0 }
 0x42c   :  { %vm7836_vm0 = vcmp.gt.f32.partialorder %v7756_v35, 0.0  ;;  %v7900_v43 = vmul.f32 0.2, %v7756_v35  ;;  %v7758_v4 = vadd.f32 %v7757_v9, %v7645_v2  ;;  %v7961_v2 = vsel %vm7833_vm1, %v7754_v28, %v7897_v38 }
 0x42d   :  { %v7761_v40 = vpop.f32.mrf.mxu1  ;;  %v7437_v9 = vadd.f32 %v15057_v63, %v15195_v23 }
 0x42e   :  { %vm7837_vm3 = vcmp.gt.f32.partialorder %v7758_v4, 0.0  ;;  %v7901_v56 = vmul.f32 0.2, %v7758_v4  ;;  %v7964_v26 = vsel %vm7836_vm0, %v7756_v35, %v7900_v43  ;;  %v7762_v33 = vadd.f32 %v7761_v40, %v7649_v11 }
 0x42f   :  { %v7763_v54 = vpop.f32.mrf.mxu1  ;;  %v8024_v19 = vpack.c.bf16 %v7964_v26, %v7960_v31  ;;  %v7655_v43 = vadd.f32 %v15264_v20, %v7542_v60  ;;  %v7550_v61 = vadd.f32 %v15250_v30, %v7437_v9  ;;  %v7661_v20 = vadd.f32 %v15280_v37, %v15246_v17 }
 0x430   :  { %v7764_v51 = vadd.f32 %v7763_v54, %v7651_v21  ;;  %v7965_v22 = vsel %vm7837_vm3, %v7758_v4, %v7901_v56  ;;  %v7904_v4 = vmul.f32 0.2, %v7762_v33  ;;  %v7552_v40 = vadd.f32 %v15252_v62, %v7439_v15 }
 0x431   :  { %v7765_v47 = vpop.f32.mrf.mxu1  ;;  %v8025_v3 = vpack.c.bf16 %v7965_v22, %v7961_v2  ;;  %vm7840_vm6 = vcmp.gt.f32.partialorder %v7762_v33, 0.0  ;;  %v7659_v60 = vadd.f32 %v15272_v52, %v15244_v48  ;;  %v15381_v2 = vpop.f32.mrf.mxu0  ;;  %v7449_v48 = vadd.f32 %v15092_v8, %v15201_v16 }
 0x432   :  { %v7766_v35 = vadd.f32 %v7765_v47, %v7653_v57  ;;  %v7905_v5 = vmul.f32 0.2, %v7764_v51  ;;  %vm7841_vm5 = vcmp.gt.f32.partialorder %v7764_v51, 0.0  ;;  %v7447_v57 = vadd.f32 %v15087_v45, %v15195_v23 }
 0x433   :  { %v7767_v28 = vpop.f32.mrf.mxu1  ;;  %8595 = vmatprep.mubr.bf16.mxu1 %v8025_v3  ;;  %v7968_v17 = vsel %vm7840_vm6, %v7762_v33, %v7904_v4  ;;  %v7665_v47 = vadd.f32 %v15296_v18, %v7552_v40  ;;  %v15387_v33 = vpop.f32.mrf.mxu0  ;;  %v7671_v18 = vadd.f32 %v15312_v44, %v15262_v42  ;;  %v7562_v13 = vadd.f32 %v15268_v29, %v7449_v48 }
 0x434   :  { %vm7844_vm4 = vcmp.gt.f32.partialorder %v7766_v35, 0.0  ;;  %v7908_v63 = vmul.f32 0.2, %v7766_v35  ;;  %v7768_v38 = vadd.f32 %v7767_v28, %v7655_v43  ;;  %8596 = vmatmul.mubr.bf16.vlgmr.msra.gmra.mxu1 %v8024_v19  ;;  %v7663_v19 = vadd.f32 %v15288_v0, %v7550_v61 }
 0x435   :  { %v7771_v55 = vpop.f32.mrf.mxu1  ;;  %v7969_v11 = vsel %vm7841_vm5, %v7764_v51, %v7905_v5  ;;  %v7560_v52 = vadd.f32 %v15266_v59, %v7447_v57  ;;  %v7669_v15 = vadd.f32 %v15304_v36, %v15260_v34  ;;  %v7457_v4 = vadd.f32 %v15113_v39, %v15195_v23 }
 0x436   :  { %vm7845_vm7 = vcmp.gt.f32.partialorder %v7768_v38, 0.0  ;;  %v7909_v30 = vmul.f32 0.2, %v7768_v38  ;;  %v7972_v21 = vsel %vm7844_vm4, %v7766_v35, %v7908_v63  ;;  %v7772_v62 = vadd.f32 %v7771_v55, %v7659_v60  ;;  %v15397_v55 = vpop.f32.mrf.mxu0 }
 0x437   :  { %v7773_v56 = vpop.f32.mrf.mxu1  ;;  %v8028_v9 = vpack.c.bf16 %v7972_v21, %v7968_v17  ;;  %v7673_v5 = vadd.f32 %v15320_v32, %v7560_v52  ;;  %v7675_v21 = vadd.f32 %v15328_v10, %v7562_v13  ;;  %v7459_v34 = vadd.f32 %v15118_v7, %v15201_v16 }
 0x438   :  { %v7774_v26 = vadd.f32 %v7773_v56, %v7661_v20  ;;  %v7973_v54 = vsel %vm7845_vm7, %v7768_v38, %v7909_v30  ;;  %v7912_v35 = vmul.f32 0.2, %v7772_v62  ;;  %vm7848_vm10 = vcmp.gt.f32.partialorder %v7772_v62, 0.0 }
 0x439   :  { %v7775_v37 = vpop.f32.mrf.mxu1  ;;  %v8029_v22 = vpack.c.bf16 %v7973_v54, %v7969_v11  ;;  %v7570_v36 = vadd.f32 %v15282_v25, %v7457_v4  ;;  %v7681_v10 = vadd.f32 %v15349_v53, %v15278_v14  ;;  %v7572_v54 = vadd.f32 %v15284_v49, %v7459_v34  ;;  %v15894_v4 = vld [vmem:[#allocation41_spill] sm:$0xff] }
 0x43a   :  { %v7776_v31 = vadd.f32 %v7775_v37, %v7663_v19  ;;  %v7913_v51 = vmul.f32 0.2, %v7774_v26  ;;  %vm7849_vm9 = vcmp.gt.f32.partialorder %v7774_v26, 0.0  ;;  %v7976_v42 = vsel %vm7848_vm10, %v7772_v62, %v7912_v35 }
 0x43b   :  { %v7777_v0 = vpop.f32.mrf.mxu1  ;;  %8605 = vmatprep.mubr.bf16.mxu1 %v8029_v22  ;;  %v7679_v57 = vadd.f32 %v15339_v6, %v15276_v12  ;;  %v7683_v37 = vadd.f32 %v15355_v46, %v7570_v36  ;;  %v7469_v12 = vadd.f32 %v15136_v1, %v15201_v16  ;;  %v7691_v13 = vadd.f32 %v15381_v2, %v15294_v50  ;;  %v15896_v36 = vld [vmem:[#allocation13_spill] sm:$0xff] }
 0x43c   :  { %vm7852_vm8 = vcmp.gt.f32.partialorder %v7776_v31, 0.0  ;;  %v7916_v45 = vmul.f32 0.2, %v7776_v31  ;;  %v7778_v3 = vadd.f32 %v7777_v0, %v7665_v47  ;;  %8606 = vmatmul.mubr.bf16.gmra.mxu1 %v8028_v9  ;;  %v7977_v63 = vsel %vm7849_vm9, %v7774_v26, %v7913_v51  ;;  %v15403_v26 = vpop.f32.mrf.mxu0 }
 0x43d   :  { %v7781_v43 = vpop.f32.mrf.mxu1  ;;  %v7685_v51 = vadd.f32 %v15365_v24, %v7572_v54  ;;  %v15892_v24 = vld [vmem:[#allocation33_spill] sm:$0xff]  ;;  %v15897_v54 = vld [vmem:[#allocation35_spill] sm:$0xff] }
 0x43e   :  { %vm7853_vm11 = vcmp.gt.f32.partialorder %v7778_v3, 0.0  ;;  %v7917_v8 = vmul.f32 0.2, %v7778_v3  ;;  %v7980_v59 = vsel %vm7852_vm8, %v7776_v31, %v7916_v45  ;;  %v7782_v29 = vadd.f32 %v7781_v43, %v7669_v15  ;;  %v7700_v47 = vpop.f32.mrf.mxu0 }
 0x43f   :  { %v7783_v61 = vpop.f32.mrf.mxu1  ;;  %v8032_v40 = vpack.c.bf16 %v7980_v59, %v7976_v42  ;;  %v7467_v31 = vadd.f32 %v15131_v27, %v15195_v23  ;;  %v15893_v59 = vld [vmem:[#allocation34_spill] sm:$0xff]  ;;  %v7477_v42 = vadd.f32 %v15894_v4, %v15195_v23 }
 0x440   :  { %v7784_v28 = vadd.f32 %v7783_v61, %v7671_v18  ;;  %v7981_v38 = vsel %vm7853_vm11, %v7778_v3, %v7917_v8  ;;  %v7920_v19 = vmul.f32 0.2, %v7782_v29  ;;  %vm7856_vm14 = vcmp.gt.f32.partialorder %v7782_v29, 0.0  ;;  %v7702_v35 = vpop.f32.mrf.mxu0 }
 0x441   :  { %v7785_v44 = vpop.f32.mrf.mxu1  ;;  %v8033_v20 = vpack.c.bf16 %v7981_v38, %v7977_v63  ;;  %v7580_v6 = vadd.f32 %v15298_v58, %v7467_v31  ;;  %v7582_v8 = vadd.f32 %v15892_v24, %v7469_v12  ;;  %v7689_v15 = vadd.f32 %v15371_v41, %v15893_v59  ;;  %v15895_v41 = vld [vmem:[#allocation32_spill] sm:$0xff] }
 0x442   :  { %v7786_v30 = vadd.f32 %v7785_v44, %v7673_v5  ;;  %v7921_v60 = vmul.f32 0.2, %v7784_v28  ;;  %vm7857_vm13 = vcmp.gt.f32.partialorder %v7784_v28, 0.0  ;;  %v7984_v53 = vsel %vm7856_vm14, %v7782_v29, %v7920_v19  ;;  %v7704_v29 = vpop.f32.mrf.mxu0 }
 0x443   :  { %v7787_v32 = vpop.f32.mrf.mxu1  ;;  %8615 = vmatprep.mubr.bf16.mxu1 %v8033_v20  ;;  %v7693_v5 = vadd.f32 %v15387_v33, %v7580_v6  ;;  %v7479_v34 = vadd.f32 %v15895_v41, %v15201_v16 }
 0x444   :  { %vm7860_vm12 = vcmp.gt.f32.partialorder %v7786_v30, 0.0  ;;  %v7924_v39 = vmul.f32 0.2, %v7786_v30  ;;  %v7788_v56 = vadd.f32 %v7787_v32, %v7675_v21  ;;  %8616 = vmatmul.mubr.bf16.gmra.mxu1 %v8032_v40  ;;  %v7985_v22 = vsel %vm7857_vm13, %v7784_v28, %v7921_v60  ;;  %v7708_v19 = vpop.f32.mrf.mxu0 }
 0x445   :  { %v7791_v11 = vpop.f32.mrf.mxu1  ;;  %v7695_v21 = vadd.f32 %v15397_v55, %v7582_v8  ;;  %v7590_v32 = vadd.f32 %v15896_v36, %v7477_v42 }
 0x446   :  { %vm7861_vm15 = vcmp.gt.f32.partialorder %v7788_v56, 0.0  ;;  %v7925_v7 = vmul.f32 0.2, %v7788_v56  ;;  %v7988_v25 = vsel %vm7860_vm12, %v7786_v30, %v7924_v39  ;;  %v7792_v14 = vadd.f32 %v7791_v11, %v7679_v57 }
 0x447   :  { %v7793_v17 = vpop.f32.mrf.mxu1  ;;  %v8036_v52 = vpack.c.bf16 %v7988_v25, %v7984_v53  ;;  %v15898_v25 = vld [vmem:[#allocation2_spill] sm:$0xff]  ;;  %v7703_v31 = vadd.f32 %v7702_v35, %v7590_v32 }
 0x448   :  { %v7794_v62 = vadd.f32 %v7793_v17, %v7681_v10  ;;  %v7989_v9 = vsel %vm7861_vm15, %v7788_v56, %v7925_v7  ;;  %v7928_v43 = vmul.f32 0.2, %v7792_v14  ;;  %vm7864_vm2 = vcmp.gt.f32.partialorder %v7792_v14, 0.0 }
 0x449   :  { %v7795_v49 = vpop.f32.mrf.mxu1  ;;  %v8037_v48 = vpack.c.bf16 %v7989_v9, %v7985_v22  ;;  %v7701_v7 = vadd.f32 %v7700_v47, %v15897_v54  ;;  %v7592_v55 = vadd.f32 %v15898_v25, %v7479_v34 }
 0x44a   :  { %v7796_v0 = vadd.f32 %v7795_v49, %v7683_v37  ;;  %v7929_v45 = vmul.f32 0.2, %v7794_v62  ;;  %vm7865_vm1 = vcmp.gt.f32.partialorder %v7794_v62, 0.0  ;;  %v7992_v50 = vsel %vm7864_vm2, %v7792_v14, %v7928_v43  ;;  %v15900_v49 = vld [vmem:[#allocation40_spill] sm:$0xff] }
 0x44b   :  { %v7797_v46 = vpop.f32.mrf.mxu1  ;;  %8625 = vmatprep.mubr.bf16.mxu1 %v8037_v48  ;;  %v7487_v48 = vadd.f32 %v15900_v49, %v15195_v23 }
 0x44c   :  { %vm7868_vm0 = vcmp.gt.f32.partialorder %v7796_v0, 0.0  ;;  %v7932_v3 = vmul.f32 0.2, %v7796_v0  ;;  %v7798_v27 = vadd.f32 %v7797_v46, %v7685_v51  ;;  %8626 = vmatmul.mubr.bf16.gmra.mxu1 %v8036_v52  ;;  %v7993_v63 = vsel %vm7865_vm1, %v7794_v62, %v7929_v45  ;;  %v15899_v62 = vld [vmem:[#allocation36_spill] sm:$0xff]  ;;  %v7710_v52 = vpop.f32.mrf.mxu0 }
 0x44d   :  { %v7801_v18 = vpop.f32.mrf.mxu1  ;;  %v7699_v37 = vadd.f32 %v15403_v26, %v15899_v62  ;;  %v7705_v45 = vadd.f32 %v7704_v29, %v7592_v55  ;;  %v15902_v26 = vld [vmem:[#allocation22_spill] sm:$0xff] }
 0x44e   :  { %vm7869_vm3 = vcmp.gt.f32.partialorder %v7798_v27, 0.0  ;;  %v7933_v1 = vmul.f32 0.2, %v7798_v27  ;;  %v7996_v58 = vsel %vm7868_vm0, %v7796_v0, %v7932_v3  ;;  %v7802_v2 = vadd.f32 %v7801_v18, %v7689_v15  ;;  %v15901_v3 = vld [vmem:[#allocation31_spill] sm:$0xff]  ;;  %v7712_v23 = vpop.f32.mrf.mxu0  ;;  %v15904_v15 = vld [vmem:[#allocation6_spill] sm:$0xff] }
 0x44f   :  { %v7803_v61 = vpop.f32.mrf.mxu1  ;;  %v8040_v40 = vpack.c.bf16 %v7996_v58, %v7992_v50  ;;  %v7600_v43 = vadd.f32 %v15902_v26, %v7487_v48  ;;  %v15903_v58 = vld [vmem:[#allocation5_spill] sm:$0xff] }
 0x450   :  { %v7804_v28 = vadd.f32 %v7803_v61, %v7691_v13  ;;  %v7997_v38 = vsel %vm7869_vm3, %v7798_v27, %v7933_v1  ;;  %v7936_v11 = vmul.f32 0.2, %v7802_v2  ;;  %vm7872_vm6 = vcmp.gt.f32.partialorder %v7802_v2, 0.0 }
 0x451   :  { %v7805_v44 = vpop.f32.mrf.mxu1  ;;  %v8041_v20 = vpack.c.bf16 %v7997_v38, %v7993_v63  ;;  %v7489_v27 = vadd.f32 %v15901_v3, %v15201_v16  ;;  %v7711_v59 = vadd.f32 %v7710_v52, %v15903_v58  ;;  %v7713_v42 = vadd.f32 %v7712_v23, %v7600_v43  ;;  %v15463_v23 = vld [vmem:[%s15621_s7] sm:$0x3] }
 0x452   :  { %v7806_v30 = vadd.f32 %v7805_v44, %v7693_v5  ;;  %v7937_v60 = vmul.f32 0.2, %v7804_v28  ;;  %vm7873_vm5 = vcmp.gt.f32.partialorder %v7804_v28, 0.0  ;;  %v8000_v0 = vsel %vm7872_vm6, %v7802_v2, %v7936_v11  ;;  %v15905_v5 = vld [vmem:[#allocation4_spill] sm:$0xff]  ;;  %v7714_v2 = vpop.f32.mrf.mxu0  ;;  %15908 = vst [vmem:[#allocation19_spill] sm:$0xff] %v15463_v23 }
 0x453   :  { %v7807_v33 = vpop.f32.mrf.mxu1  ;;  %8635 = vmatprep.mubr.bf16.mxu1 %v8041_v20  ;;  %v7602_v61 = vadd.f32 %v15904_v15, %v7489_v27  ;;  %v7709_v63 = vadd.f32 %v7708_v19, %v15905_v5 }
 0x454   :  { %vm7876_vm4 = vcmp.gt.f32.partialorder %v7806_v30, 0.0  ;;  %v7940_v39 = vmul.f32 0.2, %v7806_v30  ;;  %v7808_v56 = vadd.f32 %v7807_v33, %v7695_v21  ;;  %8636 = vmatmul.mubr.bf16.gmra.mxu1 %v8040_v40  ;;  %v8001_v53 = vsel %vm7873_vm5, %v7804_v28, %v7937_v60 }
 0x455   :  { %v7811_v10 = vpop.f32.mrf.mxu1  ;;  %v7715_v34 = vadd.f32 %v7714_v2, %v7602_v61 }
 0x456   :  { %vm7877_vm7 = vcmp.gt.f32.partialorder %v7808_v56, 0.0  ;;  %v7941_v57 = vmul.f32 0.2, %v7808_v56  ;;  %v8004_v17 = vsel %vm7876_vm4, %v7806_v30, %v7940_v39  ;;  %v7812_v47 = vadd.f32 %v7811_v10, %v7699_v37 }
 0x457   :  { %v7813_v22 = vpop.f32.mrf.mxu1  ;;  %v8044_v6 = vpack.c.bf16 %v8004_v17, %v8000_v0 }
 0x458   :  { %v7814_v9 = vadd.f32 %v7813_v22, %v7701_v7  ;;  %v8005_v14 = vsel %vm7877_vm7, %v7808_v56, %v7941_v57  ;;  %v7944_v8 = vmul.f32 0.2, %v7812_v47  ;;  %vm7880_vm10 = vcmp.gt.f32.partialorder %v7812_v47, 0.0 }
 0x459   :  { %v7815_v51 = vpop.f32.mrf.mxu1  ;;  %v8045_v12 = vpack.c.bf16 %v8005_v14, %v8001_v53 }
 0x45a   :  { %v7816_v46 = vadd.f32 %v7815_v51, %v7703_v31  ;;  %v7945_v35 = vmul.f32 0.2, %v7814_v9  ;;  %vm7881_vm9 = vcmp.gt.f32.partialorder %v7814_v9, 0.0  ;;  %v8008_v44 = vsel %vm7880_vm10, %v7812_v47, %v7944_v8  ;;  %v8118_v51 = vld [vmem:[%s15620_s6] sm:$0x3] }
 0x45b   :  { %v7817_v18 = vpop.f32.mrf.mxu1  ;;  %8645 = vmatprep.mubr.bf16.mxu1 %v8045_v12 }
 0x45c   :  { %vm7884_vm8 = vcmp.gt.f32.partialorder %v7816_v46, 0.0  ;;  %v7948_v13 = vmul.f32 0.2, %v7816_v46  ;;  %v7818_v24 = vadd.f32 %v7817_v18, %v7705_v45  ;;  %8646 = vmatmul.mubr.bf16.gmra.mxu1 %v8044_v6  ;;  %v8009_v29 = vsel %vm7881_vm9, %v7814_v9, %v7945_v35  ;;  %v15906_v6 = vld [vmem:[#allocation8_spill] sm:$0xff]  ;;  %v15907_v45 = vld [vmem:[#allocation9_spill] sm:$0xff] }
 0x45d   :  { %v7821_v1 = vpop.f32.mrf.mxu1  ;;  %v15450_v3 = vrot.slane %v8118_v51, %v15907_v45 }
 0x45e   :  { %vm7885_vm11 = vcmp.gt.f32.partialorder %v7818_v24, 0.0  ;;  %v7949_v16 = vmul.f32 0.2, %v7818_v24  ;;  %v8012_v28 = vsel %vm7884_vm8, %v7816_v46, %v7948_v13  ;;  %v7822_v20 = vadd.f32 %v7821_v1, %v7709_v63 }
 0x45f   :  { %v7823_v38 = vpop.f32.mrf.mxu1  ;;  %v8048_v21 = vpack.c.bf16 %v8012_v28, %v8008_v44  ;;  %v15447_v46 = vrot.slane %v8118_v51, %v15906_v6 }
 0x460   :  { %v7824_v4 = vadd.f32 %v7823_v38, %v7711_v59  ;;  %v8013_v50 = vsel %vm7885_vm11, %v7818_v24, %v7949_v16  ;;  %v7952_v39 = vmul.f32 0.2, %v7822_v20  ;;  %vm7888_vm14 = vcmp.gt.f32.partialorder %v7822_v20, 0.0 }
 0x461   :  { %v7825_v40 = vpop.f32.mrf.mxu1  ;;  %v8049_v30 = vpack.c.bf16 %v8013_v50, %v8009_v29  ;;  %v8781_v59 = vrot.slane %v15463_v23, %v15907_v45 }
 0x462   :  { %v7826_v41 = vadd.f32 %v7825_v40, %v7713_v42  ;;  %v7953_v32 = vmul.f32 0.2, %v7824_v4  ;;  %vm7889_vm13 = vcmp.gt.f32.partialorder %v7824_v4, 0.0  ;;  %v8016_v54 = vsel %vm7888_vm14, %v7822_v20, %v7952_v39 }
 0x463   :  { %v7827_v36 = vpop.f32.mrf.mxu1  ;;  %8655 = vmatprep.mubr.bf16.mxu1 %v8049_v30  ;;  %8848 = vmatprep.mubr.f32.mxu0 %v8781_v59 }
 0x464   :  { %vm7892_vm12 = vcmp.gt.f32.partialorder %v7826_v41, 0.0  ;;  %v7956_v33 = vmul.f32 0.2, %v7826_v41  ;;  %v7828_v60 = vadd.f32 %v7827_v36, %v7715_v34  ;;  %8656 = vmatmul.mubr.bf16.gmra.mxu1 %v8048_v21  ;;  %v8017_v11 = vsel %vm7889_vm13, %v7824_v4, %v7953_v32 }
 0x466   :  { %vm7893_vm15 = vcmp.gt.f32.partialorder %v7828_v60, 0.0  ;;  %v7957_v56 = vmul.f32 0.2, %v7828_v60  ;;  %v8020_v19 = vsel %vm7892_vm12, %v7826_v41, %v7956_v33 }
 0x467   :  { %v8052_v25 = vpack.c.bf16 %v8020_v19, %v8016_v54 }
 0x468   :  { %v8021_v10 = vsel %vm7893_vm15, %v7828_v60, %v7957_v56 }
 0x469   :  { %v8053_v7 = vpack.c.bf16 %v8021_v10, %v8017_v11 }
 0x46b   :  { %8665 = vmatprep.mubr.bf16.mxu1 %v8053_v7 }
 0x46c   :  { %8666 = vmatmul.mubr.bf16.gmra.mxu1 %v8052_v25 }
 0x474   :  { %v8484_v55 = vpop.f32.mrf.mxu0 }
 0x475   :  { %v8485_v26 = vadd.f32 %v8484_v55, %v15447_v46 }
 0x476   :  { %v8486_v57 = vpop.f32.mrf.mxu0 }
 0x477   :  { %v8487_v18 = vadd.f32 %v8486_v57, %v15450_v3 }
 0x478   :  { %v8488_v17 = vpop.f32.mrf.mxu0 }
 0x479   :  { %v8489_v8 = vadd.f32 %v8488_v17, %v15447_v46 }
 0x47a   :  { %v8490_v62 = vpop.f32.mrf.mxu0 }
 0x47b   :  { %v8491_v15 = vadd.f32 %v8490_v62, %v15450_v3 }
 0x47c   :  { %v8494_v37 = vpop.f32.mrf.mxu0 }
 0x47d   :  { %v8495_v5 = vadd.f32 %v8494_v37, %v15447_v46 }
 0x47e   :  { %v8496_v22 = vpop.f32.mrf.mxu0 }
 0x47f   :  { %v8497_v4 = vadd.f32 %v8496_v22, %v15450_v3 }
 0x480   :  { %v8498_v9 = vpop.f32.mrf.mxu0 }
 0x481   :  { %v8499_v2 = vadd.f32 %v8498_v9, %v15447_v46 }
 0x482   :  { %v8500_v31 = vpop.f32.mrf.mxu0 }
 0x483   :  { %v8501_v40 = vadd.f32 %v8500_v31, %v15450_v3 }
 0x484   :  { %v8504_v53 = vpop.f32.mrf.mxu0 }
 0x485   :  { %v8505_v34 = vadd.f32 %v8504_v53, %v15447_v46 }
 0x486   :  { %v8506_v14 = vpop.f32.mrf.mxu0 }
 0x487   :  { %v8507_v33 = vadd.f32 %v8506_v14, %v15450_v3 }
 0x488   :  { %v8508_v49 = vpop.f32.mrf.mxu0 }
 0x489   :  { %v8509_v19 = vadd.f32 %v8508_v49, %v15447_v46 }
 0x48a   :  { %v8510_v48 = vpop.f32.mrf.mxu0 }
 0x48b   :  { %v8511_v54 = vadd.f32 %v8510_v48, %v15450_v3 }
 0x48c   :  { %v8514_v52 = vpop.f32.mrf.mxu0 }
 0x48d   :  { %v8515_v57 = vadd.f32 %v8514_v52, %v15447_v46 }
 0x48e   :  { %v8516_v0 = vpop.f32.mrf.mxu0 }
 0x48f   :  { %v8517_v37 = vadd.f32 %v8516_v0, %v15450_v3 }
 0x490   :  { %v8518_v47 = vpop.f32.mrf.mxu0 }
 0x491   :  { %v8519_v53 = vadd.f32 %v8518_v47, %v15447_v46 }
 0x492   :  { %v15444_v12 = vpop.f32.mrf.mxu0 }
 0x494   :  { %v15452_v27 = vpop.f32.mrf.mxu0 }
 0x496   :  { %v15458_v13 = vpop.f32.mrf.mxu0 }
 0x498   :  { %v15473_v16 = vpop.f32.mrf.mxu0 }
 0x49a   :  { %v15481_v29 = vpop.f32.mrf.mxu0 }
 0x49c   :  { %v15489_v21 = vpop.f32.mrf.mxu0 }
 0x49e   :  { %v15497_v39 = vpop.f32.mrf.mxu0 }
 0x4a0   :  { %v15505_v25 = vpop.f32.mrf.mxu0 }
 0x4a2   :  { %v8540_v9 = vpop.f32.mrf.mxu0 }
 0x4a4   :  { %v8544_v51 = vpop.f32.mrf.mxu0 }
 0x4f4   :  { %v8597_v43 = vpop.f32.mrf.mxu1 }
 0x4f5   :  { %v15456_v35 = vadd.f32 %v8597_v43, %v8485_v26  ;;  %v8546_v26 = vpop.f32.mrf.mxu0 }
 0x4f6   :  { %v8599_v24 = vpop.f32.mrf.mxu1 }
 0x4f7   :  { %v15466_v1 = vadd.f32 %v8599_v24, %v8487_v18  ;;  %v8548_v18 = vpop.f32.mrf.mxu0 }
 0x4f8   :  { %v8601_v58 = vpop.f32.mrf.mxu1 }
 0x4f9   :  { %v15471_v61 = vadd.f32 %v8601_v58, %v8489_v8  ;;  %v8550_v47 = vpop.f32.mrf.mxu0 }
 0x4fa   :  { %v8603_v28 = vpop.f32.mrf.mxu1 }
 0x4fb   :  { %v15476_v63 = vadd.f32 %v8603_v28, %v8491_v15  ;;  %v8554_v15 = vpop.f32.mrf.mxu0 }
 0x4fc   :  { %v8607_v38 = vpop.f32.mrf.mxu1 }
 0x4fd   :  { %v15479_v42 = vadd.f32 %v8607_v38, %v8495_v5  ;;  %v8556_v38 = vpop.f32.mrf.mxu0 }
 0x4fe   :  { %v8609_v50 = vpop.f32.mrf.mxu1 }
 0x4ff   :  { %v15484_v44 = vadd.f32 %v8609_v50, %v8497_v4 }
 0x500   :  { %v8611_v20 = vpop.f32.mrf.mxu1 }
 0x501   :  { %v15487_v30 = vadd.f32 %v8611_v20, %v8499_v2  ;;  %v8558_v2 = vpop.f32.mrf.mxu0 }
 0x502   :  { %v8613_v41 = vpop.f32.mrf.mxu1 }
 0x503   :  { %v15492_v36 = vadd.f32 %v8613_v41, %v8501_v40  ;;  %v8560_v41 = vpop.f32.mrf.mxu0 }
 0x504   :  { %v8617_v32 = vpop.f32.mrf.mxu1 }
 0x505   :  { %v15495_v60 = vadd.f32 %v8617_v32, %v8505_v34  ;;  %v8557_v32 = vadd.f32 %v8556_v38, %v15450_v3  ;;  %v8549_v38 = vadd.f32 %v8548_v18, %v15447_v46 }
 0x506   :  { %v8619_v56 = vpop.f32.mrf.mxu1 }
 0x507   :  { %v15500_v11 = vadd.f32 %v8619_v56, %v8507_v33  ;;  %v8559_v33 = vadd.f32 %v8558_v2, %v15447_v46  ;;  %v8547_v2 = vadd.f32 %v8546_v26, %v15450_v3 }
 0x508   :  { %v8621_v10 = vpop.f32.mrf.mxu1 }
 0x509   :  { %v15503_v7 = vadd.f32 %v8621_v10, %v8509_v19  ;;  %v8561_v19 = vadd.f32 %v8560_v41, %v15450_v3 }
 0x50a   :  { %v8623_v55 = vpop.f32.mrf.mxu1 }
 0x50b   :  { %v15508_v17 = vadd.f32 %v8623_v55, %v8511_v54  ;;  %v8551_v55 = vadd.f32 %v8550_v47, %v15450_v3 }
 0x50c   :  { %v8627_v62 = vpop.f32.mrf.mxu1 }
 0x50d   :  { %v15511_v22 = vadd.f32 %v8627_v62, %v8515_v57  ;;  %v8555_v57 = vadd.f32 %v8554_v15, %v15447_v46 }
 0x50e   :  { %v8629_v31 = vpop.f32.mrf.mxu1 }
 0x50f   :  { %v15514_v14 = vadd.f32 %v8629_v31, %v8517_v37 }
 0x510   :  { %v8631_v49 = vpop.f32.mrf.mxu1 }
 0x511   :  { %v15516_v48 = vadd.f32 %v8631_v49, %v8519_v53 }
 0x512   :  { %v15518_v45 = vpop.f32.mrf.mxu1 }
 0x514   :  { %v15520_v52 = vpop.f32.mrf.mxu1 }
 0x516   :  { %v15522_v43 = vpop.f32.mrf.mxu1 }
 0x518   :  { %v15524_v0 = vpop.f32.mrf.mxu1 }
 0x51a   :  { %v15526_v24 = vpop.f32.mrf.mxu1 }
 0x51c   :  { %v15528_v8 = vpop.f32.mrf.mxu1 }
 0x51e   :  { %v15530_v58 = vpop.f32.mrf.mxu1 }
 0x520   :  { %v8651_v59 = vpop.f32.mrf.mxu1 }
 0x522   :  { %v8653_v28 = vpop.f32.mrf.mxu1 }
 0x524   :  { %v8657_v5 = vpop.f32.mrf.mxu1 }
 0x526   :  { %v8659_v4 = vpop.f32.mrf.mxu1 }
 0x527   :  { %v8660_v15 = vadd.f32 %v8659_v4, %v8547_v2  ;;  %v8539_v4 = vadd.f32 %v15505_v25, %v15447_v46  ;;  %v8531_v25 = vadd.f32 %v15481_v29, %v15450_v3 }
 0x528   :  { %v8661_v50 = vpop.f32.mrf.mxu1 }
 0x529   :  { %vm8701_vm6 = vcmp.gt.f32.partialorder %v8660_v15, 0.0 }
 0x52a   :  { %v8663_v20 = vpop.f32.mrf.mxu1 }
 0x52b   :  { %v8664_v31 = vadd.f32 %v8663_v20, %v8551_v55 }
 0x52c   :  { %v8667_v40 = vpop.f32.mrf.mxu1 }
 0x52d   :  { %v8668_v53 = vadd.f32 %v8667_v40, %v8555_v57  ;;  %v8545_v40 = vadd.f32 %v8544_v51, %v15447_v46  ;;  %vm8703_vm4 = vcmp.gt.f32.partialorder %v8664_v31, 0.0  ;;  %v8652_v51 = vadd.f32 %v8651_v59, %v8539_v4 }
 0x52e   :  { %v8669_v34 = vpop.f32.mrf.mxu1  ;;  %v8535_v57 = vadd.f32 %v15489_v21, %v15447_v46  ;;  %v8527_v21 = vadd.f32 %v15458_v13, %v15450_v3  ;;  %v8714_v4 = vmul.f32 0.2, %v15487_v30 }
 0x52f   :  { %v8670_v10 = vadd.f32 %v8669_v34, %v8557_v32  ;;  %v8662_v34 = vadd.f32 %v8661_v50, %v8549_v38  ;;  %v8736_v32 = vmul.f32 0.2, %v8668_v53  ;;  %vm8704_vm3 = vcmp.gt.f32.partialorder %v8668_v53, 0.0 }
 0x530   :  { %v8671_v56 = vpop.f32.mrf.mxu1  ;;  %v8658_v18 = vadd.f32 %v8657_v5, %v8545_v40  ;;  %vm8698_vm9 = vcmp.gt.f32.partialorder %v8652_v51, 0.0  ;;  %v8640_v38 = vadd.f32 %v15522_v43, %v8527_v21 }
 0x531   :  { %v8672_v54 = vadd.f32 %v8671_v56, %v8559_v33  ;;  %v8737_v23 = vmul.f32 0.2, %v8670_v10  ;;  %vm8705_vm2 = vcmp.gt.f32.partialorder %v8670_v10, 0.0  ;;  %v8735_v33 = vmul.f32 0.2, %v8664_v31 }
 0x532   :  { %v8673_v62 = vpop.f32.mrf.mxu1  ;;  %v8541_v56 = vadd.f32 %v8540_v9, %v15450_v3  ;;  %v8768_v55 = vsel %vm8704_vm3, %v8668_v53, %v8736_v32  ;;  %vm8702_vm5 = vcmp.gt.f32.partialorder %v8662_v34, 0.0  ;;  %vm8700_vm7 = vcmp.gt.f32.partialorder %v8658_v18, 0.0 }
 0x533   :  { %v8674_v37 = vadd.f32 %v8673_v62, %v8561_v19  ;;  %v8738_v49 = vmul.f32 0.2, %v8672_v54  ;;  %vm8706_vm0 = vcmp.gt.f32.partialorder %v8672_v54, 0.0  ;;  %v8769_v20 = vsel %vm8705_vm2, %v8670_v10, %v8737_v23 }
 0x534   :  { %v8734_v19 = vmul.f32 0.2, %v8662_v34  ;;  %v8654_v26 = vadd.f32 %v8653_v28, %v8541_v56  ;;  %v8767_v50 = vsel %vm8703_vm4, %v8664_v31, %v8735_v33  ;;  %v8537_v23 = vadd.f32 %v15497_v39, %v15450_v3 }
 0x535   :  { %v8739_v6 = vmul.f32 0.2, %v8674_v37  ;;  %vm8707_vm1 = vcmp.gt.f32.partialorder %v8674_v37, 0.0  ;;  %v8770_v47 = vsel %vm8706_vm0, %v8672_v54, %v8738_v49  ;;  %v8732_v10 = vmul.f32 0.2, %v8658_v18 }
 0x536   :  { %v8766_v54 = vsel %vm8702_vm5, %v8662_v34, %v8734_v19  ;;  %v8650_v9 = vadd.f32 %v15530_v58, %v8537_v23  ;;  %v8731_v5 = vmul.f32 0.2, %v8654_v26  ;;  %vm8699_vm8 = vcmp.gt.f32.partialorder %v8654_v26, 0.0 }
 0x537   :  { %v8771_v41 = vsel %vm8707_vm1, %v8674_v37, %v8739_v6  ;;  %v8733_v6 = vmul.f32 0.2, %v8660_v15  ;;  %v8648_v62 = vadd.f32 %v15528_v8, %v8535_v57  ;;  %v8730_v39 = vmul.f32 0.2, %v8652_v51  ;;  %v15909_v57 = vld [vmem:[#allocation8_spill] sm:$0xff] }
 0x538   :  { %8784 = vmatprep.subr.mxu0 %v8771_v41  ;;  %v8764_v59 = vsel %vm8700_vm7, %v8658_v18, %v8732_v10  ;;  %v8644_v37 = vadd.f32 %v15526_v24, %v8531_v25  ;;  %v8729_v31 = vmul.f32 0.2, %v8650_v9  ;;  %v8763_v58 = vsel %vm8699_vm8, %v8654_v26, %v8731_v5  ;;  %v15910_v25 = vld [vmem:[#allocation19_spill] sm:$0xff] }
 0x539   :  { %8785 = vmatpush1.xpose.msra.mxu0 %v8770_v47  ;;  %v8765_v28 = vsel %vm8701_vm6, %v8660_v15, %v8733_v6  ;;  %v8529_v53 = vadd.f32 %v15473_v16, %v15447_v46  ;;  %vm8697_vm10 = vcmp.gt.f32.partialorder %v8650_v9, 0.0  ;;  %v8728_v49 = vmul.f32 0.2, %v8648_v62 }
 0x53a   :  { %8786 = vmatprep.subr.mxu0 %v8769_v20  ;;  %v8762_v8 = vsel %vm8698_vm9, %v8652_v51, %v8730_v39  ;;  %v8727_v2 = vmul.f32 0.2, %v8644_v37  ;;  %vm8696_vm11 = vcmp.gt.f32.partialorder %v8648_v62, 0.0  ;;  %v8761_v24 = vsel %vm8697_vm10, %v8650_v9, %v8729_v31 }
 0x53b   :  { %v8642_v29 = vadd.f32 %v15524_v0, %v8529_v53  ;;  %v8525_v41 = vadd.f32 %v15452_v27, %v15447_v46  ;;  %vm8695_vm12 = vcmp.gt.f32.partialorder %v8644_v37, 0.0  ;;  %v8521_v16 = vadd.f32 %v15444_v12, %v15450_v3 }
 0x53c   :  { %v8760_v0 = vsel %vm8696_vm11, %v8648_v62, %v8728_v49  ;;  %v8725_v47 = vmul.f32 0.2, %v8640_v38  ;;  %v8759_v43 = vsel %vm8695_vm12, %v8644_v37, %v8727_v2  ;;  %vm8693_vm14 = vcmp.gt.f32.partialorder %v8640_v38, 0.0 }
 0x53d   :  { %8787 = vmatpush1.xpose.msra.mxu0 %v8768_v55  ;;  %v8638_v13 = vadd.f32 %v15520_v52, %v8525_v41  ;;  %v8726_v34 = vmul.f32 0.2, %v8642_v29  ;;  %v8634_v32 = vadd.f32 %v15518_v45, %v8521_v16  ;;  %vm8694_vm13 = vcmp.gt.f32.partialorder %v8642_v29, 0.0 }
 0x53e   :  { %8788 = vmatprep.subr.mxu0 %v8767_v50  ;;  %v8757_v27 = vsel %vm8693_vm14, %v8640_v38, %v8725_v47  ;;  %v8722_v12 = vmul.f32 0.2, %v15516_v48  ;;  %v8721_v52 = vmul.f32 0.2, %v15514_v14  ;;  %vm8690_vm1 = vcmp.gt.f32.partialorder %v15516_v48, 0.0 }
 0x53f   :  { %v8724_v15 = vmul.f32 0.2, %v8638_v13  ;;  %v8758_v33 = vsel %vm8694_vm13, %v8642_v29, %v8726_v34  ;;  %v8723_v46 = vmul.f32 0.2, %v8634_v32  ;;  %vm8692_vm15 = vcmp.gt.f32.partialorder %v8638_v13, 0.0 }
 0x540   :  { %vm8691_vm0 = vcmp.gt.f32.partialorder %v8634_v32, 0.0  ;;  %vm8689_vm2 = vcmp.gt.f32.partialorder %v15514_v14, 0.0  ;;  %v8720_v20 = vmul.f32 0.2, %v15511_v22  ;;  %v8754_v40 = vsel %vm8690_vm1, %v15516_v48, %v8722_v12 }
 0x541   :  { %8789 = vmatpush1.xpose.msra.mxu0 %v8766_v54  ;;  %v8756_v3 = vsel %vm8692_vm15, %v8638_v13, %v8724_v15  ;;  %v8755_v45 = vsel %vm8691_vm0, %v8634_v32, %v8723_v46  ;;  %v8719_v56 = vmul.f32 0.2, %v15508_v17  ;;  %vm8688_vm3 = vcmp.gt.f32.partialorder %v15511_v22, 0.0 }
 0x542   :  { %8790 = vmatprep.subr.mxu0 %v8765_v28  ;;  %v8753_v18 = vsel %vm8689_vm2, %v15514_v14, %v8721_v52  ;;  %vm8687_vm4 = vcmp.gt.f32.partialorder %v15508_v17, 0.0  ;;  %v8718_v19 = vmul.f32 0.2, %v15503_v7  ;;  %v8752_v55 = vsel %vm8688_vm3, %v15511_v22, %v8720_v20 }
 0x543   :  { %v8717_v26 = vmul.f32 0.2, %v15500_v11  ;;  %vm8686_vm5 = vcmp.gt.f32.partialorder %v15503_v7, 0.0  ;;  %v8751_v48 = vsel %vm8687_vm4, %v15508_v17, %v8719_v56  ;;  %vm8685_vm6 = vcmp.gt.f32.partialorder %v15500_v11, 0.0 }
 0x544   :  { %v8716_v6 = vmul.f32 0.2, %v15495_v60  ;;  %v8750_v14 = vsel %vm8686_vm5, %v15503_v7, %v8718_v19  ;;  %v8715_v50 = vmul.f32 0.2, %v15492_v36  ;;  %vm8684_vm7 = vcmp.gt.f32.partialorder %v15495_v60, 0.0 }
 0x545   :  { %8791 = vmatpush1.xpose.msra.mxu0 %v8764_v59  ;;  %v8749_v22 = vsel %vm8685_vm6, %v15500_v11, %v8717_v26  ;;  %vm8683_vm8 = vcmp.gt.f32.partialorder %v15492_v36, 0.0  ;;  %v8713_v23 = vmul.f32 0.2, %v15484_v44  ;;  %vm8682_vm9 = vcmp.gt.f32.partialorder %v15487_v30, 0.0 }
 0x546   :  { %8792 = vmatprep.subr.mxu0 %v8763_v58  ;;  %v8748_v17 = vsel %vm8684_vm7, %v15495_v60, %v8716_v6  ;;  %v8747_v7 = vsel %vm8683_vm8, %v15492_v36, %v8715_v50  ;;  %vm8681_vm10 = vcmp.gt.f32.partialorder %v15484_v44, 0.0  ;;  %v8712_v51 = vmul.f32 0.2, %v15479_v42 }
 0x547   :  { %v8746_v11 = vsel %vm8682_vm9, %v15487_v30, %v8714_v4  ;;  %v8711_v10 = vmul.f32 0.2, %v15476_v63  ;;  %vm8680_vm11 = vcmp.gt.f32.partialorder %v15479_v42, 0.0  ;;  %v8745_v60 = vsel %vm8681_vm10, %v15484_v44, %v8713_v23 }
 0x548   :  { %vm8679_vm12 = vcmp.gt.f32.partialorder %v15476_v63, 0.0  ;;  %v8710_v54 = vmul.f32 0.2, %v15471_v61  ;;  %v8744_v36 = vsel %vm8680_vm11, %v15479_v42, %v8712_v51  ;;  %v8709_v9 = vmul.f32 0.2, %v15466_v1 }
 0x549   :  { %8793 = vmatpush1.xpose.msra.mxu0 %v8762_v8  ;;  %vm8678_vm13 = vcmp.gt.f32.partialorder %v15471_v61, 0.0  ;;  %v8743_v30 = vsel %vm8679_vm12, %v15476_v63, %v8711_v10  ;;  %vm8677_vm14 = vcmp.gt.f32.partialorder %v15466_v1, 0.0  ;;  %v8708_v5 = vmul.f32 0.2, %v15456_v35 }
 0x54a   :  { %8794 = vmatprep.subr.mxu0 %v8761_v24  ;;  %v8742_v44 = vsel %vm8678_vm13, %v15471_v61, %v8710_v54  ;;  %vm8676_vm15 = vcmp.gt.f32.partialorder %v15456_v35, 0.0  ;;  %v8741_v28 = vsel %vm8677_vm14, %v15466_v1, %v8709_v9  ;;  %v8777_v62 = vrot.slane %v15910_v25, %v15909_v57 }
 0x54b   :  { %v8740_v42 = vsel %vm8676_vm15, %v15456_v35, %v8708_v5 }
 0x54d   :  { %8795 = vmatpush1.xpose.msra.mxu0 %v8760_v0 }
 0x54e   :  { %8796 = vmatprep.subr.mxu0 %v8759_v43 }
 0x551   :  { %8797 = vmatpush1.xpose.msra.mxu0 %v8758_v33 }
 0x552   :  { %8798 = vmatprep.subr.mxu0 %v8757_v27 }
 0x555   :  { %8799 = vmatpush1.xpose.msra.mxu0 %v8756_v3 }
 0x556   :  { %8800 = vmatprep.subr.mxu0 %v8755_v45 }
 0x559   :  { %8801 = vmatpush1.xpose.msra.mxu0 %v8754_v40 }
 0x55a   :  { %8802 = vmatprep.subr.mxu0 %v8753_v18 }
 0x55d   :  { %8803 = vmatpush1.xpose.msra.mxu0 %v8752_v55 }
 0x55e   :  { %8804 = vmatprep.subr.mxu0 %v8751_v48 }
 0x561   :  { %8805 = vmatpush1.xpose.msra.mxu0 %v8750_v14 }
 0x562   :  { %8806 = vmatprep.subr.mxu0 %v8749_v22 }
 0x565   :  { %8807 = vmatpush1.xpose.msra.mxu0 %v8748_v17 }
 0x566   :  { %8808 = vmatprep.subr.mxu0 %v8747_v7 }
 0x569   :  { %8809 = vmatpush1.xpose.msra.mxu0 %v8746_v11 }
 0x56a   :  { %8810 = vmatprep.subr.mxu0 %v8745_v60 }
 0x56d   :  { %8811 = vmatpush1.xpose.msra.mxu0 %v8744_v36 }
 0x56e   :  { %8812 = vmatprep.subr.mxu0 %v8743_v30 }
 0x571   :  { %8813 = vmatpush1.xpose.msra.mxu0 %v8742_v44 }
 0x572   :  { %8814 = vmatprep.subr.mxu0 %v8741_v28 }
 0x575   :  { %8815 = vmatpush1.xpose.msra.mxu0 %v8740_v42 }
 0x578   :  { %8849 = vmatmul.mubr.f32.vlgmr.msra.gmra.mxu0 %v8777_v62 }
 0x638   :  { %v8850_v63 = vpop.f32.mrf.mxu0 }
 0x639   :  { %8854 = vst [vmem:[%s15622_s8] sm:$0x1] %v8850_v63 }
 0x63a   :  { %v8852_v39 = vpop.f32.mrf.mxu0 }

</bundles_post_ra>
